<compile_context>
chip_gen: v6e
topology: v6e:2x2x1
jax: 0.10.0
libtpu: 0.0.40
codegen_flags: <defaults>
</compile_context>

<pallas_src>
import numpy as np
import jax
import jax.numpy as jnp
from jax import lax
from jax.experimental import pallas as pl
from jax.experimental.pallas import tpu as pltpu


def _rup(x, m):
    return ((x + m - 1) // m) * m


def _make_up_kernel(*, H, W, Cout, Cs_p, Cu_p, Co_p, diff,
                    cat_rows, h1_rows, IB, RB):
    """Builds the fused Up kernel; all arguments are static Python ints."""
    HH, WW = 2 * H, 2 * W
    Ho1 = HH - 2
    Ho2, Wo2 = HH - 4, WW - 4
    Ccat = Cs_p + Cu_p
    f32, bf16 = jnp.float32, jnp.bfloat16
    T_DN = (((0,), (0,)), ((), ()))          # contract dim 0 of both: A^T @ B

    def kernel(x1_ref, x2_ref, wup_ref, bup_ref, eye_ref, w1_ref, w2_ref,
               o_ref, cat_ref, h1_ref):
        # x1_ref : (Cin, H*W)          f32  NCHW input, W-flattened (free reshape)
        # x2_ref : (Cup, H2, W2)       f32  uncropped NCHW skip connection
        # wup_ref: (2, 2, Cin, Cu_p)   bf16 up-conv weight [di, dj, ci, co] (N-padded)
        # bup_ref: (1, Cu_p)           f32  up-conv bias (padded)
        # eye_ref: (Cup, Cs_p)         bf16 [I | 0]  (MXU transpose + zero-pad)
        # w1_ref : (3, 3, Ccat, Co_p)  bf16 conv1 weight (concat folded into K)
        # w2_ref : (3, 3, Co_p, Co_p)  bf16 conv2 weight
        # o_ref  : (Cout, Ho2, Wo2)    f32  NCHW output block
        # cat_ref: (cat_rows, Ccat)    bf16 flat (r*WW + c, chan) concat buffer
        # h1_ref : (h1_rows, Co_p)     bf16 flat conv1 activations

        # ---- 0. zero the halo rows so uninitialized VMEM never feeds a read.
        cat_ref[HH * WW:cat_rows, :] = jnp.zeros((cat_rows - HH * WW, Ccat), bf16)
        h1_ref[Ho1 * WW:h1_rows, :] = jnp.zeros((h1_rows - Ho1 * WW, Co_p), bf16)

        # ---- 1. skip half of cat: center-crop + CHW -> (row, chan) relayout.
        #         One small MXU dot per spatial row: x2_row^T @ [I | 0]
        #         (transpose and zero-pad to a full 128-lane slab in one op).
        eyep = eye_ref[...]
        for r in range(HH):
            row = x2_ref[:, diff + r, diff:diff + WW].astype(bf16)       # (Cup, WW)
            rowt = lax.dot_general(row, eyep, T_DN, preferred_element_type=f32)
            cat_ref[r * WW:(r + 1) * WW, 0:Cs_p] = rowt.astype(bf16)      # (WW, Cs_p)

        # ---- 2. ConvTranspose2d(k=2, s=2) + bias -> up half of cat.
        bup = bup_ref[...]                                                # (1, Cu_p)
        for i0 in range(0, H, IB):
            ib = min(IB, H - i0)
            xcm = x1_ref[:, i0 * W:(i0 + ib) * W].astype(bf16)            # (Cin, ib*W)
            for di in range(2):
                # row-batched x^T @ Wup[di, dj] for both column parities
                y0 = lax.dot_general(xcm, wup_ref[di, 0], T_DN,
                                     preferred_element_type=f32)          # (ib*W, Cu_p)
                y1 = lax.dot_general(xcm, wup_ref[di, 1], T_DN,
                                     preferred_element_type=f32)
                # stride-2 column interleave = minor-dim-preserving reshape
                z = jnp.concatenate([y0[:, None, :], y1[:, None, :]], axis=1)
                z = (z.reshape(ib * WW, Cu_p) + bup).astype(bf16)         # (ib*WW, Cu_p)
                for i in range(ib):
                    r = (2 * (i0 + i) + di) * WW                          # spatial row 2i+di
                    cat_ref[r:r + WW, Cs_p:Ccat] = z[i * WW:(i + 1) * WW]

        # ---- 3. conv1: 3x3 VALID + ReLU as 9 row-batched full-width GEMMs.
        #         (columns >= Wo1 of each row are garbage and never feed a
        #          valid conv2 output.)
        for r0 in range(0, Ho1, RB):
            rb = min(RB, Ho1 - r0)
            m = rb * WW
            acc = jnp.zeros((m, Co_p), f32)
            for dy in range(3):
                for dx in range(3):
                    a = cat_ref[(r0 + dy) * WW + dx:(r0 + dy) * WW + dx + m, :]
                    acc = acc + jnp.dot(a, w1_ref[dy, dx],
                                        preferred_element_type=f32)
            h1_ref[r0 * WW:r0 * WW + m, :] = jnp.maximum(acc, 0.0).astype(bf16)

        # ---- 4. conv2: 3x3 VALID + ReLU, stored straight into the NCHW block.
        for r0 in range(0, Ho2, RB):
            rb = min(RB, Ho2 - r0)
            m = rb * WW
            acc = jnp.zeros((m, Co_p), f32)
            for dy in range(3):
                for dx in range(3):
                    a = h1_ref[(r0 + dy) * WW + dx:(r0 + dy) * WW + dx + m, :]
                    acc = acc + jnp.dot(a, w2_ref[dy, dx],
                                        preferred_element_type=f32)
            acc_t = jnp.transpose(jnp.maximum(acc, 0.0))                  # (Co_p, m), aligned 2D
            for r in range(rb):
                o_ref[:, r0 + r, :] = acc_t[:Cout, r * WW:r * WW + Wo2]

    return kernel


# ---------------------------------------------------------------------------
# Up.forward (NCHW in / NCHW out, matching the PyTorch module)
# ---------------------------------------------------------------------------
@jax.jit
def up_forward(params, x1_nchw, x2_nchw):
    w_up, b_up = params["w_up"], params["b_up"]      # (Cin, Cup, 2, 2), (Cup,)
    w_c1, w_c2 = params["w_c1"], params["w_c2"]      # (Cout, Cin, 3, 3), (Cout, Cout, 3, 3)

    N, Cin, H, W = x1_nchw.shape
    Cup = Cin // 2
    Cout = w_c1.shape[0]
    _, _, H2, W2 = x2_nchw.shape
    HH, WW = 2 * H, 2 * W
    Ho1 = HH - 2
    Ho2, Wo2 = HH - 4, WW - 4
    diff = (H2 - HH) // 2            # torch reuses the H-based diff for W too

    # lane-dense padded channel widths
    Cs_p = _rup(max(Cup, 1), 128)    # skip half of the concat
    Cu_p = _rup(max(Cup, 1), 128)    # upsampled half of the concat
    Co_p = _rup(max(Cout, 1), 128)
    Ccat = Cs_p + Cu_p

    cat_rows = _rup(HH * WW + 2, 8)  # +2: full-width conv taps read 2 past the end
    h1_rows = _rup(Ho1 * WW + 2, 8)
    IB = max(1, 256 // max(W, 1))    # input-row block  (M ~ 256 for the up-conv dots)
    RB = max(1, 256 // max(WW, 1))   # output-row block (M ~ 256 for the conv dots)

    cdt = jnp.bfloat16

    # ---- weight prep (tiny, fused by XLA, done outside the kernel) ----
    wupt = jnp.transpose(w_up, (2, 3, 0, 1)).astype(cdt)                  # (2,2,Cin,Cup)
    wup_p = jnp.zeros((2, 2, Cin, Cu_p), cdt).at[..., :Cup].set(wupt)
    bup_p = jnp.zeros((1, Cu_p), jnp.float32).at[0, :Cup].set(b_up.astype(jnp.float32))
    eye_p = jnp.zeros((Cup, Cs_p), cdt).at[:, :Cup].set(jnp.eye(Cup, dtype=cdt))

    w1t = jnp.transpose(w_c1, (2, 3, 1, 0)).astype(cdt)                   # (3,3,Cin,Cout)
    w1_p = (jnp.zeros((3, 3, Ccat, Co_p), cdt)
            .at[:, :, 0:Cup, 0:Cout].set(w1t[:, :, 0:Cup, :])             # skip half of concat
            .at[:, :, Cs_p:Cs_p + Cup, 0:Cout].set(w1t[:, :, Cup:Cin, :]))  # upsampled half
    w2t = jnp.transpose(w_c2, (2, 3, 1, 0)).astype(cdt)                   # (3,3,Cout,Cout)
    w2_p = jnp.zeros((3, 3, Co_p, Co_p), cdt).at[:, :, :Cout, :Cout].set(w2t)

    # x1 as (N, Cin, H*W): free row-major reshape -- no HBM transpose pass.
    x1r = x1_nchw.reshape(N, Cin, H * W)

    kernel = _make_up_kernel(H=H, W=W, Cout=Cout, Cs_p=Cs_p, Cu_p=Cu_p,
                             Co_p=Co_p, diff=diff, cat_rows=cat_rows,
                             h1_rows=h1_rows, IB=IB, RB=RB)

    # explicit VMEM budget: double-buffered activation blocks + weights + scratch
    est = (2 * 4 * (Cin * H * W + Cup * H2 * W2 + Cout * Ho2 * Wo2)
           + 2 * 2 * (wup_p.size + eye_p.size + w1_p.size + w2_p.size)
           + 4 * bup_p.size
           + 2 * (cat_rows * Ccat + h1_rows * Co_p))
    vmem_limit = int(min(64 * 2 ** 20, max(16 * 2 ** 20, 2 * est)))

    out = pl.pallas_call(
        kernel,
        out_shape=jax.ShapeDtypeStruct((N, Cout, Ho2, Wo2), jnp.float32),
        grid_spec=pltpu.PrefetchScalarGridSpec(
            num_scalar_prefetch=0,
            grid=(N,),
            in_specs=[
                pl.BlockSpec((None, Cin, H * W), lambda n: (n, 0, 0)),
                pl.BlockSpec((None, Cup, H2, W2), lambda n: (n, 0, 0, 0)),
                # TODO(synk): pipeline_mode=pl.Buffered(1) on these constant
                # weight blocks to reclaim VMEM at real widths on v7x.
                pl.BlockSpec((2, 2, Cin, Cu_p), lambda n: (0, 0, 0, 0)),
                pl.BlockSpec((1, Cu_p), lambda n: (0, 0)),
                pl.BlockSpec((Cup, Cs_p), lambda n: (0, 0)),
                pl.BlockSpec((3, 3, Ccat, Co_p), lambda n: (0, 0, 0, 0)),
                pl.BlockSpec((3, 3, Co_p, Co_p), lambda n: (0, 0, 0, 0)),
            ],
            out_specs=pl.BlockSpec((None, Cout, Ho2, Wo2), lambda n: (n, 0, 0, 0)),
            scratch_shapes=[
                pltpu.VMEM((cat_rows, Ccat), cdt),
                pltpu.VMEM((h1_rows, Co_p), cdt),
            ],
        ),
        compiler_params=pltpu.CompilerParams(
            dimension_semantics=("parallel",),   # N samples across v7x TensorCores
            vmem_limit_bytes=vmem_limit,
        ),
    )(x1r, x2_nchw, wup_p, bup_p, eye_p, w1_p, w2_p)
    return out


# ---------------------------------------------------------------------------
# Pure-JAX f32 reference (correctness check only)
# ---------------------------------------------------------------------------
def up_ref(params, x1, x2):
    w_up, b_up, w_c1, w_c2 = params["w_up"], params["b_up"], params["w_c1"], params["w_c2"]
    N, Cin, H, W = x1.shape
    Cup = Cin // 2
    t = jnp.einsum("nchw,cokl->nohkwl", x1, w_up, precision=lax.Precision.HIGHEST)
    y = t.reshape(N, Cup, 2 * H, 2 * W) + b_up[None, :, None, None]
    diff = (x2.shape[2] - 2 * H) // 2
    x2c = x2[:, :, diff:diff + 2 * H, diff:diff + 2 * W]
    x = jnp.concatenate([x2c, y], axis=1)
    dn = ("NCHW", "OIHW", "NCHW")
    h = jax.nn.relu(lax.conv_general_dilated(x, w_c1, (1, 1), "VALID",
                                             dimension_numbers=dn,
                                             precision=lax.Precision.HIGHEST))
    h = jax.nn.relu(lax.conv_general_dilated(h, w_c2, (1, 1), "VALID",
                                             dimension_numbers=dn,
                                             precision=lax.Precision.HIGHEST))
    return h


if __name__ == "__main__":
    key = jax.random.PRNGKey(0)
    N, Cin, Cout = 2, 8, 4
    H1 = W1 = 8           # x1 spatial
    H2 = W2 = 20          # x2 spatial (center-cropped to 16x16 after upsample)

    ks = jax.random.split(key, 6)
    x1 = jax.random.normal(ks[0], (N, Cin, H1, W1), jnp.float32)
    x2 = jax.random.normal(ks[1], (N, Cin // 2, H2, W2), jnp.float32)

    params = {
        "w_up": 0.2 * jax.random.normal(ks[2], (Cin, Cin // 2, 2, 2), jnp.float32),
        "b_up": 0.1 * jax.random.normal(ks[3], (Cin // 2,), jnp.float32),
        "w_c1": 0.2 * jax.random.normal(ks[4], (Cout, Cin, 3, 3), jnp.float32),
        "w_c2": 0.2 * jax.random.normal(ks[5], (Cout, Cout, 3, 3), jnp.float32),
    }

    out = jax.block_until_ready(up_forward(params, x1, x2))
    assert out.shape == (N, Cout, 2 * H1 - 4, 2 * W1 - 4), out.shape

    ref = jax.block_until_ready(up_ref(params, x1, x2))
    # Tolerance set for bf16 matmul operands / f32 accumulation.
    np.testing.assert_allclose(np.asarray(out), np.asarray(ref), rtol=2e-2, atol=3e-2)

    print("KERNEL_OK")
</pallas_src>

<mosaic_0001>
module attributes {stable_mosaic.version = 11 : i64} {
  func.func @kernel(%arg0: i32, %arg1: memref<1x8x64xf32, #tpu.memory_space<vmem>>, %arg2: memref<1x4x20x20xf32, #tpu.memory_space<vmem>>, %arg3: memref<2x2x8x128xbf16, #tpu.memory_space<vmem>>, %arg4: memref<1x128xf32, #tpu.memory_space<vmem>>, %arg5: memref<4x128xbf16, #tpu.memory_space<vmem>>, %arg6: memref<3x3x256x128xbf16, #tpu.memory_space<vmem>>, %arg7: memref<3x3x128x128xbf16, #tpu.memory_space<vmem>>, %arg8: memref<1x4x12x12xf32, #tpu.memory_space<vmem>>, %arg9: memref<264x256xbf16, #tpu.memory_space<vmem>>, %arg10: memref<232x128xbf16, #tpu.memory_space<vmem>>) attributes {dimension_semantics = [#tpu.dimension_semantics<parallel>], iteration_bounds = array<i64: 2>, scalar_prefetch = 0 : i64, scratch_operands = 2 : i64, tpu.core_type = #tpu.core_type<tc>, window_params = [{transform_indices = @transform_0, window_bounds = array<i64: 1, 8, 64>}, {transform_indices = @transform_1, window_bounds = array<i64: 1, 4, 20, 20>}, {pipeline_mode = #tpu.pipeline_mode<synchronous>, transform_indices = @transform_2, window_bounds = array<i64: 2, 2, 8, 128>}, {pipeline_mode = #tpu.pipeline_mode<synchronous>, transform_indices = @transform_3, window_bounds = array<i64: 1, 128>}, {pipeline_mode = #tpu.pipeline_mode<synchronous>, transform_indices = @transform_4, window_bounds = array<i64: 4, 128>}, {pipeline_mode = #tpu.pipeline_mode<synchronous>, transform_indices = @transform_5, window_bounds = array<i64: 3, 3, 256, 128>}, {pipeline_mode = #tpu.pipeline_mode<synchronous>, transform_indices = @transform_6, window_bounds = array<i64: 3, 3, 128, 128>}, {transform_indices = @transform_7, window_bounds = array<i64: 1, 4, 12, 12>}]} {
    %cst = arith.constant 0.000000e+00 : bf16
    %0 = vector.broadcast %cst : bf16 to vector<8x256xbf16>
    %c256 = arith.constant 256 : index
    %c0 = arith.constant 0 : index
    %1 = vector.load %arg9[%c256, %c0] : memref<264x256xbf16, #tpu.memory_space<vmem>>, vector<8x256xbf16>
    tpu.vector_store %arg9[%c256, %c0], %0 {strides = array<i32>} : memref<264x256xbf16, #tpu.memory_space<vmem>>, vector<8x256xbf16>,
    %cst_0 = arith.constant 0.000000e+00 : bf16
    %2 = vector.broadcast %cst_0 : bf16 to vector<8x128xbf16>
    %c224 = arith.constant 224 : index
    %c0_1 = arith.constant 0 : index
    %3 = vector.load %arg10[%c224, %c0_1] : memref<232x128xbf16, #tpu.memory_space<vmem>>, vector<8x128xbf16>
    tpu.vector_store %arg10[%c224, %c0_1], %2 {strides = array<i32>} : memref<232x128xbf16, #tpu.memory_space<vmem>>, vector<8x128xbf16>,
    %c0_2 = arith.constant 0 : index
    %c0_3 = arith.constant 0 : index
    %4 = vector.load %arg5[%c0_2, %c0_3] : memref<4x128xbf16, #tpu.memory_space<vmem>>, vector<4x128xbf16>
    %c0_4 = arith.constant 0 : index
    %c0_5 = arith.constant 0 : index
    %c2 = arith.constant 2 : index
    %c2_6 = arith.constant 2 : index
    %5 = vector.load %arg2[%c0_4, %c0_5, %c2, %c2_6] : memref<1x4x20x20xf32, #tpu.memory_space<vmem>>, vector<1x4x1x16xf32>
    %6 = vector.shape_cast %5 : vector<1x4x1x16xf32> to vector<4x16xf32>
    %7 = arith.truncf %6 : vector<4x16xf32> to vector<4x16xbf16>
    %cst_7 = arith.constant dense<0.000000e+00> : vector<16x128xf32>
    %8 = tpu.matmul %7, %4, %cst_7 {dimension_numbers = #tpu.dot_dimension_numbers<[0], [0], [1], [1], [0, 1, 1, 1], [], []>} : vector<4x16xbf16>, vector<4x128xbf16>, vector<16x128xf32> -> vector<16x128xf32>
    %9 = arith.truncf %8 : vector<16x128xf32> to vector<16x128xbf16>
    %c0_8 = arith.constant 0 : index
    %c0_9 = arith.constant 0 : index
    %10 = vector.load %arg9[%c0_8, %c0_9] : memref<264x256xbf16, #tpu.memory_space<vmem>>, vector<16x128xbf16>
    tpu.vector_store %arg9[%c0_8, %c0_9], %9 {strides = array<i32>} : memref<264x256xbf16, #tpu.memory_space<vmem>>, vector<16x128xbf16>,
    %c0_10 = arith.constant 0 : index
    %c0_11 = arith.constant 0 : index
    %c3 = arith.constant 3 : index
    %c2_12 = arith.constant 2 : index
    %11 = vector.load %arg2[%c0_10, %c0_11, %c3, %c2_12] : memref<1x4x20x20xf32, #tpu.memory_space<vmem>>, vector<1x4x1x16xf32>
    %12 = vector.shape_cast %11 : vector<1x4x1x16xf32> to vector<4x16xf32>
    %13 = arith.truncf %12 : vector<4x16xf32> to vector<4x16xbf16>
    %cst_13 = arith.constant dense<0.000000e+00> : vector<16x128xf32>
    %14 = tpu.matmul %13, %4, %cst_13 {dimension_numbers = #tpu.dot_dimension_numbers<[0], [0], [1], [1], [0, 1, 1, 1], [], []>} : vector<4x16xbf16>, vector<4x128xbf16>, vector<16x128xf32> -> vector<16x128xf32>
    %15 = arith.truncf %14 : vector<16x128xf32> to vector<16x128xbf16>
    %c16 = arith.constant 16 : index
    %c0_14 = arith.constant 0 : index
    %16 = vector.load %arg9[%c16, %c0_14] : memref<264x256xbf16, #tpu.memory_space<vmem>>, vector<16x128xbf16>
    tpu.vector_store %arg9[%c16, %c0_14], %15 {strides = array<i32>} : memref<264x256xbf16, #tpu.memory_space<vmem>>, vector<16x128xbf16>,
    %c0_15 = arith.constant 0 : index
    %c0_16 = arith.constant 0 : index
    %c4 = arith.constant 4 : index
    %c2_17 = arith.constant 2 : index
    %17 = vector.load %arg2[%c0_15, %c0_16, %c4, %c2_17] : memref<1x4x20x20xf32, #tpu.memory_space<vmem>>, vector<1x4x1x16xf32>
    %18 = vector.shape_cast %17 : vector<1x4x1x16xf32> to vector<4x16xf32>
    %19 = arith.truncf %18 : vector<4x16xf32> to vector<4x16xbf16>
    %cst_18 = arith.constant dense<0.000000e+00> : vector<16x128xf32>
    %20 = tpu.matmul %19, %4, %cst_18 {dimension_numbers = #tpu.dot_dimension_numbers<[0], [0], [1], [1], [0, 1, 1, 1], [], []>} : vector<4x16xbf16>, vector<4x128xbf16>, vector<16x128xf32> -> vector<16x128xf32>
    %21 = arith.truncf %20 : vector<16x128xf32> to vector<16x128xbf16>
    %c32 = arith.constant 32 : index
    %c0_19 = arith.constant 0 : index
    %22 = vector.load %arg9[%c32, %c0_19] : memref<264x256xbf16, #tpu.memory_space<vmem>>, vector<16x128xbf16>
    tpu.vector_store %arg9[%c32, %c0_19], %21 {strides = array<i32>} : memref<264x256xbf16, #tpu.memory_space<vmem>>, vector<16x128xbf16>,
    %c0_20 = arith.constant 0 : index
    %c0_21 = arith.constant 0 : index
    %c5 = arith.constant 5 : index
    %c2_22 = arith.constant 2 : index
    %23 = vector.load %arg2[%c0_20, %c0_21, %c5, %c2_22] : memref<1x4x20x20xf32, #tpu.memory_space<vmem>>, vector<1x4x1x16xf32>
    %24 = vector.shape_cast %23 : vector<1x4x1x16xf32> to vector<4x16xf32>
    %25 = arith.truncf %24 : vector<4x16xf32> to vector<4x16xbf16>
    %cst_23 = arith.constant dense<0.000000e+00> : vector<16x128xf32>
    %26 = tpu.matmul %25, %4, %cst_23 {dimension_numbers = #tpu.dot_dimension_numbers<[0], [0], [1], [1], [0, 1, 1, 1], [], []>} : vector<4x16xbf16>, vector<4x128xbf16>, vector<16x128xf32> -> vector<16x128xf32>
    %27 = arith.truncf %26 : vector<16x128xf32> to vector<16x128xbf16>
    %c48 = arith.constant 48 : index
    %c0_24 = arith.constant 0 : index
    %28 = vector.load %arg9[%c48, %c0_24] : memref<264x256xbf16, #tpu.memory_space<vmem>>, vector<16x128xbf16>
    tpu.vector_store %arg9[%c48, %c0_24], %27 {strides = array<i32>} : memref<264x256xbf16, #tpu.memory_space<vmem>>, vector<16x128xbf16>,
    %c0_25 = arith.constant 0 : index
    %c0_26 = arith.constant 0 : index
    %c6 = arith.constant 6 : index
    %c2_27 = arith.constant 2 : index
    %29 = vector.load %arg2[%c0_25, %c0_26, %c6, %c2_27] : memref<1x4x20x20xf32, #tpu.memory_space<vmem>>, vector<1x4x1x16xf32>
    %30 = vector.shape_cast %29 : vector<1x4x1x16xf32> to vector<4x16xf32>
    %31 = arith.truncf %30 : vector<4x16xf32> to vector<4x16xbf16>
    %cst_28 = arith.constant dense<0.000000e+00> : vector<16x128xf32>
    %32 = tpu.matmul %31, %4, %cst_28 {dimension_numbers = #tpu.dot_dimension_numbers<[0], [0], [1], [1], [0, 1, 1, 1], [], []>} : vector<4x16xbf16>, vector<4x128xbf16>, vector<16x128xf32> -> vector<16x128xf32>
    %33 = arith.truncf %32 : vector<16x128xf32> to vector<16x128xbf16>
    %c64 = arith.constant 64 : index
    %c0_29 = arith.constant 0 : index
    %34 = vector.load %arg9[%c64, %c0_29] : memref<264x256xbf16, #tpu.memory_space<vmem>>, vector<16x128xbf16>
    tpu.vector_store %arg9[%c64, %c0_29], %33 {strides = array<i32>} : memref<264x256xbf16, #tpu.memory_space<vmem>>, vector<16x128xbf16>,
    %c0_30 = arith.constant 0 : index
    %c0_31 = arith.constant 0 : index
    %c7 = arith.constant 7 : index
    %c2_32 = arith.constant 2 : index
    %35 = vector.load %arg2[%c0_30, %c0_31, %c7, %c2_32] : memref<1x4x20x20xf32, #tpu.memory_space<vmem>>, vector<1x4x1x16xf32>
    %36 = vector.shape_cast %35 : vector<1x4x1x16xf32> to vector<4x16xf32>
    %37 = arith.truncf %36 : vector<4x16xf32> to vector<4x16xbf16>
    %cst_33 = arith.constant dense<0.000000e+00> : vector<16x128xf32>
    %38 = tpu.matmul %37, %4, %cst_33 {dimension_numbers = #tpu.dot_dimension_numbers<[0], [0], [1], [1], [0, 1, 1, 1], [], []>} : vector<4x16xbf16>, vector<4x128xbf16>, vector<16x128xf32> -> vector<16x128xf32>
    %39 = arith.truncf %38 : vector<16x128xf32> to vector<16x128xbf16>
    %c80 = arith.constant 80 : index
    %c0_34 = arith.constant 0 : index
    %40 = vector.load %arg9[%c80, %c0_34] : memref<264x256xbf16, #tpu.memory_space<vmem>>, vector<16x128xbf16>
    tpu.vector_store %arg9[%c80, %c0_34], %39 {strides = array<i32>} : memref<264x256xbf16, #tpu.memory_space<vmem>>, vector<16x128xbf16>,
    %c0_35 = arith.constant 0 : index
    %c0_36 = arith.constant 0 : index
    %c8 = arith.constant 8 : index
    %c2_37 = arith.constant 2 : index
    %41 = vector.load %arg2[%c0_35, %c0_36, %c8, %c2_37] : memref<1x4x20x20xf32, #tpu.memory_space<vmem>>, vector<1x4x1x16xf32>
    %42 = vector.shape_cast %41 : vector<1x4x1x16xf32> to vector<4x16xf32>
    %43 = arith.truncf %42 : vector<4x16xf32> to vector<4x16xbf16>
    %cst_38 = arith.constant dense<0.000000e+00> : vector<16x128xf32>
    %44 = tpu.matmul %43, %4, %cst_38 {dimension_numbers = #tpu.dot_dimension_numbers<[0], [0], [1], [1], [0, 1, 1, 1], [], []>} : vector<4x16xbf16>, vector<4x128xbf16>, vector<16x128xf32> -> vector<16x128xf32>
    %45 = arith.truncf %44 : vector<16x128xf32> to vector<16x128xbf16>
    %c96 = arith.constant 96 : index
    %c0_39 = arith.constant 0 : index
    %46 = vector.load %arg9[%c96, %c0_39] : memref<264x256xbf16, #tpu.memory_space<vmem>>, vector<16x128xbf16>
    tpu.vector_store %arg9[%c96, %c0_39], %45 {strides = array<i32>} : memref<264x256xbf16, #tpu.memory_space<vmem>>, vector<16x128xbf16>,
    %c0_40 = arith.constant 0 : index
    %c0_41 = arith.constant 0 : index
    %c9 = arith.constant 9 : index
    %c2_42 = arith.constant 2 : index
    %47 = vector.load %arg2[%c0_40, %c0_41, %c9, %c2_42] : memref<1x4x20x20xf32, #tpu.memory_space<vmem>>, vector<1x4x1x16xf32>
    %48 = vector.shape_cast %47 : vector<1x4x1x16xf32> to vector<4x16xf32>
    %49 = arith.truncf %48 : vector<4x16xf32> to vector<4x16xbf16>
    %cst_43 = arith.constant dense<0.000000e+00> : vector<16x128xf32>
    %50 = tpu.matmul %49, %4, %cst_43 {dimension_numbers = #tpu.dot_dimension_numbers<[0], [0], [1], [1], [0, 1, 1, 1], [], []>} : vector<4x16xbf16>, vector<4x128xbf16>, vector<16x128xf32> -> vector<16x128xf32>
    %51 = arith.truncf %50 : vector<16x128xf32> to vector<16x128xbf16>
    %c112 = arith.constant 112 : index
    %c0_44 = arith.constant 0 : index
    %52 = vector.load %arg9[%c112, %c0_44] : memref<264x256xbf16, #tpu.memory_space<vmem>>, vector<16x128xbf16>
    tpu.vector_store %arg9[%c112, %c0_44], %51 {strides = array<i32>} : memref<264x256xbf16, #tpu.memory_space<vmem>>, vector<16x128xbf16>,
    %c0_45 = arith.constant 0 : index
    %c0_46 = arith.constant 0 : index
    %c10 = arith.constant 10 : index
    %c2_47 = arith.constant 2 : index
    %53 = vector.load %arg2[%c0_45, %c0_46, %c10, %c2_47] : memref<1x4x20x20xf32, #tpu.memory_space<vmem>>, vector<1x4x1x16xf32>
    %54 = vector.shape_cast %53 : vector<1x4x1x16xf32> to vector<4x16xf32>
    %55 = arith.truncf %54 : vector<4x16xf32> to vector<4x16xbf16>
    %cst_48 = arith.constant dense<0.000000e+00> : vector<16x128xf32>
    %56 = tpu.matmul %55, %4, %cst_48 {dimension_numbers = #tpu.dot_dimension_numbers<[0], [0], [1], [1], [0, 1, 1, 1], [], []>} : vector<4x16xbf16>, vector<4x128xbf16>, vector<16x128xf32> -> vector<16x128xf32>
    %57 = arith.truncf %56 : vector<16x128xf32> to vector<16x128xbf16>
    %c128 = arith.constant 128 : index
    %c0_49 = arith.constant 0 : index
    %58 = vector.load %arg9[%c128, %c0_49] : memref<264x256xbf16, #tpu.memory_space<vmem>>, vector<16x128xbf16>
    tpu.vector_store %arg9[%c128, %c0_49], %57 {strides = array<i32>} : memref<264x256xbf16, #tpu.memory_space<vmem>>, vector<16x128xbf16>,
    %c0_50 = arith.constant 0 : index
    %c0_51 = arith.constant 0 : index
    %c11 = arith.constant 11 : index
    %c2_52 = arith.constant 2 : index
    %59 = vector.load %arg2[%c0_50, %c0_51, %c11, %c2_52] : memref<1x4x20x20xf32, #tpu.memory_space<vmem>>, vector<1x4x1x16xf32>
    %60 = vector.shape_cast %59 : vector<1x4x1x16xf32> to vector<4x16xf32>
    %61 = arith.truncf %60 : vector<4x16xf32> to vector<4x16xbf16>
    %cst_53 = arith.constant dense<0.000000e+00> : vector<16x128xf32>
    %62 = tpu.matmul %61, %4, %cst_53 {dimension_numbers = #tpu.dot_dimension_numbers<[0], [0], [1], [1], [0, 1, 1, 1], [], []>} : vector<4x16xbf16>, vector<4x128xbf16>, vector<16x128xf32> -> vector<16x128xf32>
    %63 = arith.truncf %62 : vector<16x128xf32> to vector<16x128xbf16>
    %c144 = arith.constant 144 : index
    %c0_54 = arith.constant 0 : index
    %64 = vector.load %arg9[%c144, %c0_54] : memref<264x256xbf16, #tpu.memory_space<vmem>>, vector<16x128xbf16>
    tpu.vector_store %arg9[%c144, %c0_54], %63 {strides = array<i32>} : memref<264x256xbf16, #tpu.memory_space<vmem>>, vector<16x128xbf16>,
    %c0_55 = arith.constant 0 : index
    %c0_56 = arith.constant 0 : index
    %c12 = arith.constant 12 : index
    %c2_57 = arith.constant 2 : index
    %65 = vector.load %arg2[%c0_55, %c0_56, %c12, %c2_57] : memref<1x4x20x20xf32, #tpu.memory_space<vmem>>, vector<1x4x1x16xf32>
    %66 = vector.shape_cast %65 : vector<1x4x1x16xf32> to vector<4x16xf32>
    %67 = arith.truncf %66 : vector<4x16xf32> to vector<4x16xbf16>
    %cst_58 = arith.constant dense<0.000000e+00> : vector<16x128xf32>
    %68 = tpu.matmul %67, %4, %cst_58 {dimension_numbers = #tpu.dot_dimension_numbers<[0], [0], [1], [1], [0, 1, 1, 1], [], []>} : vector<4x16xbf16>, vector<4x128xbf16>, vector<16x128xf32> -> vector<16x128xf32>
    %69 = arith.truncf %68 : vector<16x128xf32> to vector<16x128xbf16>
    %c160 = arith.constant 160 : index
    %c0_59 = arith.constant 0 : index
    %70 = vector.load %arg9[%c160, %c0_59] : memref<264x256xbf16, #tpu.memory_space<vmem>>, vector<16x128xbf16>
    tpu.vector_store %arg9[%c160, %c0_59], %69 {strides = array<i32>} : memref<264x256xbf16, #tpu.memory_space<vmem>>, vector<16x128xbf16>,
    %c0_60 = arith.constant 0 : index
    %c0_61 = arith.constant 0 : index
    %c13 = arith.constant 13 : index
    %c2_62 = arith.constant 2 : index
    %71 = vector.load %arg2[%c0_60, %c0_61, %c13, %c2_62] : memref<1x4x20x20xf32, #tpu.memory_space<vmem>>, vector<1x4x1x16xf32>
    %72 = vector.shape_cast %71 : vector<1x4x1x16xf32> to vector<4x16xf32>
    %73 = arith.truncf %72 : vector<4x16xf32> to vector<4x16xbf16>
    %cst_63 = arith.constant dense<0.000000e+00> : vector<16x128xf32>
    %74 = tpu.matmul %73, %4, %cst_63 {dimension_numbers = #tpu.dot_dimension_numbers<[0], [0], [1], [1], [0, 1, 1, 1], [], []>} : vector<4x16xbf16>, vector<4x128xbf16>, vector<16x128xf32> -> vector<16x128xf32>
    %75 = arith.truncf %74 : vector<16x128xf32> to vector<16x128xbf16>
    %c176 = arith.constant 176 : index
    %c0_64 = arith.constant 0 : index
    %76 = vector.load %arg9[%c176, %c0_64] : memref<264x256xbf16, #tpu.memory_space<vmem>>, vector<16x128xbf16>
    tpu.vector_store %arg9[%c176, %c0_64], %75 {strides = array<i32>} : memref<264x256xbf16, #tpu.memory_space<vmem>>, vector<16x128xbf16>,
    %c0_65 = arith.constant 0 : index
    %c0_66 = arith.constant 0 : index
    %c14 = arith.constant 14 : index
    %c2_67 = arith.constant 2 : index
    %77 = vector.load %arg2[%c0_65, %c0_66, %c14, %c2_67] : memref<1x4x20x20xf32, #tpu.memory_space<vmem>>, vector<1x4x1x16xf32>
    %78 = vector.shape_cast %77 : vector<1x4x1x16xf32> to vector<4x16xf32>
    %79 = arith.truncf %78 : vector<4x16xf32> to vector<4x16xbf16>
    %cst_68 = arith.constant dense<0.000000e+00> : vector<16x128xf32>
    %80 = tpu.matmul %79, %4, %cst_68 {dimension_numbers = #tpu.dot_dimension_numbers<[0], [0], [1], [1], [0, 1, 1, 1], [], []>} : vector<4x16xbf16>, vector<4x128xbf16>, vector<16x128xf32> -> vector<16x128xf32>
    %81 = arith.truncf %80 : vector<16x128xf32> to vector<16x128xbf16>
    %c192 = arith.constant 192 : index
    %c0_69 = arith.constant 0 : index
    %82 = vector.load %arg9[%c192, %c0_69] : memref<264x256xbf16, #tpu.memory_space<vmem>>, vector<16x128xbf16>
    tpu.vector_store %arg9[%c192, %c0_69], %81 {strides = array<i32>} : memref<264x256xbf16, #tpu.memory_space<vmem>>, vector<16x128xbf16>,
    %c0_70 = arith.constant 0 : index
    %c0_71 = arith.constant 0 : index
    %c15 = arith.constant 15 : index
    %c2_72 = arith.constant 2 : index
    %83 = vector.load %arg2[%c0_70, %c0_71, %c15, %c2_72] : memref<1x4x20x20xf32, #tpu.memory_space<vmem>>, vector<1x4x1x16xf32>
    %84 = vector.shape_cast %83 : vector<1x4x1x16xf32> to vector<4x16xf32>
    %85 = arith.truncf %84 : vector<4x16xf32> to vector<4x16xbf16>
    %cst_73 = arith.constant dense<0.000000e+00> : vector<16x128xf32>
    %86 = tpu.matmul %85, %4, %cst_73 {dimension_numbers = #tpu.dot_dimension_numbers<[0], [0], [1], [1], [0, 1, 1, 1], [], []>} : vector<4x16xbf16>, vector<4x128xbf16>, vector<16x128xf32> -> vector<16x128xf32>
    %87 = arith.truncf %86 : vector<16x128xf32> to vector<16x128xbf16>
    %c208 = arith.constant 208 : index
    %c0_74 = arith.constant 0 : index
    %88 = vector.load %arg9[%c208, %c0_74] : memref<264x256xbf16, #tpu.memory_space<vmem>>, vector<16x128xbf16>
    tpu.vector_store %arg9[%c208, %c0_74], %87 {strides = array<i32>} : memref<264x256xbf16, #tpu.memory_space<vmem>>, vector<16x128xbf16>,
    %c0_75 = arith.constant 0 : index
    %c0_76 = arith.constant 0 : index
    %c16_77 = arith.constant 16 : index
    %c2_78 = arith.constant 2 : index
    %89 = vector.load %arg2[%c0_75, %c0_76, %c16_77, %c2_78] : memref<1x4x20x20xf32, #tpu.memory_space<vmem>>, vector<1x4x1x16xf32>
    %90 = vector.shape_cast %89 : vector<1x4x1x16xf32> to vector<4x16xf32>
    %91 = arith.truncf %90 : vector<4x16xf32> to vector<4x16xbf16>
    %cst_79 = arith.constant dense<0.000000e+00> : vector<16x128xf32>
    %92 = tpu.matmul %91, %4, %cst_79 {dimension_numbers = #tpu.dot_dimension_numbers<[0], [0], [1], [1], [0, 1, 1, 1], [], []>} : vector<4x16xbf16>, vector<4x128xbf16>, vector<16x128xf32> -> vector<16x128xf32>
    %93 = arith.truncf %92 : vector<16x128xf32> to vector<16x128xbf16>
    %c224_80 = arith.constant 224 : index
    %c0_81 = arith.constant 0 : index
    %94 = vector.load %arg9[%c224_80, %c0_81] : memref<264x256xbf16, #tpu.memory_space<vmem>>, vector<16x128xbf16>
    tpu.vector_store %arg9[%c224_80, %c0_81], %93 {strides = array<i32>} : memref<264x256xbf16, #tpu.memory_space<vmem>>, vector<16x128xbf16>,
    %c0_82 = arith.constant 0 : index
    %c0_83 = arith.constant 0 : index
    %c17 = arith.constant 17 : index
    %c2_84 = arith.constant 2 : index
    %95 = vector.load %arg2[%c0_82, %c0_83, %c17, %c2_84] : memref<1x4x20x20xf32, #tpu.memory_space<vmem>>, vector<1x4x1x16xf32>
    %96 = vector.shape_cast %95 : vector<1x4x1x16xf32> to vector<4x16xf32>
    %97 = arith.truncf %96 : vector<4x16xf32> to vector<4x16xbf16>
    %cst_85 = arith.constant dense<0.000000e+00> : vector<16x128xf32>
    %98 = tpu.matmul %97, %4, %cst_85 {dimension_numbers = #tpu.dot_dimension_numbers<[0], [0], [1], [1], [0, 1, 1, 1], [], []>} : vector<4x16xbf16>, vector<4x128xbf16>, vector<16x128xf32> -> vector<16x128xf32>
    %99 = arith.truncf %98 : vector<16x128xf32> to vector<16x128xbf16>
    %c240 = arith.constant 240 : index
    %c0_86 = arith.constant 0 : index
    %100 = vector.load %arg9[%c240, %c0_86] : memref<264x256xbf16, #tpu.memory_space<vmem>>, vector<16x128xbf16>
    tpu.vector_store %arg9[%c240, %c0_86], %99 {strides = array<i32>} : memref<264x256xbf16, #tpu.memory_space<vmem>>, vector<16x128xbf16>,
    %c0_87 = arith.constant 0 : index
    %c0_88 = arith.constant 0 : index
    %101 = vector.load %arg4[%c0_87, %c0_88] : memref<1x128xf32, #tpu.memory_space<vmem>>, vector<1x128xf32>
    %c0_89 = arith.constant 0 : index
    %c0_90 = arith.constant 0 : index
    %c0_91 = arith.constant 0 : index
    %102 = vector.load %arg1[%c0_89, %c0_90, %c0_91] : memref<1x8x64xf32, #tpu.memory_space<vmem>>, vector<1x8x64xf32>
    %103 = vector.shape_cast %102 : vector<1x8x64xf32> to vector<8x64xf32>
    %104 = arith.truncf %103 : vector<8x64xf32> to vector<8x64xbf16>
    %c0_92 = arith.constant 0 : index
    %c0_93 = arith.constant 0 : index
    %c0_94 = arith.constant 0 : index
    %c0_95 = arith.constant 0 : index
    %105 = vector.load %arg3[%c0_92, %c0_93, %c0_94, %c0_95] : memref<2x2x8x128xbf16, #tpu.memory_space<vmem>>, vector<1x1x8x128xbf16>
    %106 = vector.shape_cast %105 : vector<1x1x8x128xbf16> to vector<8x128xbf16>
    %cst_96 = arith.constant dense<0.000000e+00> : vector<64x128xf32>
    %107 = tpu.matmul %104, %106, %cst_96 {dimension_numbers = #tpu.dot_dimension_numbers<[0], [0], [1], [1], [0, 1, 1, 1], [], []>} : vector<8x64xbf16>, vector<8x128xbf16>, vector<64x128xf32> -> vector<64x128xf32>
    %c0_97 = arith.constant 0 : index
    %c1 = arith.constant 1 : index
    %c0_98 = arith.constant 0 : index
    %c0_99 = arith.constant 0 : index
    %108 = vector.load %arg3[%c0_97, %c1, %c0_98, %c0_99] : memref<2x2x8x128xbf16, #tpu.memory_space<vmem>>, vector<1x1x8x128xbf16>
    %109 = vector.shape_cast %108 : vector<1x1x8x128xbf16> to vector<8x128xbf16>
    %cst_100 = arith.constant dense<0.000000e+00> : vector<64x128xf32>
    %110 = tpu.matmul %104, %109, %cst_100 {dimension_numbers = #tpu.dot_dimension_numbers<[0], [0], [1], [1], [0, 1, 1, 1], [], []>} : vector<8x64xbf16>, vector<8x128xbf16>, vector<64x128xf32> -> vector<64x128xf32>
    %111 = vector.shape_cast %107 : vector<64x128xf32> to vector<64x1x128xf32>
    %112 = vector.shape_cast %110 : vector<64x128xf32> to vector<64x1x128xf32>
    %113 = tpu.concatenate %111, %112 in 1 : vector<64x1x128xf32>, vector<64x1x128xf32> -> vector<64x2x128xf32>
    %114 = vector.shape_cast %113 : vector<64x2x128xf32> to vector<128x128xf32>
    %115 = vector.broadcast %101 : vector<1x128xf32> to vector<128x128xf32>
    %116 = arith.addf %114, %115 : vector<128x128xf32>
    %117 = arith.truncf %116 : vector<128x128xf32> to vector<128x128xbf16>
    %118 = vector.extract_strided_slice %117 {offsets = [0, 0], sizes = [16, 128], strides = [1, 1]} : vector<128x128xbf16> to vector<16x128xbf16>
    %c0_101 = arith.constant 0 : index
    %c128_102 = arith.constant 128 : index
    %119 = vector.load %arg9[%c0_101, %c128_102] : memref<264x256xbf16, #tpu.memory_space<vmem>>, vector<16x128xbf16>
    tpu.vector_store %arg9[%c0_101, %c128_102], %118 {strides = array<i32>} : memref<264x256xbf16, #tpu.memory_space<vmem>>, vector<16x128xbf16>,
    %120 = vector.extract_strided_slice %117 {offsets = [16, 0], sizes = [16, 128], strides = [1, 1]} : vector<128x128xbf16> to vector<16x128xbf16>
    %c32_103 = arith.constant 32 : index
    %c128_104 = arith.constant 128 : index
    %121 = vector.load %arg9[%c32_103, %c128_104] : memref<264x256xbf16, #tpu.memory_space<vmem>>, vector<16x128xbf16>
    tpu.vector_store %arg9[%c32_103, %c128_104], %120 {strides = array<i32>} : memref<264x256xbf16, #tpu.memory_space<vmem>>, vector<16x128xbf16>,
    %122 = vector.extract_strided_slice %117 {offsets = [32, 0], sizes = [16, 128], strides = [1, 1]} : vector<128x128xbf16> to vector<16x128xbf16>
    %c64_105 = arith.constant 64 : index
    %c128_106 = arith.constant 128 : index
    %123 = vector.load %arg9[%c64_105, %c128_106] : memref<264x256xbf16, #tpu.memory_space<vmem>>, vector<16x128xbf16>
    tpu.vector_store %arg9[%c64_105, %c128_106], %122 {strides = array<i32>} : memref<264x256xbf16, #tpu.memory_space<vmem>>, vector<16x128xbf16>,
    %124 = vector.extract_strided_slice %117 {offsets = [48, 0], sizes = [16, 128], strides = [1, 1]} : vector<128x128xbf16> to vector<16x128xbf16>
    %c96_107 = arith.constant 96 : index
    %c128_108 = arith.constant 128 : index
    %125 = vector.load %arg9[%c96_107, %c128_108] : memref<264x256xbf16, #tpu.memory_space<vmem>>, vector<16x128xbf16>
    tpu.vector_store %arg9[%c96_107, %c128_108], %124 {strides = array<i32>} : memref<264x256xbf16, #tpu.memory_space<vmem>>, vector<16x128xbf16>,
    %126 = vector.extract_strided_slice %117 {offsets = [64, 0], sizes = [16, 128], strides = [1, 1]} : vector<128x128xbf16> to vector<16x128xbf16>
    %c128_109 = arith.constant 128 : index
    %c128_110 = arith.constant 128 : index
    %127 = vector.load %arg9[%c128_109, %c128_110] : memref<264x256xbf16, #tpu.memory_space<vmem>>, vector<16x128xbf16>
    tpu.vector_store %arg9[%c128_109, %c128_110], %126 {strides = array<i32>} : memref<264x256xbf16, #tpu.memory_space<vmem>>, vector<16x128xbf16>,
    %128 = vector.extract_strided_slice %117 {offsets = [80, 0], sizes = [16, 128], strides = [1, 1]} : vector<128x128xbf16> to vector<16x128xbf16>
    %c160_111 = arith.constant 160 : index
    %c128_112 = arith.constant 128 : index
    %129 = vector.load %arg9[%c160_111, %c128_112] : memref<264x256xbf16, #tpu.memory_space<vmem>>, vector<16x128xbf16>
    tpu.vector_store %arg9[%c160_111, %c128_112], %128 {strides = array<i32>} : memref<264x256xbf16, #tpu.memory_space<vmem>>, vector<16x128xbf16>,
    %130 = vector.extract_strided_slice %117 {offsets = [96, 0], sizes = [16, 128], strides = [1, 1]} : vector<128x128xbf16> to vector<16x128xbf16>
    %c192_113 = arith.constant 192 : index
    %c128_114 = arith.constant 128 : index
    %131 = vector.load %arg9[%c192_113, %c128_114] : memref<264x256xbf16, #tpu.memory_space<vmem>>, vector<16x128xbf16>
    tpu.vector_store %arg9[%c192_113, %c128_114], %130 {strides = array<i32>} : memref<264x256xbf16, #tpu.memory_space<vmem>>, vector<16x128xbf16>,
    %132 = vector.extract_strided_slice %117 {offsets = [112, 0], sizes = [16, 128], strides = [1, 1]} : vector<128x128xbf16> to vector<16x128xbf16>
    %c224_115 = arith.constant 224 : index
    %c128_116 = arith.constant 128 : index
    %133 = vector.load %arg9[%c224_115, %c128_116] : memref<264x256xbf16, #tpu.memory_space<vmem>>, vector<16x128xbf16>
    tpu.vector_store %arg9[%c224_115, %c128_116], %132 {strides = array<i32>} : memref<264x256xbf16, #tpu.memory_space<vmem>>, vector<16x128xbf16>,
    %c1_117 = arith.constant 1 : index
    %c0_118 = arith.constant 0 : index
    %c0_119 = arith.constant 0 : index
    %c0_120 = arith.constant 0 : index
    %134 = vector.load %arg3[%c1_117, %c0_118, %c0_119, %c0_120] : memref<2x2x8x128xbf16, #tpu.memory_space<vmem>>, vector<1x1x8x128xbf16>
    %135 = vector.shape_cast %134 : vector<1x1x8x128xbf16> to vector<8x128xbf16>
    %cst_121 = arith.constant dense<0.000000e+00> : vector<64x128xf32>
    %136 = tpu.matmul %104, %135, %cst_121 {dimension_numbers = #tpu.dot_dimension_numbers<[0], [0], [1], [1], [0, 1, 1, 1], [], []>} : vector<8x64xbf16>, vector<8x128xbf16>, vector<64x128xf32> -> vector<64x128xf32>
    %c1_122 = arith.constant 1 : index
    %c1_123 = arith.constant 1 : index
    %c0_124 = arith.constant 0 : index
    %c0_125 = arith.constant 0 : index
    %137 = vector.load %arg3[%c1_122, %c1_123, %c0_124, %c0_125] : memref<2x2x8x128xbf16, #tpu.memory_space<vmem>>, vector<1x1x8x128xbf16>
    %138 = vector.shape_cast %137 : vector<1x1x8x128xbf16> to vector<8x128xbf16>
    %cst_126 = arith.constant dense<0.000000e+00> : vector<64x128xf32>
    %139 = tpu.matmul %104, %138, %cst_126 {dimension_numbers = #tpu.dot_dimension_numbers<[0], [0], [1], [1], [0, 1, 1, 1], [], []>} : vector<8x64xbf16>, vector<8x128xbf16>, vector<64x128xf32> -> vector<64x128xf32>
    %140 = vector.shape_cast %136 : vector<64x128xf32> to vector<64x1x128xf32>
    %141 = vector.shape_cast %139 : vector<64x128xf32> to vector<64x1x128xf32>
    %142 = tpu.concatenate %140, %141 in 1 : vector<64x1x128xf32>, vector<64x1x128xf32> -> vector<64x2x128xf32>
    %143 = vector.shape_cast %142 : vector<64x2x128xf32> to vector<128x128xf32>
    %144 = vector.broadcast %101 : vector<1x128xf32> to vector<128x128xf32>
    %145 = arith.addf %143, %144 : vector<128x128xf32>
    %146 = arith.truncf %145 : vector<128x128xf32> to vector<128x128xbf16>
    %147 = vector.extract_strided_slice %146 {offsets = [0, 0], sizes = [16, 128], strides = [1, 1]} : vector<128x128xbf16> to vector<16x128xbf16>
    %c16_127 = arith.constant 16 : index
    %c128_128 = arith.constant 128 : index
    %148 = vector.load %arg9[%c16_127, %c128_128] : memref<264x256xbf16, #tpu.memory_space<vmem>>, vector<16x128xbf16>
    tpu.vector_store %arg9[%c16_127, %c128_128], %147 {strides = array<i32>} : memref<264x256xbf16, #tpu.memory_space<vmem>>, vector<16x128xbf16>,
    %149 = vector.extract_strided_slice %146 {offsets = [16, 0], sizes = [16, 128], strides = [1, 1]} : vector<128x128xbf16> to vector<16x128xbf16>
    %c48_129 = arith.constant 48 : index
    %c128_130 = arith.constant 128 : index
    %150 = vector.load %arg9[%c48_129, %c128_130] : memref<264x256xbf16, #tpu.memory_space<vmem>>, vector<16x128xbf16>
    tpu.vector_store %arg9[%c48_129, %c128_130], %149 {strides = array<i32>} : memref<264x256xbf16, #tpu.memory_space<vmem>>, vector<16x128xbf16>,
    %151 = vector.extract_strided_slice %146 {offsets = [32, 0], sizes = [16, 128], strides = [1, 1]} : vector<128x128xbf16> to vector<16x128xbf16>
    %c80_131 = arith.constant 80 : index
    %c128_132 = arith.constant 128 : index
    %152 = vector.load %arg9[%c80_131, %c128_132] : memref<264x256xbf16, #tpu.memory_space<vmem>>, vector<16x128xbf16>
    tpu.vector_store %arg9[%c80_131, %c128_132], %151 {strides = array<i32>} : memref<264x256xbf16, #tpu.memory_space<vmem>>, vector<16x128xbf16>,
    %153 = vector.extract_strided_slice %146 {offsets = [48, 0], sizes = [16, 128], strides = [1, 1]} : vector<128x128xbf16> to vector<16x128xbf16>
    %c112_133 = arith.constant 112 : index
    %c128_134 = arith.constant 128 : index
    %154 = vector.load %arg9[%c112_133, %c128_134] : memref<264x256xbf16, #tpu.memory_space<vmem>>, vector<16x128xbf16>
    tpu.vector_store %arg9[%c112_133, %c128_134], %153 {strides = array<i32>} : memref<264x256xbf16, #tpu.memory_space<vmem>>, vector<16x128xbf16>,
    %155 = vector.extract_strided_slice %146 {offsets = [64, 0], sizes = [16, 128], strides = [1, 1]} : vector<128x128xbf16> to vector<16x128xbf16>
    %c144_135 = arith.constant 144 : index
    %c128_136 = arith.constant 128 : index
    %156 = vector.load %arg9[%c144_135, %c128_136] : memref<264x256xbf16, #tpu.memory_space<vmem>>, vector<16x128xbf16>
    tpu.vector_store %arg9[%c144_135, %c128_136], %155 {strides = array<i32>} : memref<264x256xbf16, #tpu.memory_space<vmem>>, vector<16x128xbf16>,
    %157 = vector.extract_strided_slice %146 {offsets = [80, 0], sizes = [16, 128], strides = [1, 1]} : vector<128x128xbf16> to vector<16x128xbf16>
    %c176_137 = arith.constant 176 : index
    %c128_138 = arith.constant 128 : index
    %158 = vector.load %arg9[%c176_137, %c128_138] : memref<264x256xbf16, #tpu.memory_space<vmem>>, vector<16x128xbf16>
    tpu.vector_store %arg9[%c176_137, %c128_138], %157 {strides = array<i32>} : memref<264x256xbf16, #tpu.memory_space<vmem>>, vector<16x128xbf16>,
    %159 = vector.extract_strided_slice %146 {offsets = [96, 0], sizes = [16, 128], strides = [1, 1]} : vector<128x128xbf16> to vector<16x128xbf16>
    %c208_139 = arith.constant 208 : index
    %c128_140 = arith.constant 128 : index
    %160 = vector.load %arg9[%c208_139, %c128_140] : memref<264x256xbf16, #tpu.memory_space<vmem>>, vector<16x128xbf16>
    tpu.vector_store %arg9[%c208_139, %c128_140], %159 {strides = array<i32>} : memref<264x256xbf16, #tpu.memory_space<vmem>>, vector<16x128xbf16>,
    %161 = vector.extract_strided_slice %146 {offsets = [112, 0], sizes = [16, 128], strides = [1, 1]} : vector<128x128xbf16> to vector<16x128xbf16>
    %c240_141 = arith.constant 240 : index
    %c128_142 = arith.constant 128 : index
    %162 = vector.load %arg9[%c240_141, %c128_142] : memref<264x256xbf16, #tpu.memory_space<vmem>>, vector<16x128xbf16>
    tpu.vector_store %arg9[%c240_141, %c128_142], %161 {strides = array<i32>} : memref<264x256xbf16, #tpu.memory_space<vmem>>, vector<16x128xbf16>,
    %cst_143 = arith.constant 0.000000e+00 : f32
    %163 = vector.broadcast %cst_143 : f32 to vector<224x128xf32>
    %c0_144 = arith.constant 0 : index
    %c0_145 = arith.constant 0 : index
    %164 = vector.load %arg9[%c0_144, %c0_145] : memref<264x256xbf16, #tpu.memory_space<vmem>>, vector<224x256xbf16>
    %c0_146 = arith.constant 0 : index
    %c0_147 = arith.constant 0 : index
    %c0_148 = arith.constant 0 : index
    %c0_149 = arith.constant 0 : index
    %165 = vector.load %arg6[%c0_146, %c0_147, %c0_148, %c0_149] : memref<3x3x256x128xbf16, #tpu.memory_space<vmem>>, vector<1x1x256x128xbf16>
    %166 = vector.shape_cast %165 : vector<1x1x256x128xbf16> to vector<256x128xbf16>
    %cst_150 = arith.constant dense<0.000000e+00> : vector<224x128xf32>
    %167 = tpu.matmul %164, %166, %cst_150 {dimension_numbers = #tpu.dot_dimension_numbers<[1], [0], [0], [1], [0, 0, 1, 1], [], []>} : vector<224x256xbf16>, vector<256x128xbf16>, vector<224x128xf32> -> vector<224x128xf32>
    %168 = arith.addf %163, %167 : vector<224x128xf32>
    %c1_151 = arith.constant 1 : index
    %c0_152 = arith.constant 0 : index
    %169 = vector.load %arg9[%c1_151, %c0_152] : memref<264x256xbf16, #tpu.memory_space<vmem>>, vector<224x256xbf16>
    %c0_153 = arith.constant 0 : index
    %c1_154 = arith.constant 1 : index
    %c0_155 = arith.constant 0 : index
    %c0_156 = arith.constant 0 : index
    %170 = vector.load %arg6[%c0_153, %c1_154, %c0_155, %c0_156] : memref<3x3x256x128xbf16, #tpu.memory_space<vmem>>, vector<1x1x256x128xbf16>
    %171 = vector.shape_cast %170 : vector<1x1x256x128xbf16> to vector<256x128xbf16>
    %cst_157 = arith.constant dense<0.000000e+00> : vector<224x128xf32>
    %172 = tpu.matmul %169, %171, %cst_157 {dimension_numbers = #tpu.dot_dimension_numbers<[1], [0], [0], [1], [0, 0, 1, 1], [], []>} : vector<224x256xbf16>, vector<256x128xbf16>, vector<224x128xf32> -> vector<224x128xf32>
    %173 = arith.addf %168, %172 : vector<224x128xf32>
    %c2_158 = arith.constant 2 : index
    %c0_159 = arith.constant 0 : index
    %174 = vector.load %arg9[%c2_158, %c0_159] : memref<264x256xbf16, #tpu.memory_space<vmem>>, vector<224x256xbf16>
    %c0_160 = arith.constant 0 : index
    %c2_161 = arith.constant 2 : index
    %c0_162 = arith.constant 0 : index
    %c0_163 = arith.constant 0 : index
    %175 = vector.load %arg6[%c0_160, %c2_161, %c0_162, %c0_163] : memref<3x3x256x128xbf16, #tpu.memory_space<vmem>>, vector<1x1x256x128xbf16>
    %176 = vector.shape_cast %175 : vector<1x1x256x128xbf16> to vector<256x128xbf16>
    %cst_164 = arith.constant dense<0.000000e+00> : vector<224x128xf32>
    %177 = tpu.matmul %174, %176, %cst_164 {dimension_numbers = #tpu.dot_dimension_numbers<[1], [0], [0], [1], [0, 0, 1, 1], [], []>} : vector<224x256xbf16>, vector<256x128xbf16>, vector<224x128xf32> -> vector<224x128xf32>
    %178 = arith.addf %173, %177 : vector<224x128xf32>
    %c16_165 = arith.constant 16 : index
    %c0_166 = arith.constant 0 : index
    %179 = vector.load %arg9[%c16_165, %c0_166] : memref<264x256xbf16, #tpu.memory_space<vmem>>, vector<224x256xbf16>
    %c1_167 = arith.constant 1 : index
    %c0_168 = arith.constant 0 : index
    %c0_169 = arith.constant 0 : index
    %c0_170 = arith.constant 0 : index
    %180 = vector.load %arg6[%c1_167, %c0_168, %c0_169, %c0_170] : memref<3x3x256x128xbf16, #tpu.memory_space<vmem>>, vector<1x1x256x128xbf16>
    %181 = vector.shape_cast %180 : vector<1x1x256x128xbf16> to vector<256x128xbf16>
    %cst_171 = arith.constant dense<0.000000e+00> : vector<224x128xf32>
    %182 = tpu.matmul %179, %181, %cst_171 {dimension_numbers = #tpu.dot_dimension_numbers<[1], [0], [0], [1], [0, 0, 1, 1], [], []>} : vector<224x256xbf16>, vector<256x128xbf16>, vector<224x128xf32> -> vector<224x128xf32>
    %183 = arith.addf %178, %182 : vector<224x128xf32>
    %c17_172 = arith.constant 17 : index
    %c0_173 = arith.constant 0 : index
    %184 = vector.load %arg9[%c17_172, %c0_173] : memref<264x256xbf16, #tpu.memory_space<vmem>>, vector<224x256xbf16>
    %c1_174 = arith.constant 1 : index
    %c1_175 = arith.constant 1 : index
    %c0_176 = arith.constant 0 : index
    %c0_177 = arith.constant 0 : index
    %185 = vector.load %arg6[%c1_174, %c1_175, %c0_176, %c0_177] : memref<3x3x256x128xbf16, #tpu.memory_space<vmem>>, vector<1x1x256x128xbf16>
    %186 = vector.shape_cast %185 : vector<1x1x256x128xbf16> to vector<256x128xbf16>
    %cst_178 = arith.constant dense<0.000000e+00> : vector<224x128xf32>
    %187 = tpu.matmul %184, %186, %cst_178 {dimension_numbers = #tpu.dot_dimension_numbers<[1], [0], [0], [1], [0, 0, 1, 1], [], []>} : vector<224x256xbf16>, vector<256x128xbf16>, vector<224x128xf32> -> vector<224x128xf32>
    %188 = arith.addf %183, %187 : vector<224x128xf32>
    %c18 = arith.constant 18 : index
    %c0_179 = arith.constant 0 : index
    %189 = vector.load %arg9[%c18, %c0_179] : memref<264x256xbf16, #tpu.memory_space<vmem>>, vector<224x256xbf16>
    %c1_180 = arith.constant 1 : index
    %c2_181 = arith.constant 2 : index
    %c0_182 = arith.constant 0 : index
    %c0_183 = arith.constant 0 : index
    %190 = vector.load %arg6[%c1_180, %c2_181, %c0_182, %c0_183] : memref<3x3x256x128xbf16, #tpu.memory_space<vmem>>, vector<1x1x256x128xbf16>
    %191 = vector.shape_cast %190 : vector<1x1x256x128xbf16> to vector<256x128xbf16>
    %cst_184 = arith.constant dense<0.000000e+00> : vector<224x128xf32>
    %192 = tpu.matmul %189, %191, %cst_184 {dimension_numbers = #tpu.dot_dimension_numbers<[1], [0], [0], [1], [0, 0, 1, 1], [], []>} : vector<224x256xbf16>, vector<256x128xbf16>, vector<224x128xf32> -> vector<224x128xf32>
    %193 = arith.addf %188, %192 : vector<224x128xf32>
    %c32_185 = arith.constant 32 : index
    %c0_186 = arith.constant 0 : index
    %194 = vector.load %arg9[%c32_185, %c0_186] : memref<264x256xbf16, #tpu.memory_space<vmem>>, vector<224x256xbf16>
    %c2_187 = arith.constant 2 : index
    %c0_188 = arith.constant 0 : index
    %c0_189 = arith.constant 0 : index
    %c0_190 = arith.constant 0 : index
    %195 = vector.load %arg6[%c2_187, %c0_188, %c0_189, %c0_190] : memref<3x3x256x128xbf16, #tpu.memory_space<vmem>>, vector<1x1x256x128xbf16>
    %196 = vector.shape_cast %195 : vector<1x1x256x128xbf16> to vector<256x128xbf16>
    %cst_191 = arith.constant dense<0.000000e+00> : vector<224x128xf32>
    %197 = tpu.matmul %194, %196, %cst_191 {dimension_numbers = #tpu.dot_dimension_numbers<[1], [0], [0], [1], [0, 0, 1, 1], [], []>} : vector<224x256xbf16>, vector<256x128xbf16>, vector<224x128xf32> -> vector<224x128xf32>
    %198 = arith.addf %193, %197 : vector<224x128xf32>
    %c33 = arith.constant 33 : index
    %c0_192 = arith.constant 0 : index
    %199 = vector.load %arg9[%c33, %c0_192] : memref<264x256xbf16, #tpu.memory_space<vmem>>, vector<224x256xbf16>
    %c2_193 = arith.constant 2 : index
    %c1_194 = arith.constant 1 : index
    %c0_195 = arith.constant 0 : index
    %c0_196 = arith.constant 0 : index
    %200 = vector.load %arg6[%c2_193, %c1_194, %c0_195, %c0_196] : memref<3x3x256x128xbf16, #tpu.memory_space<vmem>>, vector<1x1x256x128xbf16>
    %201 = vector.shape_cast %200 : vector<1x1x256x128xbf16> to vector<256x128xbf16>
    %cst_197 = arith.constant dense<0.000000e+00> : vector<224x128xf32>
    %202 = tpu.matmul %199, %201, %cst_197 {dimension_numbers = #tpu.dot_dimension_numbers<[1], [0], [0], [1], [0, 0, 1, 1], [], []>} : vector<224x256xbf16>, vector<256x128xbf16>, vector<224x128xf32> -> vector<224x128xf32>
    %203 = arith.addf %198, %202 : vector<224x128xf32>
    %c34 = arith.constant 34 : index
    %c0_198 = arith.constant 0 : index
    %204 = vector.load %arg9[%c34, %c0_198] : memref<264x256xbf16, #tpu.memory_space<vmem>>, vector<224x256xbf16>
    %c2_199 = arith.constant 2 : index
    %c2_200 = arith.constant 2 : index
    %c0_201 = arith.constant 0 : index
    %c0_202 = arith.constant 0 : index
    %205 = vector.load %arg6[%c2_199, %c2_200, %c0_201, %c0_202] : memref<3x3x256x128xbf16, #tpu.memory_space<vmem>>, vector<1x1x256x128xbf16>
    %206 = vector.shape_cast %205 : vector<1x1x256x128xbf16> to vector<256x128xbf16>
    %cst_203 = arith.constant dense<0.000000e+00> : vector<224x128xf32>
    %207 = tpu.matmul %204, %206, %cst_203 {dimension_numbers = #tpu.dot_dimension_numbers<[1], [0], [0], [1], [0, 0, 1, 1], [], []>} : vector<224x256xbf16>, vector<256x128xbf16>, vector<224x128xf32> -> vector<224x128xf32>
    %208 = arith.addf %203, %207 : vector<224x128xf32>
    %cst_204 = arith.constant 0.000000e+00 : f32
    %209 = vector.broadcast %cst_204 : f32 to vector<224x128xf32>
    %210 = arith.maximumf %208, %209 : vector<224x128xf32>
    %211 = arith.truncf %210 : vector<224x128xf32> to vector<224x128xbf16>
    %c0_205 = arith.constant 0 : index
    %c0_206 = arith.constant 0 : index
    %212 = vector.load %arg10[%c0_205, %c0_206] : memref<232x128xbf16, #tpu.memory_space<vmem>>, vector<224x128xbf16>
    tpu.vector_store %arg10[%c0_205, %c0_206], %211 {strides = array<i32>} : memref<232x128xbf16, #tpu.memory_space<vmem>>, vector<224x128xbf16>,
    %cst_207 = arith.constant 0.000000e+00 : f32
    %213 = vector.broadcast %cst_207 : f32 to vector<192x128xf32>
    %c0_208 = arith.constant 0 : index
    %c0_209 = arith.constant 0 : index
    %214 = vector.load %arg10[%c0_208, %c0_209] : memref<232x128xbf16, #tpu.memory_space<vmem>>, vector<192x128xbf16>
    %c0_210 = arith.constant 0 : index
    %c0_211 = arith.constant 0 : index
    %c0_212 = arith.constant 0 : index
    %c0_213 = arith.constant 0 : index
    %215 = vector.load %arg7[%c0_210, %c0_211, %c0_212, %c0_213] : memref<3x3x128x128xbf16, #tpu.memory_space<vmem>>, vector<1x1x128x128xbf16>
    %216 = vector.shape_cast %215 : vector<1x1x128x128xbf16> to vector<128x128xbf16>
    %cst_214 = arith.constant dense<0.000000e+00> : vector<192x128xf32>
    %217 = tpu.matmul %214, %216, %cst_214 {dimension_numbers = #tpu.dot_dimension_numbers<[1], [0], [0], [1], [0, 0, 1, 1], [], []>} : vector<192x128xbf16>, vector<128x128xbf16>, vector<192x128xf32> -> vector<192x128xf32>
    %218 = arith.addf %213, %217 : vector<192x128xf32>
    %c1_215 = arith.constant 1 : index
    %c0_216 = arith.constant 0 : index
    %219 = vector.load %arg10[%c1_215, %c0_216] : memref<232x128xbf16, #tpu.memory_space<vmem>>, vector<192x128xbf16>
    %c0_217 = arith.constant 0 : index
    %c1_218 = arith.constant 1 : index
    %c0_219 = arith.constant 0 : index
    %c0_220 = arith.constant 0 : index
    %220 = vector.load %arg7[%c0_217, %c1_218, %c0_219, %c0_220] : memref<3x3x128x128xbf16, #tpu.memory_space<vmem>>, vector<1x1x128x128xbf16>
    %221 = vector.shape_cast %220 : vector<1x1x128x128xbf16> to vector<128x128xbf16>
    %cst_221 = arith.constant dense<0.000000e+00> : vector<192x128xf32>
    %222 = tpu.matmul %219, %221, %cst_221 {dimension_numbers = #tpu.dot_dimension_numbers<[1], [0], [0], [1], [0, 0, 1, 1], [], []>} : vector<192x128xbf16>, vector<128x128xbf16>, vector<192x128xf32> -> vector<192x128xf32>
    %223 = arith.addf %218, %222 : vector<192x128xf32>
    %c2_222 = arith.constant 2 : index
    %c0_223 = arith.constant 0 : index
    %224 = vector.load %arg10[%c2_222, %c0_223] : memref<232x128xbf16, #tpu.memory_space<vmem>>, vector<192x128xbf16>
    %c0_224 = arith.constant 0 : index
    %c2_225 = arith.constant 2 : index
    %c0_226 = arith.constant 0 : index
    %c0_227 = arith.constant 0 : index
    %225 = vector.load %arg7[%c0_224, %c2_225, %c0_226, %c0_227] : memref<3x3x128x128xbf16, #tpu.memory_space<vmem>>, vector<1x1x128x128xbf16>
    %226 = vector.shape_cast %225 : vector<1x1x128x128xbf16> to vector<128x128xbf16>
    %cst_228 = arith.constant dense<0.000000e+00> : vector<192x128xf32>
    %227 = tpu.matmul %224, %226, %cst_228 {dimension_numbers = #tpu.dot_dimension_numbers<[1], [0], [0], [1], [0, 0, 1, 1], [], []>} : vector<192x128xbf16>, vector<128x128xbf16>, vector<192x128xf32> -> vector<192x128xf32>
    %228 = arith.addf %223, %227 : vector<192x128xf32>
    %c16_229 = arith.constant 16 : index
    %c0_230 = arith.constant 0 : index
    %229 = vector.load %arg10[%c16_229, %c0_230] : memref<232x128xbf16, #tpu.memory_space<vmem>>, vector<192x128xbf16>
    %c1_231 = arith.constant 1 : index
    %c0_232 = arith.constant 0 : index
    %c0_233 = arith.constant 0 : index
    %c0_234 = arith.constant 0 : index
    %230 = vector.load %arg7[%c1_231, %c0_232, %c0_233, %c0_234] : memref<3x3x128x128xbf16, #tpu.memory_space<vmem>>, vector<1x1x128x128xbf16>
    %231 = vector.shape_cast %230 : vector<1x1x128x128xbf16> to vector<128x128xbf16>
    %cst_235 = arith.constant dense<0.000000e+00> : vector<192x128xf32>
    %232 = tpu.matmul %229, %231, %cst_235 {dimension_numbers = #tpu.dot_dimension_numbers<[1], [0], [0], [1], [0, 0, 1, 1], [], []>} : vector<192x128xbf16>, vector<128x128xbf16>, vector<192x128xf32> -> vector<192x128xf32>
    %233 = arith.addf %228, %232 : vector<192x128xf32>
    %c17_236 = arith.constant 17 : index
    %c0_237 = arith.constant 0 : index
    %234 = vector.load %arg10[%c17_236, %c0_237] : memref<232x128xbf16, #tpu.memory_space<vmem>>, vector<192x128xbf16>
    %c1_238 = arith.constant 1 : index
    %c1_239 = arith.constant 1 : index
    %c0_240 = arith.constant 0 : index
    %c0_241 = arith.constant 0 : index
    %235 = vector.load %arg7[%c1_238, %c1_239, %c0_240, %c0_241] : memref<3x3x128x128xbf16, #tpu.memory_space<vmem>>, vector<1x1x128x128xbf16>
    %236 = vector.shape_cast %235 : vector<1x1x128x128xbf16> to vector<128x128xbf16>
    %cst_242 = arith.constant dense<0.000000e+00> : vector<192x128xf32>
    %237 = tpu.matmul %234, %236, %cst_242 {dimension_numbers = #tpu.dot_dimension_numbers<[1], [0], [0], [1], [0, 0, 1, 1], [], []>} : vector<192x128xbf16>, vector<128x128xbf16>, vector<192x128xf32> -> vector<192x128xf32>
    %238 = arith.addf %233, %237 : vector<192x128xf32>
    %c18_243 = arith.constant 18 : index
    %c0_244 = arith.constant 0 : index
    %239 = vector.load %arg10[%c18_243, %c0_244] : memref<232x128xbf16, #tpu.memory_space<vmem>>, vector<192x128xbf16>
    %c1_245 = arith.constant 1 : index
    %c2_246 = arith.constant 2 : index
    %c0_247 = arith.constant 0 : index
    %c0_248 = arith.constant 0 : index
    %240 = vector.load %arg7[%c1_245, %c2_246, %c0_247, %c0_248] : memref<3x3x128x128xbf16, #tpu.memory_space<vmem>>, vector<1x1x128x128xbf16>
    %241 = vector.shape_cast %240 : vector<1x1x128x128xbf16> to vector<128x128xbf16>
    %cst_249 = arith.constant dense<0.000000e+00> : vector<192x128xf32>
    %242 = tpu.matmul %239, %241, %cst_249 {dimension_numbers = #tpu.dot_dimension_numbers<[1], [0], [0], [1], [0, 0, 1, 1], [], []>} : vector<192x128xbf16>, vector<128x128xbf16>, vector<192x128xf32> -> vector<192x128xf32>
    %243 = arith.addf %238, %242 : vector<192x128xf32>
    %c32_250 = arith.constant 32 : index
    %c0_251 = arith.constant 0 : index
    %244 = vector.load %arg10[%c32_250, %c0_251] : memref<232x128xbf16, #tpu.memory_space<vmem>>, vector<192x128xbf16>
    %c2_252 = arith.constant 2 : index
    %c0_253 = arith.constant 0 : index
    %c0_254 = arith.constant 0 : index
    %c0_255 = arith.constant 0 : index
    %245 = vector.load %arg7[%c2_252, %c0_253, %c0_254, %c0_255] : memref<3x3x128x128xbf16, #tpu.memory_space<vmem>>, vector<1x1x128x128xbf16>
    %246 = vector.shape_cast %245 : vector<1x1x128x128xbf16> to vector<128x128xbf16>
    %cst_256 = arith.constant dense<0.000000e+00> : vector<192x128xf32>
    %247 = tpu.matmul %244, %246, %cst_256 {dimension_numbers = #tpu.dot_dimension_numbers<[1], [0], [0], [1], [0, 0, 1, 1], [], []>} : vector<192x128xbf16>, vector<128x128xbf16>, vector<192x128xf32> -> vector<192x128xf32>
    %248 = arith.addf %243, %247 : vector<192x128xf32>
    %c33_257 = arith.constant 33 : index
    %c0_258 = arith.constant 0 : index
    %249 = vector.load %arg10[%c33_257, %c0_258] : memref<232x128xbf16, #tpu.memory_space<vmem>>, vector<192x128xbf16>
    %c2_259 = arith.constant 2 : index
    %c1_260 = arith.constant 1 : index
    %c0_261 = arith.constant 0 : index
    %c0_262 = arith.constant 0 : index
    %250 = vector.load %arg7[%c2_259, %c1_260, %c0_261, %c0_262] : memref<3x3x128x128xbf16, #tpu.memory_space<vmem>>, vector<1x1x128x128xbf16>
    %251 = vector.shape_cast %250 : vector<1x1x128x128xbf16> to vector<128x128xbf16>
    %cst_263 = arith.constant dense<0.000000e+00> : vector<192x128xf32>
    %252 = tpu.matmul %249, %251, %cst_263 {dimension_numbers = #tpu.dot_dimension_numbers<[1], [0], [0], [1], [0, 0, 1, 1], [], []>} : vector<192x128xbf16>, vector<128x128xbf16>, vector<192x128xf32> -> vector<192x128xf32>
    %253 = arith.addf %248, %252 : vector<192x128xf32>
    %c34_264 = arith.constant 34 : index
    %c0_265 = arith.constant 0 : index
    %254 = vector.load %arg10[%c34_264, %c0_265] : memref<232x128xbf16, #tpu.memory_space<vmem>>, vector<192x128xbf16>
    %c2_266 = arith.constant 2 : index
    %c2_267 = arith.constant 2 : index
    %c0_268 = arith.constant 0 : index
    %c0_269 = arith.constant 0 : index
    %255 = vector.load %arg7[%c2_266, %c2_267, %c0_268, %c0_269] : memref<3x3x128x128xbf16, #tpu.memory_space<vmem>>, vector<1x1x128x128xbf16>
    %256 = vector.shape_cast %255 : vector<1x1x128x128xbf16> to vector<128x128xbf16>
    %cst_270 = arith.constant dense<0.000000e+00> : vector<192x128xf32>
    %257 = tpu.matmul %254, %256, %cst_270 {dimension_numbers = #tpu.dot_dimension_numbers<[1], [0], [0], [1], [0, 0, 1, 1], [], []>} : vector<192x128xbf16>, vector<128x128xbf16>, vector<192x128xf32> -> vector<192x128xf32>
    %258 = arith.addf %253, %257 : vector<192x128xf32>
    %cst_271 = arith.constant 0.000000e+00 : f32
    %259 = vector.broadcast %cst_271 : f32 to vector<192x128xf32>
    %260 = arith.maximumf %258, %259 : vector<192x128xf32>
    %261 = tpu.transpose %260, [1, 0] : vector<192x128xf32> -> vector<128x192xf32>
    %262 = vector.extract_strided_slice %261 {offsets = [0, 0], sizes = [4, 12], strides = [1, 1]} : vector<128x192xf32> to vector<4x12xf32>
    %c0_272 = arith.constant 0 : index
    %c0_273 = arith.constant 0 : index
    %c0_274 = arith.constant 0 : index
    %c0_275 = arith.constant 0 : index
    %263 = vector.load %arg8[%c0_272, %c0_273, %c0_274, %c0_275] : memref<1x4x12x12xf32, #tpu.memory_space<vmem>>, vector<1x4x1x12xf32>
    %264 = vector.shape_cast %263 : vector<1x4x1x12xf32> to vector<4x12xf32>
    %265 = vector.shape_cast %262 : vector<4x12xf32> to vector<1x4x1x12xf32>
    tpu.vector_store %arg8[%c0_272, %c0_273, %c0_274, %c0_275], %265 {strides = array<i32>} : memref<1x4x12x12xf32, #tpu.memory_space<vmem>>, vector<1x4x1x12xf32>,
    %266 = vector.extract_strided_slice %261 {offsets = [0, 16], sizes = [4, 12], strides = [1, 1]} : vector<128x192xf32> to vector<4x12xf32>
    %c0_276 = arith.constant 0 : index
    %c0_277 = arith.constant 0 : index
    %c1_278 = arith.constant 1 : index
    %c0_279 = arith.constant 0 : index
    %267 = vector.load %arg8[%c0_276, %c0_277, %c1_278, %c0_279] : memref<1x4x12x12xf32, #tpu.memory_space<vmem>>, vector<1x4x1x12xf32>
    %268 = vector.shape_cast %267 : vector<1x4x1x12xf32> to vector<4x12xf32>
    %269 = vector.shape_cast %266 : vector<4x12xf32> to vector<1x4x1x12xf32>
    tpu.vector_store %arg8[%c0_276, %c0_277, %c1_278, %c0_279], %269 {strides = array<i32>} : memref<1x4x12x12xf32, #tpu.memory_space<vmem>>, vector<1x4x1x12xf32>,
    %270 = vector.extract_strided_slice %261 {offsets = [0, 32], sizes = [4, 12], strides = [1, 1]} : vector<128x192xf32> to vector<4x12xf32>
    %c0_280 = arith.constant 0 : index
    %c0_281 = arith.constant 0 : index
    %c2_282 = arith.constant 2 : index
    %c0_283 = arith.constant 0 : index
    %271 = vector.load %arg8[%c0_280, %c0_281, %c2_282, %c0_283] : memref<1x4x12x12xf32, #tpu.memory_space<vmem>>, vector<1x4x1x12xf32>
    %272 = vector.shape_cast %271 : vector<1x4x1x12xf32> to vector<4x12xf32>
    %273 = vector.shape_cast %270 : vector<4x12xf32> to vector<1x4x1x12xf32>
    tpu.vector_store %arg8[%c0_280, %c0_281, %c2_282, %c0_283], %273 {strides = array<i32>} : memref<1x4x12x12xf32, #tpu.memory_space<vmem>>, vector<1x4x1x12xf32>,
    %274 = vector.extract_strided_slice %261 {offsets = [0, 48], sizes = [4, 12], strides = [1, 1]} : vector<128x192xf32> to vector<4x12xf32>
    %c0_284 = arith.constant 0 : index
    %c0_285 = arith.constant 0 : index
    %c3_286 = arith.constant 3 : index
    %c0_287 = arith.constant 0 : index
    %275 = vector.load %arg8[%c0_284, %c0_285, %c3_286, %c0_287] : memref<1x4x12x12xf32, #tpu.memory_space<vmem>>, vector<1x4x1x12xf32>
    %276 = vector.shape_cast %275 : vector<1x4x1x12xf32> to vector<4x12xf32>
    %277 = vector.shape_cast %274 : vector<4x12xf32> to vector<1x4x1x12xf32>
    tpu.vector_store %arg8[%c0_284, %c0_285, %c3_286, %c0_287], %277 {strides = array<i32>} : memref<1x4x12x12xf32, #tpu.memory_space<vmem>>, vector<1x4x1x12xf32>,
    %278 = vector.extract_strided_slice %261 {offsets = [0, 64], sizes = [4, 12], strides = [1, 1]} : vector<128x192xf32> to vector<4x12xf32>
    %c0_288 = arith.constant 0 : index
    %c0_289 = arith.constant 0 : index
    %c4_290 = arith.constant 4 : index
    %c0_291 = arith.constant 0 : index
    %279 = vector.load %arg8[%c0_288, %c0_289, %c4_290, %c0_291] : memref<1x4x12x12xf32, #tpu.memory_space<vmem>>, vector<1x4x1x12xf32>
    %280 = vector.shape_cast %279 : vector<1x4x1x12xf32> to vector<4x12xf32>
    %281 = vector.shape_cast %278 : vector<4x12xf32> to vector<1x4x1x12xf32>
    tpu.vector_store %arg8[%c0_288, %c0_289, %c4_290, %c0_291], %281 {strides = array<i32>} : memref<1x4x12x12xf32, #tpu.memory_space<vmem>>, vector<1x4x1x12xf32>,
    %282 = vector.extract_strided_slice %261 {offsets = [0, 80], sizes = [4, 12], strides = [1, 1]} : vector<128x192xf32> to vector<4x12xf32>
    %c0_292 = arith.constant 0 : index
    %c0_293 = arith.constant 0 : index
    %c5_294 = arith.constant 5 : index
    %c0_295 = arith.constant 0 : index
    %283 = vector.load %arg8[%c0_292, %c0_293, %c5_294, %c0_295] : memref<1x4x12x12xf32, #tpu.memory_space<vmem>>, vector<1x4x1x12xf32>
    %284 = vector.shape_cast %283 : vector<1x4x1x12xf32> to vector<4x12xf32>
    %285 = vector.shape_cast %282 : vector<4x12xf32> to vector<1x4x1x12xf32>
    tpu.vector_store %arg8[%c0_292, %c0_293, %c5_294, %c0_295], %285 {strides = array<i32>} : memref<1x4x12x12xf32, #tpu.memory_space<vmem>>, vector<1x4x1x12xf32>,
    %286 = vector.extract_strided_slice %261 {offsets = [0, 96], sizes = [4, 12], strides = [1, 1]} : vector<128x192xf32> to vector<4x12xf32>
    %c0_296 = arith.constant 0 : index
    %c0_297 = arith.constant 0 : index
    %c6_298 = arith.constant 6 : index
    %c0_299 = arith.constant 0 : index
    %287 = vector.load %arg8[%c0_296, %c0_297, %c6_298, %c0_299] : memref<1x4x12x12xf32, #tpu.memory_space<vmem>>, vector<1x4x1x12xf32>
    %288 = vector.shape_cast %287 : vector<1x4x1x12xf32> to vector<4x12xf32>
    %289 = vector.shape_cast %286 : vector<4x12xf32> to vector<1x4x1x12xf32>
    tpu.vector_store %arg8[%c0_296, %c0_297, %c6_298, %c0_299], %289 {strides = array<i32>} : memref<1x4x12x12xf32, #tpu.memory_space<vmem>>, vector<1x4x1x12xf32>,
    %290 = vector.extract_strided_slice %261 {offsets = [0, 112], sizes = [4, 12], strides = [1, 1]} : vector<128x192xf32> to vector<4x12xf32>
    %c0_300 = arith.constant 0 : index
    %c0_301 = arith.constant 0 : index
    %c7_302 = arith.constant 7 : index
    %c0_303 = arith.constant 0 : index
    %291 = vector.load %arg8[%c0_300, %c0_301, %c7_302, %c0_303] : memref<1x4x12x12xf32, #tpu.memory_space<vmem>>, vector<1x4x1x12xf32>
    %292 = vector.shape_cast %291 : vector<1x4x1x12xf32> to vector<4x12xf32>
    %293 = vector.shape_cast %290 : vector<4x12xf32> to vector<1x4x1x12xf32>
    tpu.vector_store %arg8[%c0_300, %c0_301, %c7_302, %c0_303], %293 {strides = array<i32>} : memref<1x4x12x12xf32, #tpu.memory_space<vmem>>, vector<1x4x1x12xf32>,
    %294 = vector.extract_strided_slice %261 {offsets = [0, 128], sizes = [4, 12], strides = [1, 1]} : vector<128x192xf32> to vector<4x12xf32>
    %c0_304 = arith.constant 0 : index
    %c0_305 = arith.constant 0 : index
    %c8_306 = arith.constant 8 : index
    %c0_307 = arith.constant 0 : index
    %295 = vector.load %arg8[%c0_304, %c0_305, %c8_306, %c0_307] : memref<1x4x12x12xf32, #tpu.memory_space<vmem>>, vector<1x4x1x12xf32>
    %296 = vector.shape_cast %295 : vector<1x4x1x12xf32> to vector<4x12xf32>
    %297 = vector.shape_cast %294 : vector<4x12xf32> to vector<1x4x1x12xf32>
    tpu.vector_store %arg8[%c0_304, %c0_305, %c8_306, %c0_307], %297 {strides = array<i32>} : memref<1x4x12x12xf32, #tpu.memory_space<vmem>>, vector<1x4x1x12xf32>,
    %298 = vector.extract_strided_slice %261 {offsets = [0, 144], sizes = [4, 12], strides = [1, 1]} : vector<128x192xf32> to vector<4x12xf32>
    %c0_308 = arith.constant 0 : index
    %c0_309 = arith.constant 0 : index
    %c9_310 = arith.constant 9 : index
    %c0_311 = arith.constant 0 : index
    %299 = vector.load %arg8[%c0_308, %c0_309, %c9_310, %c0_311] : memref<1x4x12x12xf32, #tpu.memory_space<vmem>>, vector<1x4x1x12xf32>
    %300 = vector.shape_cast %299 : vector<1x4x1x12xf32> to vector<4x12xf32>
    %301 = vector.shape_cast %298 : vector<4x12xf32> to vector<1x4x1x12xf32>
    tpu.vector_store %arg8[%c0_308, %c0_309, %c9_310, %c0_311], %301 {strides = array<i32>} : memref<1x4x12x12xf32, #tpu.memory_space<vmem>>, vector<1x4x1x12xf32>,
    %302 = vector.extract_strided_slice %261 {offsets = [0, 160], sizes = [4, 12], strides = [1, 1]} : vector<128x192xf32> to vector<4x12xf32>
    %c0_312 = arith.constant 0 : index
    %c0_313 = arith.constant 0 : index
    %c10_314 = arith.constant 10 : index
    %c0_315 = arith.constant 0 : index
    %303 = vector.load %arg8[%c0_312, %c0_313, %c10_314, %c0_315] : memref<1x4x12x12xf32, #tpu.memory_space<vmem>>, vector<1x4x1x12xf32>
    %304 = vector.shape_cast %303 : vector<1x4x1x12xf32> to vector<4x12xf32>
    %305 = vector.shape_cast %302 : vector<4x12xf32> to vector<1x4x1x12xf32>
    tpu.vector_store %arg8[%c0_312, %c0_313, %c10_314, %c0_315], %305 {strides = array<i32>} : memref<1x4x12x12xf32, #tpu.memory_space<vmem>>, vector<1x4x1x12xf32>,
    %306 = vector.extract_strided_slice %261 {offsets = [0, 176], sizes = [4, 12], strides = [1, 1]} : vector<128x192xf32> to vector<4x12xf32>
    %c0_316 = arith.constant 0 : index
    %c0_317 = arith.constant 0 : index
    %c11_318 = arith.constant 11 : index
    %c0_319 = arith.constant 0 : index
    %307 = vector.load %arg8[%c0_316, %c0_317, %c11_318, %c0_319] : memref<1x4x12x12xf32, #tpu.memory_space<vmem>>, vector<1x4x1x12xf32>
    %308 = vector.shape_cast %307 : vector<1x4x1x12xf32> to vector<4x12xf32>
    %309 = vector.shape_cast %306 : vector<4x12xf32> to vector<1x4x1x12xf32>
    tpu.vector_store %arg8[%c0_316, %c0_317, %c11_318, %c0_319], %309 {strides = array<i32>} : memref<1x4x12x12xf32, #tpu.memory_space<vmem>>, vector<1x4x1x12xf32>,
    return
  }
  func.func @transform_0(%arg0: i32) -> (i32, i32, i32) {
    %c0_i32 = arith.constant 0 : i32
    %c0_i32_0 = arith.constant 0 : i32
    %c0_i32_1 = arith.constant 0 : i32
    return %arg0, %c0_i32, %c0_i32_0 : i32, i32, i32
  }
  func.func @transform_1(%arg0: i32) -> (i32, i32, i32, i32) {
    %c0_i32 = arith.constant 0 : i32
    %c0_i32_0 = arith.constant 0 : i32
    %c0_i32_1 = arith.constant 0 : i32
    %c0_i32_2 = arith.constant 0 : i32
    return %arg0, %c0_i32, %c0_i32_0, %c0_i32_1 : i32, i32, i32, i32
  }
  func.func @transform_2(%arg0: i32) -> (i32, i32, i32, i32) {
    %c0_i32 = arith.constant 0 : i32
    %c0_i32_0 = arith.constant 0 : i32
    %c0_i32_1 = arith.constant 0 : i32
    %c0_i32_2 = arith.constant 0 : i32
    %c0_i32_3 = arith.constant 0 : i32
    return %c0_i32, %c0_i32_0, %c0_i32_1, %c0_i32_2 : i32, i32, i32, i32
  }
  func.func @transform_3(%arg0: i32) -> (i32, i32) {
    %c0_i32 = arith.constant 0 : i32
    %c0_i32_0 = arith.constant 0 : i32
    %c0_i32_1 = arith.constant 0 : i32
    return %c0_i32, %c0_i32_0 : i32, i32
  }
  func.func @transform_4(%arg0: i32) -> (i32, i32) {
    %c0_i32 = arith.constant 0 : i32
    %c0_i32_0 = arith.constant 0 : i32
    %c0_i32_1 = arith.constant 0 : i32
    return %c0_i32, %c0_i32_0 : i32, i32
  }
  func.func @transform_5(%arg0: i32) -> (i32, i32, i32, i32) {
    %c0_i32 = arith.constant 0 : i32
    %c0_i32_0 = arith.constant 0 : i32
    %c0_i32_1 = arith.constant 0 : i32
    %c0_i32_2 = arith.constant 0 : i32
    %c0_i32_3 = arith.constant 0 : i32
    return %c0_i32, %c0_i32_0, %c0_i32_1, %c0_i32_2 : i32, i32, i32, i32
  }
  func.func @transform_6(%arg0: i32) -> (i32, i32, i32, i32) {
    %c0_i32 = arith.constant 0 : i32
    %c0_i32_0 = arith.constant 0 : i32
    %c0_i32_1 = arith.constant 0 : i32
    %c0_i32_2 = arith.constant 0 : i32
    %c0_i32_3 = arith.constant 0 : i32
    return %c0_i32, %c0_i32_0, %c0_i32_1, %c0_i32_2 : i32, i32, i32, i32
  }
  func.func @transform_7(%arg0: i32) -> (i32, i32, i32, i32) {
    %c0_i32 = arith.constant 0 : i32
    %c0_i32_0 = arith.constant 0 : i32
    %c0_i32_1 = arith.constant 0 : i32
    %c0_i32_2 = arith.constant 0 : i32
    return %arg0, %c0_i32, %c0_i32_0, %c0_i32_1 : i32, i32, i32, i32
  }
}

</mosaic_0001>

<bundles_post_ra>
// kernel: up_forward.1
= control target key start
LH: loop header
LB: loop body
LE: loop exit
PB: predicated region body
PF: predicated region fallthrough
CT: control target
= control target key end

     0   :  { %s16917_s24 = smov 0   ;;  %s21557_s0 = inlined_call_operand.vmem [shape: f32[2,8,64], index: 0, kind: input, shape index: {}]   ;;  %s21558_s1 = inlined_call_operand.vmem [shape: f32[2,4,20,20], index: 1, kind: input, shape index: {}]   ;;  %s21559_s2 = inlined_call_operand.vmem [shape: bf16[2,2,8,128], index: 2, kind: input, shape index: {}]   ;;  %s21560_s3 = inlined_call_operand.vmem [shape: f32[1,128], index: 3, kind: input, shape index: {}]   ;;  %s21561_s4 = inlined_call_operand.vmem [shape: bf16[4,128], index: 4, kind: input, shape index: {}]   ;;  %s21562_s5 = inlined_call_operand.vmem [shape: bf16[3,3,256,128], index: 5, kind: input, shape index: {}]   ;;  %s21563_s6 = inlined_call_operand.vmem [shape: bf16[3,3,128,128], index: 6, kind: input, shape index: {}]   ;;  %s21564_s7 = inlined_call_operand.vmem [shape: f32[2,4,12,12], index: 7, kind: output, shape index: {}]  }
   0x1 LB: > { %s13614_s25 = sadd.s32 4294967295, %s16862_s24   ;;  %p13618_p0 = scmp.ge.s32.totalorder %s16862_s24, 1  ;;  %s16862_s24 = sphi %s16917_s24, %s17_s24  }
   0x2   : > { %p246_p1 = scmp.lt.s32.totalorder %s16862_s24, 3 }
   0x4   : > { %p247_p2 = pnand %p13618_p0, %p246_p1 }
   0x6   : > { %250 = sbr.rel (%p247_p2) target bundleno = 2278 (0x8e6), region = 48 }
   0xb   : > { %p282_p3 = scmp.lt.s32.totalorder %s13614_s25, 1  ;;  %vm317_vm0 = vcmask 1041409   ;;  %vm320_vm1 = vcmask 1042434   ;;  %vm323_vm2 = vcmask 1043459   ;;  %s16864_s30 = smov 126   ;;  %vm349_vm3 = vcmask 1041408  }
   0xc   : > { %vm16866_vm4 = vmmov 0   ;;  %vm345_vm5 = vcmask 31744   ;;  %vm1877_vm6 = vcmask 1043456   ;;  %vm1864_vm7 = vcmask 64512   ;;  %s16871_s19 = smov 112   ;;  %s16872_s20 = smov 64  }
   0xd   : > { %s21821_s25 = smov (!%p282_p3, %s13614_s25), 1  ;;  %vm3200_vm8 = vcmask 1040384   ;;  %vm5882_vm9 = vsmask.f32 7424  ;;  %vm6692_vm10 = vcmask 1046528   ;;  %vm13317_vm11 = vcmask 90112  }
   0xe   : > { %s16379_s26 = smul.u32 96, %s21821_s25  ;;  %s13619_s10 = sshll.u32 %s21821_s25, 3 }
   0xf   : > { %s285_s13 = scalar_lea.vmem %s21557_s0, %s13619_s10  ;;  %s14571_s15 = sshll.u32 %s21821_s25, 6 }
  0x10   : > { %s16931_s29 = scalar_lea.vmem %s21558_s1, %s16379_s26  ;;  %s21403_s18 = scalar_lea.vmem %s21564_s7, %s14571_s15 }
  0x11   : > { %v300_v0 = vld [vmem:[%s16931_s29 + $0x2] sm:$0x1]  ;;  %v301_v1 = vld [vmem:[%s16931_s29 + $0x1a] sm:$0x1]  ;;  %v302_v2 = vld [vmem:[%s16931_s29 + $0x32] sm:$0x1] }
  0x12   : > { %v303_v3 = vld [vmem:[%s16931_s29 + $0x4a] sm:$0x1]  ;;  %v304_v4 = vpack.c.bf16 %v300_v0, %v300_v0  ;;  %v305_v5 = vpack.c.bf16 %v301_v1, %v301_v1  ;;  %v306_v6 = vpack.c.bf16 %v302_v2, %v302_v2  ;;  %v500_v7 = vld [vmem:[%s16931_s29 + $0x4] sm:$0x1]  ;;  %v501_v8 = vld [vmem:[%s16931_s29 + $0x1c] sm:$0x1] }
  0x13   : > { %v307_v9 = vpack.c.bf16 %v303_v3, %v303_v3  ;;  %v502_v10 = vld [vmem:[%s16931_s29 + $0x34] sm:$0x1]  ;;  %v503_v11 = vld [vmem:[%s16931_s29 + $0x4c] sm:$0x1]  ;;  %v504_v12 = vpack.c.bf16 %v500_v7, %v500_v7  ;;  %v505_v13 = vpack.c.bf16 %v501_v8, %v501_v8  ;;  %v692_v14 = vld [vmem:[%s16931_s29 + $0x6] sm:$0x1] }
  0x14   : > { %v312_v15 = vunpack.c.l.b16 %v304_v4  ;;  %v313_v16 = vunpack.c.l.b16 %v305_v5  ;;  %v314_v17 = vunpack.c.l.b16 %v306_v6  ;;  %v506_v18 = vpack.c.bf16 %v502_v10, %v502_v10  ;;  %v693_v19 = vld [vmem:[%s16931_s29 + $0x1e] sm:$0x1]  ;;  %v694_v24 = vld [vmem:[%s16931_s29 + $0x36] sm:$0x1]  ;;  %v695_v25 = vld [vmem:[%s16931_s29 + $0x4e] sm:$0x1] }
  0x15   : > { %v315_v20 = vunpack.c.l.b16 %v307_v9  ;;  %v507_v21 = vpack.c.bf16 %v503_v11, %v503_v11  ;;  %v512_v22 = vunpack.c.l.b16 %v504_v12  ;;  %v513_v23 = vunpack.c.l.b16 %v505_v13  ;;  %v884_v38 = vld [vmem:[%s16931_s29 + $0x8] sm:$0x1]  ;;  %v885_v43 = vld [vmem:[%s16931_s29 + $0x20] sm:$0x1]  ;;  %v886_v48 = vld [vmem:[%s16931_s29 + $0x38] sm:$0x1] }
  0x16   : > { %v316_v26 = vrot.slane %v313_v16, 7  ;;  %v319_v27 = vrot.slane %v314_v17, 6  ;;  %v514_v28 = vunpack.c.l.b16 %v506_v18  ;;  %v696_v29 = vpack.c.bf16 %v692_v14, %v692_v14  ;;  %v887_v49 = vld [vmem:[%s16931_s29 + $0x50] sm:$0x1]  ;;  %v1076_v54 = vld [vmem:[%s16931_s29 + $0xa] sm:$0x1] }
  0x17   : > { %v322_v30 = vrot.slane %v315_v20, 5  ;;  %v515_v31 = vunpack.c.l.b16 %v507_v21  ;;  %v516_v32 = vrot.slane %v513_v23, 7  ;;  %v697_v33 = vpack.c.bf16 %v693_v19, %v693_v19  ;;  %v1077_v55 = vld [vmem:[%s16931_s29 + $0x22] sm:$0x1]  ;;  %v1078_v60 = vld [vmem:[%s16931_s29 + $0x3a] sm:$0x1] }
  0x18   : > { %v318_v34 = vsel %vm317_vm0, %v316_v26, %v312_v15  ;;  %v518_v35 = vrot.slane %v514_v28, 6  ;;  %v698_v36 = vpack.c.bf16 %v694_v24, %v694_v24  ;;  %v699_v37 = vpack.c.bf16 %v695_v25, %v695_v25  ;;  %v1079_v1 = vld [vmem:[%s16931_s29 + $0x52] sm:$0x1]  ;;  %v404_v10 = vld [vmem:[%s16931_s29 + $0x3] sm:$0x1]  ;;  %s16870_s25 = smov 80  }
  0x19   : > { %v321_v39 = vsel %vm320_vm1, %v319_v27, %v318_v34  ;;  %v517_v40 = vsel %vm317_vm0, %v516_v32, %v512_v22  ;;  %v520_v41 = vrot.slane %v515_v31, 5  ;;  %v704_v42 = vunpack.c.l.b16 %v696_v29  ;;  %v405_v15 = vld [vmem:[%s16931_s29 + $0x1b] sm:$0x1]  ;;  %v406_v16 = vld [vmem:[%s16931_s29 + $0x33] sm:$0x1]  ;;  %s16873_s21 = smov 96  }
  0x1a   : > { %v324_v44 = vsel %vm323_vm2, %v322_v30, %v321_v39  ;;  %v519_v45 = vsel %vm320_vm1, %v518_v35, %v517_v40  ;;  %v705_v46 = vunpack.c.l.b16 %v697_v33  ;;  %v706_v47 = vunpack.c.l.b16 %v698_v36  ;;  %v407_v21 = vld [vmem:[%s16931_s29 + $0x4b] sm:$0x1]  ;;  %v596_v30 = vld [vmem:[%s16931_s29 + $0x5] sm:$0x1]  ;;  %v597_v35 = vld [vmem:[%s16931_s29 + $0x1d] sm:$0x1] }
  0x1b   : > { %v325_v50 = vpack.c.b16 %v324_v44, %v324_v44  ;;  %v521_v51 = vsel %vm323_vm2, %v520_v41, %v519_v45  ;;  %v707_v52 = vunpack.c.l.b16 %v699_v37  ;;  %v888_v53 = vpack.c.bf16 %v884_v38, %v884_v38  ;;  %v598_v36 = vld [vmem:[%s16931_s29 + $0x35] sm:$0x1]  ;;  %v599_v41 = vld [vmem:[%s16931_s29 + $0x4d] sm:$0x1]  ;;  %s16874_s22 = smov 48   ;;  %s16875_s23 = smov 32  }
  0x1c   : > { %v522_v56 = vpack.c.b16 %v521_v51, %v521_v51  ;;  %v708_v57 = vrot.slane %v705_v46, 7  ;;  %v710_v58 = vrot.slane %v706_v47, 6  ;;  %v889_v59 = vpack.c.bf16 %v885_v43, %v885_v43  ;;  %v1269_v51 = vld [vmem:[%s16931_s29 + $0x24] sm:$0x1]  ;;  %s16876_s26 = smov 16  }
  0x1d   : > { %326 = vrot.lane.b32.xlu0 %v325_v50, %s16864_s30  ;;  %v712_v61 = vrot.slane %v707_v52, 5  ;;  %v890_v62 = vpack.c.bf16 %v886_v48, %v886_v48  ;;  %v891_v63 = vpack.c.bf16 %v887_v49, %v887_v49  ;;  %v896_v0 = vunpack.c.l.b16 %v888_v53  ;;  %v1268_v50 = vld [vmem:[%s16931_s29 + $0xc] sm:$0x1] }
  0x1e   : > { %v709_v2 = vsel %vm317_vm0, %v708_v57, %v704_v42  ;;  %v897_v3 = vunpack.c.l.b16 %v889_v59  ;;  %v1080_v4 = vpack.c.bf16 %v1076_v54, %v1076_v54  ;;  %v1081_v5 = vpack.c.bf16 %v1077_v55, %v1077_v55  ;;  %v1271_v57 = vld [vmem:[%s16931_s29 + $0x54] sm:$0x1] }
  0x1f   : > { %v711_v6 = vsel %vm320_vm1, %v710_v58, %v709_v2  ;;  %v898_v7 = vunpack.c.l.b16 %v890_v62  ;;  %v899_v8 = vunpack.c.l.b16 %v891_v63  ;;  %v1082_v9 = vpack.c.bf16 %v1078_v60, %v1078_v60  ;;  %v788_v62 = vld [vmem:[%s16931_s29 + $0x7] sm:$0x1]  ;;  %v789_v63 = vld [vmem:[%s16931_s29 + $0x1f] sm:$0x1] }
  0x20   : > { %v713_v11 = vsel %vm323_vm2, %v712_v61, %v711_v6  ;;  %v900_v12 = vrot.slane %v897_v3, 7  ;;  %v1083_v13 = vpack.c.bf16 %v1079_v1, %v1079_v1  ;;  %v1088_v14 = vunpack.c.l.b16 %v1080_v4 }
  0x21   : > { %523 = vrot.lane.b32.xlu0 %v522_v56, %s16864_s30  ;;  %v714_v17 = vpack.c.b16 %v713_v11, %v713_v11  ;;  %v902_v18 = vrot.slane %v898_v7, 6  ;;  %v904_v19 = vrot.slane %v899_v8, 5  ;;  %v1089_v20 = vunpack.c.l.b16 %v1081_v5  ;;  %v1270_v56 = vld [vmem:[%s16931_s29 + $0x3c] sm:$0x1]  ;;  %v791_v5 = vld [vmem:[%s16931_s29 + $0x4f] sm:$0x1] }
  0x22   : > { %v901_v22 = vsel %vm317_vm0, %v900_v12, %v896_v0  ;;  %v1090_v23 = vunpack.c.l.b16 %v1082_v9  ;;  %v1091_v24 = vunpack.c.l.b16 %v1083_v13  ;;  %v408_v25 = vpack.c.bf16 %v404_v10, %v404_v10  ;;  %v790_v0 = vld [vmem:[%s16931_s29 + $0x37] sm:$0x1] }
  0x23   : > { %715 = vrot.lane.b32.xlu1 %v714_v17, %s16864_s30  ;;  %v903_v26 = vsel %vm320_vm1, %v902_v18, %v901_v22  ;;  %v1092_v27 = vrot.slane %v1089_v20, 7  ;;  %v409_v28 = vpack.c.bf16 %v405_v15, %v405_v15  ;;  %v410_v29 = vpack.c.bf16 %v406_v16, %v406_v16  ;;  %v1462_v20 = vld [vmem:[%s16931_s29 + $0x3e] sm:$0x1] }
  0x24   : > { %v905_v31 = vsel %vm323_vm2, %v904_v19, %v903_v26  ;;  %v1094_v32 = vrot.slane %v1090_v23, 6  ;;  %v1096_v33 = vrot.slane %v1091_v24, 5  ;;  %v411_v34 = vpack.c.bf16 %v407_v21, %v407_v21  ;;  %v1461_v19 = vld [vmem:[%s16931_s29 + $0x26] sm:$0x1] }
  0x25   : > { %v906_v37 = vpack.c.b16 %v905_v31, %v905_v31  ;;  %v1093_v38 = vsel %vm317_vm0, %v1092_v27, %v1088_v14  ;;  %v416_v39 = vunpack.c.l.b16 %v408_v25  ;;  %v417_v40 = vunpack.c.l.b16 %v409_v28  ;;  %v1460_v14 = vld [vmem:[%s16931_s29 + $0xe] sm:$0x1]  ;;  %v1463_v25 = vld [vmem:[%s16931_s29 + $0x56] sm:$0x1] }
  0x26   : > { %v1095_v42 = vsel %vm320_vm1, %v1094_v32, %v1093_v38  ;;  %v418_v43 = vunpack.c.l.b16 %v410_v29  ;;  %v419_v44 = vunpack.c.l.b16 %v411_v34  ;;  %v600_v45 = vpack.c.bf16 %v596_v30, %v596_v30  ;;  %v980_v34 = vld [vmem:[%s16931_s29 + $0x9] sm:$0x1] }
  0x27   : > { %907 = vrot.lane.b32.xlu1 %v906_v37, %s16864_s30  ;;  %v1097_v46 = vsel %vm323_vm2, %v1096_v33, %v1095_v42  ;;  %v420_v47 = vrot.slane %v417_v40, 7  ;;  %v601_v48 = vpack.c.bf16 %v597_v35, %v597_v35  ;;  %v602_v49 = vpack.c.bf16 %v598_v36, %v598_v36  ;;  %v982_v40 = vld [vmem:[%s16931_s29 + $0x39] sm:$0x1] }
  0x28   : > { %v1098_v52 = vpack.c.b16 %v1097_v46, %v1097_v46  ;;  %v422_v53 = vrot.slane %v418_v43, 6  ;;  %v424_v54 = vrot.slane %v419_v44, 5  ;;  %v603_v55 = vpack.c.bf16 %v599_v41, %v599_v41 }
  0x29   : > { %v421_v58 = vsel %vm317_vm0, %v420_v47, %v416_v39  ;;  %v608_v59 = vunpack.c.l.b16 %v600_v45  ;;  %v609_v60 = vunpack.c.l.b16 %v601_v48  ;;  %v610_v61 = vunpack.c.l.b16 %v602_v49  ;;  %v981_v39 = vld [vmem:[%s16931_s29 + $0x21] sm:$0x1]  ;;  %v983_v45 = vld [vmem:[%s16931_s29 + $0x51] sm:$0x1] }
  0x2a   : > { %v423_v1 = vsel %vm320_vm1, %v422_v53, %v421_v58  ;;  %v611_v2 = vunpack.c.l.b16 %v603_v55  ;;  %v1272_v3 = vpack.c.bf16 %v1268_v50, %v1268_v50  ;;  %v1273_v4 = vpack.c.bf16 %v1269_v51, %v1269_v51  ;;  %v1653_v55 = vld [vmem:[%s16931_s29 + $0x28] sm:$0x1] }
  0x2b   : > { %1099 = vrot.lane.b32.xlu1 %v1098_v52, %s16864_s30  ;;  %v425_v6 = vsel %vm323_vm2, %v424_v54, %v423_v1  ;;  %v612_v7 = vrot.slane %v609_v60, 7  ;;  %v614_v8 = vrot.slane %v610_v61, 6  ;;  %v1274_v9 = vpack.c.bf16 %v1270_v56, %v1270_v56  ;;  %v1652_v54 = vld [vmem:[%s16931_s29 + $0x10] sm:$0x1]  ;;  %v1654_v60 = vld [vmem:[%s16931_s29 + $0x40] sm:$0x1] }
  0x2c   : > { %v426_v10 = vpack.c.b16 %v425_v6, %v425_v6  ;;  %v616_v11 = vrot.slane %v611_v2, 5  ;;  %v1275_v12 = vpack.c.bf16 %v1271_v57, %v1271_v57  ;;  %v1280_v13 = vunpack.c.l.b16 %v1272_v3  ;;  %v1655_v1 = vld [vmem:[%s16931_s29 + $0x58] sm:$0x1]  ;;  %v1172_v6 = vld [vmem:[%s16931_s29 + $0xb] sm:$0x1] }
  0x2d   : > { %v613_v15 = vsel %vm317_vm0, %v612_v7, %v608_v59  ;;  %v1281_v16 = vunpack.c.l.b16 %v1273_v4  ;;  %v1282_v17 = vunpack.c.l.b16 %v1274_v9  ;;  %v792_v18 = vpack.c.bf16 %v788_v62, %v788_v62 }
  0x2e   : > { %427 = vrot.lane.b32.xlu0 %v426_v10, %s16864_s30  ;;  %v615_v21 = vsel %vm320_vm1, %v614_v8, %v613_v15  ;;  %v1283_v22 = vunpack.c.l.b16 %v1275_v12  ;;  %v793_v23 = vpack.c.bf16 %v789_v63, %v789_v63  ;;  %v794_v24 = vpack.c.bf16 %v790_v0, %v790_v0  ;;  %v1174_v12 = vld [vmem:[%s16931_s29 + $0x3b] sm:$0x1] }
  0x2f   : > { %v617_v26 = vsel %vm323_vm2, %v616_v11, %v615_v21  ;;  %v1284_v27 = vrot.slane %v1281_v16, 7  ;;  %v1286_v28 = vrot.slane %v1282_v17, 6  ;;  %v795_v29 = vpack.c.bf16 %v791_v5, %v791_v5  ;;  %v1173_v11 = vld [vmem:[%s16931_s29 + $0x23] sm:$0x1]  ;;  %v1175_v17 = vld [vmem:[%s16931_s29 + $0x53] sm:$0x1] }
  0x30   : > { %v618_v30 = vpack.c.b16 %v617_v26, %v617_v26  ;;  %v1288_v31 = vrot.slane %v1283_v22, 5  ;;  %v800_v32 = vunpack.c.l.b16 %v792_v18  ;;  %v801_v33 = vunpack.c.l.b16 %v793_v23  ;;  %v1364_v26 = vld [vmem:[%s16931_s29 + $0xd] sm:$0x1] }
  0x31   : > { %v1285_v35 = vsel %vm317_vm0, %v1284_v27, %v1280_v13  ;;  %v802_v36 = vunpack.c.l.b16 %v794_v24  ;;  %v803_v37 = vunpack.c.l.b16 %v795_v29  ;;  %v1464_v38 = vpack.c.bf16 %v1460_v14, %v1460_v14 }
  0x32   : > { %619 = vrot.lane.b32.xlu0 %v618_v30, %s16864_s30  ;;  %v1287_v41 = vsel %vm320_vm1, %v1286_v28, %v1285_v35  ;;  %v804_v42 = vrot.slane %v801_v33, 7  ;;  %v1465_v43 = vpack.c.bf16 %v1461_v19, %v1461_v19  ;;  %v1466_v44 = vpack.c.bf16 %v1462_v20, %v1462_v20 }
  0x33   : > { %v1289_v46 = vsel %vm323_vm2, %v1288_v31, %v1287_v41  ;;  %v806_v47 = vrot.slane %v802_v36, 6  ;;  %v808_v48 = vrot.slane %v803_v37, 5  ;;  %v1467_v49 = vpack.c.bf16 %v1463_v25, %v1463_v25  ;;  %v1365_v31 = vld [vmem:[%s16931_s29 + $0x25] sm:$0x1]  ;;  %v1367_v37 = vld [vmem:[%s16931_s29 + $0x55] sm:$0x1] }
  0x34   : > { %v1290_v50 = vpack.c.b16 %v1289_v46, %v1289_v46  ;;  %v805_v51 = vsel %vm317_vm0, %v804_v42, %v800_v32  ;;  %v1472_v52 = vunpack.c.l.b16 %v1464_v38  ;;  %v1473_v53 = vunpack.c.l.b16 %v1465_v43  ;;  %v1366_v32 = vld [vmem:[%s16931_s29 + $0x3d] sm:$0x1]  ;;  %v1556_v46 = vld [vmem:[%s16931_s29 + $0xf] sm:$0x1] }
  0x35   : > { %v807_v56 = vsel %vm320_vm1, %v806_v47, %v805_v51  ;;  %v1474_v57 = vunpack.c.l.b16 %v1466_v44  ;;  %v1475_v58 = vunpack.c.l.b16 %v1467_v49  ;;  %v984_v59 = vpack.c.bf16 %v980_v34, %v980_v34  ;;  %v1557_v51 = vld [vmem:[%s16931_s29 + $0x27] sm:$0x1] }
  0x36   : > { %1291 = vrot.lane.b32.xlu1 %v1290_v50, %s16864_s30  ;;  %v809_v61 = vsel %vm323_vm2, %v808_v48, %v807_v56  ;;  %v1476_v62 = vrot.slane %v1473_v53, 7  ;;  %v985_v63 = vpack.c.bf16 %v981_v39, %v981_v39  ;;  %v986_v0 = vpack.c.bf16 %v982_v40, %v982_v40 }
  0x37   : > { %v810_v2 = vpack.c.b16 %v809_v61, %v809_v61  ;;  %v1478_v3 = vrot.slane %v1474_v57, 6  ;;  %v1480_v4 = vrot.slane %v1475_v58, 5  ;;  %v987_v5 = vpack.c.bf16 %v983_v45, %v983_v45  ;;  %v1559_v57 = vld [vmem:[%s16931_s29 + $0x57] sm:$0x1] }
  0x38   : > { %v1477_v7 = vsel %vm317_vm0, %v1476_v62, %v1472_v52  ;;  %v992_v8 = vunpack.c.l.b16 %v984_v59  ;;  %v993_v9 = vunpack.c.l.b16 %v985_v63  ;;  %v994_v10 = vunpack.c.l.b16 %v986_v0  ;;  %v1558_v52 = vld [vmem:[%s16931_s29 + $0x3f] sm:$0x1] }
  0x39   : > { %811 = vrot.lane.b32.xlu0 %v810_v2, %s16864_s30  ;;  %v1479_v13 = vsel %vm320_vm1, %v1478_v3, %v1477_v7  ;;  %v995_v14 = vunpack.c.l.b16 %v987_v5  ;;  %v1656_v15 = vpack.c.bf16 %v1652_v54, %v1652_v54  ;;  %v1657_v16 = vpack.c.bf16 %v1653_v55, %v1653_v55  ;;  %v1748_v2 = vld [vmem:[%s16931_s29 + $0x11] sm:$0x1]  ;;  %v1749_v3 = vld [vmem:[%s16931_s29 + $0x29] sm:$0x1] }
  0x3a   : > { %v1481_v18 = vsel %vm323_vm2, %v1480_v4, %v1479_v13  ;;  %v996_v19 = vrot.slane %v993_v9, 7  ;;  %v998_v20 = vrot.slane %v994_v10, 6  ;;  %v1658_v21 = vpack.c.bf16 %v1654_v60, %v1654_v60  ;;  %v1751_v13 = vld [vmem:[%s16931_s29 + $0x59] sm:$0x1] }
  0x3b   : > { %v1482_v22 = vpack.c.b16 %v1481_v18, %v1481_v18  ;;  %v1000_v23 = vrot.slane %v995_v14, 5  ;;  %v1659_v24 = vpack.c.bf16 %v1655_v1, %v1655_v1  ;;  %v1664_v25 = vunpack.c.l.b16 %v1656_v15 }
  0x3c   : > { %v997_v27 = vsel %vm317_vm0, %v996_v19, %v992_v8  ;;  %v1665_v28 = vunpack.c.l.b16 %v1657_v16  ;;  %v1666_v29 = vunpack.c.l.b16 %v1658_v21  ;;  %v1176_v30 = vpack.c.bf16 %v1172_v6, %v1172_v6  ;;  %v1750_v8 = vld [vmem:[%s16931_s29 + $0x41] sm:$0x1] }
  0x3d   : > { %1483 = vrot.lane.b32.xlu1 %v1482_v22, %s16864_s30  ;;  %v999_v33 = vsel %vm320_vm1, %v998_v20, %v997_v27  ;;  %v1667_v34 = vunpack.c.l.b16 %v1659_v24  ;;  %v1177_v35 = vpack.c.bf16 %v1173_v11, %v1173_v11  ;;  %v1178_v36 = vpack.c.bf16 %v1174_v12, %v1174_v12 }
  0x3e   : > { %v1001_v38 = vsel %vm323_vm2, %v1000_v23, %v999_v33  ;;  %v1668_v39 = vrot.slane %v1665_v28, 7  ;;  %v1670_v40 = vrot.slane %v1666_v29, 6  ;;  %v1179_v41 = vpack.c.bf16 %v1175_v17, %v1175_v17 }
  0x3f   : > { %v1002_v42 = vpack.c.b16 %v1001_v38, %v1001_v38  ;;  %v1672_v43 = vrot.slane %v1667_v34, 5  ;;  %v1184_v44 = vunpack.c.l.b16 %v1176_v30  ;;  %v1185_v45 = vunpack.c.l.b16 %v1177_v35 }
  0x40   : > { %v1669_v47 = vsel %vm317_vm0, %v1668_v39, %v1664_v25  ;;  %v1186_v48 = vunpack.c.l.b16 %v1178_v36  ;;  %v1187_v49 = vunpack.c.l.b16 %v1179_v41  ;;  %v1368_v50 = vpack.c.bf16 %v1364_v26, %v1364_v26 }
  0x41   : > { %1003 = vrot.lane.b32.xlu0 %v1002_v42, %s16864_s30  ;;  %v1671_v53 = vsel %vm320_vm1, %v1670_v40, %v1669_v47  ;;  %v1188_v54 = vrot.slane %v1185_v45, 7  ;;  %v1369_v55 = vpack.c.bf16 %v1365_v31, %v1365_v31  ;;  %v1370_v56 = vpack.c.bf16 %v1366_v32, %v1366_v32 }
  0x42   : > { %v1673_v58 = vsel %vm323_vm2, %v1672_v43, %v1671_v53  ;;  %v1190_v59 = vrot.slane %v1186_v48, 6  ;;  %v1192_v60 = vrot.slane %v1187_v49, 5  ;;  %v1371_v61 = vpack.c.bf16 %v1367_v37, %v1367_v37 }
  0x43   : > { %v1674_v62 = vpack.c.b16 %v1673_v58, %v1673_v58  ;;  %v1189_v63 = vsel %vm317_vm0, %v1188_v54, %v1184_v44  ;;  %v1376_v0 = vunpack.c.l.b16 %v1368_v50  ;;  %v1377_v1 = vunpack.c.l.b16 %v1369_v55  ;;  %v1845_v55 = vld [vmem:[%s285_s13] sm:$0xff] }
  0x44   : > { %v1191_v4 = vsel %vm320_vm1, %v1190_v59, %v1189_v63  ;;  %v1378_v5 = vunpack.c.l.b16 %v1370_v56  ;;  %v1379_v6 = vunpack.c.l.b16 %v1371_v61  ;;  %v1560_v7 = vpack.c.bf16 %v1556_v46, %v1556_v46  ;;  %v299_v46 = vld [vmem:[%s21561_s4] sm:$0x3] }
  0x45   : > { %1675 = vrot.lane.b32.xlu1 %v1674_v62, %s16864_s30  ;;  %v1193_v9 = vsel %vm323_vm2, %v1192_v60, %v1191_v4  ;;  %v1380_v10 = vrot.slane %v1377_v1, 7  ;;  %v1561_v11 = vpack.c.bf16 %v1557_v51, %v1557_v51  ;;  %v1562_v12 = vpack.c.bf16 %v1558_v52, %v1558_v52 }
  0x46   : > { %v1194_v14 = vpack.c.b16 %v1193_v9, %v1193_v9  ;;  %v1382_v15 = vrot.slane %v1378_v5, 6  ;;  %v1384_v16 = vrot.slane %v1379_v6, 5  ;;  %v1563_v17 = vpack.c.bf16 %v1559_v57, %v1559_v57 }
  0x47   : > { %v1381_v18 = vsel %vm317_vm0, %v1380_v10, %v1376_v0  ;;  %v1568_v19 = vunpack.c.l.b16 %v1560_v7  ;;  %v1569_v20 = vunpack.c.l.b16 %v1561_v11  ;;  %v1570_v21 = vunpack.c.l.b16 %v1562_v12 }
  0x48   : > { %v1383_v22 = vsel %vm320_vm1, %v1382_v15, %v1381_v18  ;;  %v1571_v23 = vunpack.c.l.b16 %v1563_v17  ;;  %v1752_v24 = vpack.c.bf16 %v1748_v2, %v1748_v2  ;;  %v1753_v25 = vpack.c.bf16 %v1749_v3, %v1749_v3 }
  0x49   : > { %1195 = vrot.lane.b32.xlu1 %v1194_v14, %s16864_s30  ;;  %v1385_v26 = vsel %vm323_vm2, %v1384_v16, %v1383_v22  ;;  %v1572_v27 = vrot.slane %v1569_v20, 7  ;;  %v1574_v28 = vrot.slane %v1570_v21, 6  ;;  %v1754_v29 = vpack.c.bf16 %v1750_v8, %v1750_v8  ;;  %v1847_v16 = vld [vmem:[%s21559_s2] sm:$0xf]  ;;  %v13675_v20 = vld [vmem:[%s21559_s2 + $0x4] sm:$0xf] }
  0x4a   : > { %v1386_v30 = vpack.c.b16 %v1385_v26, %v1385_v26  ;;  %v1576_v31 = vrot.slane %v1571_v23, 5  ;;  %v1755_v32 = vpack.c.bf16 %v1751_v13, %v1751_v13  ;;  %v1760_v34 = vunpack.c.l.b16 %v1752_v24  ;;  %v13697_v26 = vld [vmem:[%s21559_s2 + $0x8] sm:$0xf] }
  0x4b   : > { %v1573_v33 = vsel %vm317_vm0, %v1572_v27, %v1568_v19  ;;  %v1761_v35 = vunpack.c.l.b16 %v1753_v25  ;;  %v1762_v36 = vunpack.c.l.b16 %v1754_v29  ;;  %v16865_v47 = vmov 0.0  }
  0x4c   : > { %1387 = vrot.lane.b32.xlu0 %v1386_v30, %s16864_s30  ;;  %v1575_v37 = vsel %vm320_vm1, %v1574_v28, %v1573_v33  ;;  %v1763_v38 = vunpack.c.l.b16 %v1755_v32  ;;  %15879 = vmatprep.subr.bf16.mxu0 %v16865_v47  ;;  %v17063_v48 = vsel %vm349_vm3, %v299_v46, 0  ;;  %v1846_v58 = vpack.c.bf16 %v1845_v55, %v1845_v55  ;;  %v13702_v30 = vld [vmem:[%s21559_s2 + $0xc] sm:$0xf] }
  0x4d   : > { %v1577_v39 = vsel %vm323_vm2, %v1576_v31, %v1575_v37  ;;  %v1764_v40 = vrot.slane %v1761_v35, 7  ;;  %v1766_v41 = vrot.slane %v1762_v36, 6  ;;  %15881 = vmatprep.mubr.msk.bf16.mxu0 %vm16866_vm4, %v16865_v47  ;;  %15880 = vmatpush3.bf16.msra.mxu0 %v17063_v48  ;;  %v1879_v19 = vsel %vm1877_vm6, %v1847_v16, 0  ;;  %v16401_v37 = vld [vmem:[%s21562_s5 + $0x78] sm:$0xff]  }
  0x4e   : > { %v1768_v42 = vrot.slane %v1763_v38, 5  ;;  %15885 = vmatprep.subr.bf16.mxu1 %v16865_v47  ;;  %15891 = vmatprep.subr.bf16.mxu0 %v16865_v47  ;;  %v1578_v51 = vpack.c.b16 %v1577_v39, %v1577_v39  ;;  %v1949_v23 = vsel %vm1877_vm6, %v13675_v20, 0  ;;  %v3790_v28 = vsel %vm1877_vm6, %v13697_v26, 0 }
  0x4f   : > { %v1765_v43 = vsel %vm317_vm0, %v1764_v40, %v1760_v34  ;;  %15886 = vmatpush3.bf16.msra.mxu1 %v17063_v48  ;;  %15887 = vmatprep.mubr.msk.bf16.mxu1 %vm16866_vm4, %v16865_v47  ;;  %v3860_v32 = vsel %vm1877_vm6, %v13702_v30, 0 }
  0x50   : > { %v1767_v44 = vsel %vm320_vm1, %v1766_v41, %v1765_v43  ;;  %15897 = vmatprep.subr.bf16.mxu1 %v16865_v47 }
  0x51   : > { %v1769_v45 = vsel %vm323_vm2, %v1768_v42, %v1767_v44 }
  0x52   : > { %v1770_v53 = vpack.c.b16 %v1769_v45, %v1769_v45 }
  0x8f   : > { %v327_v49 = vpop.permute.xlu0 %326 }
  0x90   : > { %329 = vxpose.xlu0.c.b16.start.end [1/1] (short) (narrow) %v327_v49, 16 }
  0x93   : > { %v524_v50 = vpop.permute.xlu0 %523 }
  0x94   : > { %526 = vxpose.xlu1.c.b16.start.end [1/1] (short) (narrow) %v524_v50, 16 }
  0x95   : > { %v716_v52 = vpop.permute.xlu1 %715 }
  0x96   : > { %718 = vxpose.xlu0.c.b16.start.end [1/1] (short) (narrow) %v716_v52, 16 }
  0x98   : > { %1579 = vrot.lane.b32.xlu1 %v1578_v51, %s16864_s30 }
  0x99   : > { %v908_v54 = vpop.permute.xlu1 %907 }
  0x9d   : > { %v1100_v57 = vpop.permute.xlu1 %1099 }
  0x9f   : > { %1771 = vrot.lane.b32.xlu0 %v1770_v53, %s16864_s30  ;;  %v16403_v53 = vld [vmem:[%s21562_s5 + $0x70] sm:$0xff]  }
  0xa0   : > { %v428_v56 = vpop.permute.xlu0 %427 }
  0xa4   : > { %v620_v59 = vpop.permute.xlu0 %619 }
  0xa8   : > { %v1292_v60 = vpop.permute.xlu1 %1291 }
  0xab   : > { %v812_v61 = vpop.permute.xlu0 %811 }
  0xaf   : > { %v1484_v62 = vpop.permute.xlu1 %1483 }
  0xb3   : > { %v1004_v63 = vpop.permute.xlu0 %1003 }
  0xb7   : > { %v1676_v0 = vpop.permute.xlu1 %1675 }
  0xbb   : > { %910 = vxpose.xlu1.c.b16.start.end [1/1] (short) (narrow) %v908_v54, 16  ;;  %v1196_v1 = vpop.permute.xlu1 %1195  ;;  %v16404_v54 = vld [vmem:[%s21562_s5 + $0x30] sm:$0xff]  }
  0xbd   : > { %430 = vxpose.xlu0.c.b16.start.end [1/1] (short) (narrow) %v428_v56, 16 }
  0xbe   : > { %v1388_v2 = vpop.permute.xlu0 %1387 }
  0xbf   : > { %1102 = vxpose.xlu1.c.b16.start.end [1/1] (short) (narrow) %v1100_v57, 16 }
  0xc1   : > { %1848 = vxpose.xlu0.c.b16.start.end [1/1] (short) (narrow) %v1846_v58, 64 }
  0xc3   : > { %622 = vxpose.xlu1.c.b16.start.end [1/1] (short) (narrow) %v620_v59, 16 }
  0xc7   : > { %1294 = vxpose.xlu1.c.b16.start.end [1/1] (short) (narrow) %v1292_v60, 16 }
  0xcb   : > { %814 = vxpose.xlu1.c.b16.start.end [1/1] (short) (narrow) %v812_v61, 16 }
  0xcf   : > { %1486 = vxpose.xlu1.c.b16.start.end [1/1] (short) (narrow) %v1484_v62, 16 }
  0xd3   : > { %1006 = vxpose.xlu1.c.b16.start.end [1/1] (short) (narrow) %v1004_v63, 16 }
  0xd7   : > { %1678 = vxpose.xlu1.c.b16.start.end [1/1] (short) (narrow) %v1676_v0, 16 }
  0xdb   : > { %1198 = vxpose.xlu1.c.b16.start.end [1/1] (short) (narrow) %v1196_v1, 16 }
  0xdf   : > { %1390 = vxpose.xlu1.c.b16.start.end [1/1] (short) (narrow) %v1388_v2, 16 }
  0xf2   : > { %v337_v3 = vpop.trf.xlu0 }
  0xf3   : > { %15882 = vmatmul.mubr.msk.bf16.vlgmr.msra.gmra.mxu0 %vm345_vm5, %v337_v3 }
  0xf4   : > { %15892 = vmatpush3.bf16.msra.mxu0 %v17063_v48  ;;  %15893 = vmatprep.mubr.msk.bf16.mxu0 %vm16866_vm4, %v16865_v47 }
  0xf5   : > { %15903 = vmatprep.subr.bf16.mxu0 %v16865_v47 }
  0xf6   : > { %v534_v4 = vpop.trf.xlu1 }
  0xf8   : > { %v726_v5 = vpop.trf.xlu0 }
  0xfb   : > { %15894 = vmatmul.mubr.msk.bf16.vlgmr.msra.gmra.mxu0 %vm345_vm5, %v534_v4 }
  0xfc   : > { %15904 = vmatpush3.bf16.msra.mxu0 %v17063_v48  ;;  %15905 = vmatprep.mubr.msk.bf16.mxu0 %vm16866_vm4, %v16865_v47 }
  0xfd   : > { %15915 = vmatprep.subr.bf16.mxu0 %v16865_v47 }
 0x103   : > { %15906 = vmatmul.mubr.msk.bf16.vlgmr.msra.gmra.mxu0 %vm345_vm5, %v726_v5 }
 0x104   : > { %15916 = vmatpush3.bf16.msra.mxu0 %v17063_v48  ;;  %15917 = vmatprep.mubr.msk.bf16.mxu0 %vm16866_vm4, %v16865_v47 }
 0x105   : > { %15927 = vmatprep.subr.bf16.mxu0 %v16865_v47 }
 0x10a   : > { %v1580_v6 = vpop.permute.xlu1 %1579 }
 0x10b   : > { %1582 = vxpose.xlu0.c.b16.start.end [1/1] (short) (narrow) %v1580_v6, 16 }
 0x111   : > { %v1772_v7 = vpop.permute.xlu0 %1771 }
 0x112   : > { %1774 = vxpose.xlu1.c.b16.start.end [1/1] (short) (narrow) %v1772_v7, 16  ;;  %v16405_v7 = vld [vmem:[%s21562_s5 + $0x68] sm:$0xff]  }
 0x11d   : > { %v918_v8 = vpop.trf.xlu1 }
 0x11e   : > { %15918 = vmatmul.mubr.msk.bf16.vlgmr.msra.gmra.mxu0 %vm345_vm5, %v918_v8 }
 0x11f   : > { %15928 = vmatpush3.bf16.msra.mxu0 %v17063_v48  ;;  %15929 = vmatprep.mubr.msk.bf16.mxu0 %vm16866_vm4, %v16865_v47  ;;  %v438_v9 = vpop.trf.xlu0 }
 0x120   : > { %15939 = vmatprep.subr.bf16.mxu0 %v16865_v47  ;;  %15888 = vmatmul.mubr.msk.bf16.vlgmr.msra.gmra.mxu1 %vm345_vm5, %v438_v9 }
 0x121   : > { %v1110_v10 = vpop.trf.xlu1  ;;  %15898 = vmatpush3.bf16.msra.mxu1 %v17063_v48  ;;  %15899 = vmatprep.mubr.msk.bf16.mxu1 %vm16866_vm4, %v16865_v47 }
 0x122   : > { %15909 = vmatprep.subr.bf16.mxu1 %v16865_v47 }
 0x123   : > { %v1856_v18 = vpop.trf.xlu0 }
 0x125   : > { %v630_v11 = vpop.trf.xlu1 }
 0x126   : > { %15930 = vmatmul.mubr.msk.bf16.vlgmr.msra.gmra.mxu0 %vm345_vm5, %v1110_v10 }
 0x127   : > { %15940 = vmatpush3.bf16.msra.mxu0 %v17063_v48  ;;  %15941 = vmatprep.mubr.msk.bf16.mxu0 %vm16866_vm4, %v16865_v47  ;;  %v1857_v22 = vpop.trf.xlu0 }
 0x128   : > { %15951 = vmatprep.subr.bf16.mxu0 %v16865_v47  ;;  %15900 = vmatmul.mubr.msk.bf16.vlgmr.msra.gmra.mxu1 %vm345_vm5, %v630_v11 }
 0x129   : > { %v1302_v12 = vpop.trf.xlu1  ;;  %15910 = vmatpush3.bf16.msra.mxu1 %v17063_v48  ;;  %15911 = vmatprep.mubr.msk.bf16.mxu1 %vm16866_vm4, %v16865_v47 }
 0x12a   : > { %15921 = vmatprep.subr.bf16.mxu1 %v16865_v47 }
 0x12b   : > { %v1858_v24 = vpop.trf.xlu0 }
 0x12d   : > { %v822_v13 = vpop.trf.xlu1 }
 0x12e   : > { %15942 = vmatmul.mubr.msk.bf16.vlgmr.msra.gmra.mxu0 %vm345_vm5, %v1302_v12 }
 0x12f   : > { %15952 = vmatpush3.bf16.msra.mxu0 %v17063_v48  ;;  %15953 = vmatprep.mubr.msk.bf16.mxu0 %vm16866_vm4, %v16865_v47  ;;  %v1859_v27 = vpop.trf.xlu0 }
 0x130   : > { %15963 = vmatprep.subr.bf16.mxu0 %v16865_v47  ;;  %15912 = vmatmul.mubr.msk.bf16.vlgmr.msra.gmra.mxu1 %vm345_vm5, %v822_v13 }
 0x131   : > { %v1494_v14 = vpop.trf.xlu1  ;;  %15922 = vmatpush3.bf16.msra.mxu1 %v17063_v48  ;;  %15923 = vmatprep.mubr.msk.bf16.mxu1 %vm16866_vm4, %v16865_v47 }
 0x132   : > { %15933 = vmatprep.subr.bf16.mxu1 %v16865_v47 }
 0x135   : > { %v1014_v15 = vpop.trf.xlu1 }
 0x136   : > { %15954 = vmatmul.mubr.msk.bf16.vlgmr.msra.gmra.mxu0 %vm345_vm5, %v1494_v14 }
 0x137   : > { %15964 = vmatpush3.bf16.msra.mxu0 %v17063_v48  ;;  %15965 = vmatprep.mubr.msk.bf16.mxu0 %vm16866_vm4, %v16865_v47 }
 0x138   : > { %16375 = vmatprep.subr.msk.bf16.mxu0 %vm1877_vm6, %v1847_v16  ;;  %15924 = vmatmul.mubr.msk.bf16.vlgmr.msra.gmra.mxu1 %vm345_vm5, %v1014_v15 }
 0x139   : > { %v1686_v17 = vpop.trf.xlu1  ;;  %15934 = vmatpush3.bf16.msra.mxu1 %v17063_v48  ;;  %15935 = vmatprep.mubr.msk.bf16.mxu1 %vm16866_vm4, %v16865_v47 }
 0x13a   : > { %15945 = vmatprep.subr.bf16.mxu1 %v16865_v47 }
 0x13d   : > { %v1206_v21 = vpop.trf.xlu1 }
 0x13e   : > { %15966 = vmatmul.mubr.msk.bf16.vlgmr.msra.gmra.mxu0 %vm345_vm5, %v1686_v17 }
 0x13f   : > { %15976 = vmatpush3.bf16.msra.mxu0 %v1879_v19  ;;  %15977 = vmatprep.mubr.msk.bf16.mxu0 %vm1864_vm7, %v1856_v18 }
 0x140   : > { %16376 = vmatprep.subr.msk.bf16.mxu0 %vm1877_vm6, %v13675_v20  ;;  %15936 = vmatmul.mubr.msk.bf16.vlgmr.msra.gmra.mxu1 %vm345_vm5, %v1206_v21 }
 0x141   : > { %15946 = vmatpush3.bf16.msra.mxu1 %v17063_v48  ;;  %15947 = vmatprep.mubr.msk.bf16.mxu1 %vm16866_vm4, %v16865_v47  ;;  %v1398_v25 = vpop.trf.xlu1 }
 0x142   : > { %15957 = vmatprep.subr.bf16.mxu1 %v16865_v47 }
 0x146   : > { %15978 = vmatmul.mubr.msk.bf16.vlgmr.msra.gmra.mxu0 %vm1864_vm7, %v1857_v22 }
 0x147   : > { %15981 = vmatprep.mubr.msk.bf16.mxu0 %vm1864_vm7, %v1858_v24  ;;  %15986 = vmatpush3.bf16.msra.mxu0 %v1949_v23 }
 0x148   : > { %15948 = vmatmul.mubr.msk.bf16.vlgmr.msra.gmra.mxu1 %vm345_vm5, %v1398_v25  ;;  %16377 = vmatprep.subr.msk.bf16.mxu0 %vm1877_vm6, %v13697_v26  ;;  %v16406_v26 = vld [vmem:[%s21562_s5 + $0x28] sm:$0xff]  }
 0x149   : > { %15958 = vmatpush3.bf16.msra.mxu1 %v17063_v48  ;;  %15959 = vmatprep.mubr.msk.bf16.mxu1 %vm16866_vm4, %v16865_v47 }
 0x14a   : > { %15969 = vmatprep.subr.bf16.mxu1 %v16865_v47 }
 0x14e   : > { %15982 = vmatmul.mubr.msk.bf16.gmra.mxu0 %vm1864_vm7, %v1859_v27 }
 0x14f   : > { %15987 = vmatprep.mubr.msk.bf16.mxu0 %vm1864_vm7, %v1856_v18 }
 0x156   : > { %15988 = vmatmul.mubr.msk.bf16.vlgmr.msra.gmra.mxu0 %vm1864_vm7, %v1857_v22 }
 0x157   : > { %15991 = vmatprep.mubr.msk.bf16.mxu0 %vm1864_vm7, %v1858_v24  ;;  %15996 = vmatpush3.bf16.msra.mxu0 %v3790_v28 }
 0x15e   : > { %15992 = vmatmul.mubr.msk.bf16.gmra.mxu0 %vm1864_vm7, %v1859_v27 }
 0x15f   : > { %15997 = vmatprep.mubr.msk.bf16.mxu0 %vm1864_vm7, %v1856_v18 }
 0x166   : > { %15998 = vmatmul.mubr.msk.bf16.vlgmr.msra.gmra.mxu0 %vm1864_vm7, %v1857_v22 }
 0x167   : > { %16001 = vmatprep.mubr.msk.bf16.mxu0 %vm1864_vm7, %v1858_v24 }
 0x16d   : > { %v1590_v29 = vpop.trf.xlu0 }
 0x16e   : > { %15960 = vmatmul.mubr.msk.bf16.vlgmr.msra.gmra.mxu1 %vm345_vm5, %v1590_v29  ;;  %16002 = vmatmul.mubr.msk.bf16.gmra.mxu0 %vm1864_vm7, %v1859_v27 }
 0x16f   : > { %15970 = vmatpush3.bf16.msra.mxu1 %v17063_v48  ;;  %15971 = vmatprep.mubr.msk.bf16.mxu1 %vm16866_vm4, %v16865_v47  ;;  %v16402_v47 = vld [vmem:[%s21562_s5 + $0x38] sm:$0xff]  }
 0x170   : > { %16378 = vmatprep.subr.msk.bf16.mxu1 %vm1877_vm6, %v13702_v30 }
 0x174   : > { %v1782_v31 = vpop.trf.xlu1 }
 0x176   : > { %15972 = vmatmul.mubr.msk.bf16.vlgmr.msra.gmra.mxu1 %vm345_vm5, %v1782_v31 }
 0x177   : > { %16006 = vmatpush3.bf16.msra.mxu1 %v3860_v32  ;;  %16007 = vmatprep.mubr.msk.bf16.mxu1 %vm1864_vm7, %v1856_v18 }
 0x178   : > { %14899 = vmatprep.subr.bf16.mxu1 %v16401_v37 }
 0x17e   : > { %16008 = vmatmul.mubr.msk.bf16.vlgmr.msra.gmra.mxu1 %vm1864_vm7, %v1857_v22 }
 0x17f   : > { %16011 = vmatprep.mubr.msk.bf16.mxu1 %vm1864_vm7, %v1858_v24  ;;  %14900 = vmatpush3.bf16.msra.mxu1 %v16402_v47 }
 0x180   : > { %14901 = vmatprep.subr.bf16.mxu1 %v16403_v53 }
 0x183   : > { %14902 = vmatpush3.bf16.msra.mxu1 %v16404_v54 }
 0x184   : > { %14903 = vmatprep.subr.bf16.mxu1 %v16405_v7 }
 0x186   : > { %16012 = vmatmul.mubr.msk.bf16.gmra.mxu1 %vm1864_vm7, %v1859_v27 }
 0x187   : > { %14904 = vmatpush3.bf16.msra.mxu1 %v16406_v26 }
 0x1b3   : > { %v387_v33 = vpop.f32.mrf.mxu0 }
 0x1b4   : > { %v14572_v34 = vpack.c.bf16 %v387_v33, %v387_v33 }
 0x1b5   : > { %v15883_v35 = vpop.f32.mrf.mxu0 }
 0x1b6   : > { %402 = vst [vmem:[#allocation2] sm:$0xf] %v14572_v34 }
 0x1b7   : > { %v390_v36 = vpop.f32.mrf.mxu0 }
 0x1b8   : > { %v14573_v38 = vpack.c.bf16 %v390_v36, %v390_v36  ;;  %v16867_v36 = vmov 1983009808  }
 0x1b9   : > { %v15884_v39 = vpop.f32.mrf.mxu0  ;;  %v3272_v37 = vunpack.c.l.s4 %v16867_v36 }
 0x1ba   : > { %403 = vst [vmem:[#allocation2 + $0x8] sm:$0xf] %v14573_v38 }
 0x1bb   : > { %v579_v40 = vpop.f32.mrf.mxu0  ;;  %v3273_v47 = vunpack.c.0.s8 %v3272_v37 }
 0x1bc   : > { %v14576_v41 = vpack.c.bf16 %v579_v40, %v579_v40  ;;  %v2028_v40 = vlaneseq }
 0x1bd   : > { %v15895_v42 = vpop.f32.mrf.mxu0 }
 0x1be   : > { %594 = vst [vmem:[#allocation2 + $0x20] sm:$0xf] %v14576_v41  ;;  %v16868_v42 = vmov 1966171168  }
 0x1bf   : > { %v582_v43 = vpop.f32.mrf.mxu0 }
 0x1c0   : > { %v14577_v44 = vpack.c.bf16 %v582_v43, %v582_v43  ;;  %v2026_v43 = vunpack.c.l.s4 %v16868_v42 }
 0x1c1   : > { %v15896_v45 = vpop.f32.mrf.mxu0 }
 0x1c2   : > { %595 = vst [vmem:[#allocation2 + $0x28] sm:$0xf] %v14577_v44  ;;  %v2027_v53 = vunpack.c.0.s8 %v2026_v43 }
 0x1c3   : > { %v771_v46 = vpop.f32.mrf.mxu0 }
 0x1c4   : > { %v14580_v48 = vpack.c.bf16 %v771_v46, %v771_v46 }
 0x1c5   : > { %v15907_v49 = vpop.f32.mrf.mxu0 }
 0x1c6   : > { %786 = vst [vmem:[#allocation2 + $0x40] sm:$0xf] %v14580_v48  ;;  %v13680_v49 = vld [vmem:[%s21560_s3] ss:$0 sm:$0xff] }
 0x1c7   : > { %v774_v50 = vpop.f32.mrf.mxu0 }
 0x1c8   : > { %v14581_v51 = vpack.c.bf16 %v774_v50, %v774_v50 }
 0x1c9   : > { %v15908_v52 = vpop.f32.mrf.mxu0 }
 0x1ca   : > { %787 = vst [vmem:[#allocation2 + $0x48] sm:$0xf] %v14581_v51  ;;  %v2029_v51 = vshrl.u32 %v2028_v40, 7 }
 0x1de   : > { %v963_v55 = vpop.f32.mrf.mxu0 }
 0x1df   : > { %v14584_v56 = vpack.c.bf16 %v963_v55, %v963_v55  ;;  %v16407_v55 = vld [vmem:[%s21562_s5 + $0x60] sm:$0xff]  }
 0x1e0   : > { %v15919_v57 = vpop.f32.mrf.mxu0  ;;  %v483_v58 = vpop.f32.mrf.mxu1  ;;  %14905 = vmatprep.subr.bf16.mxu1 %v16407_v55 }
 0x1e1   : > { %978 = vst [vmem:[#allocation2 + $0x60] sm:$0xf] %v14584_v56  ;;  %v14574_v59 = vpack.c.bf16 %v483_v58, %v483_v58  ;;  %v3270_v57 = vcombine.high %v13680_v49, %v13680_v49  ;;  %v17210_v58 = vsub.s32 %v3273_v47, %v2029_v51  ;;  %v16411_v47 = vld [vmem:[%s21562_s5 + $0x50] sm:$0xff]  }
 0x1e2   : > { %v966_v60 = vpop.f32.mrf.mxu0  ;;  %v15889_v61 = vpop.f32.mrf.mxu1 }
 0x1e3   : > { %v14585_v62 = vpack.c.bf16 %v966_v60, %v966_v60  ;;  %498 = vst [vmem:[#allocation2 + $0x10] sm:$0xf] %v14574_v59 }
 0x1e4   : > { %v15920_v63 = vpop.f32.mrf.mxu0  ;;  %v486_v0 = vpop.f32.mrf.mxu1 }
 0x1e5   : > { %979 = vst [vmem:[#allocation2 + $0x68] sm:$0xf] %v14585_v62  ;;  %v14575_v1 = vpack.c.bf16 %v486_v0, %v486_v0  ;;  %v16408_v63 = vld [vmem:[%s21562_s5 + $0x20] sm:$0xff]   ;;  %v17215_v0 = vsub.s32 %v2027_v53, %v2029_v51 }
 0x1e6   : > { %v1155_v2 = vpop.f32.mrf.mxu0  ;;  %v15890_v3 = vpop.f32.mrf.mxu1  ;;  %14906 = vmatpush3.bf16.msra.mxu1 %v16408_v63 }
 0x1e7   : > { %v14588_v4 = vpack.c.bf16 %v1155_v2, %v1155_v2  ;;  %499 = vst [vmem:[#allocation2 + $0x18] sm:$0xf] %v14575_v1  ;;  %21576 = vst [vmem:[#allocation4_spill] sm:$0xff] %v17215_v0  ;;  %v17218_v3 = vrot.slane %v13680_v49, %v17210_v58 }
 0x1e8   : > { %v15931_v5 = vpop.f32.mrf.mxu0  ;;  %v675_v6 = vpop.f32.mrf.mxu1 }
 0x1e9   : > { %1170 = vst [vmem:[#allocation2 + $0x80] sm:$0xf] %v14588_v4  ;;  %v14578_v8 = vpack.c.bf16 %v675_v6, %v675_v6  ;;  %v17221_v4 = vrot.slane %v3270_v57, %v17210_v58  ;;  %v16412_v57 = vld [vmem:[%s21562_s5 + $0x10] sm:$0xff]  }
 0x1ea   : > { %v1158_v9 = vpop.f32.mrf.mxu0  ;;  %v15901_v10 = vpop.f32.mrf.mxu1 }
 0x1eb   : > { %v14589_v11 = vpack.c.bf16 %v1158_v9, %v1158_v9  ;;  %690 = vst [vmem:[#allocation2 + $0x30] sm:$0xf] %v14578_v8  ;;  %v17224_v9 = vsub.s32 0, %v2029_v51 }
 0x1ec   : > { %v15932_v12 = vpop.f32.mrf.mxu0  ;;  %v678_v13 = vpop.f32.mrf.mxu1 }
 0x1ed   : > { %1171 = vst [vmem:[#allocation2 + $0x88] sm:$0xf] %v14589_v11  ;;  %v14579_v14 = vpack.c.bf16 %v678_v13, %v678_v13  ;;  %21577 = vst [vmem:[#allocation5_spill] sm:$0xff] %v17224_v9 }
 0x1ee   : > { %v1347_v15 = vpop.f32.mrf.mxu0  ;;  %v15902_v16 = vpop.f32.mrf.mxu1 }
 0x1ef   : > { %v14592_v17 = vpack.c.bf16 %v1347_v15, %v1347_v15  ;;  %691 = vst [vmem:[#allocation2 + $0x38] sm:$0xf] %v14579_v14  ;;  %v16409_v15 = vld [vmem:[%s21562_s5 + $0x58] sm:$0xff]  }
 0x1f0   : > { %v15943_v18 = vpop.f32.mrf.mxu0  ;;  %v867_v19 = vpop.f32.mrf.mxu1  ;;  %14907 = vmatprep.subr.bf16.mxu1 %v16409_v15 }
 0x1f1   : > { %1362 = vst [vmem:[#allocation2 + $0xa0] sm:$0xf] %v14592_v17  ;;  %v14582_v20 = vpack.c.bf16 %v867_v19, %v867_v19  ;;  %v17236_v18 = vcombine.high %v17218_v3, %v17218_v3  ;;  %v17240_v19 = vcombine.high %v17221_v4, %v17221_v4 }
 0x1f2   : > { %v1350_v21 = vpop.f32.mrf.mxu0  ;;  %v15913_v22 = vpop.f32.mrf.mxu1 }
 0x1f3   : > { %v14593_v23 = vpack.c.bf16 %v1350_v21, %v1350_v21  ;;  %882 = vst [vmem:[#allocation2 + $0x50] sm:$0xf] %v14582_v20  ;;  %v16410_v22 = vld [vmem:[%s21562_s5 + $0x18] sm:$0xff]  }
 0x1f4   : > { %v15944_v24 = vpop.f32.mrf.mxu0  ;;  %v870_v25 = vpop.f32.mrf.mxu1  ;;  %14908 = vmatpush3.bf16.msra.mxu1 %v16410_v22 }
 0x1f5   : > { %1363 = vst [vmem:[#allocation2 + $0xa8] sm:$0xf] %v14593_v23  ;;  %v14583_v27 = vpack.c.bf16 %v870_v25, %v870_v25  ;;  %14909 = vmatprep.subr.bf16.mxu1 %v16411_v47 }
 0x1f6   : > { %v1539_v28 = vpop.f32.mrf.mxu0  ;;  %v15914_v29 = vpop.f32.mrf.mxu1 }
 0x1f7   : > { %v14596_v30 = vpack.c.bf16 %v1539_v28, %v1539_v28  ;;  %883 = vst [vmem:[#allocation2 + $0x58] sm:$0xf] %v14583_v27 }
 0x1f8   : > { %v15955_v31 = vpop.f32.mrf.mxu0  ;;  %v1059_v32 = vpop.f32.mrf.mxu1  ;;  %14910 = vmatpush3.bf16.msra.mxu1 %v16412_v57 }
 0x1f9   : > { %1554 = vst [vmem:[#allocation2 + $0xc0] sm:$0xf] %v14596_v30  ;;  %v14586_v33 = vpack.c.bf16 %v1059_v32, %v1059_v32 }
 0x1fa   : > { %v1542_v34 = vpop.f32.mrf.mxu0  ;;  %v15925_v35 = vpop.f32.mrf.mxu1 }
 0x1fb   : > { %v14597_v38 = vpack.c.bf16 %v1542_v34, %v1542_v34  ;;  %1074 = vst [vmem:[#allocation2 + $0x70] sm:$0xf] %v14586_v33 }
 0x1fc   : > { %v15956_v39 = vpop.f32.mrf.mxu0  ;;  %v1062_v41 = vpop.f32.mrf.mxu1 }
 0x1fd   : > { %1555 = vst [vmem:[#allocation2 + $0xc8] sm:$0xf] %v14597_v38  ;;  %v14587_v44 = vpack.c.bf16 %v1062_v41, %v1062_v41 }
 0x1fe   : > { %v1731_v45 = vpop.f32.mrf.mxu0  ;;  %v15926_v46 = vpop.f32.mrf.mxu1 }
 0x1ff   : > { %v14600_v48 = vpack.c.bf16 %v1731_v45, %v1731_v45  ;;  %1075 = vst [vmem:[#allocation2 + $0x78] sm:$0xf] %v14587_v44 }
 0x200   : > { %v15967_v50 = vpop.f32.mrf.mxu0  ;;  %v1251_v52 = vpop.f32.mrf.mxu1 }
 0x201   : > { %1746 = vst [vmem:[#allocation2 + $0xe0] sm:$0xf] %v14600_v48  ;;  %v14590_v54 = vpack.c.bf16 %v1251_v52, %v1251_v52 }
 0x202   : > { %v1734_v56 = vpop.f32.mrf.mxu0  ;;  %v15937_v59 = vpop.f32.mrf.mxu1 }
 0x203   : > { %v14601_v60 = vpack.c.bf16 %v1734_v56, %v1734_v56  ;;  %1266 = vst [vmem:[#allocation2 + $0x90] sm:$0xf] %v14590_v54 }
 0x204   : > { %v15968_v61 = vpop.f32.mrf.mxu0  ;;  %v1254_v62 = vpop.f32.mrf.mxu1 }
 0x205   : > { %1747 = vst [vmem:[#allocation2 + $0xe8] sm:$0xf] %v14601_v60  ;;  %v14591_v1 = vpack.c.bf16 %v1254_v62, %v1254_v62 }
 0x206   : > { %v15979_v2 = vpop.f32.mrf.mxu0  ;;  %v15938_v5 = vpop.f32.mrf.mxu1 }
 0x207   : > { %v2122_v6 = vcombine.high %v15979_v2, %v15979_v2  ;;  %v2129_v7 = vrot.slane %v15979_v2, %v17215_v0  ;;  %1267 = vst [vmem:[#allocation2 + $0x98] sm:$0xf] %v14591_v1 }
 0x208   : > { %v1915_v8 = vpop.f32.mrf.mxu0  ;;  %v1443_v10 = vpop.f32.mrf.mxu1 }
 0x209   : > { %v2136_v11 = vrot.slane %v2122_v6, %v17215_v0  ;;  %v2137_v12 = vcombine.high %v2129_v7, %v2129_v7  ;;  %v17228_v13 = vrot.slane %v2129_v7, %v17215_v0  ;;  %v2024_v14 = vcombine.high %v1915_v8, %v1915_v8 }
 0x20a   : > { %v2031_v16 = vrot.slane %v1915_v8, %v17215_v0  ;;  %v15980_v17 = vpop.f32.mrf.mxu0  ;;  %v14594_v20 = vpack.c.bf16 %v1443_v10, %v1443_v10  ;;  %v15949_v21 = vpop.f32.mrf.mxu1 }
 0x20b   : > { %v2138_v23 = vcombine.high %v2136_v11, %v2136_v11  ;;  %v17246_v24 = vrot.slane %v2136_v11, %v17215_v0  ;;  %v17249_v25 = vrot.slane %v2137_v12, %v17215_v0  ;;  %v2167_v26 = vcombine.high %v17228_v13, %v17228_v13 }
 0x20c   : > { %v2038_v27 = vrot.slane %v2024_v14, %v17215_v0  ;;  %v2039_v28 = vcombine.high %v2031_v16, %v2031_v16  ;;  %v17255_v29 = vrot.slane %v2031_v16, %v17215_v0  ;;  %v2171_v30 = vcombine.high %v15980_v17, %v15980_v17  ;;  %v1918_v31 = vpop.f32.mrf.mxu0  ;;  %1458 = vst [vmem:[#allocation2 + $0xb0] sm:$0xf] %v14594_v20  ;;  %v17257_v32 = vpop.f32.mrf.mxu1 }
 0x20d   : > { %v17260_v33 = vrot.slane %v2138_v23, %v17215_v0  ;;  %v2168_v34 = vcombine.high %v17246_v24, %v17246_v24  ;;  %v2169_v35 = vcombine.high %v17249_v25, %v17249_v25  ;;  %v2178_v36 = vrot.slane %v15980_v17, %v17215_v0  ;;  %v16413_v23 = vld [vmem:[%s21562_s5 + $0x48] sm:$0xff]  }
 0x20e   : > { %v2040_v37 = vcombine.high %v2038_v27, %v2038_v27  ;;  %v17268_v38 = vrot.slane %v2038_v27, %v17215_v0  ;;  %v17271_v39 = vrot.slane %v2039_v28, %v17215_v0  ;;  %v15983_v41 = vpop.f32.mrf.mxu0  ;;  %v15950_v42 = vpop.f32.mrf.mxu1  ;;  %v2185_v44 = vrot.slane %v2171_v30, %v17215_v0  ;;  %14911 = vmatprep.subr.bf16.mxu1 %v16413_v23 }
 0x20f   : > { %v2170_v43 = vcombine.high %v17260_v33, %v17260_v33  ;;  %v2186_v45 = vcombine.high %v2178_v36, %v2178_v36  ;;  %v17279_v46 = vrot.slane %v2178_v36, %v17215_v0  ;;  %v2073_v51 = vcombine.high %v1918_v31, %v1918_v31  ;;  %v16414_v36 = vld [vmem:[%s21562_s5 + $0x8] sm:$0xff]  }
 0x210   : > { %v17285_v48 = vrot.slane %v2040_v37, %v17215_v0  ;;  %v1931_v52 = vpop.f32.mrf.mxu0  ;;  %v2187_v53 = vcombine.high %v2185_v44, %v2185_v44  ;;  %v17292_v54 = vrot.slane %v2185_v44, %v17215_v0  ;;  %v2080_v60 = vrot.slane %v1918_v31, %v17215_v0  ;;  %14912 = vmatpush3.bf16.msra.mxu1 %v16414_v36 }
 0x211   : > { %v17295_v55 = vrot.slane %v2186_v45, %v17215_v0  ;;  %v2087_v61 = vrot.slane %v2073_v51, %v17215_v0  ;;  %v2318_v62 = vcombine.high %v15983_v41, %v15983_v41  ;;  %v2325_v5 = vrot.slane %v15983_v41, %v17215_v0 }
 0x212   : > { %v17307_v63 = vrot.slane %v2187_v53, %v17215_v0  ;;  %v2088_v6 = vcombine.high %v2080_v60, %v2080_v60  ;;  %v17315_v8 = vrot.slane %v2080_v60, %v17215_v0  ;;  %v15984_v11 = vpop.f32.mrf.mxu0  ;;  %v2220_v42 = vcombine.high %v1931_v52, %v1931_v52 }
 0x213   : > { %v2089_v7 = vcombine.high %v2087_v61, %v2087_v61  ;;  %v17318_v10 = vrot.slane %v2087_v61, %v17215_v0  ;;  %v2332_v14 = vrot.slane %v2318_v62, %v17215_v0  ;;  %v2333_v15 = vcombine.high %v2325_v5, %v2325_v5 }
 0x214   : > { %v17324_v16 = vrot.slane %v2325_v5, %v17215_v0  ;;  %v17327_v17 = vrot.slane %v2088_v6, %v17215_v0  ;;  %v2227_v44 = vrot.slane %v1931_v52, %v17215_v0  ;;  %v1934_v45 = vpop.f32.mrf.mxu0  ;;  %v2367_v57 = vcombine.high %v15984_v11, %v15984_v11 }
 0x215   : > { %v17330_v20 = vrot.slane %v2089_v7, %v17215_v0  ;;  %v2334_v27 = vcombine.high %v2332_v14, %v2332_v14  ;;  %v17340_v28 = vrot.slane %v2332_v14, %v17215_v0  ;;  %v17343_v30 = vrot.slane %v2333_v15, %v17215_v0 }
 0x216   : > { %v2234_v60 = vrot.slane %v2220_v42, %v17215_v0  ;;  %v2235_v61 = vcombine.high %v2227_v44, %v2227_v44  ;;  %v17364_v62 = vrot.slane %v2227_v44, %v17215_v0  ;;  %v2374_v52 = vrot.slane %v15984_v11, %v17215_v0  ;;  %v15989_v42 = vpop.f32.mrf.mxu0  ;;  %v16415_v11 = vld [vmem:[%s21562_s5 + $0x40] sm:$0xff]  }
 0x217   : > { %v17356_v47 = vrot.slane %v2334_v27, %v17215_v0  ;;  %v2381_v6 = vrot.slane %v2367_v57, %v17215_v0  ;;  %v2269_v7 = vcombine.high %v1934_v45, %v1934_v45  ;;  %v2276_v14 = vrot.slane %v1934_v45, %v17215_v0  ;;  %14913 = vmatprep.subr.bf16.mxu1 %v16415_v11 }
 0x218   : > { %v2236_v15 = vcombine.high %v2234_v60, %v2234_v60  ;;  %v17372_v23 = vrot.slane %v2234_v60, %v17215_v0  ;;  %v17375_v27 = vrot.slane %v2235_v61, %v17215_v0  ;;  %v2382_v44 = vcombine.high %v2374_v52, %v2374_v52  ;;  %v16416_v60 = vld [vmem:[%s21562_s5] sm:$0xff]   ;;  %v1985_v11 = vpop.f32.mrf.mxu0 }
 0x219   : > { %v2383_v57 = vcombine.high %v2381_v6, %v2381_v6  ;;  %v17383_v5 = vrot.slane %v2374_v52, %v17215_v0  ;;  %v17386_v45 = vrot.slane %v2381_v6, %v17215_v0  ;;  %v2283_v52 = vrot.slane %v2269_v7, %v17215_v0  ;;  %14914 = vmatpush3.bf16.msra.mxu1 %v16416_v60 }
 0x21a   : > { %v17392_v61 = vrot.slane %v2236_v15, %v17215_v0  ;;  %v17400_v6 = vrot.slane %v2382_v44, %v17215_v0  ;;  %v2284_v51 = vcombine.high %v2276_v14, %v2276_v14  ;;  %v17412_v7 = vrot.slane %v2276_v14, %v17215_v0 }
 0x21b   : > { %v17403_v53 = vrot.slane %v2383_v57, %v17215_v0  ;;  %v2285_v41 = vcombine.high %v2283_v52, %v2283_v52  ;;  %v17419_v31 = vrot.slane %v2283_v52, %v17215_v0  ;;  %v2586_v15 = vcombine.high %v15989_v42, %v15989_v42 }
 0x21c   : > { %v17422_v60 = vrot.slane %v2284_v51, %v17215_v0  ;;  %v2593_v22 = vrot.slane %v15989_v42, %v17215_v0  ;;  %v2488_v37 = vcombine.high %v1985_v11, %v1985_v11  ;;  %v2495_v52 = vrot.slane %v1985_v11, %v17215_v0 }
 0x21d   : > { %v17425_v36 = vrot.slane %v2285_v41, %v17215_v0  ;;  %v2600_v57 = vrot.slane %v2586_v15, %v17215_v0 }
 0x21e   : > { %v2601_v21 = vcombine.high %v2593_v22, %v2593_v22  ;;  %v2609_v12 = vrot.slane %v2593_v22, %v17215_v0  ;;  %v2502_v2 = vrot.slane %v2488_v37, %v17215_v0  ;;  %v2503_v44 = vcombine.high %v2495_v52, %v2495_v52 }
 0x21f   : > { %v2602_v14 = vcombine.high %v2600_v57, %v2600_v57  ;;  %v2616_v42 = vrot.slane %v2600_v57, %v17215_v0  ;;  %v2511_v56 = vrot.slane %v2495_v52, %v17215_v0 }
 0x220   : > { %v2623_v15 = vrot.slane %v2601_v21, %v17215_v0  ;;  %v2631_v1 = vcombine.high %v2609_v12, %v2609_v12  ;;  %v2947_v11 = vrot.slane %v2609_v12, %v17224_v9  ;;  %v2504_v49 = vcombine.high %v2502_v2, %v2502_v2 }
 0x221   : > { %v2630_v51 = vrot.slane %v2602_v14, %v17215_v0  ;;  %v2632_v59 = vcombine.high %v2616_v42, %v2616_v42  ;;  %v2963_v41 = vrot.slane %v2616_v42, %v17224_v9 }
 0x222   : > { %v2633_v22 = vcombine.high %v2623_v15, %v2623_v15  ;;  %v2951_v50 = vrot.slane %v2623_v15, %v17224_v9  ;;  %v2955_v57 = vrot.slane %v2631_v1, %v17224_v9  ;;  %v3217_v37 = vsel %vm3200_vm8, %v17228_v13, %v2947_v11 }
 0x223   : > { %v2634_v21 = vcombine.high %v2630_v51, %v2630_v51  ;;  %v2967_v40 = vrot.slane %v2630_v51, %v17224_v9  ;;  %v2971_v12 = vrot.slane %v2632_v59, %v17224_v9  ;;  %v3221_v14 = vsel %vm3200_vm8, %v17246_v24, %v2963_v41 }
 0x224   : > { %v2959_v52 = vrot.slane %v2633_v22, %v17224_v9  ;;  %v3218_v42 = vsel %vm3200_vm8, %v17249_v25, %v2951_v50  ;;  %v3219_v1 = vsel %vm3200_vm8, %v2167_v26, %v2955_v57  ;;  %v3307_v15 = vadd.f32 %v17218_v3, %v3217_v37 }
 0x225   : > { %v2975_v11 = vrot.slane %v2634_v21, %v17224_v9  ;;  %v3222_v59 = vsel %vm3200_vm8, %v17260_v33, %v2967_v40  ;;  %v3223_v51 = vsel %vm3200_vm8, %v2168_v34, %v2971_v12  ;;  %v3308_v41 = vadd.f32 %v17236_v18, %v3218_v42 }
 0x226   : > { %v3220_v13 = vsel %vm3200_vm8, %v2169_v35, %v2959_v52  ;;  %v3309_v26 = vadd.f32 %v17221_v4, %v3219_v1  ;;  %v3311_v50 = vadd.f32 %v17218_v3, %v3221_v14  ;;  %v3312_v22 = vadd.f32 %v17236_v18, %v3222_v59 }
 0x227   : > { %v3224_v24 = vsel %vm3200_vm8, %v2170_v43, %v2975_v11  ;;  %v3310_v34 = vadd.f32 %v17240_v19, %v3220_v13  ;;  %v3313_v40 = vadd.f32 %v17221_v4, %v3223_v51  ;;  %v3487_v57 = vcombine.low %v3307_v15, %v3308_v41 }
 0x228   : > { %v3314_v25 = vadd.f32 %v17240_v19, %v3224_v24  ;;  %v3504_v37 = vcombine.low %v3311_v50, %v3312_v22  ;;  %v2518_v35 = vrot.slane %v2502_v2, %v17215_v0  ;;  %v2525_v21 = vrot.slane %v2503_v44, %v17215_v0  ;;  %v15990_v22 = vpop.f32.mrf.mxu0 }
 0x229   : > { %v3488_v14 = vcombine.low %v3309_v26, %v3310_v34  ;;  %v3495_v52 = vrot.slane %v3487_v57, %v17210_v58  ;;  %v2532_v33 = vrot.slane %v2504_v49, %v17215_v0  ;;  %v2533_v43 = vcombine.high %v2511_v56, %v2511_v56 }
 0x22a   : > { %v3505_v42 = vcombine.low %v3313_v40, %v3314_v25  ;;  %v3512_v1 = vrot.slane %v3504_v37, %v17210_v58  ;;  %v2534_v11 = vcombine.high %v2518_v35, %v2518_v35  ;;  %v2535_v15 = vcombine.high %v2525_v21, %v2525_v21 }
 0x22b   : > { %v3502_v51 = vrot.slane %v3488_v14, %v17210_v58  ;;  %v2536_v41 = vcombine.high %v2532_v33, %v2532_v33  ;;  %v2883_v2 = vrot.slane %v2511_v56, %v17224_v9  ;;  %v2887_v44 = vrot.slane %v2525_v21, %v17224_v9 }
 0x22c   : > { %v3519_v13 = vrot.slane %v3505_v42, %v17210_v58  ;;  %v2891_v26 = vrot.slane %v2533_v43, %v17224_v9  ;;  %v2895_v49 = vrot.slane %v2535_v15, %v17224_v9  ;;  %v2899_v50 = vrot.slane %v2518_v35, %v17224_v9 }
 0x22d   : > { %v3503_v34 = vcombine.low %v3495_v52, %v3502_v51  ;;  %v2903_v40 = vrot.slane %v2532_v33, %v17224_v9  ;;  %v2907_v57 = vrot.slane %v2534_v11, %v17224_v9  ;;  %v2911_v56 = vrot.slane %v2536_v41, %v17224_v9 }
 0x22e   : > { %v17486_v12 = vpop.f32.mrf.mxu1  ;;  %v3520_v25 = vcombine.low %v3512_v1, %v3519_v13  ;;  %v3201_v37 = vsel %vm3200_vm8, %v17255_v29, %v2883_v2  ;;  %v3202_v21 = vsel %vm3200_vm8, %v17271_v39, %v2887_v44  ;;  %v21578_v35 = vcombine.high %v17255_v29, %v17255_v29  ;;  %v17528_v2 = vpop.f32.mrf.mxu0 }
 0x22f   : > { %v14608_v52 = vpack.c.bf16 %v3503_v34, %v3503_v34  ;;  %v21579_v33 = vcombine.high %v17271_v39, %v17271_v39  ;;  %v3205_v1 = vsel %vm3200_vm8, %v17268_v38, %v2899_v50  ;;  %v3206_v11 = vsel %vm3200_vm8, %v17285_v48, %v2903_v40 }
 0x230   : > { %v15961_v59 = vpop.f32.mrf.mxu1  ;;  %v3203_v14 = vsel %vm3200_vm8, %v21578_v35, %v2891_v26  ;;  %v14609_v15 = vpack.c.bf16 %v3520_v25, %v3520_v25  ;;  %v21581_v51 = vcombine.high %v17285_v48, %v17285_v48  ;;  %v3291_v39 = vadd.f32 %v17218_v3, %v3201_v37 }
 0x231   : > { %v3204_v42 = vsel %vm3200_vm8, %v21579_v33, %v2895_v49  ;;  %v21580_v59 = vcombine.high %v17268_v38, %v17268_v38  ;;  %3740 = vst [vmem:[#allocation2 + $0x44] sm:$0xf] %v14608_v52  ;;  %v3292_v13 = vadd.f32 %v17236_v18, %v3202_v21  ;;  %v3293_v26 = vadd.f32 %v17221_v4, %v3203_v14 }
 0x232   : > { %v17498_v24 = vpop.f32.mrf.mxu1  ;;  %v3208_v41 = vsel %vm3200_vm8, %v21581_v51, %v2911_v56  ;;  %v3294_v38 = vadd.f32 %v17240_v19, %v3204_v42  ;;  %v3295_v49 = vadd.f32 %v17218_v3, %v3205_v1  ;;  %3741 = vst [vmem:[#allocation2 + $0x4c] sm:$0xf] %v14609_v15  ;;  %v3296_v48 = vadd.f32 %v17236_v18, %v3206_v11 }
 0x233   : > { %v3207_v29 = vsel %vm3200_vm8, %v21580_v59, %v2907_v57  ;;  %v3298_v34 = vadd.f32 %v17240_v19, %v3208_v41  ;;  %v2635_v40 = vcombine.high %v15990_v22, %v15990_v22  ;;  %v3419_v56 = vcombine.low %v3291_v39, %v3292_v13 }
 0x234   : > { %v15962_v43 = vpop.f32.mrf.mxu1  ;;  %v3297_v50 = vadd.f32 %v17221_v4, %v3207_v29  ;;  %v3420_v25 = vcombine.low %v3293_v26, %v3294_v38  ;;  %v2642_v37 = vrot.slane %v15990_v22, %v17215_v0  ;;  %v2537_v21 = vcombine.high %v17528_v2, %v17528_v2 }
 0x235   : > { %v3436_v35 = vcombine.low %v3295_v49, %v3296_v48  ;;  %v2649_v43 = vrot.slane %v2635_v40, %v17215_v0  ;;  %v2544_v52 = vrot.slane %v17528_v2, %v17215_v0  ;;  %v3427_v42 = vrot.slane %v3419_v56, %v17210_v58 }
 0x236   : > { %v17530_v44 = vpop.f32.mrf.mxu1  ;;  %v3437_v14 = vcombine.low %v3297_v50, %v3298_v34  ;;  %v3434_v1 = vrot.slane %v3420_v25, %v17210_v58  ;;  %v2650_v11 = vcombine.high %v2642_v37, %v2642_v37  ;;  %v2658_v15 = vrot.slane %v2642_v37, %v17215_v0 }
 0x237   : > { %v3444_v22 = vrot.slane %v3436_v35, %v17210_v58  ;;  %v2651_v29 = vcombine.high %v2649_v43, %v2649_v43  ;;  %v2665_v51 = vrot.slane %v2649_v43, %v17215_v0 }
 0x238   : > { %v15973_v57 = vpop.f32.mrf.mxu1  ;;  %v3451_v59 = vrot.slane %v3437_v14, %v17210_v58  ;;  %v3435_v39 = vcombine.low %v3427_v42, %v3434_v1  ;;  %v2672_v2 = vrot.slane %v2650_v11, %v17215_v0  ;;  %v2680_v13 = vcombine.high %v2658_v15, %v2658_v15 }
 0x239   : > { %v2979_v26 = vrot.slane %v2658_v15, %v17224_v9  ;;  %v2679_v49 = vrot.slane %v2651_v29, %v17215_v0  ;;  %v2681_v48 = vcombine.high %v2665_v51, %v2665_v51  ;;  %v2995_v50 = vrot.slane %v2665_v51, %v17224_v9 }
 0x23a   : > { %v17545_v33 = vpop.f32.mrf.mxu1  ;;  %v3452_v38 = vcombine.low %v3444_v22, %v3451_v59  ;;  %v14604_v34 = vpack.c.bf16 %v3435_v39, %v3435_v39  ;;  %v2682_v40 = vcombine.high %v2672_v2, %v2672_v2  ;;  %v2983_v57 = vrot.slane %v2672_v2, %v17224_v9 }
 0x23b   : > { %v2987_v56 = vrot.slane %v2680_v13, %v17224_v9  ;;  %v2683_v37 = vcombine.high %v2679_v49, %v2679_v49  ;;  %v2999_v35 = vrot.slane %v2679_v49, %v17224_v9  ;;  %v3003_v14 = vrot.slane %v2681_v48, %v17224_v9 }
 0x23c   : > { %v15974_v41 = vpop.f32.mrf.mxu1  ;;  %v14605_v25 = vpack.c.bf16 %v3452_v38, %v3452_v38  ;;  %3722 = vst [vmem:[#allocation2 + $0x4] sm:$0xf] %v14604_v34  ;;  %v2991_v43 = vrot.slane %v2682_v40, %v17224_v9  ;;  %v3225_v42 = vsel %vm3200_vm8, %v17279_v46, %v2979_v26  ;;  %v3226_v1 = vsel %vm3200_vm8, %v17295_v55, %v2983_v57 }
 0x23d   : > { %v21582_v11 = vcombine.high %v17279_v46, %v17279_v46  ;;  %v3007_v22 = vrot.slane %v2683_v37, %v17224_v9  ;;  %v3229_v59 = vsel %vm3200_vm8, %v17292_v54, %v2995_v50  ;;  %v3230_v29 = vsel %vm3200_vm8, %v17307_v63, %v2999_v35 }
 0x23e   : > { %3723 = vst [vmem:[#allocation2 + $0xc] sm:$0xf] %v14605_v25  ;;  %v21583_v51 = vcombine.high %v17292_v54, %v17292_v54  ;;  %v21584_v39 = vcombine.high %v17295_v55, %v17295_v55  ;;  %v3315_v2 = vadd.f32 %v17218_v3, %v3225_v42  ;;  %v3316_v13 = vadd.f32 %v17236_v18, %v3226_v1 }
 0x23f   : > { %v3227_v15 = vsel %vm3200_vm8, %v21582_v11, %v2987_v56  ;;  %v21585_v38 = vcombine.high %v17307_v63, %v17307_v63  ;;  %v3319_v48 = vadd.f32 %v17218_v3, %v3229_v59  ;;  %v3320_v50 = vadd.f32 %v17236_v18, %v3230_v29 }
 0x240   : > { %v3231_v41 = vsel %vm3200_vm8, %v21583_v51, %v3003_v14  ;;  %v3228_v46 = vsel %vm3200_vm8, %v21584_v39, %v2991_v43  ;;  %v3317_v26 = vadd.f32 %v17221_v4, %v3227_v15  ;;  %v3521_v40 = vcombine.low %v3315_v2, %v3316_v13 }
 0x241   : > { %v3232_v49 = vsel %vm3200_vm8, %v21585_v38, %v3007_v22  ;;  %v3318_v54 = vadd.f32 %v17240_v19, %v3228_v46  ;;  %v3321_v55 = vadd.f32 %v17221_v4, %v3231_v41  ;;  %v2551_v57 = vrot.slane %v2537_v21, %v17215_v0 }
 0x242   : > { %v3322_v34 = vadd.f32 %v17240_v19, %v3232_v49  ;;  %v3538_v25 = vcombine.low %v3319_v48, %v3320_v50  ;;  %v2552_v37 = vcombine.high %v2544_v52, %v2544_v52  ;;  %v2560_v63 = vrot.slane %v2544_v52, %v17215_v0  ;;  %v15993_v49 = vpop.f32.mrf.mxu0 }
 0x243   : > { %v3522_v56 = vcombine.low %v3317_v26, %v3318_v54  ;;  %v3529_v35 = vrot.slane %v3521_v40, %v17210_v58  ;;  %v2553_v43 = vcombine.high %v2551_v57, %v2551_v57  ;;  %v2567_v42 = vrot.slane %v2551_v57, %v17215_v0 }
 0x244   : > { %v3539_v14 = vcombine.low %v3321_v55, %v3322_v34  ;;  %v3546_v11 = vrot.slane %v3538_v25, %v17210_v58  ;;  %v2574_v15 = vrot.slane %v2552_v37, %v17215_v0  ;;  %v2582_v22 = vcombine.high %v2560_v63, %v2560_v63 }
 0x245   : > { %v3536_v1 = vrot.slane %v3522_v56, %v17210_v58  ;;  %v2581_v59 = vrot.slane %v2553_v43, %v17215_v0  ;;  %v2583_v29 = vcombine.high %v2567_v42, %v2567_v42  ;;  %v2915_v52 = vrot.slane %v2560_v63, %v17224_v9 }
 0x246   : > { %v3553_v21 = vrot.slane %v3539_v14, %v17210_v58  ;;  %v2584_v41 = vcombine.high %v2574_v15, %v2574_v15  ;;  %v2919_v39 = vrot.slane %v2574_v15, %v17224_v9  ;;  %v2923_v46 = vrot.slane %v2582_v22, %v17224_v9  ;;  %v2001_v22 = vpop.f32.mrf.mxu0 }
 0x247   : > { %v3537_v51 = vcombine.low %v3529_v35, %v3536_v1  ;;  %v2585_v13 = vcombine.high %v2581_v59, %v2581_v59  ;;  %v2931_v26 = vrot.slane %v2567_v42, %v17224_v9  ;;  %v2935_v38 = vrot.slane %v2581_v59, %v17224_v9 }
 0x248   : > { %v3554_v2 = vcombine.low %v3546_v11, %v3553_v21  ;;  %v2927_v48 = vrot.slane %v2584_v41, %v17224_v9  ;;  %v2939_v50 = vrot.slane %v2583_v29, %v17224_v9  ;;  %v3209_v55 = vsel %vm3200_vm8, %v17315_v8, %v2915_v52 }
 0x249   : > { %v14610_v54 = vpack.c.bf16 %v3537_v51, %v3537_v51  ;;  %v2943_v40 = vrot.slane %v2585_v13, %v17224_v9  ;;  %v3210_v57 = vsel %vm3200_vm8, %v17327_v17, %v2919_v39  ;;  %v21586_v56 = vcombine.high %v17315_v8, %v17315_v8 }
 0x24a   : > { %v14611_v34 = vpack.c.bf16 %v3554_v2, %v3554_v2  ;;  %v21587_v37 = vcombine.high %v17327_v17, %v17327_v17  ;;  %v3213_v35 = vsel %vm3200_vm8, %v17318_v10, %v2931_v26  ;;  %v3214_v14 = vsel %vm3200_vm8, %v17330_v20, %v2935_v38  ;;  %v16419_v26 = vld [vmem:[%s21562_s5 + $0xf8] sm:$0xff]  }
 0x24b   : > { %v3211_v25 = vsel %vm3200_vm8, %v21586_v56, %v2923_v46  ;;  %3749 = vst [vmem:[#allocation2 + $0x64] sm:$0xf] %v14610_v54  ;;  %v21588_v43 = vcombine.high %v17318_v10, %v17318_v10  ;;  %v21589_v8 = vcombine.high %v17330_v20, %v17330_v20  ;;  %v3299_v17 = vadd.f32 %v17218_v3, %v3209_v55 }
 0x24c   : > { %v3212_v63 = vsel %vm3200_vm8, %v21587_v37, %v2927_v48  ;;  %3750 = vst [vmem:[#allocation2 + $0x6c] sm:$0xf] %v14611_v34  ;;  %v3300_v11 = vadd.f32 %v17236_v18, %v3210_v57  ;;  %v3301_v15 = vadd.f32 %v17221_v4, %v3211_v25  ;;  %v3303_v59 = vadd.f32 %v17218_v3, %v3213_v35 }
 0x24d   : > { %v3215_v42 = vsel %vm3200_vm8, %v21588_v43, %v2939_v50  ;;  %v3216_v1 = vsel %vm3200_vm8, %v21589_v8, %v2943_v40  ;;  %v3302_v21 = vadd.f32 %v17240_v19, %v3212_v63  ;;  %v3304_v10 = vadd.f32 %v17236_v18, %v3214_v14  ;;  %14799 = vmatprep.subr.bf16.mxu0 %v16419_v26 }
 0x24e   : > { %v3305_v29 = vadd.f32 %v17221_v4, %v3215_v42  ;;  %v3306_v52 = vadd.f32 %v17240_v19, %v3216_v1  ;;  %v3453_v20 = vcombine.low %v3299_v17, %v3300_v11  ;;  %v2782_v51 = vcombine.high %v15993_v49, %v15993_v49 }
 0x24f   : > { %v2789_v41 = vrot.slane %v15993_v49, %v17215_v0  ;;  %v3454_v39 = vcombine.low %v3301_v15, %v3302_v21  ;;  %v3470_v46 = vcombine.low %v3303_v59, %v3304_v10  ;;  %v2684_v2 = vcombine.high %v2001_v22, %v2001_v22 }
 0x250   : > { %v2691_v13 = vrot.slane %v2001_v22, %v17215_v0  ;;  %v3461_v38 = vrot.slane %v3453_v20, %v17210_v58  ;;  %v3471_v54 = vcombine.low %v3305_v29, %v3306_v52  ;;  %v2796_v48 = vrot.slane %v2782_v51, %v17215_v0 }
 0x251   : > { %v2797_v50 = vcombine.high %v2789_v41, %v2789_v41  ;;  %v3468_v55 = vrot.slane %v3454_v39, %v17210_v58  ;;  %v3478_v34 = vrot.slane %v3470_v46, %v17210_v58  ;;  %v2805_v49 = vrot.slane %v2789_v41, %v17215_v0 }
 0x252   : > { %v2698_v40 = vrot.slane %v2684_v2, %v17215_v0  ;;  %v3485_v57 = vrot.slane %v3471_v54, %v17210_v58  ;;  %v2798_v56 = vcombine.high %v2796_v48, %v2796_v48  ;;  %v2812_v25 = vrot.slane %v2796_v48, %v17215_v0 }
 0x253   : > { %v2819_v37 = vrot.slane %v2797_v50, %v17215_v0  ;;  %v3469_v63 = vcombine.low %v3461_v38, %v3468_v55  ;;  %v2827_v35 = vcombine.high %v2805_v49, %v2805_v49  ;;  %v3075_v14 = vrot.slane %v2805_v49, %v17224_v9 }
 0x254   : > { %v2699_v43 = vcombine.high %v2691_v13, %v2691_v13  ;;  %v3486_v42 = vcombine.low %v3478_v34, %v3485_v57  ;;  %v2826_v8 = vrot.slane %v2798_v56, %v17215_v0  ;;  %v2828_v1 = vcombine.high %v2812_v25, %v2812_v25 }
 0x255   : > { %v2829_v17 = vcombine.high %v2819_v37, %v2819_v37  ;;  %v14606_v11 = vpack.c.bf16 %v3469_v63, %v3469_v63  ;;  %v3079_v15 = vrot.slane %v2819_v37, %v17224_v9  ;;  %v3083_v22 = vrot.slane %v2827_v35, %v17224_v9 }
 0x256   : > { %v3091_v21 = vrot.slane %v2812_v25, %v17224_v9  ;;  %v14607_v59 = vpack.c.bf16 %v3486_v42, %v3486_v42  ;;  %v2830_v10 = vcombine.high %v2826_v8, %v2826_v8  ;;  %v3095_v52 = vrot.slane %v2826_v8, %v17224_v9 }
 0x257   : > { %v3087_v29 = vrot.slane %v2829_v17, %v17224_v9  ;;  %3731 = vst [vmem:[#allocation2 + $0x24] sm:$0xf] %v14606_v11  ;;  %v3099_v20 = vrot.slane %v2828_v1, %v17224_v9  ;;  %v3249_v51 = vsel %vm3200_vm8, %v17324_v16, %v3075_v14  ;;  %v3250_v41 = vsel %vm3200_vm8, %v17343_v30, %v3079_v15 }
 0x258   : > { %v21590_v39 = vcombine.high %v17324_v16, %v17324_v16  ;;  %3732 = vst [vmem:[#allocation2 + $0x2c] sm:$0xf] %v14607_v59  ;;  %v3103_v2 = vrot.slane %v2830_v10, %v17224_v9  ;;  %v21591_v26 = vcombine.high %v17343_v30, %v17343_v30  ;;  %v3253_v54 = vsel %vm3200_vm8, %v17340_v28, %v3091_v21  ;;  %v16420_v30 = vld [vmem:[%s21562_s5 + $0xb8] sm:$0xff]  }
 0x259   : > { %v3254_v48 = vsel %vm3200_vm8, %v17356_v47, %v3095_v52  ;;  %v21592_v50 = vcombine.high %v17340_v28, %v17340_v28  ;;  %v3339_v55 = vadd.f32 %v17218_v3, %v3249_v51  ;;  %v3340_v34 = vadd.f32 %v17236_v18, %v3250_v41  ;;  %14800 = vmatpush3.bf16.msra.mxu0 %v16420_v30 }
 0x25a   : > { %v3251_v46 = vsel %vm3200_vm8, %v21590_v39, %v3083_v22  ;;  %v3252_v38 = vsel %vm3200_vm8, %v21591_v26, %v3087_v29  ;;  %v21593_v57 = vcombine.high %v17356_v47, %v17356_v47  ;;  %v3343_v28 = vadd.f32 %v17218_v3, %v3253_v54 }
 0x25b   : > { %v3255_v16 = vsel %vm3200_vm8, %v21592_v50, %v3099_v20  ;;  %v3341_v49 = vadd.f32 %v17221_v4, %v3251_v46  ;;  %v3342_v25 = vadd.f32 %v17240_v19, %v3252_v38  ;;  %v3344_v37 = vadd.f32 %v17236_v18, %v3254_v48  ;;  %v15994_v48 = vpop.f32.mrf.mxu0 }
 0x25c   : > { %v3256_v56 = vsel %vm3200_vm8, %v21593_v57, %v3103_v2  ;;  %v3345_v63 = vadd.f32 %v17221_v4, %v3255_v16  ;;  %v3623_v14 = vcombine.low %v3339_v55, %v3340_v34  ;;  %v2700_v42 = vcombine.high %v2698_v40, %v2698_v40 }
 0x25d   : > { %v3346_v35 = vadd.f32 %v17240_v19, %v3256_v56  ;;  %v3624_v8 = vcombine.low %v3341_v49, %v3342_v25  ;;  %v3640_v1 = vcombine.low %v3343_v28, %v3344_v37  ;;  %v2707_v17 = vrot.slane %v2691_v13, %v17215_v0 }
 0x25e   : > { %v2714_v47 = vrot.slane %v2698_v40, %v17215_v0  ;;  %v3631_v11 = vrot.slane %v3623_v14, %v17210_v58  ;;  %v2721_v22 = vrot.slane %v2699_v43, %v17215_v0  ;;  %v2728_v21 = vrot.slane %v2700_v42, %v17215_v0 }
 0x25f   : > { %v3641_v15 = vcombine.low %v3345_v63, %v3346_v35  ;;  %v3638_v59 = vrot.slane %v3624_v8, %v17210_v58  ;;  %v3648_v10 = vrot.slane %v3640_v1, %v17210_v58  ;;  %v2729_v29 = vcombine.high %v2707_v17, %v2707_v17 }
 0x260   : > { %v2730_v52 = vcombine.high %v2714_v47, %v2714_v47  ;;  %v2731_v51 = vcombine.high %v2721_v22, %v2721_v22  ;;  %v2732_v41 = vcombine.high %v2728_v21, %v2728_v21  ;;  %v3011_v13 = vrot.slane %v2707_v17, %v17224_v9 }
 0x261   : > { %v3655_v20 = vrot.slane %v3641_v15, %v17210_v58  ;;  %v3639_v40 = vcombine.low %v3631_v11, %v3638_v59  ;;  %v3015_v39 = vrot.slane %v2721_v22, %v17224_v9  ;;  %v3019_v46 = vrot.slane %v2729_v29, %v17224_v9  ;;  %v16421_v29 = vld [vmem:[%s21562_s5 + $0xf0] sm:$0xff]  }
 0x262   : > { %v3027_v43 = vrot.slane %v2714_v47, %v17224_v9  ;;  %v3023_v26 = vrot.slane %v2731_v51, %v17224_v9  ;;  %v3031_v38 = vrot.slane %v2728_v21, %v17224_v9  ;;  %v3035_v54 = vrot.slane %v2730_v52, %v17224_v9  ;;  %v17747_v47 = vpop.f32.mrf.mxu0  ;;  %14801 = vmatprep.subr.bf16.mxu0 %v16421_v29 }
 0x263   : > { %v3656_v2 = vcombine.low %v3648_v10, %v3655_v20  ;;  %v14616_v50 = vpack.c.bf16 %v3639_v40, %v3639_v40  ;;  %v3039_v16 = vrot.slane %v2732_v41, %v17224_v9  ;;  %v3233_v55 = vsel %vm3200_vm8, %v17364_v62, %v3011_v13 }
 0x264   : > { %v3234_v34 = vsel %vm3200_vm8, %v17375_v27, %v3015_v39  ;;  %v21594_v30 = vcombine.high %v17364_v62, %v17364_v62  ;;  %v21595_v56 = vcombine.high %v17375_v27, %v17375_v27  ;;  %v3237_v28 = vsel %vm3200_vm8, %v17372_v23, %v3027_v43 }
 0x265   : > { %v14617_v49 = vpack.c.bf16 %v3656_v2, %v3656_v2  ;;  %3776 = vst [vmem:[#allocation2 + $0xc4] sm:$0xf] %v14616_v50  ;;  %v3238_v37 = vsel %vm3200_vm8, %v17392_v61, %v3031_v38  ;;  %v21596_v63 = vcombine.high %v17372_v23, %v17372_v23  ;;  %v21597_v62 = vcombine.high %v17392_v61, %v17392_v61 }
 0x266   : > { %v3235_v57 = vsel %vm3200_vm8, %v21594_v30, %v3019_v46  ;;  %v3236_v25 = vsel %vm3200_vm8, %v21595_v56, %v3023_v26  ;;  %v3323_v27 = vadd.f32 %v17218_v3, %v3233_v55  ;;  %v3324_v42 = vadd.f32 %v17236_v18, %v3234_v34 }
 0x267   : > { %v3239_v35 = vsel %vm3200_vm8, %v21596_v63, %v3035_v54  ;;  %v3240_v14 = vsel %vm3200_vm8, %v21597_v62, %v3039_v16  ;;  %3777 = vst [vmem:[#allocation2 + $0xcc] sm:$0xf] %v14617_v49  ;;  %v3325_v8 = vadd.f32 %v17221_v4, %v3235_v57  ;;  %v3326_v1 = vadd.f32 %v17240_v19, %v3236_v25 }
 0x268   : > { %v3327_v17 = vadd.f32 %v17218_v3, %v3237_v28  ;;  %v3328_v23 = vadd.f32 %v17236_v18, %v3238_v37  ;;  %v3329_v11 = vadd.f32 %v17221_v4, %v3239_v35  ;;  %v3330_v61 = vadd.f32 %v17240_v19, %v3240_v14 }
 0x269   : > { %v2831_v15 = vcombine.high %v15994_v48, %v15994_v48  ;;  %v3555_v22 = vcombine.low %v3323_v27, %v3324_v42  ;;  %v3556_v21 = vcombine.low %v3325_v8, %v3326_v1  ;;  %v2838_v59 = vrot.slane %v15994_v48, %v17215_v0 }
 0x26a   : > { %v14595_v10 = vpack.c.bf16 %v17257_v32, %v17257_v32  ;;  %v3572_v52 = vcombine.low %v3327_v17, %v3328_v23  ;;  %v3573_v20 = vcombine.low %v3329_v11, %v3330_v61  ;;  %v2733_v41 = vcombine.high %v17747_v47, %v17747_v47 }
 0x26b   : > { %v2845_v51 = vrot.slane %v2831_v15, %v17215_v0  ;;  %v3563_v13 = vrot.slane %v3555_v22, %v17210_v58  ;;  %v3570_v40 = vrot.slane %v3556_v21, %v17210_v58  ;;  %v2846_v39 = vcombine.high %v2838_v59, %v2838_v59 }
 0x26c   : > { %v2854_v46 = vrot.slane %v2838_v59, %v17215_v0  ;;  %1459 = vst [vmem:[#allocation2 + $0xb8] sm:$0xf] %v14595_v10  ;;  %v3580_v32 = vrot.slane %v3572_v52, %v17210_v58  ;;  %v3587_v43 = vrot.slane %v3573_v20, %v17210_v58  ;;  %v21598_v42 = vcombine.high %v17383_v5, %v17383_v5  ;;  %v17800_v10 = vpop.f32.mrf.mxu0 }
 0x26d   : > { %v2847_v2 = vcombine.high %v2845_v51, %v2845_v51  ;;  %v2861_v26 = vrot.slane %v2845_v51, %v17215_v0  ;;  %v3571_v38 = vcombine.low %v3563_v13, %v3570_v40  ;;  %v2868_v54 = vrot.slane %v2846_v39, %v17215_v0  ;;  %v16422_v51 = vld [vmem:[%s21562_s5 + $0xb0] sm:$0xff]  }
 0x26e   : > { %v2876_v48 = vcombine.high %v2854_v46, %v2854_v46  ;;  %v3107_v50 = vrot.slane %v2854_v46, %v17224_v9  ;;  %v3588_v16 = vcombine.low %v3580_v32, %v3587_v43  ;;  %v21599_v11 = vcombine.high %v17386_v45, %v17386_v45  ;;  %14802 = vmatpush3.bf16.msra.mxu0 %v16422_v51 }
 0x26f   : > { %v2875_v55 = vrot.slane %v2847_v2, %v17215_v0  ;;  %v2877_v34 = vcombine.high %v2861_v26, %v2861_v26  ;;  %v3123_v49 = vrot.slane %v2861_v26, %v17224_v9  ;;  %v14612_v30 = vpack.c.bf16 %v3571_v38, %v3571_v38 }
 0x270   : > { %v2878_v57 = vcombine.high %v2868_v54, %v2868_v54  ;;  %v3111_v56 = vrot.slane %v2868_v54, %v17224_v9  ;;  %v3115_v25 = vrot.slane %v2876_v48, %v17224_v9  ;;  %v14613_v28 = vpack.c.bf16 %v3588_v16, %v3588_v16 }
 0x271   : > { %v2879_v37 = vcombine.high %v2875_v55, %v2875_v55  ;;  %v3127_v63 = vrot.slane %v2875_v55, %v17224_v9  ;;  %v3131_v35 = vrot.slane %v2877_v34, %v17224_v9  ;;  %3758 = vst [vmem:[#allocation2 + $0x84] sm:$0xf] %v14612_v30  ;;  %v3257_v14 = vsel %vm3200_vm8, %v17383_v5, %v3107_v50  ;;  %v16423_v50 = vld [vmem:[%s21562_s5 + $0xe8] sm:$0xff]  }
 0x272   : > { %v3119_v62 = vrot.slane %v2878_v57, %v17224_v9  ;;  %v3258_v27 = vsel %vm3200_vm8, %v17400_v6, %v3111_v56  ;;  %v3259_v8 = vsel %vm3200_vm8, %v21598_v42, %v3115_v25  ;;  %3759 = vst [vmem:[#allocation2 + $0x8c] sm:$0xf] %v14613_v28  ;;  %v3261_v17 = vsel %vm3200_vm8, %v17386_v45, %v3123_v49  ;;  %v16424_v34 = vld [vmem:[%s21562_s5 + $0xa8] sm:$0xff]   ;;  %v16425_v42 = vld [vmem:[%s21562_s5 + $0xe0] sm:$0xff]  }
 0x273   : > { %v3135_v1 = vrot.slane %v2879_v37, %v17224_v9  ;;  %v3262_v23 = vsel %vm3200_vm8, %v17403_v53, %v3127_v63  ;;  %v3263_v61 = vsel %vm3200_vm8, %v21599_v11, %v3131_v35  ;;  %v21600_v15 = vcombine.high %v17400_v6, %v17400_v6  ;;  %14803 = vmatprep.subr.bf16.mxu0 %v16423_v50  ;;  %v16426_v11 = vld [vmem:[%s21562_s5 + $0xa0] sm:$0xff]  }
 0x274   : > { %v3347_v22 = vadd.f32 %v17218_v3, %v3257_v14  ;;  %v3348_v21 = vadd.f32 %v17236_v18, %v3258_v27  ;;  %v3349_v59 = vadd.f32 %v17221_v4, %v3259_v8  ;;  %v21601_v29 = vcombine.high %v17403_v53, %v17403_v53  ;;  %14804 = vmatpush3.bf16.msra.mxu0 %v16424_v34 }
 0x275   : > { %v3260_v5 = vsel %vm3200_vm8, %v21600_v15, %v3119_v62  ;;  %v3351_v20 = vadd.f32 %v17218_v3, %v3261_v17  ;;  %v3352_v6 = vadd.f32 %v17236_v18, %v3262_v23  ;;  %v3353_v13 = vadd.f32 %v17221_v4, %v3263_v61  ;;  %14805 = vmatprep.subr.bf16.mxu0 %v16425_v42 }
 0x276   : > { %v3264_v45 = vsel %vm3200_vm8, %v21601_v29, %v3135_v1  ;;  %v3350_v52 = vadd.f32 %v17240_v19, %v3260_v5  ;;  %v3657_v39 = vcombine.low %v3347_v22, %v3348_v21  ;;  %v2740_v53 = vrot.slane %v17747_v47, %v17215_v0  ;;  %v3826_v21 = vpop.f32.mrf.mxu0 }
 0x277   : > { %v3354_v40 = vadd.f32 %v17240_v19, %v3264_v45  ;;  %v3674_v32 = vcombine.low %v3351_v20, %v3352_v6  ;;  %v2747_v43 = vrot.slane %v2733_v41, %v17215_v0  ;;  %v4033_v2 = vcombine.high %v17800_v10, %v17800_v10 }
 0x278   : > { %v3658_v46 = vcombine.low %v3349_v59, %v3350_v52  ;;  %v3665_v26 = vrot.slane %v3657_v39, %v17210_v58  ;;  %v2748_v54 = vcombine.high %v2740_v53, %v2740_v53  ;;  %v2756_v48 = vrot.slane %v2740_v53, %v17215_v0  ;;  %14806 = vmatpush3.bf16.msra.mxu0 %v16426_v11  ;;  %v16427_v53 = vld [vmem:[%s21562_s5 + $0xd8] sm:$0xff]  }
 0x279   : > { %v3675_v38 = vcombine.low %v3353_v13, %v3354_v40  ;;  %v3682_v16 = vrot.slane %v3674_v32, %v17210_v58  ;;  %v2749_v55 = vcombine.high %v2747_v43, %v2747_v43  ;;  %v2763_v41 = vrot.slane %v2747_v43, %v17215_v0  ;;  %14807 = vmatprep.subr.bf16.mxu0 %v16427_v53 }
 0x27a   : > { %v3672_v47 = vrot.slane %v3658_v46, %v17210_v58  ;;  %v2770_v30 = vrot.slane %v2748_v54, %v17215_v0  ;;  %v2778_v57 = vcombine.high %v2756_v48, %v2756_v48  ;;  %v3043_v56 = vrot.slane %v2756_v48, %v17224_v9 }
 0x27b   : > { %v3689_v49 = vrot.slane %v3675_v38, %v17210_v58  ;;  %v2777_v28 = vrot.slane %v2749_v55, %v17215_v0  ;;  %v2779_v37 = vcombine.high %v2763_v41, %v2763_v41  ;;  %v3059_v63 = vrot.slane %v2763_v41, %v17224_v9 }
 0x27c   : > { %v3673_v25 = vcombine.low %v3665_v26, %v3672_v47  ;;  %v2780_v62 = vcombine.high %v2770_v30, %v2770_v30  ;;  %v3047_v14 = vrot.slane %v2770_v30, %v17224_v9  ;;  %v3051_v27 = vrot.slane %v2778_v57, %v17224_v9  ;;  %v16428_v26 = vld [vmem:[%s21562_s5 + $0x98] sm:$0xff]  }
 0x27d   : > { %v3690_v35 = vcombine.low %v3682_v16, %v3689_v49  ;;  %v2781_v1 = vcombine.high %v2777_v28, %v2777_v28  ;;  %v3063_v17 = vrot.slane %v2777_v28, %v17224_v9  ;;  %v3067_v23 = vrot.slane %v2779_v37, %v17224_v9  ;;  %14808 = vmatpush3.bf16.msra.mxu0 %v16428_v26 }
 0x27e   : > { %v14618_v8 = vpack.c.bf16 %v3673_v25, %v3673_v25  ;;  %v3055_v15 = vrot.slane %v2780_v62, %v17224_v9  ;;  %v3241_v5 = vsel %vm3200_vm8, %v17412_v7, %v3043_v56  ;;  %v3242_v22 = vsel %vm3200_vm8, %v17422_v60, %v3047_v14  ;;  %v16429_v56 = vld [vmem:[%s21562_s5 + $0xd0] sm:$0xff]  }
 0x27f   : > { %v14619_v61 = vpack.c.bf16 %v3690_v35, %v3690_v35  ;;  %v3071_v59 = vrot.slane %v2781_v1, %v17224_v9  ;;  %v21602_v29 = vcombine.high %v17412_v7, %v17412_v7  ;;  %v3245_v52 = vsel %vm3200_vm8, %v17419_v31, %v3059_v63  ;;  %14809 = vmatprep.subr.bf16.mxu0 %v16429_v56 }
 0x280   : > { %3785 = vst [vmem:[#allocation2 + $0xe4] sm:$0xf] %v14618_v8  ;;  %v3246_v20 = vsel %vm3200_vm8, %v17425_v36, %v3063_v17  ;;  %v21603_v6 = vcombine.high %v17422_v60, %v17422_v60  ;;  %v21604_v13 = vcombine.high %v17419_v31, %v17419_v31  ;;  %v3331_v40 = vadd.f32 %v17218_v3, %v3241_v5  ;;  %v16431_v5 = vld [vmem:[%s21562_s5 + $0xc8] sm:$0xff]  }
 0x281   : > { %v3243_v45 = vsel %vm3200_vm8, %v21602_v29, %v3051_v27  ;;  %3786 = vst [vmem:[#allocation2 + $0xec] sm:$0xf] %v14619_v61  ;;  %v3332_v39 = vadd.f32 %v17236_v18, %v3242_v22  ;;  %v21605_v46 = vcombine.high %v17425_v36, %v17425_v36  ;;  %v3335_v31 = vadd.f32 %v17218_v3, %v3245_v52  ;;  %v16000_v36 = vpop.f32.mrf.mxu0 }
 0x282   : > { %v3244_v51 = vsel %vm3200_vm8, %v21603_v6, %v3055_v15  ;;  %v3247_v7 = vsel %vm3200_vm8, %v21604_v13, %v3067_v23  ;;  %v3333_v32 = vadd.f32 %v17221_v4, %v3243_v45  ;;  %v3336_v38 = vadd.f32 %v17236_v18, %v3246_v20  ;;  %v16432_v45 = vld [vmem:[%s21562_s5 + $0x88] sm:$0xff]  }
 0x283   : > { %v3248_v60 = vsel %vm3200_vm8, %v21605_v46, %v3071_v59  ;;  %v3334_v43 = vadd.f32 %v17240_v19, %v3244_v51  ;;  %v3337_v54 = vadd.f32 %v17221_v4, %v3247_v7  ;;  %v3589_v50 = vcombine.low %v3331_v40, %v3332_v39  ;;  %v3829_v27 = vpop.f32.mrf.mxu0  ;;  %v16435_v7 = vld [vmem:[%s21562_s5 + $0xc0] sm:$0xff]  }
 0x284   : > { %v3338_v48 = vadd.f32 %v17240_v19, %v3248_v60  ;;  %v4040_v16 = vrot.slane %v17800_v10, %v17215_v0  ;;  %v4047_v55 = vrot.slane %v4033_v2, %v17215_v0  ;;  %v3935_v41 = vcombine.high %v3826_v21, %v3826_v21  ;;  %v16430_v10 = vld [vmem:[%s21562_s5 + $0x90] sm:$0xff]   ;;  %v16437_v60 = vld [vmem:[%s21562_s5 + $0x80] sm:$0xff]  }
 0x285   : > { %v3590_v47 = vcombine.low %v3333_v32, %v3334_v43  ;;  %v3597_v34 = vrot.slane %v3589_v50, %v17210_v58  ;;  %v3606_v49 = vcombine.low %v3335_v31, %v3336_v38  ;;  %v3942_v57 = vrot.slane %v3826_v21, %v17215_v0  ;;  %14810 = vmatpush3.bf16.msra.mxu0 %v16430_v10  ;;  %v16003_v13 = vpop.f32.mrf.mxu0  ;;  %v16440_v38 = vld [vmem:[%s21562_s5 + $0x178] sm:$0xff]  }
 0x286   : > { %v3607_v30 = vcombine.low %v3337_v54, %v3338_v48  ;;  %v4048_v28 = vcombine.high %v4040_v16, %v4040_v16  ;;  %v4049_v37 = vcombine.high %v4047_v55, %v4047_v55  ;;  %v17898_v63 = vrot.slane %v4040_v16, %v17215_v0  ;;  %14811 = vmatprep.subr.bf16.mxu0 %v16431_v5 }
 0x287   : > { %v3604_v25 = vrot.slane %v3590_v47, %v17210_v58  ;;  %v3614_v2 = vrot.slane %v3606_v49, %v17210_v58  ;;  %v17906_v62 = vrot.slane %v4047_v55, %v17215_v0  ;;  %v3949_v14 = vrot.slane %v3935_v41, %v17215_v0 }
 0x288   : > { %v3621_v35 = vrot.slane %v3607_v30, %v17210_v58  ;;  %v17910_v8 = vrot.slane %v4048_v28, %v17215_v0  ;;  %v17913_v1 = vrot.slane %v4049_v37, %v17215_v0  ;;  %v4078_v17 = vcombine.high %v17898_v63, %v17898_v63 }
 0x289   : > { %v3605_v42 = vcombine.low %v3597_v34, %v3604_v25  ;;  %v4079_v11 = vcombine.high %v17906_v62, %v17906_v62  ;;  %v3950_v61 = vcombine.high %v3942_v57, %v3942_v57  ;;  %v3951_v15 = vcombine.high %v3949_v14, %v3949_v14  ;;  %14812 = vmatpush3.bf16.msra.mxu0 %v16432_v45  ;;  %v3842_v34 = vpop.f32.mrf.mxu0 }
 0x28a   : > { %v3622_v23 = vcombine.low %v3614_v2, %v3621_v35  ;;  %v17927_v29 = vrot.slane %v3942_v57, %v17215_v0  ;;  %v17933_v20 = vrot.slane %v3949_v14, %v17215_v0  ;;  %v4082_v39 = vcombine.high %v16000_v36, %v16000_v36  ;;  %14813 = vmatprep.subr.bf16.mxu0 %v16435_v7 }
 0x28b   : > { %v14614_v22 = vpack.c.bf16 %v3605_v42, %v3605_v42  ;;  %v17936_v6 = vrot.slane %v3950_v61, %v17215_v0  ;;  %v17939_v51 = vrot.slane %v3951_v15, %v17215_v0  ;;  %v4089_v53 = vrot.slane %v16000_v36, %v17215_v0  ;;  %v16004_v15 = vpop.f32.mrf.mxu0 }
 0x28c   : > { %v14615_v52 = vpack.c.bf16 %v3622_v23, %v3622_v23  ;;  %v3984_v46 = vcombine.high %v3829_v27, %v3829_v27  ;;  %v3991_v26 = vrot.slane %v3829_v27, %v17215_v0  ;;  %v4096_v54 = vrot.slane %v4082_v39, %v17215_v0 }
 0x28d   : > { %3767 = vst [vmem:[#allocation2 + $0xa4] sm:$0xf] %v14614_v22  ;;  %v4097_v48 = vcombine.high %v4089_v53, %v4089_v53  ;;  %v17962_v50 = vrot.slane %v4089_v53, %v17215_v0  ;;  %v14598_v55 = vpack.c.bf16 %v17486_v12, %v17486_v12  ;;  %v4229_v41 = vcombine.high %v16003_v13, %v16003_v13 }
 0x28e   : > { %3768 = vst [vmem:[#allocation2 + $0xac] sm:$0xf] %v14615_v52  ;;  %v3998_v36 = vrot.slane %v3984_v46, %v17215_v0  ;;  %v3999_v47 = vcombine.high %v3991_v26, %v3991_v26  ;;  %v17966_v16 = vrot.slane %v3991_v26, %v17215_v0  ;;  %v4098_v49 = vcombine.high %v4096_v54, %v4096_v54 }
 0x28f   : > { %v17971_v30 = vrot.slane %v4096_v54, %v17215_v0  ;;  %v17974_v57 = vrot.slane %v4097_v48, %v17215_v0  ;;  %14814 = vmatpush3.bf16.msra.mxu0 %v16437_v60  ;;  %1650 = vst [vmem:[#allocation2 + $0xd0] sm:$0xf] %v14598_v55  ;;  %v4236_v14 = vrot.slane %v16003_v13, %v17215_v0  ;;  %v3845_v55 = vpop.f32.mrf.mxu0  ;;  %v16009_v48 = vpop.f32.mrf.mxu1 }
 0x290   : > { %v4000_v25 = vcombine.high %v3998_v36, %v3998_v36  ;;  %v17979_v28 = vrot.slane %v3998_v36, %v17215_v0  ;;  %v17982_v37 = vrot.slane %v3999_v47, %v17215_v0  ;;  %14999 = vmatprep.subr.bf16.mxu0 %v16440_v38  ;;  %v17987_v10 = vrot.slane %v4098_v49, %v17215_v0 }
 0x291   : > { %v4243_v61 = vrot.slane %v4229_v41, %v17215_v0  ;;  %v4244_v22 = vcombine.high %v4236_v14, %v4236_v14  ;;  %v18005_v45 = vrot.slane %v4236_v14, %v17215_v0  ;;  %v4131_v52 = vcombine.high %v3842_v34, %v3842_v34  ;;  %v3896_v42 = vpop.f32.mrf.mxu1 }
 0x292   : > { %v17995_v27 = vrot.slane %v4000_v25, %v17215_v0  ;;  %v4138_v53 = vrot.slane %v3842_v34, %v17215_v0  ;;  %v14599_v38 = vpack.c.bf16 %v17498_v24, %v17498_v24  ;;  %v4278_v24 = vcombine.high %v16004_v15, %v16004_v15 }
 0x293   : > { %v4245_v7 = vcombine.high %v4243_v61, %v4243_v61  ;;  %v18010_v39 = vrot.slane %v4243_v61, %v17215_v0  ;;  %v18014_v46 = vrot.slane %v4244_v22, %v17215_v0  ;;  %v4145_v26 = vrot.slane %v4131_v52, %v17215_v0 }
 0x294   : > { %v4146_v36 = vcombine.high %v4138_v53, %v4138_v53  ;;  %v18027_v47 = vrot.slane %v4138_v53, %v17215_v0  ;;  %1651 = vst [vmem:[#allocation2 + $0xd8] sm:$0xf] %v14599_v38  ;;  %v4285_v22 = vrot.slane %v16004_v15, %v17215_v0  ;;  %v4292_v53 = vrot.slane %v4278_v24, %v17215_v0 }
 0x295   : > { %v18022_v54 = vrot.slane %v4245_v7, %v17215_v0  ;;  %v4147_v34 = vcombine.high %v4145_v26, %v4145_v26  ;;  %v18032_v49 = vrot.slane %v4145_v26, %v17215_v0  ;;  %v4180_v26 = vcombine.high %v3845_v55, %v3845_v55 }
 0x296   : > { %v18037_v14 = vrot.slane %v4146_v36, %v17215_v0  ;;  %v4293_v25 = vcombine.high %v4285_v22, %v4285_v22  ;;  %v18051_v36 = vrot.slane %v4285_v22, %v17215_v0  ;;  %v4187_v61 = vrot.slane %v3845_v55, %v17215_v0 }
 0x297   : > { %v18043_v52 = vrot.slane %v4147_v34, %v17215_v0  ;;  %v4294_v34 = vcombine.high %v4292_v53, %v4292_v53  ;;  %v18057_v41 = vrot.slane %v4292_v53, %v17215_v0  ;;  %v4194_v24 = vrot.slane %v4180_v26, %v17215_v0  ;;  %v5672_v26 = vld [vmem:[#allocation2 + $0x8] sm:$0xff] }
 0x298   : > { %v18061_v7 = vrot.slane %v4293_v25, %v17215_v0  ;;  %v4195_v22 = vcombine.high %v4187_v61, %v4187_v61  ;;  %v18066_v60 = vrot.slane %v4187_v61, %v17215_v0  ;;  %v5671_v25 = vld [vmem:[#allocation2] sm:$0xff]  ;;  %v4497_v5 = vcombine.high %v16009_v48, %v16009_v48 }
 0x299   : > { %v18069_v55 = vrot.slane %v4294_v34, %v17215_v0  ;;  %v4196_v53 = vcombine.high %v4194_v24, %v4194_v24  ;;  %v18074_v13 = vrot.slane %v4194_v24, %v17215_v0  ;;  %v14602_v34 = vpack.c.bf16 %v17530_v44, %v17530_v44 }
 0x29a   : > { %v18079_v38 = vrot.slane %v4195_v22, %v17215_v0  ;;  %v14603_v22 = vpack.c.bf16 %v17545_v33, %v17545_v33  ;;  %v18096_v12 = vcombine.low %v5671_v25, %v5672_v26  ;;  %v18098_v44 = vcombine.high %v5671_v25, %v5672_v26 }
 0x29b   : > { %v18088_v24 = vrot.slane %v4196_v53, %v17215_v0  ;;  %1842 = vst [vmem:[#allocation2 + $0xf0] sm:$0xf] %v14602_v34  ;;  %v4504_v15 = vrot.slane %v16009_v48, %v17215_v0  ;;  %v4399_v23 = vcombine.high %v3896_v42, %v3896_v42  ;;  %v4406_v35 = vrot.slane %v3896_v42, %v17215_v0 }
 0x29c   : > { %1843 = vst [vmem:[#allocation2 + $0xf8] sm:$0xf] %v14603_v22  ;;  %v5886_v2 = vshll.u32 %v18096_v12, 16  ;;  %6540 = vmatprep.mubr.bf16.mxu1 %v18098_v44  ;;  %v4511_v26 = vrot.slane %v4497_v5, %v17215_v0 }
 0x29d   : > { %6541 = vmatmul.mubr.bf16.vlgmr.msra.gmra.mxu1 %v18096_v12  ;;  %v4512_v25 = vcombine.high %v4504_v15, %v4504_v15  ;;  %v4520_v22 = vrot.slane %v4504_v15, %v17215_v0  ;;  %v4413_v48 = vrot.slane %v4399_v23, %v17215_v0  ;;  %v4414_v53 = vcombine.high %v4406_v35, %v4406_v35 }
 0x29e   : > { %v18112_v61 = vrot.slane %v5886_v2, 1  ;;  %v4513_v42 = vcombine.high %v4511_v26, %v4511_v26  ;;  %v4527_v33 = vrot.slane %v4511_v26, %v17215_v0  ;;  %v4422_v56 = vrot.slane %v4406_v35, %v17215_v0 }
 0x29f   : > { %v4534_v34 = vrot.slane %v4512_v25, %v17215_v0  ;;  %v4542_v31 = vcombine.high %v4520_v22, %v4520_v22  ;;  %v4858_v5 = vrot.slane %v4520_v22, %v17224_v9  ;;  %v4415_v32 = vcombine.high %v4413_v48, %v4413_v48 }
 0x2a0   : > { %v4541_v43 = vrot.slane %v4513_v42, %v17215_v0  ;;  %v4543_v40 = vcombine.high %v4527_v33, %v4527_v33  ;;  %v4874_v15 = vrot.slane %v4527_v33, %v17224_v9  ;;  %v4429_v23 = vrot.slane %v4413_v48, %v17215_v0 }
 0x2a1   : > { %v4544_v2 = vcombine.high %v4534_v34, %v4534_v34  ;;  %v4862_v59 = vrot.slane %v4534_v34, %v17224_v9  ;;  %v4866_v26 = vrot.slane %v4542_v31, %v17224_v9  ;;  %v5127_v35 = vsel %vm3200_vm8, %v17898_v63, %v4858_v5 }
 0x2a2   : > { %v4545_v25 = vcombine.high %v4541_v43, %v4541_v43  ;;  %v4878_v21 = vrot.slane %v4541_v43, %v17224_v9  ;;  %v4882_v22 = vrot.slane %v4543_v40, %v17224_v9  ;;  %v5131_v42 = vsel %vm3200_vm8, %v17906_v62, %v4874_v15 }
 0x2a3   : > { %v4870_v33 = vrot.slane %v4544_v2, %v17224_v9  ;;  %v5128_v48 = vsel %vm3200_vm8, %v17910_v8, %v4862_v59  ;;  %v5129_v31 = vsel %vm3200_vm8, %v4078_v17, %v4866_v26  ;;  %v5191_v34 = vadd.f32 %v5127_v35, %v17218_v3 }
 0x2a4   : > { %v4886_v5 = vrot.slane %v4545_v25, %v17224_v9  ;;  %v5132_v40 = vsel %vm3200_vm8, %v17913_v1, %v4878_v21  ;;  %v5133_v43 = vsel %vm3200_vm8, %v4079_v11, %v4882_v22  ;;  %v5192_v15 = vadd.f32 %v5128_v48, %v17236_v18 }
 0x2a5   : > { %v21606_v59 = vcombine.high %v17910_v8, %v17910_v8  ;;  %v5193_v17 = vadd.f32 %v5129_v31, %v17221_v4  ;;  %v5195_v2 = vadd.f32 %v5131_v42, %v17218_v3  ;;  %v5196_v26 = vadd.f32 %v5132_v40, %v17236_v18 }
 0x2a6   : > { %v21607_v21 = vcombine.high %v17913_v1, %v17913_v1  ;;  %v5197_v35 = vadd.f32 %v5133_v43, %v17221_v4  ;;  %v5371_v25 = vcombine.low %v5191_v34, %v5192_v15  ;;  %v4443_v48 = vrot.slane %v4415_v32, %v17215_v0 }
 0x2a7   : > { %v5130_v63 = vsel %vm3200_vm8, %v21606_v59, %v4870_v33  ;;  %v5388_v22 = vcombine.low %v5195_v2, %v5196_v26  ;;  %v4436_v33 = vrot.slane %v4414_v53, %v17215_v0  ;;  %v4444_v40 = vcombine.high %v4422_v56, %v4422_v56 }
 0x2a8   : > { %v5134_v62 = vsel %vm3200_vm8, %v21607_v21, %v4886_v5  ;;  %v5194_v11 = vadd.f32 %v5130_v63, %v17240_v19  ;;  %v5379_v31 = vrot.slane %v5371_v25, %v17210_v58  ;;  %v4445_v59 = vcombine.high %v4429_v23, %v4429_v23 }
 0x2a9   : > { %v5198_v8 = vadd.f32 %v5134_v62, %v17240_v19  ;;  %v5396_v5 = vrot.slane %v5388_v22, %v17210_v58  ;;  %v4446_v21 = vcombine.high %v4436_v33, %v4436_v33  ;;  %v4447_v63 = vcombine.high %v4443_v48, %v4443_v48  ;;  %v16010_v62 = vpop.f32.mrf.mxu1 }
 0x2aa   : > { %v5372_v42 = vcombine.low %v5193_v17, %v5194_v11  ;;  %v4794_v34 = vrot.slane %v4422_v56, %v17224_v9  ;;  %v4798_v15 = vrot.slane %v4436_v33, %v17224_v9  ;;  %v4802_v53 = vrot.slane %v4444_v40, %v17224_v9 }
 0x2ab   : > { %v5389_v1 = vcombine.low %v5197_v35, %v5198_v8  ;;  %v4806_v17 = vrot.slane %v4446_v21, %v17224_v9  ;;  %v4810_v2 = vrot.slane %v4429_v23, %v17224_v9  ;;  %v4814_v26 = vrot.slane %v4443_v48, %v17224_v9 }
 0x2ac   : > { %v5386_v43 = vrot.slane %v5372_v42, %v17210_v58  ;;  %v4818_v35 = vrot.slane %v4445_v59, %v17224_v9  ;;  %v4822_v25 = vrot.slane %v4447_v63, %v17224_v9  ;;  %v5111_v56 = vsel %vm3200_vm8, %v17927_v29, %v4794_v34  ;;  %v3899_v34 = vpop.f32.mrf.mxu1 }
 0x2ad   : > { %v5403_v32 = vrot.slane %v5389_v1, %v17210_v58  ;;  %v5112_v22 = vsel %vm3200_vm8, %v17936_v6, %v4798_v15  ;;  %v21608_v33 = vcombine.high %v17927_v29, %v17927_v29  ;;  %v21609_v48 = vcombine.high %v17936_v6, %v17936_v6 }
 0x2ae   : > { %v5387_v11 = vcombine.low %v5379_v31, %v5386_v43  ;;  %v5115_v40 = vsel %vm3200_vm8, %v17933_v20, %v4810_v2  ;;  %v5116_v59 = vsel %vm3200_vm8, %v17939_v51, %v4814_v26  ;;  %v21610_v1 = vcombine.high %v17933_v20, %v17933_v20 }
 0x2af   : > { %v5404_v8 = vcombine.low %v5396_v5, %v5403_v32  ;;  %v5113_v23 = vsel %vm3200_vm8, %v21608_v33, %v4802_v53  ;;  %v5114_v42 = vsel %vm3200_vm8, %v21609_v48, %v4806_v17  ;;  %v21611_v21 = vcombine.high %v17939_v51, %v17939_v51 }
 0x2b0   : > { %v14624_v31 = vpack.c.bf16 %v5387_v11, %v5387_v11  ;;  %v5117_v5 = vsel %vm3200_vm8, %v21610_v1, %v4818_v35  ;;  %v5175_v63 = vadd.f32 %v5111_v56, %v17218_v3  ;;  %v5176_v43 = vadd.f32 %v5112_v22, %v17236_v18 }
 0x2b1   : > { %v14625_v29 = vpack.c.bf16 %v5404_v8, %v5404_v8  ;;  %v5118_v6 = vsel %vm3200_vm8, %v21611_v21, %v4822_v25  ;;  %v5177_v15 = vadd.f32 %v5113_v23, %v17221_v4  ;;  %v5178_v53 = vadd.f32 %v5114_v42, %v17240_v19 }
 0x2b2   : > { %5624 = vst [vmem:[#allocation2 + $0x54] sm:$0xf] %v14624_v31  ;;  %v5179_v20 = vadd.f32 %v5115_v40, %v17218_v3  ;;  %v5180_v32 = vadd.f32 %v5116_v59, %v17236_v18  ;;  %v5181_v17 = vadd.f32 %v5117_v5, %v17221_v4  ;;  %v5182_v51 = vadd.f32 %v5118_v6, %v17240_v19 }
 0x2b3   : > { %5625 = vst [vmem:[#allocation2 + $0x5c] sm:$0xf] %v14625_v29  ;;  %v5303_v2 = vcombine.low %v5175_v63, %v5176_v43  ;;  %v4546_v26 = vcombine.high %v16010_v62, %v16010_v62  ;;  %v5304_v11 = vcombine.low %v5177_v15, %v5178_v53  ;;  %v4553_v25 = vrot.slane %v16010_v62, %v17215_v0 }
 0x2b4   : > { %v5320_v35 = vcombine.low %v5179_v20, %v5180_v32  ;;  %v4448_v56 = vcombine.high %v3899_v34, %v3899_v34  ;;  %v5321_v22 = vcombine.low %v5181_v17, %v5182_v51  ;;  %v4455_v23 = vrot.slane %v3899_v34, %v17215_v0 }
 0x2b5   : > { %v5311_v8 = vrot.slane %v5303_v2, %v17210_v58  ;;  %v4560_v33 = vrot.slane %v4546_v26, %v17215_v0  ;;  %v5318_v48 = vrot.slane %v5304_v11, %v17210_v58  ;;  %v4561_v31 = vcombine.high %v4553_v25, %v4553_v25 }
 0x2b6   : > { %v5328_v42 = vrot.slane %v5320_v35, %v17210_v58  ;;  %v4569_v40 = vrot.slane %v4553_v25, %v17215_v0  ;;  %v5335_v59 = vrot.slane %v5321_v22, %v17210_v58  ;;  %v4462_v5 = vrot.slane %v4448_v56, %v17215_v0 }
 0x2b7   : > { %v4562_v1 = vcombine.high %v4560_v33, %v4560_v33  ;;  %v4576_v62 = vrot.slane %v4560_v33, %v17215_v0  ;;  %v5319_v29 = vcombine.low %v5311_v8, %v5318_v48  ;;  %v4583_v21 = vrot.slane %v4561_v31, %v17215_v0 }
 0x2b8   : > { %v4591_v6 = vcombine.high %v4569_v40, %v4569_v40  ;;  %v4890_v63 = vrot.slane %v4569_v40, %v17224_v9  ;;  %v5336_v43 = vcombine.low %v5328_v42, %v5335_v59  ;;  %v21612_v22 = vcombine.high %v17962_v50, %v17962_v50 }
 0x2b9   : > { %v4590_v34 = vrot.slane %v4562_v1, %v17215_v0  ;;  %v4592_v15 = vcombine.high %v4576_v62, %v4576_v62  ;;  %v4906_v53 = vrot.slane %v4576_v62, %v17224_v9  ;;  %v14620_v20 = vpack.c.bf16 %v5319_v29, %v5319_v29 }
 0x2ba   : > { %v4593_v32 = vcombine.high %v4583_v21, %v4583_v21  ;;  %v4894_v17 = vrot.slane %v4583_v21, %v17224_v9  ;;  %v4898_v51 = vrot.slane %v4591_v6, %v17224_v9  ;;  %v14621_v2 = vpack.c.bf16 %v5336_v43, %v5336_v43 }
 0x2bb   : > { %v4594_v26 = vcombine.high %v4590_v34, %v4590_v34  ;;  %v4910_v11 = vrot.slane %v4590_v34, %v17224_v9  ;;  %v4914_v35 = vrot.slane %v4592_v15, %v17224_v9  ;;  %5606 = vst [vmem:[#allocation2 + $0x14] sm:$0xf] %v14620_v20  ;;  %v5135_v56 = vsel %vm3200_vm8, %v17962_v50, %v4890_v63 }
 0x2bc   : > { %v4902_v25 = vrot.slane %v4593_v32, %v17224_v9  ;;  %v5136_v8 = vsel %vm3200_vm8, %v17974_v57, %v4894_v17  ;;  %v5137_v33 = vsel %vm3200_vm8, %v21612_v22, %v4898_v51  ;;  %5607 = vst [vmem:[#allocation2 + $0x1c] sm:$0xf] %v14621_v2  ;;  %v5139_v42 = vsel %vm3200_vm8, %v17971_v30, %v4906_v53 }
 0x2bd   : > { %v4918_v48 = vrot.slane %v4594_v26, %v17224_v9  ;;  %v5140_v31 = vsel %vm3200_vm8, %v17987_v10, %v4910_v11  ;;  %v21613_v40 = vcombine.high %v17971_v30, %v17971_v30  ;;  %v21614_v1 = vcombine.high %v17974_v57, %v17974_v57 }
 0x2be   : > { %v5199_v62 = vadd.f32 %v5135_v56, %v17218_v3  ;;  %v5200_v29 = vadd.f32 %v5136_v8, %v17236_v18  ;;  %v5201_v21 = vadd.f32 %v5137_v33, %v17221_v4  ;;  %v21615_v6 = vcombine.high %v17987_v10, %v17987_v10 }
 0x2bf   : > { %v5141_v59 = vsel %vm3200_vm8, %v21613_v40, %v4914_v35  ;;  %v5138_v50 = vsel %vm3200_vm8, %v21614_v1, %v4902_v25  ;;  %v5203_v43 = vadd.f32 %v5139_v42, %v17218_v3  ;;  %v5204_v34 = vadd.f32 %v5140_v31, %v17236_v18  ;;  %v18268_v40 = vld [vmem:[#allocation2 + $0x10] ss:$8 sps:$4 sm:$0xff]  }
 0x2c0   : > { %v5142_v63 = vsel %vm3200_vm8, %v21615_v6, %v4918_v48  ;;  %v5202_v30 = vadd.f32 %v5138_v50, %v17240_v19  ;;  %v5205_v57 = vadd.f32 %v5141_v59, %v17221_v4  ;;  %v5405_v53 = vcombine.low %v5199_v62, %v5200_v29  ;;  %v16475_v62 = vld [vmem:[%s21562_s5 + $0x1f8] sm:$0xff]  }
 0x2c1   : > { %v5206_v15 = vadd.f32 %v5142_v63, %v17240_v19  ;;  %v4463_v20 = vcombine.high %v4455_v23, %v4455_v23  ;;  %v5422_v17 = vcombine.low %v5203_v43, %v5204_v34  ;;  %v4464_v51 = vcombine.high %v4462_v5, %v4462_v5  ;;  %v18279_v43 = vld [vmem:[#allocation2 + $0x24] ss:$8 sps:$4 sm:$0xff]   ;;  %v16478_v34 = vld [vmem:[%s21562_s5 + $0x1b8] sm:$0xff]   ;;  %15099 = vmatprep.subr.bf16.mxu1 %v16475_v62 }
 0x2c2   : > { %v5406_v32 = vcombine.low %v5201_v21, %v5202_v30  ;;  %v4471_v2 = vrot.slane %v4455_v23, %v17215_v0  ;;  %v5413_v10 = vrot.slane %v5405_v53, %v17210_v58  ;;  %v4478_v11 = vrot.slane %v4462_v5, %v17215_v0  ;;  %v16013_v30 = vpop.f32.mrf.mxu1  ;;  %15100 = vmatpush3.bf16.msra.mxu1 %v16478_v34 }
 0x2c3   : > { %v5423_v26 = vcombine.low %v5205_v57, %v5206_v15  ;;  %v4485_v35 = vrot.slane %v4463_v20, %v17215_v0  ;;  %v5430_v56 = vrot.slane %v5422_v17, %v17210_v58  ;;  %v4492_v8 = vrot.slane %v4464_v51, %v17215_v0  ;;  %v18266_v31 = vld [vmem:[#allocation2 + $0x14] ss:$8 sps:$4 sm:$0xff]  }
 0x2c4   : > { %v5420_v25 = vrot.slane %v5406_v32, %v17210_v58  ;;  %v4493_v22 = vcombine.high %v4471_v2, %v4471_v2  ;;  %v4494_v48 = vcombine.high %v4478_v11, %v4478_v11  ;;  %v4826_v23 = vrot.slane %v4471_v2, %v17224_v9  ;;  %6548 = vmatprep.mubr.bf16.mxu1 %v18266_v31  ;;  %v16481_v32 = vld [vmem:[%s21562_s5 + $0x1f0] sm:$0xff]  }
 0x2c5   : > { %v5437_v33 = vrot.slane %v5423_v26, %v17210_v58  ;;  %v4495_v42 = vcombine.high %v4485_v35, %v4485_v35  ;;  %v4496_v59 = vcombine.high %v4492_v8, %v4492_v8  ;;  %v4830_v1 = vrot.slane %v4485_v35, %v17224_v9  ;;  %6549 = vmatmul.mubr.bf16.gmra.mxu1 %v18268_v40 }
 0x2c6   : > { %v5421_v5 = vcombine.low %v5413_v10, %v5420_v25  ;;  %v4834_v50 = vrot.slane %v4493_v22, %v17224_v9  ;;  %v4842_v6 = vrot.slane %v4478_v11, %v17224_v9  ;;  %v4846_v63 = vrot.slane %v4492_v8, %v17224_v9  ;;  %6556 = vmatprep.mubr.bf16.mxu1 %v18279_v43 }
 0x2c7   : > { %v5438_v29 = vcombine.low %v5430_v56, %v5437_v33  ;;  %v4838_v21 = vrot.slane %v4495_v42, %v17224_v9  ;;  %v4850_v15 = vrot.slane %v4494_v48, %v17224_v9  ;;  %v4854_v53 = vrot.slane %v4496_v59, %v17224_v9  ;;  %15101 = vmatprep.subr.bf16.mxu1 %v16481_v32 }
 0x2c8   : > { %v14626_v57 = vpack.c.bf16 %v5421_v5, %v5421_v5  ;;  %v5119_v20 = vsel %vm3200_vm8, %v17966_v16, %v4826_v23  ;;  %v5120_v51 = vsel %vm3200_vm8, %v17982_v37, %v4830_v1  ;;  %v21616_v2 = vcombine.high %v17966_v16, %v17966_v16  ;;  %v3912_v23 = vpop.f32.mrf.mxu1 }
 0x2c9   : > { %v14627_v17 = vpack.c.bf16 %v5438_v29, %v5438_v29  ;;  %v21617_v26 = vcombine.high %v17982_v37, %v17982_v37  ;;  %v5123_v35 = vsel %vm3200_vm8, %v17979_v28, %v4842_v6  ;;  %v5124_v25 = vsel %vm3200_vm8, %v17995_v27, %v4846_v63 }
 0x2ca   : > { %v5121_v10 = vsel %vm3200_vm8, %v21616_v2, %v4834_v50  ;;  %5633 = vst [vmem:[#allocation2 + $0x74] sm:$0xf] %v14626_v57  ;;  %v21618_v56 = vcombine.high %v17979_v28, %v17979_v28  ;;  %v21619_v8 = vcombine.high %v17995_v27, %v17995_v27  ;;  %v5183_v22 = vadd.f32 %v5119_v20, %v17218_v3 }
 0x2cb   : > { %v5122_v11 = vsel %vm3200_vm8, %v21617_v26, %v4838_v21  ;;  %5634 = vst [vmem:[#allocation2 + $0x7c] sm:$0xf] %v14627_v17  ;;  %v5184_v33 = vadd.f32 %v5120_v51, %v17236_v18  ;;  %v5185_v48 = vadd.f32 %v5121_v10, %v17221_v4  ;;  %v5187_v28 = vadd.f32 %v5123_v35, %v17218_v3  ;;  %v16482_v21 = vld [vmem:[%s21562_s5 + $0x1b0] sm:$0xff]   ;;  %v16487_v51 = vld [vmem:[%s21562_s5 + $0x1a8] sm:$0xff]   ;;  %v16488_v35 = vld [vmem:[%s21562_s5 + $0x1e0] sm:$0xff]  }
 0x2cc   : > { %v5125_v16 = vsel %vm3200_vm8, %v21618_v56, %v4850_v15  ;;  %v5126_v37 = vsel %vm3200_vm8, %v21619_v8, %v4854_v53  ;;  %v5186_v42 = vadd.f32 %v5122_v11, %v17240_v19  ;;  %v5188_v5 = vadd.f32 %v5124_v25, %v17236_v18  ;;  %v18330_v15 = vld [vmem:[#allocation2 + $0x20] ss:$8 sps:$4 sm:$0xff]   ;;  %15102 = vmatpush3.bf16.msra.mxu1 %v16482_v21 }
 0x2cd   : > { %v5189_v27 = vadd.f32 %v5125_v16, %v17221_v4  ;;  %v5190_v59 = vadd.f32 %v5126_v37, %v17240_v19  ;;  %v5337_v1 = vcombine.low %v5183_v22, %v5184_v33  ;;  %v4693_v62 = vcombine.high %v16013_v30, %v16013_v30  ;;  %v16484_v53 = vld [vmem:[%s21562_s5 + $0x1e8] sm:$0xff]   ;;  %6557 = vmatmul.mubr.bf16.gmra.mxu1 %v18330_v15 }
 0x2ce   : > { %v5338_v50 = vcombine.low %v5185_v48, %v5186_v42  ;;  %v4700_v29 = vrot.slane %v16013_v30, %v17215_v0  ;;  %v5354_v6 = vcombine.low %v5187_v28, %v5188_v5  ;;  %v4595_v34 = vcombine.high %v3912_v23, %v3912_v23  ;;  %15103 = vmatprep.subr.bf16.mxu1 %v16484_v53 }
 0x2cf   : > { %v5355_v63 = vcombine.low %v5189_v27, %v5190_v59  ;;  %v18328_v57 = vrot.slane %v3912_v23, %v17215_v0  ;;  %v5345_v20 = vrot.slane %v5337_v1, %v17210_v58  ;;  %v4707_v32 = vrot.slane %v4693_v62, %v17215_v0 }
 0x2d0   : > { %v5352_v30 = vrot.slane %v5338_v50, %v17210_v58  ;;  %v4708_v17 = vcombine.high %v4700_v29, %v4700_v29  ;;  %v5362_v2 = vrot.slane %v5354_v6, %v17210_v58  ;;  %v4716_v26 = vrot.slane %v4700_v29, %v17215_v0  ;;  %15104 = vmatpush3.bf16.msra.mxu1 %v16487_v51 }
 0x2d1   : > { %v5369_v10 = vrot.slane %v5355_v63, %v17210_v58  ;;  %v18345_v11 = vrot.slane %v4595_v34, %v17215_v0  ;;  %v4709_v56 = vcombine.high %v4707_v32, %v4707_v32  ;;  %v4723_v16 = vrot.slane %v4707_v32, %v17215_v0  ;;  %15105 = vmatprep.subr.bf16.mxu1 %v16488_v35  ;;  %v16489_v63 = vld [vmem:[%s21562_s5 + $0x1a0] sm:$0xff]  }
 0x2d2   : > { %v5353_v25 = vcombine.low %v5345_v20, %v5352_v30  ;;  %v4730_v8 = vrot.slane %v4708_v17, %v17215_v0  ;;  %v4738_v22 = vcombine.high %v4716_v26, %v4716_v26  ;;  %v4986_v33 = vrot.slane %v4716_v26, %v17224_v9  ;;  %v16492_v17 = vld [vmem:[%s21562_s5 + $0x1d8] sm:$0xff]  }
 0x2d3   : > { %v5370_v37 = vcombine.low %v5362_v2, %v5369_v10  ;;  %v4610_v48 = vcombine.high %v18328_v57, %v18328_v57  ;;  %v4737_v23 = vrot.slane %v4709_v56, %v17215_v0  ;;  %v4739_v28 = vcombine.high %v4723_v16, %v4723_v16 }
 0x2d4   : > { %v14622_v42 = vpack.c.bf16 %v5353_v25, %v5353_v25  ;;  %v4740_v5 = vcombine.high %v4730_v8, %v4730_v8  ;;  %v4990_v59 = vrot.slane %v4730_v8, %v17224_v9  ;;  %v4994_v1 = vrot.slane %v4738_v22, %v17224_v9  ;;  %15106 = vmatpush3.bf16.msra.mxu1 %v16489_v63  ;;  %v16496_v25 = vld [vmem:[%s21562_s5 + $0x198] sm:$0xff]  }
 0x2d5   : > { %v14623_v27 = vpack.c.bf16 %v5370_v37, %v5370_v37  ;;  %v5002_v50 = vrot.slane %v4723_v16, %v17224_v9  ;;  %v4741_v62 = vcombine.high %v4737_v23, %v4737_v23  ;;  %v5006_v21 = vrot.slane %v4737_v23, %v17224_v9  ;;  %15107 = vmatprep.subr.bf16.mxu1 %v16492_v17 }
 0x2d6   : > { %5615 = vst [vmem:[#allocation2 + $0x34] sm:$0xf] %v14622_v42  ;;  %v4998_v29 = vrot.slane %v4740_v5, %v17224_v9  ;;  %v5010_v6 = vrot.slane %v4739_v28, %v17224_v9  ;;  %v5159_v34 = vsel %vm3200_vm8, %v18005_v45, %v4986_v33  ;;  %v5160_v53 = vsel %vm3200_vm8, %v18014_v46, %v4990_v59 }
 0x2d7   : > { %5616 = vst [vmem:[#allocation2 + $0x3c] sm:$0xf] %v14623_v27  ;;  %v21620_v20 = vcombine.high %v18005_v45, %v18005_v45  ;;  %v5163_v32 = vsel %vm3200_vm8, %v18010_v39, %v5002_v50  ;;  %v5014_v51 = vrot.slane %v4741_v62, %v17224_v9  ;;  %v21621_v2 = vcombine.high %v18014_v46, %v18014_v46 }
 0x2d8   : > { %v5164_v26 = vsel %vm3200_vm8, %v18022_v54, %v5006_v21  ;;  %v21622_v45 = vcombine.high %v18010_v39, %v18010_v39  ;;  %v5223_v56 = vadd.f32 %v5159_v34, %v17218_v3  ;;  %v5224_v16 = vadd.f32 %v5160_v53, %v17236_v18  ;;  %v16497_v39 = vld [vmem:[%s21562_s5 + $0x1d0] sm:$0xff]   ;;  %15108 = vmatpush3.bf16.msra.mxu1 %v16496_v25  ;;  %v16014_v25 = vpop.f32.mrf.mxu1 }
 0x2d9   : > { %v5161_v30 = vsel %vm3200_vm8, %v21620_v20, %v4994_v1  ;;  %v5162_v10 = vsel %vm3200_vm8, %v21621_v2, %v4998_v29  ;;  %v21623_v37 = vcombine.high %v18022_v54, %v18022_v54  ;;  %v5227_v33 = vadd.f32 %v5163_v32, %v17218_v3  ;;  %15109 = vmatprep.subr.bf16.mxu1 %v16497_v39  ;;  %v16498_v2 = vld [vmem:[%s21562_s5 + $0x190] sm:$0xff]  }
 0x2da   : > { %v5165_v35 = vsel %vm3200_vm8, %v21622_v45, %v5010_v6  ;;  %v5225_v46 = vadd.f32 %v5161_v30, %v17221_v4  ;;  %v5226_v8 = vadd.f32 %v5162_v10, %v17240_v19  ;;  %v5228_v42 = vadd.f32 %v5164_v26, %v17236_v18 }
 0x2db   : > { %v5166_v22 = vsel %vm3200_vm8, %v21623_v37, %v5014_v51  ;;  %v5229_v23 = vadd.f32 %v5165_v35, %v17221_v4  ;;  %v5507_v5 = vcombine.low %v5223_v56, %v5224_v16  ;;  %v4611_v59 = vcombine.high %v18345_v11, %v18345_v11  ;;  %v18423_v51 = vld [vmem:[#allocation2 + $0x30] ss:$8 sps:$4 sm:$0xff]   ;;  %v18433_v56 = vld [vmem:[#allocation2 + $0x44] ss:$8 sps:$4 sm:$0xff]  }
 0x2dc   : > { %v5230_v28 = vadd.f32 %v5166_v22, %v17240_v19  ;;  %v5508_v27 = vcombine.low %v5225_v46, %v5226_v8  ;;  %v5524_v1 = vcombine.low %v5227_v33, %v5228_v42  ;;  %v4618_v50 = vrot.slane %v18328_v57, %v17215_v0  ;;  %v16500_v16 = vld [vmem:[%s21562_s5 + $0x1c8] sm:$0xff]   ;;  %15110 = vmatpush3.bf16.msra.mxu1 %v16498_v2 }
 0x2dd   : > { %v4625_v54 = vrot.slane %v18345_v11, %v17215_v0  ;;  %v4632_v62 = vrot.slane %v4610_v48, %v17215_v0  ;;  %v5515_v29 = vrot.slane %v5507_v5, %v17210_v58  ;;  %v4639_v63 = vrot.slane %v4611_v59, %v17215_v0  ;;  %15111 = vmatprep.subr.bf16.mxu1 %v16500_v16 }
 0x2de   : > { %v5522_v21 = vrot.slane %v5508_v27, %v17210_v58  ;;  %v5525_v6 = vcombine.low %v5229_v23, %v5230_v28  ;;  %v5532_v34 = vrot.slane %v5524_v1, %v17210_v58  ;;  %v4640_v53 = vcombine.high %v4618_v50, %v4618_v50  ;;  %v18419_v57 = vld [vmem:[#allocation2 + $0x34] ss:$8 sps:$4 sm:$0xff]  }
 0x2df   : > { %v4641_v20 = vcombine.high %v4625_v54, %v4625_v54  ;;  %v4642_v30 = vcombine.high %v4632_v62, %v4632_v62  ;;  %v4643_v48 = vcombine.high %v4639_v63, %v4639_v63  ;;  %v4922_v17 = vrot.slane %v4618_v50, %v17224_v9  ;;  %6564 = vmatprep.mubr.bf16.mxu1 %v18419_v57 }
 0x2e0   : > { %v5523_v32 = vcombine.low %v5515_v29, %v5522_v21  ;;  %v5539_v11 = vrot.slane %v5525_v6, %v17210_v58  ;;  %v4926_v10 = vrot.slane %v4632_v62, %v17224_v9  ;;  %v4930_v26 = vrot.slane %v4640_v53, %v17224_v9  ;;  %6565 = vmatmul.mubr.bf16.gmra.mxu1 %v18423_v51 }
 0x2e1   : > { %v4934_v45 = vrot.slane %v4642_v30, %v17224_v9  ;;  %v4938_v35 = vrot.slane %v4625_v54, %v17224_v9  ;;  %v4942_v39 = vrot.slane %v4639_v63, %v17224_v9  ;;  %v4946_v37 = vrot.slane %v4641_v20, %v17224_v9  ;;  %6572 = vmatprep.mubr.bf16.mxu1 %v18433_v56  ;;  %v3915_v63 = vpop.f32.mrf.mxu1 }
 0x2e2   : > { %v5540_v46 = vcombine.low %v5532_v34, %v5539_v11  ;;  %v14632_v8 = vpack.c.bf16 %v5523_v32, %v5523_v32  ;;  %v4950_v22 = vrot.slane %v4643_v48, %v17224_v9  ;;  %v5143_v33 = vsel %vm3200_vm8, %v18027_v47, %v4922_v17  ;;  %v16502_v34 = vld [vmem:[%s21562_s5 + $0x1c0] sm:$0xff]  }
 0x2e3   : > { %v5144_v42 = vsel %vm3200_vm8, %v18037_v14, %v4926_v10  ;;  %v21624_v23 = vcombine.high %v18027_v47, %v18027_v47  ;;  %v21625_v27 = vcombine.high %v18037_v14, %v18037_v14  ;;  %v5147_v1 = vsel %vm3200_vm8, %v18032_v49, %v4938_v35  ;;  %v16501_v47 = vld [vmem:[%s21562_s5 + $0x188] sm:$0xff]   ;;  %v16503_v35 = vld [vmem:[%s21562_s5 + $0x180] sm:$0xff]  }
 0x2e4   : > { %v14633_v5 = vpack.c.bf16 %v5540_v46, %v5540_v46  ;;  %5660 = vst [vmem:[#allocation2 + $0xd4] sm:$0xf] %v14632_v8  ;;  %v5148_v50 = vsel %vm3200_vm8, %v18043_v52, %v4942_v39  ;;  %v21626_v54 = vcombine.high %v18032_v49, %v18032_v49  ;;  %v21627_v14 = vcombine.high %v18043_v52, %v18043_v52 }
 0x2e5   : > { %v5145_v28 = vsel %vm3200_vm8, %v21624_v23, %v4930_v26  ;;  %v5146_v59 = vsel %vm3200_vm8, %v21625_v27, %v4934_v45  ;;  %v5207_v21 = vadd.f32 %v5143_v33, %v17218_v3  ;;  %v5208_v6 = vadd.f32 %v5144_v42, %v17236_v18  ;;  %v18482_v45 = vld [vmem:[#allocation2 + $0x40] ss:$8 sps:$4 sm:$0xff]   ;;  %15112 = vmatpush3.bf16.msra.mxu1 %v16501_v47 }
 0x2e6   : > { %v5149_v62 = vsel %vm3200_vm8, %v21626_v54, %v4946_v37  ;;  %v5150_v29 = vsel %vm3200_vm8, %v21627_v14, %v4950_v22  ;;  %5661 = vst [vmem:[#allocation2 + $0xdc] sm:$0xf] %v14633_v5  ;;  %v5209_v49 = vadd.f32 %v5145_v28, %v17221_v4  ;;  %v5210_v53 = vadd.f32 %v5146_v59, %v17240_v19  ;;  %v18492_v37 = vld [vmem:[#allocation2 + $0x54] ss:$8 sps:$4 sm:$0xff]  }
 0x2e7   : > { %v5211_v20 = vadd.f32 %v5147_v1, %v17218_v3  ;;  %v5212_v52 = vadd.f32 %v5148_v50, %v17236_v18  ;;  %v5213_v30 = vadd.f32 %v5149_v62, %v17221_v4  ;;  %v5214_v32 = vadd.f32 %v5150_v29, %v17240_v19  ;;  %15113 = vmatprep.subr.bf16.mxu1 %v16502_v34 }
 0x2e8   : > { %v5439_v11 = vcombine.low %v5207_v21, %v5208_v6  ;;  %v4742_v48 = vcombine.high %v16014_v25, %v16014_v25  ;;  %v5440_v17 = vcombine.low %v5209_v49, %v5210_v53  ;;  %v4749_v10 = vrot.slane %v16014_v25, %v17215_v0  ;;  %6573 = vmatmul.mubr.bf16.gmra.mxu1 %v18482_v45 }
 0x2e9   : > { %v5456_v2 = vcombine.low %v5211_v20, %v5212_v52  ;;  %v4644_v26 = vcombine.high %v3915_v63, %v3915_v63  ;;  %v5457_v46 = vcombine.low %v5213_v30, %v5214_v32  ;;  %v18490_v39 = vrot.slane %v3915_v63, %v17215_v0  ;;  %6580 = vmatprep.mubr.bf16.mxu1 %v18492_v37 }
 0x2ea   : > { %v5447_v16 = vrot.slane %v5439_v11, %v17210_v58  ;;  %v4756_v8 = vrot.slane %v4742_v48, %v17215_v0  ;;  %v5454_v25 = vrot.slane %v5440_v17, %v17210_v58  ;;  %v4757_v33 = vcombine.high %v4749_v10, %v4749_v10  ;;  %15114 = vmatpush3.bf16.msra.mxu1 %v16503_v35 }
 0x2eb   : > { %v5464_v22 = vrot.slane %v5456_v2, %v17210_v58  ;;  %v4765_v42 = vrot.slane %v4749_v10, %v17215_v0  ;;  %v5471_v23 = vrot.slane %v5457_v46, %v17210_v58  ;;  %v4658_v27 = vrot.slane %v4644_v26, %v17215_v0  ;;  %v18519_v2 = vld [vmem:[#allocation2 + $0x50] ss:$8 sps:$4 sm:$0xff]  }
 0x2ec   : > { %v4758_v28 = vcombine.high %v4756_v8, %v4756_v8  ;;  %v4772_v5 = vrot.slane %v4756_v8, %v17215_v0  ;;  %v5455_v59 = vcombine.low %v5447_v16, %v5454_v25  ;;  %v4779_v1 = vrot.slane %v4757_v33, %v17215_v0  ;;  %v18530_v8 = vld [vmem:[#allocation2 + $0x64] ss:$8 sps:$4 sm:$0xff]  }
 0x2ed   : > { %v4787_v50 = vcombine.high %v4765_v42, %v4765_v42  ;;  %v5018_v47 = vrot.slane %v4765_v42, %v17224_v9  ;;  %v5472_v54 = vcombine.low %v5464_v22, %v5471_v23  ;;  %v21628_v48 = vcombine.high %v18051_v36, %v18051_v36 }
 0x2ee   : > { %v4786_v62 = vrot.slane %v4758_v28, %v17215_v0  ;;  %v4788_v14 = vcombine.high %v4772_v5, %v4772_v5  ;;  %v5034_v29 = vrot.slane %v4772_v5, %v17224_v9  ;;  %v14628_v21 = vpack.c.bf16 %v5455_v59, %v5455_v59 }
 0x2ef   : > { %v4789_v6 = vcombine.high %v4779_v1, %v4779_v1  ;;  %v5022_v63 = vrot.slane %v4779_v1, %v17224_v9  ;;  %v5026_v34 = vrot.slane %v4787_v50, %v17224_v9  ;;  %v14629_v49 = vpack.c.bf16 %v5472_v54, %v5472_v54 }
 0x2f0   : > { %v4790_v53 = vcombine.high %v4786_v62, %v4786_v62  ;;  %v5038_v20 = vrot.slane %v4786_v62, %v17224_v9  ;;  %v5042_v52 = vrot.slane %v4788_v14, %v17224_v9  ;;  %5642 = vst [vmem:[#allocation2 + $0x94] sm:$0xf] %v14628_v21  ;;  %v5167_v32 = vsel %vm3200_vm8, %v18051_v36, %v5018_v47 }
 0x2f1   : > { %v5030_v30 = vrot.slane %v4789_v6, %v17224_v9  ;;  %v5168_v11 = vsel %vm3200_vm8, %v18061_v7, %v5022_v63  ;;  %v5169_v17 = vsel %vm3200_vm8, %v21628_v48, %v5026_v34  ;;  %5643 = vst [vmem:[#allocation2 + $0x9c] sm:$0xf] %v14629_v49  ;;  %v5171_v26 = vsel %vm3200_vm8, %v18057_v41, %v5034_v29 }
 0x2f2   : > { %v5046_v10 = vrot.slane %v4790_v53, %v17224_v9  ;;  %v5172_v35 = vsel %vm3200_vm8, %v18069_v55, %v5038_v20  ;;  %v21629_v16 = vcombine.high %v18057_v41, %v18057_v41  ;;  %v21630_v36 = vcombine.high %v18061_v7, %v18061_v7  ;;  %6581 = vmatmul.mubr.bf16.gmra.mxu1 %v18519_v2 }
 0x2f3   : > { %v5231_v22 = vadd.f32 %v5167_v32, %v17218_v3  ;;  %v5232_v33 = vadd.f32 %v5168_v11, %v17236_v18  ;;  %v5233_v42 = vadd.f32 %v5169_v17, %v17221_v4  ;;  %v21631_v41 = vcombine.high %v18069_v55, %v18069_v55  ;;  %6588 = vmatprep.mubr.bf16.mxu1 %v18530_v8  ;;  %v18562_v11 = vld [vmem:[#allocation2 + $0x60] ss:$8 sps:$4 sm:$0xff]  }
 0x2f4   : > { %v5173_v46 = vsel %vm3200_vm8, %v21629_v16, %v5042_v52  ;;  %v5170_v25 = vsel %vm3200_vm8, %v21630_v36, %v5030_v30  ;;  %v5235_v5 = vadd.f32 %v5171_v26, %v17218_v3  ;;  %v5236_v7 = vadd.f32 %v5172_v35, %v17236_v18  ;;  %v18566_v26 = vld [vmem:[#allocation2 + $0x74] ss:$8 sps:$4 sm:$0xff]  }
 0x2f5   : > { %v5174_v23 = vsel %vm3200_vm8, %v21631_v41, %v5046_v10  ;;  %v5234_v28 = vadd.f32 %v5170_v25, %v17240_v19  ;;  %v5237_v59 = vadd.f32 %v5173_v46, %v17221_v4  ;;  %v5541_v50 = vcombine.low %v5231_v22, %v5232_v33 }
 0x2f6   : > { %v5238_v1 = vadd.f32 %v5174_v23, %v17240_v19  ;;  %v4659_v47 = vcombine.high %v18490_v39, %v18490_v39  ;;  %v5558_v55 = vcombine.low %v5235_v5, %v5236_v7  ;;  %v4660_v62 = vcombine.high %v4658_v27, %v4658_v27 }
 0x2f7   : > { %v5542_v54 = vcombine.low %v5233_v42, %v5234_v28  ;;  %v4667_v14 = vrot.slane %v18490_v39, %v17215_v0  ;;  %v5549_v29 = vrot.slane %v5541_v50, %v17210_v58  ;;  %v4674_v6 = vrot.slane %v4658_v27, %v17215_v0 }
 0x2f8   : > { %v5559_v21 = vcombine.low %v5237_v59, %v5238_v1  ;;  %v4681_v63 = vrot.slane %v4659_v47, %v17215_v0  ;;  %v5566_v49 = vrot.slane %v5558_v55, %v17210_v58  ;;  %v4688_v53 = vrot.slane %v4660_v62, %v17215_v0 }
 0x2f9   : > { %v5556_v34 = vrot.slane %v5542_v54, %v17210_v58  ;;  %v4689_v20 = vcombine.high %v4667_v14, %v4667_v14  ;;  %v4690_v30 = vcombine.high %v4674_v6, %v4674_v6  ;;  %v4954_v39 = vrot.slane %v4667_v14, %v17224_v9 }
 0x2fa   : > { %v5573_v52 = vrot.slane %v5559_v21, %v17210_v58  ;;  %v4691_v32 = vcombine.high %v4681_v63, %v4681_v63  ;;  %v4692_v17 = vcombine.high %v4688_v53, %v4688_v53  ;;  %v4958_v27 = vrot.slane %v4681_v63, %v17224_v9  ;;  %6589 = vmatmul.mubr.bf16.gmra.mxu1 %v18562_v11 }
 0x2fb   : > { %v5557_v48 = vcombine.low %v5549_v29, %v5556_v34  ;;  %v4962_v10 = vrot.slane %v4689_v20, %v17224_v9  ;;  %v4970_v46 = vrot.slane %v4674_v6, %v17224_v9  ;;  %v4974_v36 = vrot.slane %v4688_v53, %v17224_v9  ;;  %6596 = vmatprep.mubr.bf16.mxu1 %v18566_v26  ;;  %v18608_v53 = vld [vmem:[#allocation2 + $0x70] ss:$8 sps:$4 sm:$0xff]  }
 0x2fc   : > { %v5574_v35 = vcombine.low %v5566_v49, %v5573_v52  ;;  %v4966_v16 = vrot.slane %v4691_v32, %v17224_v9  ;;  %v4978_v22 = vrot.slane %v4690_v30, %v17224_v9  ;;  %v4982_v33 = vrot.slane %v4692_v17, %v17224_v9 }
 0x2fd   : > { %v14634_v25 = vpack.c.bf16 %v5557_v48, %v5557_v48  ;;  %v5151_v42 = vsel %vm3200_vm8, %v18066_v60, %v4954_v39  ;;  %v5152_v23 = vsel %vm3200_vm8, %v18079_v38, %v4958_v27  ;;  %v21632_v28 = vcombine.high %v18066_v60, %v18066_v60  ;;  %v18613_v39 = vld [vmem:[#allocation2 + $0x84] ss:$8 sps:$4 sm:$0xff]  }
 0x2fe   : > { %v14635_v41 = vpack.c.bf16 %v5574_v35, %v5574_v35  ;;  %v21633_v7 = vcombine.high %v18079_v38, %v18079_v38  ;;  %v5155_v1 = vsel %vm3200_vm8, %v18074_v13, %v4970_v46  ;;  %v5156_v50 = vsel %vm3200_vm8, %v18088_v24, %v4974_v36 }
 0x2ff   : > { %v5153_v5 = vsel %vm3200_vm8, %v21632_v28, %v4962_v10  ;;  %5669 = vst [vmem:[#allocation2 + $0xf4] sm:$0xf] %v14634_v25  ;;  %v21634_v47 = vcombine.high %v18074_v13, %v18074_v13  ;;  %v21635_v60 = vcombine.high %v18088_v24, %v18088_v24  ;;  %v5215_v38 = vadd.f32 %v5151_v42, %v17218_v3 }
 0x300   : > { %v5154_v59 = vsel %vm3200_vm8, %v21633_v7, %v4966_v16  ;;  %5670 = vst [vmem:[#allocation2 + $0xfc] sm:$0xf] %v14635_v41  ;;  %v5216_v62 = vadd.f32 %v5152_v23, %v17236_v18  ;;  %v5217_v14 = vadd.f32 %v5153_v5, %v17221_v4  ;;  %v5219_v21 = vadd.f32 %v5155_v1, %v17218_v3 }
 0x301   : > { %v5157_v54 = vsel %vm3200_vm8, %v21634_v47, %v4978_v22  ;;  %v5158_v55 = vsel %vm3200_vm8, %v21635_v60, %v4982_v33  ;;  %v5218_v29 = vadd.f32 %v5154_v59, %v17240_v19  ;;  %v5220_v13 = vadd.f32 %v5156_v50, %v17236_v18  ;;  %v16449_v50 = vld [vmem:[%s21562_s5 + $0x130] sm:$0xff]   ;;  %v18642_v47 = vld [vmem:[#allocation2 + $0x80] ss:$8 sps:$4 sm:$0xff]  }
 0x302   : > { %v5221_v6 = vadd.f32 %v5157_v54, %v17221_v4  ;;  %v5222_v63 = vadd.f32 %v5158_v55, %v17240_v19  ;;  %v5473_v24 = vcombine.low %v5215_v38, %v5216_v62  ;;  %v5896_v49 = vshrl.u32 %v18098_v44, 16  ;;  %6597 = vmatmul.mubr.bf16.gmra.mxu1 %v18608_v53  ;;  %v16454_v54 = vld [vmem:[%s21562_s5 + $0x168] sm:$0xff]   ;;  %v18647_v60 = vld [vmem:[#allocation2 + $0x94] ss:$8 sps:$4 sm:$0xff]  }
 0x303   : > { %v5474_v34 = vcombine.low %v5217_v14, %v5218_v29  ;;  %v5490_v20 = vcombine.low %v5219_v21, %v5220_v13  ;;  %v21636_v30 = vshll.u32 %v18098_v44, 16  ;;  %v5903_v3 = vshll.u32 %v18266_v31, 16  ;;  %6604 = vmatprep.mubr.bf16.mxu1 %v18613_v39  ;;  %v16457_v29 = vld [vmem:[%s21562_s5 + $0x128] sm:$0xff]   ;;  %v16461_v13 = vld [vmem:[%s21562_s5 + $0x160] sm:$0xff]  }
 0x304   : > { %v5491_v52 = vcombine.low %v5221_v6, %v5222_v63  ;;  %v5481_v4 = vrot.slane %v5473_v24, %v17210_v58  ;;  %v21637_v19 = vshrl.u32 %v18096_v12, 16  ;;  %v5891_v17 = vshll.u32 %v18268_v40, 16  ;;  %v16441_v12 = vld [vmem:[%s21562_s5 + $0x138] sm:$0xff]  }
 0x305   : > { %v5900_v32 = vrot.slane %v21636_v30, 1  ;;  %v5488_v18 = vrot.slane %v5474_v34, %v17210_v58  ;;  %v5498_v27 = vrot.slane %v5490_v20, %v17210_v58  ;;  %v5905_v35 = vrot.slane %v5903_v3, 1  ;;  %v16462_v34 = vld [vmem:[%s21562_s5 + $0x120] sm:$0xff]   ;;  %v16469_v30 = vld [vmem:[%s21562_s5 + $0x158] sm:$0xff]  }
 0x306   : > { %v5889_v48 = vor.u32 %v18112_v61, %v21637_v19  ;;  %v5505_v44 = vrot.slane %v5491_v52, %v17210_v58  ;;  %v5893_v46 = vrot.slane %v5891_v17, 1  ;;  %v5915_v61 = vshrl.u32 %v18266_v31, 16  ;;  %v16448_v58 = vld [vmem:[%s21562_s5 + $0x170] sm:$0xff]  }
 0x307   : > { %v5901_v10 = vor.u32 %v5900_v32, %v5896_v49  ;;  %v5489_v16 = vcombine.low %v5481_v4, %v5488_v18  ;;  %v5919_v36 = vshll.u32 %v18279_v43, 16  ;;  %v5907_v7 = vshrl.u32 %v18268_v40, 16  ;;  %v18664_v49 = vld [vmem:[#allocation2 + $0x90] ss:$8 sps:$4 sm:$0xff]   ;;  %v18671_v32 = vld [vmem:[#allocation2 + $0xa4] ss:$8 sps:$4 sm:$0xff]  }
 0x308   : > { %v5506_v25 = vcombine.low %v5498_v27, %v5505_v44  ;;  %v5894_v42 = vsel %vm5882_vm9, %v5889_v48, %v5893_v46  ;;  %v5917_v41 = vor.u32 %v5915_v61, %v5905_v35  ;;  %v5911_v59 = vshll.u32 %v18330_v15, 16  ;;  %v16470_v48 = vld [vmem:[%s21562_s5 + $0x118] sm:$0xff]   ;;  %v16479_v27 = vld [vmem:[%s21562_s5 + $0x150] sm:$0xff]  }
 0x309   : > { %v5906_v22 = vsel %vm5882_vm9, %v5901_v10, %v5905_v35  ;;  %v14630_v33 = vpack.c.bf16 %v5489_v16, %v5489_v16  ;;  %v5921_v23 = vrot.slane %v5919_v36, 1  ;;  %v5935_v1 = vshll.u32 %v18419_v57, 16  ;;  %v16480_v61 = vld [vmem:[%s21562_s5 + $0x110] sm:$0xff]  }
 0x30a   : > { %6271 = vmatprep.mubr.bf16.mxu0 %v5906_v22  ;;  %v14631_v28 = vpack.c.bf16 %v5506_v25, %v5506_v25  ;;  %v5909_v55 = vor.u32 %v5907_v7, %v5893_v46  ;;  %6605 = vmatmul.mubr.bf16.gmra.mxu1 %v18642_v47  ;;  %v5931_v38 = vshrl.u32 %v18279_v43, 16  ;;  %v5913_v14 = vrot.slane %v5911_v59, 1  ;;  %v16491_v25 = vld [vmem:[%s21562_s5 + $0x148] sm:$0xff]  }
 0x30b   : > { %6272 = vmatmul.mubr.bf16.vlgmr.msra.gmra.mxu0 %v5894_v42  ;;  %5651 = vst [vmem:[#allocation2 + $0xb4] sm:$0xf] %v14630_v33  ;;  %v5922_v5 = vsel %vm5882_vm9, %v5917_v41, %v5921_v23  ;;  %v5937_v62 = vrot.slane %v5935_v1, 1  ;;  %6612 = vmatprep.mubr.bf16.mxu1 %v18647_v60  ;;  %v5927_v63 = vshll.u32 %v18423_v51, 16  ;;  %v5947_v20 = vshrl.u32 %v18419_v57, 16  ;;  %v16495_v41 = vld [vmem:[%s21562_s5 + $0x108] sm:$0xff]  }
 0x30c   : > { %15000 = vmatpush3.bf16.msra.mxu0 %v16441_v12  ;;  %5652 = vst [vmem:[#allocation2 + $0xbc] sm:$0xf] %v14631_v28  ;;  %6279 = vmatprep.mubr.bf16.mxu0 %v5922_v5  ;;  %v5933_v21 = vor.u32 %v5931_v38, %v5921_v23  ;;  %v5914_v6 = vsel %vm5882_vm9, %v5909_v55, %v5913_v14  ;;  %v5951_v52 = vshll.u32 %v18433_v56, 16  ;;  %v5923_v3 = vshrl.u32 %v18330_v15, 16  ;;  %v18687_v12 = vld [vmem:[#allocation2 + $0xa0] ss:$8 sps:$4 sm:$0xff]  }
 0x30d   : > { %15001 = vmatprep.subr.bf16.mxu0 %v16448_v58  ;;  %v5929_v4 = vrot.slane %v5927_v63, 1  ;;  %v5949_v18 = vor.u32 %v5947_v20, %v5937_v62  ;;  %v5967_v35 = vshll.u32 %v18492_v37, 16  ;;  %v5939_v16 = vshrl.u32 %v18423_v51, 16  ;;  %v16505_v28 = vld [vmem:[%s21562_s5 + $0x140] sm:$0xff]   ;;  %v18709_v1 = vld [vmem:[#allocation2 + $0xb0] ss:$8 sps:$4 sm:$0xff]  }
 0x30e   : > { %v5938_v24 = vsel %vm5882_vm9, %v5933_v21, %v5937_v62  ;;  %v5925_v19 = vor.u32 %v5923_v3, %v5913_v14  ;;  %v5953_v17 = vrot.slane %v5951_v52, 1  ;;  %v5943_v46 = vshll.u32 %v18482_v45, 16  ;;  %v18716_v38 = vld [vmem:[#allocation2 + $0xc4] ss:$8 sps:$4 sm:$0xff]   ;;  %v16510_v62 = vld [vmem:[%s21562_s5 + $0x278] sm:$0xff]  }
 0x30f   : > { %v5941_v22 = vor.u32 %v5939_v16, %v5929_v4  ;;  %v5963_v58 = vshrl.u32 %v18433_v56, 16  ;;  %v5969_v33 = vrot.slane %v5967_v35, 1  ;;  %v5959_v7 = vshll.u32 %v18519_v2, 16  ;;  %v18731_v3 = vld [vmem:[#allocation2 + $0xd4] ss:$8 sps:$4 sm:$0xff]  }
 0x310   : > { %15002 = vmatpush3.bf16.msra.mxu0 %v16449_v50  ;;  %v5930_v44 = vsel %vm5882_vm9, %v5925_v19, %v5929_v4  ;;  %v5954_v10 = vsel %vm5882_vm9, %v5949_v18, %v5953_v17  ;;  %v5945_v42 = vrot.slane %v5943_v46, 1  ;;  %v16506_v50 = vld [vmem:[%s21562_s5 + $0x100] sm:$0xff]   ;;  %v5983_v55 = vshll.u32 %v18530_v8, 16  ;;  %v18739_v35 = vld [vmem:[#allocation2 + $0xd0] ss:$8 sps:$4 sm:$0xff]  }
 0x311   : > { %15003 = vmatprep.subr.bf16.mxu0 %v16454_v54  ;;  %v5965_v23 = vor.u32 %v5963_v58, %v5953_v17  ;;  %v5979_v54 = vshrl.u32 %v18492_v37, 16  ;;  %v5955_v14 = vshrl.u32 %v18482_v45, 16  ;;  %v5971_v20 = vshrl.u32 %v18519_v2, 16 }
 0x312   : > { %6613 = vmatmul.mubr.bf16.gmra.mxu1 %v18664_v49  ;;  %v5946_v5 = vsel %vm5882_vm9, %v5941_v22, %v5945_v42  ;;  %v5975_v52 = vshll.u32 %v18562_v11, 16  ;;  %v5995_v18 = vshrl.u32 %v18530_v8, 16  ;;  %v6011_v16 = vshrl.u32 %v18566_v26, 16 }
 0x313   : > { %6280 = vmatmul.mubr.bf16.gmra.mxu0 %v5914_v6  ;;  %6620 = vmatprep.mubr.bf16.mxu1 %v18671_v32  ;;  %v18692_v36 = vld [vmem:[#allocation2 + $0xb4] ss:$8 sps:$4 sm:$0xff]   ;;  %v5970_v59 = vsel %vm5882_vm9, %v5965_v23, %v5969_v33  ;;  %v5981_v21 = vor.u32 %v5979_v54, %v5969_v33  ;;  %v5985_v6 = vrot.slane %v5983_v55, 1  ;;  %v6015_v46 = vshll.u32 %v18613_v39, 16 }
 0x314   : > { %6287 = vmatprep.mubr.bf16.mxu0 %v5938_v24  ;;  %15004 = vmatpush3.bf16.msra.mxu0 %v16457_v29  ;;  %v5961_v29 = vrot.slane %v5959_v7, 1  ;;  %v6031_v23 = vshll.u32 %v18647_v60, 16  ;;  %v16520_v7 = vld [vmem:[%s21562_s5 + $0x2f8] sm:$0xff]   ;;  %v6027_v54 = vshrl.u32 %v18613_v39, 16 }
 0x315   : > { %15005 = vmatprep.subr.bf16.mxu0 %v16461_v13  ;;  %v5957_v13 = vor.u32 %v5955_v14, %v5945_v42  ;;  %v5986_v24 = vsel %vm5882_vm9, %v5981_v21, %v5985_v6  ;;  %v5997_v17 = vor.u32 %v5995_v18, %v5985_v6  ;;  %v6017_v33 = vrot.slane %v6015_v46, 1  ;;  %15299 = vmatprep.subr.bf16.mxu1 %v16520_v7 }
 0x316   : > { %v5973_v4 = vor.u32 %v5971_v20, %v5961_v29  ;;  %v6033_v55 = vrot.slane %v6031_v23, 1  ;;  %v6023_v21 = vshll.u32 %v18664_v49, 16  ;;  %v6043_v6 = vshrl.u32 %v18647_v60, 16  ;;  %v16538_v23 = vld [vmem:[%s21562_s5 + $0x290] sm:$0xff]  }
 0x317   : > { %v5962_v63 = vsel %vm5882_vm9, %v5957_v13, %v5961_v29  ;;  %v6029_v14 = vor.u32 %v6027_v54, %v6017_v33  ;;  %v6059_v46 = vshrl.u32 %v18671_v32, 16  ;;  %v6051_v7 = vshrl.u32 %v18687_v12, 16  ;;  %v16539_v54 = vld [vmem:[%s21562_s5 + $0x2c8] sm:$0xff]  }
 0x318   : > { %15006 = vmatpush3.bf16.msra.mxu0 %v16462_v34  ;;  %v5999_v34 = vshll.u32 %v18566_v26, 16  ;;  %v6025_v20 = vrot.slane %v6023_v21, 1  ;;  %v6095_v21 = vshll.u32 %v18731_v3, 16 }
 0x319   : > { %15007 = vmatprep.subr.bf16.mxu0 %v16469_v30  ;;  %v18729_v30 = vld [vmem:[#allocation2 + $0xc0] ss:$8 sps:$4 sm:$0xff]   ;;  %v6034_v13 = vsel %vm5882_vm9, %v6029_v14, %v6033_v55 }
 0x31a   : > { %6621 = vmatmul.mubr.bf16.gmra.mxu1 %v18687_v12  ;;  %v6001_v19 = vrot.slane %v5999_v34, 1  ;;  %v6019_v34 = vshrl.u32 %v18642_v47, 16 }
 0x31b   : > { %6288 = vmatmul.mubr.bf16.gmra.mxu0 %v5930_v44  ;;  %6628 = vmatprep.mubr.bf16.mxu1 %v18692_v36  ;;  %v5991_v44 = vshll.u32 %v18608_v53, 16 }
 0x31c   : > { %6295 = vmatprep.mubr.bf16.mxu0 %v5954_v10  ;;  %15008 = vmatpush3.bf16.msra.mxu0 %v16470_v48  ;;  %v5977_v48 = vrot.slane %v5975_v52, 1  ;;  %v6002_v10 = vsel %vm5882_vm9, %v5997_v17, %v6001_v19  ;;  %v6013_v22 = vor.u32 %v6011_v16, %v6001_v19  ;;  %v16528_v52 = vld [vmem:[%s21562_s5 + $0x2e0] sm:$0xff]  }
 0x31d   : > { %15009 = vmatprep.subr.bf16.mxu0 %v16479_v27 }
 0x31e   : > { %v5978_v27 = vsel %vm5882_vm9, %v5973_v4, %v5977_v48  ;;  %v6045_v4 = vor.u32 %v6043_v6, %v6033_v55  ;;  %v16540_v55 = vld [vmem:[%s21562_s5 + $0x288] sm:$0xff]   ;;  %v16547_v6 = vld [vmem:[%s21562_s5 + $0x280] sm:$0xff]  }
 0x320   : > { %15010 = vmatpush3.bf16.msra.mxu0 %v16480_v61  ;;  %v5987_v61 = vshrl.u32 %v18562_v11, 16 }
 0x321   : > { %15011 = vmatprep.subr.bf16.mxu0 %v16491_v25  ;;  %v5993_v25 = vrot.slane %v5991_v44, 1  ;;  %v6035_v44 = vshrl.u32 %v18664_v49, 16 }
 0x322   : > { %6629 = vmatmul.mubr.bf16.gmra.mxu1 %v18709_v1  ;;  %v5989_v58 = vor.u32 %v5987_v61, %v5977_v48 }
 0x323   : > { %6296 = vmatmul.mubr.bf16.gmra.mxu0 %v5946_v5  ;;  %6636 = vmatprep.mubr.bf16.mxu1 %v18716_v38  ;;  %v6007_v5 = vshll.u32 %v18642_v47, 16  ;;  %v6037_v16 = vor.u32 %v6035_v44, %v6025_v20  ;;  %v6083_v44 = vshrl.u32 %v18729_v30, 16 }
 0x324   : > { %6303 = vmatprep.mubr.bf16.mxu0 %v5970_v59  ;;  %15012 = vmatpush3.bf16.msra.mxu0 %v16495_v41  ;;  %v5994_v42 = vsel %vm5882_vm9, %v5989_v58, %v5993_v25  ;;  %v6018_v41 = vsel %vm5882_vm9, %v6013_v22, %v6017_v33  ;;  %v16524_v59 = vld [vmem:[%s21562_s5 + $0x2f0] sm:$0xff]   ;;  %v16531_v22 = vld [vmem:[%s21562_s5 + $0x2d8] sm:$0xff]  }
 0x325   : > { %15013 = vmatprep.subr.bf16.mxu0 %v16505_v28  ;;  %v6003_v28 = vshrl.u32 %v18608_v53, 16  ;;  %v16536_v33 = vld [vmem:[%s21562_s5 + $0x298] sm:$0xff]  }
 0x328   : > { %15014 = vmatpush3.bf16.msra.mxu0 %v16506_v50  ;;  %v6005_v50 = vor.u32 %v6003_v28, %v5993_v25  ;;  %v6075_v28 = vshrl.u32 %v18692_v36, 16 }
 0x329   : > { %15199 = vmatprep.subr.bf16.mxu0 %v16510_v62  ;;  %v6009_v62 = vrot.slane %v6007_v5, 1  ;;  %v6079_v5 = vshll.u32 %v18716_v38, 16 }
 0x32a   : > { %6637 = vmatmul.mubr.bf16.gmra.mxu1 %v18729_v30 }
 0x32b   : > { %6304 = vmatmul.mubr.bf16.gmra.mxu0 %v5962_v63  ;;  %6644 = vmatprep.mubr.bf16.mxu1 %v18731_v3  ;;  %v6010_v29 = vsel %vm5882_vm9, %v6005_v50, %v6009_v62  ;;  %v6047_v63 = vshll.u32 %v18671_v32, 16  ;;  %v6021_v18 = vor.u32 %v6019_v34, %v6009_v62  ;;  %v6081_v62 = vrot.slane %v6079_v5, 1 }
 0x32c   : > { %6311 = vmatprep.mubr.bf16.mxu0 %v5986_v24  ;;  %v16527_v24 = vld [vmem:[%s21562_s5 + $0x2a8] sm:$0xff]   ;;  %v6091_v34 = vshrl.u32 %v18716_v38, 16 }
 0x32d   : > { %v6049_v19 = vrot.slane %v6047_v63, 1  ;;  %v6026_v48 = vsel %vm5882_vm9, %v6021_v18, %v6025_v20  ;;  %v6097_v20 = vrot.slane %v6095_v21, 1 }
 0x32f   : > { %v6050_v17 = vsel %vm5882_vm9, %v6045_v4, %v6049_v19  ;;  %v6061_v58 = vor.u32 %v6059_v46, %v6049_v19  ;;  %v6093_v4 = vor.u32 %v6091_v34, %v6081_v62 }
 0x332   : > { %6645 = vmatmul.mubr.bf16.gmra.mxu1 %v18739_v35 }
 0x333   : > { %6312 = vmatmul.mubr.bf16.gmra.mxu0 %v5978_v27  ;;  %7377 = vmatprep.mubr.bf16.mxu1 %v18266_v31  ;;  %v16521_v31 = vld [vmem:[%s21562_s5 + $0x2b8] sm:$0xff]   ;;  %v6063_v27 = vshll.u32 %v18692_v36, 16 }
 0x334   : > { %6319 = vmatprep.mubr.bf16.mxu0 %v6002_v10  ;;  %v6039_v10 = vshll.u32 %v18687_v12, 16 }
 0x335   : > { %v6065_v61 = vrot.slane %v6063_v27, 1  ;;  %v6107_v27 = vshrl.u32 %v18731_v3, 16 }
 0x336   : > { %v6041_v25 = vrot.slane %v6039_v10, 1 }
 0x337   : > { %v6109_v46 = vor.u32 %v6107_v27, %v6097_v20  ;;  %v16516_v27 = vld [vmem:[%s21562_s5 + $0x260] sm:$0xff]  }
 0x338   : > { %v6053_v50 = vor.u32 %v6051_v7, %v6041_v25 }
 0x33a   : > { %7378 = vmatmul.mubr.bf16.vlgmr.msra.gmra.mxu1 %v18268_v40  ;;  %v16525_v40 = vld [vmem:[%s21562_s5 + $0x2b0] sm:$0xff]  }
 0x33b   : > { %6320 = vmatmul.mubr.bf16.gmra.mxu0 %v5994_v42  ;;  %7385 = vmatprep.mubr.bf16.mxu1 %v18279_v43  ;;  %v16526_v43 = vld [vmem:[%s21562_s5 + $0x2e8] sm:$0xff]   ;;  %v6042_v42 = vsel %vm5882_vm9, %v6037_v16, %v6041_v25 }
 0x33c   : > { %6327 = vmatprep.mubr.bf16.mxu0 %v6018_v41  ;;  %15300 = vmatpush3.bf16.msra.mxu1 %v16521_v31  ;;  %v6055_v41 = vshll.u32 %v18709_v1, 16 }
 0x33d   : > { %15301 = vmatprep.subr.bf16.mxu1 %v16524_v59  ;;  %v6077_v59 = vor.u32 %v6075_v28, %v6065_v61  ;;  %v16821_v28 = vld [vmem:[#allocation2 + $0x8] sm:$0xff] }
 0x33e   : > { %v6057_v31 = vrot.slane %v6055_v41, 1 }
 0x340   : > { %15302 = vmatpush3.bf16.msra.mxu1 %v16525_v40  ;;  %v6058_v14 = vsel %vm5882_vm9, %v6053_v50, %v6057_v31  ;;  %v6071_v40 = vshll.u32 %v18729_v30, 16 }
 0x341   : > { %15303 = vmatprep.subr.bf16.mxu1 %v16526_v43  ;;  %v16546_v43 = vld [vmem:[%s21562_s5 + $0x2c0] sm:$0xff]  }
 0x342   : > { %7386 = vmatmul.mubr.bf16.gmra.mxu1 %v18330_v15  ;;  %v16529_v15 = vld [vmem:[%s21562_s5 + $0x2a0] sm:$0xff]  }
 0x343   : > { %6328 = vmatmul.mubr.bf16.gmra.mxu0 %v6010_v29  ;;  %7393 = vmatprep.mubr.bf16.mxu1 %v18419_v57  ;;  %v6082_v29 = vsel %vm5882_vm9, %v6077_v59, %v6081_v62 }
 0x344   : > { %6335 = vmatprep.mubr.bf16.mxu0 %v6034_v13  ;;  %15304 = vmatpush3.bf16.msra.mxu1 %v16527_v24  ;;  %v6067_v13 = vshrl.u32 %v18709_v1, 16  ;;  %v5731_v24 = vld [vmem:[#allocation2 + $0xe0] sm:$0x11] }
 0x345   : > { %15305 = vmatprep.subr.bf16.mxu1 %v16528_v52  ;;  %v6073_v52 = vrot.slane %v6071_v40, 1  ;;  %v18834_v18 = vcombine.high %v5731_v24, %v5731_v24  ;;  %v18844_v25 = vcombine.low %v5731_v24, %v5731_v24  ;;  %v16511_v40 = vld [vmem:[%s21562_s5 + $0x238] sm:$0xff]  }
 0x346   : > { %v6069_v63 = vor.u32 %v6067_v13, %v6057_v31  ;;  %v16822_v31 = vld [vmem:[#allocation2 + $0x14] ss:$8 sps:$4 sm:$0xff]  }
 0x347   : > { %v6697_v59 = vrot.slane %v16822_v31, 1  ;;  %v6713_v31 = vrot.slane %v18492_v37, 1 }
 0x348   : > { %15306 = vmatpush3.bf16.msra.mxu1 %v16529_v15  ;;  %v6074_v19 = vsel %vm5882_vm9, %v6069_v63, %v6073_v52  ;;  %v6111_v15 = vshll.u32 %v18834_v18, 16  ;;  %v16512_v63 = vld [vmem:[%s21562_s5 + $0x270] sm:$0xff]  }
 0x349   : > { %15307 = vmatprep.subr.bf16.mxu1 %v16531_v22 }
 0x34a   : > { %7394 = vmatmul.mubr.bf16.gmra.mxu1 %v18423_v51  ;;  %v6066_v51 = vsel %vm5882_vm9, %v6061_v58, %v6065_v61  ;;  %v6085_v61 = vor.u32 %v6083_v44, %v6073_v52  ;;  %v6113_v58 = vrot.slane %v6111_v15, 1  ;;  %v16514_v52 = vld [vmem:[%s21562_s5 + $0x268] sm:$0xff]  }
 0x34b   : > { %6336 = vmatmul.mubr.bf16.gmra.mxu0 %v6026_v48  ;;  %7401 = vmatprep.mubr.bf16.mxu1 %v18433_v56  ;;  %v16537_v56 = vld [vmem:[%s21562_s5 + $0x2d0] sm:$0xff]   ;;  %v6087_v48 = vshll.u32 %v18739_v35, 16 }
 0x34c   : > { %6343 = vmatprep.mubr.bf16.mxu0 %v6050_v17  ;;  %15308 = vmatpush3.bf16.msra.mxu1 %v16536_v33  ;;  %v6098_v17 = vsel %vm5882_vm9, %v6093_v4, %v6097_v20  ;;  %v6114_v41 = vsel %vm5882_vm9, %v6109_v46, %v6113_v58  ;;  %v16513_v20 = vld [vmem:[%s21562_s5 + $0x230] sm:$0xff]   ;;  %v6705_v4 = vrot.slane %v18419_v57, 1  ;;  %v16517_v57 = vld [vmem:[%s21562_s5 + $0x220] sm:$0xff]  }
 0x34d   : > { %15309 = vmatprep.subr.bf16.mxu1 %v16537_v56  ;;  %v6089_v10 = vrot.slane %v6087_v48, 1  ;;  %v6103_v56 = vshll.u32 %v18844_v25, 16  ;;  %v16827_v58 = vld [vmem:[#allocation2 + $0x44] ss:$8 sps:$4 sm:$0xff]  }
 0x34f   : > { %v6105_v50 = vrot.slane %v6103_v56, 1 }
 0x350   : > { %15310 = vmatpush3.bf16.msra.mxu1 %v16538_v23  ;;  %v6653_v23 = vld [vmem:[#allocation2] sm:$0xee] }
 0x351   : > { %15311 = vmatprep.subr.bf16.mxu1 %v16539_v54  ;;  %v13850_v5 = vcombine.high %v6653_v23, %v16821_v28 }
 0x352   : > { %7402 = vmatmul.mubr.bf16.gmra.mxu1 %v18482_v45 }
 0x353   : > { %6344 = vmatmul.mubr.bf16.gmra.mxu0 %v6042_v42  ;;  %7409 = vmatprep.mubr.bf16.mxu1 %v18492_v37  ;;  %v6090_v42 = vsel %vm5882_vm9, %v6085_v61, %v6089_v10  ;;  %v6696_v54 = vrot.slane %v13850_v5, 1  ;;  %v16530_v5 = vld [vmem:[%s21562_s5 + $0x248] sm:$0xff]   ;;  %v16548_v37 = vld [vmem:[%s21562_s5 + $0x240] sm:$0xff]  }
 0x354   : > { %6351 = vmatprep.mubr.bf16.mxu0 %v6066_v51  ;;  %15312 = vmatpush3.bf16.msra.mxu1 %v16540_v55  ;;  %v6099_v51 = vshrl.u32 %v18739_v35, 16 }
 0x355   : > { %15313 = vmatprep.subr.bf16.mxu1 %v16546_v43  ;;  %v6698_v62 = vsel %vm6692_vm10, %v6696_v54, %v6697_v59  ;;  %v16824_v43 = vld [vmem:[#allocation2 + $0x24] ss:$8 sps:$4 sm:$0xff]  }
 0x356   : > { %v6101_v7 = vor.u32 %v6099_v51, %v6089_v10  ;;  %v16518_v10 = vld [vmem:[%s21562_s5 + $0x258] sm:$0xff]   ;;  %v16535_v54 = vld [vmem:[%s21562_s5 + $0x208] sm:$0xff]  }
 0x358   : > { %15314 = vmatpush3.bf16.msra.mxu1 %v16547_v6  ;;  %v6106_v55 = vsel %vm5882_vm9, %v6101_v7, %v6105_v50  ;;  %v6701_v6 = vrot.slane %v16824_v43, 1  ;;  %v16557_v43 = vld [vmem:[%s21562_s5 + $0x378] sm:$0xff]  }
 0x35a   : > { %7410 = vmatmul.mubr.bf16.gmra.mxu1 %v18519_v2  ;;  %v6702_v34 = vsel %vm6692_vm10, %v6697_v59, %v6701_v6  ;;  %v6706_v44 = vsel %vm6692_vm10, %v6701_v6, %v6705_v4  ;;  %v6707_v59 = vrot.slane %v18482_v45, 1  ;;  %v6711_v6 = vrot.slane %v18519_v2, 1 }
 0x35b   : > { %6352 = vmatmul.mubr.bf16.gmra.mxu0 %v6058_v14  ;;  %7417 = vmatprep.mubr.bf16.mxu1 %v18530_v8  ;;  %v13849_v14 = vcombine.low %v6653_v23, %v16821_v28  ;;  %v16523_v28 = vld [vmem:[%s21562_s5 + $0x210] sm:$0xff]  }
 0x35c   : > { %6359 = vmatprep.mubr.bf16.mxu0 %v6082_v29  ;;  %v16823_v29 = vld [vmem:[#allocation2 + $0x10] ss:$8 sps:$4 sm:$0xff]  }
 0x35d   : > { %v14915_v16 = vpop.f32.mrf.mxu1  ;;  %v6694_v21 = vrot.slane %v16823_v29, 1  ;;  %v6693_v13 = vrot.slane %v13849_v14, 1 }
 0x35f   : > { %v14916_v22 = vpop.f32.mrf.mxu1  ;;  %v6695_v24 = vsel %vm6692_vm10, %v6693_v13, %v6694_v21  ;;  %v16549_v13 = vld [vmem:[%s21562_s5 + $0x200] sm:$0xff]  }
 0x360   : > { %v18846_v33 = vadd.f32 %v14916_v22, %v14915_v16  ;;  %v16826_v16 = vld [vmem:[#allocation2 + $0x30] ss:$8 sps:$4 sm:$0xff]  }
 0x361   : > { %v6703_v46 = vrot.slane %v16826_v16, 1  ;;  %v18891_v61 = vpop.f32.mrf.mxu1  ;;  %v16519_v22 = vld [vmem:[%s21562_s5 + $0x218] sm:$0xff]  }
 0x362   : > { %7418 = vmatmul.mubr.bf16.gmra.mxu1 %v18562_v11 }
 0x363   : > { %6360 = vmatmul.mubr.bf16.gmra.mxu0 %v6074_v19  ;;  %7425 = vmatprep.mubr.bf16.mxu1 %v18566_v26  ;;  %v16825_v19 = vld [vmem:[#allocation2 + $0x20] ss:$8 sps:$4 sm:$0xff]   ;;  %v18901_v23 = vpop.f32.mrf.mxu1  ;;  %v6708_v14 = vsel %vm6692_vm10, %v6703_v46, %v6707_v59 }
 0x364   : > { %6367 = vmatprep.mubr.bf16.mxu0 %v6098_v17  ;;  %v6699_v48 = vrot.slane %v16825_v19, 1  ;;  %v16515_v17 = vld [vmem:[%s21562_s5 + $0x228] sm:$0xff]  }
 0x366   : > { %v6700_v15 = vsel %vm6692_vm10, %v6694_v21, %v6699_v48  ;;  %v6704_v51 = vsel %vm6692_vm10, %v6699_v48, %v6703_v46  ;;  %v18939_v48 = vld [vmem:[#allocation2 + $0x18] sm:$0xff] }
 0x36a   : > { %7426 = vmatmul.mubr.bf16.gmra.mxu1 %v18608_v53 }
 0x36b   : > { %6368 = vmatmul.mubr.bf16.gmra.mxu0 %v6090_v42  ;;  %7433 = vmatprep.mubr.bf16.mxu1 %v18613_v39  ;;  %v6709_v42 = vrot.slane %v16827_v58, 1  ;;  %v16532_v58 = vld [vmem:[#allocation2 + $0xe0] ss:$8 sps:$4 sm:$0xff]  }
 0x36c   : > { %6375 = vmatprep.mubr.bf16.mxu0 %v6114_v41  ;;  %v16522_v41 = vld [vmem:[%s21562_s5 + $0x250] sm:$0xff]  }
 0x36d   : > { %v6710_v56 = vsel %vm6692_vm10, %v6705_v4, %v6709_v42  ;;  %v6714_v45 = vsel %vm6692_vm10, %v6709_v42, %v6713_v31 }
 0x372   : > { %7434 = vmatmul.mubr.bf16.gmra.mxu1 %v18642_v47 }
 0x373   : > { %6376 = vmatmul.mubr.bf16.gmra.mxu0 %v6106_v55  ;;  %7441 = vmatprep.mubr.bf16.mxu1 %v18647_v60  ;;  %v16869_v55 = vmov 0  }
 0x374   : > { %6907 = vmatprep.mubr.bf16.mxu0 %v6698_v62  ;;  %297 = vst [vmem:[#allocation2 + $0x100] sm:$0xff] %v16869_v55  ;;  %298 = vst [vmem:[#allocation3 + $0x70] sm:$0xf] %v16869_v55 }
 0x37a   : > { %7442 = vmatmul.mubr.bf16.gmra.mxu1 %v18664_v49 }
 0x37b   : > { %6908 = vmatmul.mubr.bf16.vlgmr.msra.gmra.mxu0 %v6695_v24  ;;  %7449 = vmatprep.mubr.bf16.mxu1 %v18671_v32 }
 0x37c   : > { %15200 = vmatpush3.bf16.msra.mxu0 %v16511_v40  ;;  %6915 = vmatprep.mubr.bf16.mxu0 %v6702_v34  ;;  %v6717_v34 = vrot.slane %v18530_v8, 1 }
 0x37d   : > { %15201 = vmatprep.subr.bf16.mxu0 %v16512_v63 }
 0x37e   : > { %v6718_v19 = vsel %vm6692_vm10, %v6713_v31, %v6717_v34 }
 0x380   : > { %15202 = vmatpush3.bf16.msra.mxu0 %v16513_v20 }
 0x381   : > { %15203 = vmatprep.subr.bf16.mxu0 %v16514_v52  ;;  %v6712_v52 = vsel %vm6692_vm10, %v6707_v59, %v6711_v6 }
 0x382   : > { %7450 = vmatmul.mubr.bf16.gmra.mxu1 %v18687_v12 }
 0x383   : > { %6916 = vmatmul.mubr.bf16.gmra.mxu0 %v6700_v15  ;;  %7457 = vmatprep.mubr.bf16.mxu1 %v18692_v36  ;;  %v8226_v15 = vld [vmem:[#allocation2 + $0x10] sm:$0xee] }
 0x384   : > { %6923 = vmatprep.mubr.bf16.mxu0 %v6706_v44  ;;  %15204 = vmatpush3.bf16.msra.mxu0 %v16515_v17  ;;  %v16534_v17 = vld [vmem:[#allocation2 + $0xe4] ss:$8 sps:$4 sm:$0xff]   ;;  %v14054_v8 = vcombine.high %v8226_v15, %v18939_v48  ;;  %v6721_v44 = vrot.slane %v18566_v26, 1 }
 0x385   : > { %15205 = vmatprep.subr.bf16.mxu0 %v16516_v27  ;;  %v14921_v7 = vpop.f32.mrf.mxu1 }
 0x386   : > { %v8268_v46 = vrot.slane %v14054_v8, 1  ;;  %v16598_v8 = vld [vmem:[%s21562_s5 + $0x3f0] sm:$0xff]  }
 0x387   : > { %v14922_v50 = vpop.f32.mrf.mxu1 }
 0x388   : > { %15206 = vmatpush3.bf16.msra.mxu0 %v16517_v57  ;;  %v18916_v62 = vadd.f32 %v14922_v50, %v14921_v7  ;;  %v6715_v57 = vrot.slane %v18562_v11, 1  ;;  %v6725_v7 = vrot.slane %v18613_v39, 1  ;;  %v18969_v39 = vld [vmem:[#allocation2 + $0x30] ss:$8 sps:$4 sm:$0xff]  }
 0x389   : > { %15207 = vmatprep.subr.bf16.mxu0 %v16518_v10  ;;  %v14924_v29 = vpop.f32.mrf.mxu1  ;;  %v18947_v10 = vld [vmem:[#allocation2 + $0x24] ss:$8 sps:$4 sm:$0xff]  }
 0x38a   : > { %7458 = vmatmul.mubr.bf16.gmra.mxu1 %v18709_v1  ;;  %v6716_v16 = vsel %vm6692_vm10, %v6711_v6, %v6715_v57  ;;  %v8269_v42 = vrot.slane %v18947_v10, 1  ;;  %v6726_v55 = vsel %vm6692_vm10, %v6721_v44, %v6725_v7  ;;  %v6723_v6 = vrot.slane %v18642_v47, 1 }
 0x38b   : > { %6924 = vmatmul.mubr.bf16.gmra.mxu0 %v6704_v51  ;;  %7465 = vmatprep.mubr.bf16.mxu1 %v18716_v38  ;;  %v14925_v21 = vpop.f32.mrf.mxu1  ;;  %v6719_v51 = vrot.slane %v18608_v53, 1 }
 0x38c   : > { %6931 = vmatprep.mubr.bf16.mxu0 %v6710_v56  ;;  %15208 = vmatpush3.bf16.msra.mxu0 %v16519_v22  ;;  %v18926_v40 = vadd.f32 %v14925_v21, %v14924_v29  ;;  %v6722_v22 = vsel %vm6692_vm10, %v6717_v34, %v6721_v44  ;;  %v8270_v11 = vsel %vm6692_vm10, %v8268_v46, %v8269_v42  ;;  %v18955_v56 = vld [vmem:[#allocation2 + $0x34] ss:$8 sps:$4 sm:$0xff]   ;;  %v6727_v46 = vrot.slane %v18664_v49, 1  ;;  %v16604_v49 = vld [vmem:[%s21562_s5 + $0x3a8] sm:$0xff]  }
 0x38d   : > { %15209 = vmatprep.subr.bf16.mxu0 %v16522_v41  ;;  %v14927_v63 = vpop.f32.mrf.mxu1  ;;  %v14053_v41 = vcombine.low %v8226_v15, %v18939_v48  ;;  %v6720_v50 = vsel %vm6692_vm10, %v6715_v57, %v6719_v51  ;;  %v8273_v53 = vrot.slane %v18955_v56, 1  ;;  %v16592_v34 = vld [vmem:[%s21562_s5 + $0x3f8] sm:$0xff]   ;;  %v16599_v44 = vld [vmem:[%s21562_s5 + $0x3b0] sm:$0xff]  }
 0x38e   : > { %15499 = vmatprep.subr.bf16.mxu1 %v16592_v34 }
 0x38f   : > { %v14928_v24 = vpop.f32.mrf.mxu1  ;;  %v8265_v31 = vrot.slane %v14053_v41, 1  ;;  %v19001_v41 = vld [vmem:[#allocation2 + $0x40] ss:$8 sps:$4 sm:$0xff]  }
 0x390   : > { %15210 = vmatpush3.bf16.msra.mxu0 %v16523_v28  ;;  %v18935_v20 = vadd.f32 %v14928_v24, %v14927_v63  ;;  %v18957_v28 = vld [vmem:[#allocation2 + $0x20] ss:$8 sps:$4 sm:$0xff]   ;;  %v18974_v24 = vld [vmem:[#allocation2 + $0x44] ss:$8 sps:$4 sm:$0xff]  }
 0x391   : > { %15211 = vmatprep.subr.bf16.mxu0 %v16530_v5  ;;  %v14930_v4 = vpop.f32.mrf.mxu1  ;;  %v8277_v15 = vrot.slane %v18974_v24, 1 }
 0x392   : > { %7466 = vmatmul.mubr.bf16.gmra.mxu1 %v18729_v30 }
 0x393   : > { %6932 = vmatmul.mubr.bf16.gmra.mxu0 %v6708_v14  ;;  %7473 = vmatprep.mubr.bf16.mxu1 %v18731_v3  ;;  %v14931_v2 = vpop.f32.mrf.mxu1 }
 0x394   : > { %6939 = vmatprep.mubr.bf16.mxu0 %v6714_v45  ;;  %15212 = vmatpush3.bf16.msra.mxu0 %v16535_v54  ;;  %v18941_v27 = vadd.f32 %v14931_v2, %v14930_v4 }
 0x395   : > { %15213 = vmatprep.subr.bf16.mxu0 %v16548_v37  ;;  %v8266_v37 = vrot.slane %v18957_v28, 1 }
 0x397   : > { %v8267_v45 = vsel %vm6692_vm10, %v8265_v31, %v8266_v37 }
 0x398   : > { %15214 = vmatpush3.bf16.msra.mxu0 %v16549_v13  ;;  %v8274_v13 = vsel %vm6692_vm10, %v8269_v42, %v8273_v53  ;;  %v18999_v42 = vld [vmem:[#allocation2 + $0x54] ss:$8 sps:$4 sm:$0xff]  }
 0x399   : > { %15399 = vmatprep.subr.bf16.mxu0 %v16557_v43  ;;  %v6729_v43 = vrot.slane %v18647_v60, 1  ;;  %v6724_v60 = vsel %vm6692_vm10, %v6719_v51, %v6723_v6 }
 0x39a   : > { %7474 = vmatmul.mubr.bf16.gmra.mxu1 %v18739_v35 }
 0x39b   : > { %6940 = vmatmul.mubr.bf16.gmra.mxu0 %v6712_v52  ;;  %7481 = vmatprep.mubr.bf16.mxu1 %v16534_v17  ;;  %v16595_v52 = vld [vmem:[%s21562_s5 + $0x3b8] sm:$0xff]   ;;  %v6730_v47 = vsel %vm6692_vm10, %v6725_v7, %v6729_v43  ;;  %v6728_v7 = vsel %vm6692_vm10, %v6723_v6, %v6727_v46  ;;  %v6737_v6 = vrot.slane %v18692_v36, 1 }
 0x39c   : > { %6947 = vmatprep.mubr.bf16.mxu0 %v6718_v19  ;;  %v8271_v19 = vrot.slane %v18969_v39, 1 }
 0x3a0   : > { %v14933_v26 = vpop.f32.mrf.mxu1 }
 0x3a2   : > { %7482 = vmatmul.mubr.bf16.gmra.mxu1 %v16532_v58  ;;  %v14934_v5 = vpop.f32.mrf.mxu1  ;;  %v8278_v58 = vsel %vm6692_vm10, %v8273_v53, %v8277_v15  ;;  %v8275_v53 = vrot.slane %v19001_v41, 1 }
 0x3a3   : > { %6948 = vmatmul.mubr.bf16.gmra.mxu0 %v6716_v16  ;;  %8479 = vmatprep.mubr.bf16.mxu1 %v8270_v11  ;;  %v18960_v59 = vadd.f32 %v14934_v5, %v14933_v26  ;;  %v8272_v16 = vsel %vm6692_vm10, %v8266_v37, %v8271_v19  ;;  %v16601_v26 = vld [vmem:[%s21562_s5 + $0x3e8] sm:$0xff]   ;;  %v6733_v11 = vrot.slane %v18671_v32, 1  ;;  %v16605_v32 = vld [vmem:[%s21562_s5 + $0x3e0] sm:$0xff]  }
 0x3a4   : > { %6955 = vmatprep.mubr.bf16.mxu0 %v6722_v22  ;;  %v14936_v54 = vpop.f32.mrf.mxu1  ;;  %v16606_v37 = vld [vmem:[%s21562_s5 + $0x3a0] sm:$0xff]  }
 0x3a6   : > { %v14937_v14 = vpop.f32.mrf.mxu1 }
 0x3a7   : > { %v18966_v29 = vadd.f32 %v14937_v14, %v14936_v54  ;;  %v6734_v54 = vsel %vm6692_vm10, %v6729_v43, %v6733_v11 }
 0x3a8   : > { %v14939_v21 = vpop.f32.mrf.mxu1 }
 0x3aa   : > { %8480 = vmatmul.mubr.bf16.vlgmr.msra.gmra.mxu1 %v8267_v45  ;;  %v14940_v63 = vpop.f32.mrf.mxu1  ;;  %v8276_v45 = vsel %vm6692_vm10, %v8271_v19, %v8275_v53  ;;  %v16609_v19 = vld [vmem:[%s21562_s5 + $0x3d8] sm:$0xff]  }
 0x3ab   : > { %6956 = vmatmul.mubr.bf16.gmra.mxu0 %v6720_v50  ;;  %8487 = vmatprep.mubr.bf16.mxu1 %v8274_v13  ;;  %v18982_v4 = vadd.f32 %v14940_v63, %v14939_v21  ;;  %v8281_v50 = vrot.slane %v18999_v42, 1  ;;  %v19025_v21 = vld [vmem:[#allocation2 + $0x50] ss:$8 sps:$4 sm:$0xff]   ;;  %v6731_v63 = vrot.slane %v18687_v12, 1  ;;  %v6738_v12 = vsel %vm6692_vm10, %v6733_v11, %v6737_v6  ;;  %v19057_v11 = vld [vmem:[#allocation2 + $0x60] ss:$8 sps:$4 sm:$0xff]  }
 0x3ac   : > { %6963 = vmatprep.mubr.bf16.mxu0 %v6726_v55  ;;  %v14942_v2 = vpop.f32.mrf.mxu1  ;;  %15500 = vmatpush3.bf16.msra.mxu1 %v16595_v52  ;;  %v19030_v52 = vld [vmem:[#allocation2 + $0x64] ss:$8 sps:$4 sm:$0xff]  }
 0x3ad   : > { %15501 = vmatprep.subr.bf16.mxu1 %v16598_v8  ;;  %v8282_v43 = vsel %vm6692_vm10, %v8277_v15, %v8281_v50  ;;  %v6732_v36 = vsel %vm6692_vm10, %v6727_v46, %v6731_v63  ;;  %v8285_v8 = vrot.slane %v19030_v52, 1 }
 0x3ae   : > { %v14943_v17 = vpop.f32.mrf.mxu1 }
 0x3af   : > { %v18994_v57 = vadd.f32 %v14943_v17, %v14942_v2  ;;  %v8279_v2 = vrot.slane %v19025_v21, 1 }
 0x3b0   : > { %15502 = vmatpush3.bf16.msra.mxu1 %v16599_v44  ;;  %v16613_v44 = vld [vmem:[%s21562_s5 + $0x3d0] sm:$0xff]  }
 0x3b1   : > { %15503 = vmatprep.subr.bf16.mxu1 %v16601_v26  ;;  %v8280_v46 = vsel %vm6692_vm10, %v8275_v53, %v8279_v2  ;;  %v8286_v26 = vsel %vm6692_vm10, %v8281_v50, %v8285_v8 }
 0x3b2   : > { %v14945_v22 = vpop.f32.mrf.mxu1  ;;  %8488 = vmatmul.mubr.bf16.gmra.mxu1 %v8272_v16  ;;  %v16614_v16 = vld [vmem:[%s21562_s5 + $0x390] sm:$0xff]  }
 0x3b3   : > { %6964 = vmatmul.mubr.bf16.gmra.mxu0 %v6724_v60  ;;  %8495 = vmatprep.mubr.bf16.mxu1 %v8278_v58  ;;  %v6735_v58 = vrot.slane %v18709_v1, 1  ;;  %v16617_v1 = vld [vmem:[%s21562_s5 + $0x388] sm:$0xff]  }
 0x3b4   : > { %6971 = vmatprep.mubr.bf16.mxu0 %v6730_v47  ;;  %v14946_v51 = vpop.f32.mrf.mxu1  ;;  %15504 = vmatpush3.bf16.msra.mxu1 %v16604_v49  ;;  %v16612_v47 = vld [vmem:[%s21562_s5 + $0x398] sm:$0xff]  }
 0x3b5   : > { %v19010_v5 = vadd.f32 %v14946_v51, %v14945_v22  ;;  %15505 = vmatprep.subr.bf16.mxu1 %v16605_v32  ;;  %v19055_v49 = vld [vmem:[#allocation2 + $0x74] ss:$8 sps:$4 sm:$0xff]   ;;  %v6736_v50 = vsel %vm6692_vm10, %v6731_v63, %v6735_v58  ;;  %v16624_v63 = vld [vmem:[%s21562_s5 + $0x380] sm:$0xff]  }
 0x3b6   : > { %v14948_v31 = vpop.f32.mrf.mxu1  ;;  %v8289_v32 = vrot.slane %v19055_v49, 1 }
 0x3b8   : > { %v14949_v55 = vpop.f32.mrf.mxu1  ;;  %15506 = vmatpush3.bf16.msra.mxu1 %v16606_v37 }
 0x3b9   : > { %v19022_v14 = vadd.f32 %v14949_v55, %v14948_v31  ;;  %15507 = vmatprep.subr.bf16.mxu1 %v16609_v19  ;;  %v16616_v31 = vld [vmem:[%s21562_s5 + $0x3c8] sm:$0xff]  }
 0x3ba   : > { %v14951_v13 = vpop.f32.mrf.mxu1  ;;  %8496 = vmatmul.mubr.bf16.gmra.mxu1 %v8276_v45 }
 0x3bb   : > { %6972 = vmatmul.mubr.bf16.gmra.mxu0 %v6728_v7  ;;  %8503 = vmatprep.mubr.bf16.mxu1 %v8282_v43 }
 0x3bc   : > { %6979 = vmatprep.mubr.bf16.mxu0 %v6734_v54  ;;  %v14952_v34 = vpop.f32.mrf.mxu1  ;;  %15508 = vmatpush3.bf16.msra.mxu1 %v16612_v47  ;;  %v6741_v54 = vrot.slane %v18716_v38, 1  ;;  %v16623_v38 = vld [vmem:[%s21562_s5 + $0x3c0] sm:$0xff]  }
 0x3bd   : > { %v19035_v60 = vadd.f32 %v14952_v34, %v14951_v13  ;;  %15509 = vmatprep.subr.bf16.mxu1 %v16613_v44  ;;  %v8283_v13 = vrot.slane %v19057_v11, 1  ;;  %v6745_v44 = vrot.slane %v18731_v3, 1 }
 0x3be   : > { %v14954_v17 = vpop.f32.mrf.mxu1  ;;  %v6742_v45 = vsel %vm6692_vm10, %v6737_v6, %v6741_v54 }
 0x3bf   : > { %v8284_v47 = vsel %vm6692_vm10, %v8279_v2, %v8283_v13  ;;  %v19089_v2 = vld [vmem:[#allocation2 + $0x84] ss:$8 sps:$4 sm:$0xff]  }
 0x3c0   : > { %v14955_v15 = vpop.f32.mrf.mxu1  ;;  %15510 = vmatpush3.bf16.msra.mxu1 %v16614_v16 }
 0x3c1   : > { %v19050_v22 = vadd.f32 %v14955_v15, %v14954_v17  ;;  %15511 = vmatprep.subr.bf16.mxu1 %v16616_v31 }
 0x3c2   : > { %v14957_v51 = vpop.f32.mrf.mxu1  ;;  %8504 = vmatmul.mubr.bf16.gmra.mxu1 %v8280_v46  ;;  %v6739_v46 = vrot.slane %v18729_v30, 1  ;;  %v6746_v30 = vsel %vm6692_vm10, %v6741_v54, %v6745_v44 }
 0x3c3   : > { %6980 = vmatmul.mubr.bf16.gmra.mxu0 %v6732_v36  ;;  %8511 = vmatprep.mubr.bf16.mxu1 %v8286_v26  ;;  %v19081_v36 = vld [vmem:[#allocation2 + $0x70] ss:$8 sps:$4 sm:$0xff]  }
 0x3c4   : > { %6987 = vmatprep.mubr.bf16.mxu0 %v6738_v12  ;;  %v14958_v7 = vpop.f32.mrf.mxu1  ;;  %15512 = vmatpush3.bf16.msra.mxu1 %v16617_v1  ;;  %v8290_v12 = vsel %vm6692_vm10, %v8285_v8, %v8289_v32  ;;  %v8287_v31 = vrot.slane %v19081_v36, 1  ;;  %v14920_v8 = vadd.f32 %v18901_v23, %v18891_v61  ;;  %v6740_v3 = vsel %vm6692_vm10, %v6735_v58, %v6739_v46 }
 0x3c5   : > { %v19066_v53 = vadd.f32 %v14958_v7, %v14957_v51  ;;  %15513 = vmatprep.subr.bf16.mxu1 %v16623_v38  ;;  %v8293_v38 = vrot.slane %v19089_v2, 1  ;;  %v6743_v58 = vrot.slane %v18739_v35, 1 }
 0x3c6   : > { %v14960_v55 = vpop.f32.mrf.mxu1  ;;  %v8288_v61 = vsel %vm6692_vm10, %v8283_v13, %v8287_v31  ;;  %v6749_v13 = vrot.slane %v18834_v18, 1 }
 0x3c7   : > { %v8294_v54 = vsel %vm6692_vm10, %v8289_v32, %v8293_v38 }
 0x3c8   : > { %v14961_v43 = vpop.f32.mrf.mxu1  ;;  %15514 = vmatpush3.bf16.msra.mxu1 %v16624_v63 }
 0x3c9   : > { %v19078_v19 = vadd.f32 %v14961_v43, %v14960_v55 }
 0x3ca   : > { %v14963_v17 = vpop.f32.mrf.mxu1  ;;  %8512 = vmatmul.mubr.bf16.gmra.mxu1 %v8284_v47 }
 0x3cb   : > { %v14815_v37 = vpop.f32.mrf.mxu0  ;;  %6988 = vmatmul.mubr.bf16.gmra.mxu0 %v6736_v50  ;;  %8519 = vmatprep.mubr.bf16.mxu1 %v8290_v12  ;;  %v7518_v50 = vld [vmem:[#allocation2 + $0x10] sm:$0xff] }
 0x3cc   : > { %6995 = vmatprep.mubr.bf16.mxu0 %v6742_v45  ;;  %v14964_v51 = vpop.f32.mrf.mxu1  ;;  %v13975_v32 = vcombine.low %v7518_v50, %v18939_v48 }
 0x3cd   : > { %v14816_v34 = vpop.f32.mrf.mxu0  ;;  %v19091_v7 = vadd.f32 %v14964_v51, %v14963_v17 }
 0x3ce   : > { %v14817_v6 = vadd.f32 %v14816_v34, %v14815_v37  ;;  %v14966_v55 = vpop.f32.mrf.mxu1  ;;  %v13976_v37 = vcombine.high %v7518_v50, %v18939_v48 }
 0x3cf   : > { %v14818_v15 = vpop.f32.mrf.mxu0 }
 0x3d0   : > { %v19086_v16 = vadd.f32 %v18846_v33, %v14817_v6  ;;  %v14967_v43 = vpop.f32.mrf.mxu1  ;;  %v19107_v6 = vld [vmem:[#allocation2 + $0x94] ss:$8 sps:$4 sm:$0xff]   ;;  %v7712_v12 = vshll.u32 %v13976_v37, 16 }
 0x3d1   : > { %v14819_v26 = vpop.f32.mrf.mxu0  ;;  %v19102_v34 = vadd.f32 %v14967_v43, %v14966_v55  ;;  %v6750_v43 = vsel %vm6692_vm10, %v6745_v44, %v6749_v13  ;;  %v7700_v44 = vshll.u32 %v13975_v32, 16 }
 0x3d2   : > { %v14820_v1 = vadd.f32 %v14819_v26, %v14818_v15  ;;  %v14969_v47 = vpop.f32.mrf.mxu1  ;;  %8520 = vmatmul.mubr.bf16.gmra.mxu1 %v8288_v61  ;;  %v19109_v15 = vld [vmem:[#allocation2 + $0x80] ss:$8 sps:$4 sm:$0xff]  }
 0x3d3   : > { %v14821_v33 = vpop.f32.mrf.mxu0  ;;  %6996 = vmatmul.mubr.bf16.gmra.mxu0 %v6740_v3  ;;  %8527 = vmatprep.mubr.bf16.mxu1 %v8294_v54  ;;  %v6744_v3 = vsel %vm6692_vm10, %v6739_v46, %v6743_v58  ;;  %v7717_v46 = vshll.u32 %v18947_v10, 16  ;;  %v19129_v54 = vld [vmem:[#allocation2 + $0x90] ss:$8 sps:$4 sm:$0xff]  }
 0x3d4   : > { %v19099_v45 = vadd.f32 %v14920_v8, %v14820_v1  ;;  %7003 = vmatprep.mubr.bf16.mxu0 %v6746_v30  ;;  %v14970_v26 = vpop.f32.mrf.mxu1 }
 0x3d5   : > { %v14822_v63 = vpop.f32.mrf.mxu0  ;;  %v19115_v1 = vadd.f32 %v14970_v26, %v14969_v47  ;;  %v7710_v47 = vshrl.u32 %v13976_v37, 16  ;;  %v6747_v37 = vrot.slane %v18844_v25, 1  ;;  %v7733_v25 = vshll.u32 %v18955_v56, 16 }
 0x3d6   : > { %v14823_v23 = vadd.f32 %v14822_v63, %v14821_v33  ;;  %v14972_v55 = vpop.f32.mrf.mxu1  ;;  %v8297_v33 = vrot.slane %v19107_v6, 1  ;;  %v8291_v63 = vrot.slane %v19109_v15, 1 }
 0x3d7   : > { %v14824_v17 = vpop.f32.mrf.mxu0 }
 0x3d8   : > { %v19112_v51 = vadd.f32 %v18916_v62, %v14823_v23  ;;  %v7714_v62 = vrot.slane %v7712_v12, 1  ;;  %v14973_v18 = vpop.f32.mrf.mxu1  ;;  %v8292_v50 = vsel %vm6692_vm10, %v8287_v31, %v8291_v63  ;;  %v8298_v26 = vsel %vm6692_vm10, %v8293_v38, %v8297_v33 }
 0x3d9   : > { %v14825_v8 = vpop.f32.mrf.mxu0  ;;  %v19126_v48 = vadd.f32 %v14973_v18, %v14972_v55  ;;  %v7719_v55 = vrot.slane %v7717_v46, 1  ;;  %v6748_v38 = vsel %vm6692_vm10, %v6743_v58, %v6747_v37  ;;  %v7705_v46 = vshll.u32 %v18957_v28, 16 }
 0x3da   : > { %v14826_v35 = vadd.f32 %v14825_v8, %v14824_v17  ;;  %v14975_v12 = vpop.f32.mrf.mxu1  ;;  %8528 = vmatmul.mubr.bf16.gmra.mxu1 %v8292_v50  ;;  %v7715_v8 = vor.u32 %v7714_v62, %v7710_v47 }
 0x3db   : > { %v14827_v30 = vpop.f32.mrf.mxu0  ;;  %7004 = vmatmul.mubr.bf16.gmra.mxu0 %v6744_v3  ;;  %8535 = vmatprep.mubr.bf16.mxu1 %v8298_v26  ;;  %v19136_v3 = vld [vmem:[#allocation2 + $0xa4] ss:$8 sps:$4 sm:$0xff]  }
 0x3dc   : > { %v19123_v61 = vadd.f32 %v18926_v40, %v14826_v35  ;;  %7011 = vmatprep.mubr.bf16.mxu0 %v6750_v43  ;;  %v14976_v35 = vpop.f32.mrf.mxu1  ;;  %v8301_v26 = vrot.slane %v19136_v3, 1 }
 0x3dd   : > { %v14828_v23 = vpop.f32.mrf.mxu0  ;;  %v19138_v43 = vadd.f32 %v14976_v35, %v14975_v12 }
 0x3de   : > { %21638 = vst [vmem:[#allocation6_spill] sm:$0xff] %v19123_v61  ;;  %v14829_v17 = vadd.f32 %v14828_v23, %v14827_v30  ;;  %v8295_v30 = vrot.slane %v19129_v54, 1  ;;  %v7702_v23 = vrot.slane %v7700_v44, 1  ;;  %v14978_v62 = vpop.f32.mrf.mxu1 }
 0x3df   : > { %v14830_v40 = vpop.f32.mrf.mxu0 }
 0x3e0   : > { %v19133_v13 = vadd.f32 %v18935_v20, %v14829_v17  ;;  %v7720_v20 = vsel %vm5882_vm9, %v7715_v8, %v7719_v55  ;;  %v7698_v17 = vshrl.u32 %v13975_v32, 16  ;;  %v14979_v12 = vpop.f32.mrf.mxu1  ;;  %v8296_v44 = vsel %vm6692_vm10, %v8291_v63, %v8295_v30  ;;  %v16558_v63 = vld [vmem:[%s21562_s5 + $0x338] sm:$0xff]  }
 0x3e1   : > { %v14831_v31 = vpop.f32.mrf.mxu0  ;;  %v19149_v58 = vadd.f32 %v14979_v12, %v14978_v62  ;;  %v7707_v12 = vrot.slane %v7705_v46, 1 }
 0x3e2   : > { %21639 = vst [vmem:[#allocation7_spill] sm:$0xff] %v19133_v13  ;;  %v14832_v18 = vadd.f32 %v14831_v31, %v14830_v40  ;;  %v7703_v35 = vor.u32 %v7702_v23, %v7698_v17  ;;  %v14981_v8 = vpop.f32.mrf.mxu1  ;;  %8536 = vmatmul.mubr.bf16.gmra.mxu1 %v8296_v44  ;;  %v8302_v31 = vsel %vm6692_vm10, %v8297_v33, %v8301_v26  ;;  %v16565_v17 = vld [vmem:[%s21562_s5 + $0x370] sm:$0xff]  }
 0x3e3   : > { %v14833_v47 = vpop.f32.mrf.mxu0  ;;  %7012 = vmatmul.mubr.bf16.gmra.mxu0 %v6748_v38  ;;  %v7735_v38 = vrot.slane %v7733_v25, 1  ;;  %8543 = vmatprep.mubr.bf16.mxu1 %v8302_v31 }
 0x3e4   : > { %v19145_v50 = vadd.f32 %v18941_v27, %v14832_v18  ;;  %8085 = vmatprep.mubr.bf16.mxu0 %v7720_v20  ;;  %v19153_v27 = vld [vmem:[#allocation2 + $0xb4] ss:$8 sps:$4 sm:$0xff]   ;;  %v7729_v18 = vshrl.u32 %v18947_v10, 16  ;;  %v19156_v20 = vld [vmem:[#allocation2 + $0xa0] ss:$8 sps:$4 sm:$0xff]   ;;  %v14982_v23 = vpop.f32.mrf.mxu1 }
 0x3e5   : > { %v14834_v40 = vpop.f32.mrf.mxu0  ;;  %v19167_v10 = vadd.f32 %v14982_v23, %v14981_v8  ;;  %v7745_v23 = vshrl.u32 %v18955_v56, 16  ;;  %v21643_v56 = vrot.slane %v19153_v27, 1 }
 0x3e6   : > { %21640 = vst [vmem:[#allocation8_spill] sm:$0xff] %v19145_v50  ;;  %v14835_v37 = vadd.f32 %v14834_v40, %v14833_v47  ;;  %v7731_v33 = vor.u32 %v7729_v18, %v7719_v55  ;;  %v7708_v40 = vsel %vm5882_vm9, %v7703_v35, %v7707_v12  ;;  %v14984_v44 = vpop.f32.mrf.mxu1  ;;  %v8299_v55 = vrot.slane %v19156_v20, 1  ;;  %v16566_v35 = vld [vmem:[%s21562_s5 + $0x330] sm:$0xff]  }
 0x3e7   : > { %v14836_v32 = vpop.f32.mrf.mxu0 }
 0x3e8   : > { %v19159_v62 = vadd.f32 %v18960_v59, %v14835_v37  ;;  %v7725_v59 = vshll.u32 %v18969_v39, 16  ;;  %v7736_v31 = vsel %vm5882_vm9, %v7731_v33, %v7735_v38  ;;  %v14985_v8 = vpop.f32.mrf.mxu1  ;;  %v16571_v33 = vld [vmem:[%s21562_s5 + $0x368] sm:$0xff]  }
 0x3e9   : > { %v14837_v47 = vpop.f32.mrf.mxu0 }
 0x3ea   : > { %21641 = vst [vmem:[#allocation9_spill] sm:$0xff] %v19159_v62  ;;  %v14838_v25 = vadd.f32 %v14837_v47, %v14836_v32  ;;  %v7749_v47 = vshll.u32 %v18974_v24, 16  ;;  %v7727_v46 = vrot.slane %v7725_v59, 1  ;;  %v14987_v9 = vpop.f32.mrf.mxu1  ;;  %v19200_v59 = vld [vmem:[#allocation2 + $0xc4] ss:$8 sps:$4 sm:$0xff]  }
 0x3eb   : > { %v14839_v37 = vpop.f32.mrf.mxu0  ;;  %8086 = vmatmul.mubr.bf16.vlgmr.msra.gmra.mxu0 %v7708_v40  ;;  %v19185_v40 = vadd.f32 %v14985_v8, %v14984_v44  ;;  %v19232_v62 = vld [vmem:[#allocation2 + $0xc0] ss:$8 sps:$4 sm:$0xff]  }
 0x3ec   : > { %v19175_v18 = vadd.f32 %v18966_v29, %v14838_v25  ;;  %15400 = vmatpush3.bf16.msra.mxu0 %v16558_v63  ;;  %8093 = vmatprep.mubr.bf16.mxu0 %v7736_v31  ;;  %v8300_v29 = vsel %vm6692_vm10, %v8295_v30, %v8299_v55  ;;  %v19188_v63 = vld [vmem:[#allocation2 + $0xb0] ss:$8 sps:$4 sm:$0xff]   ;;  %v7721_v31 = vshrl.u32 %v18957_v28, 16  ;;  %v16574_v30 = vld [vmem:[%s21562_s5 + $0x328] sm:$0xff]   ;;  %v14988_v28 = vpop.f32.mrf.mxu1 }
 0x3ed   : > { %v14840_v32 = vpop.f32.mrf.mxu0  ;;  %15401 = vmatprep.subr.bf16.mxu0 %v16565_v17  ;;  %8544 = vmatmul.mubr.bf16.gmra.mxu1 %v8300_v29  ;;  %v8306_v17 = vsel %vm6692_vm10, %v8301_v26, %v21643_v56  ;;  %v16578_v26 = vld [vmem:[%s21562_s5 + $0x360] sm:$0xff]  }
 0x3ee   : > { %21642 = vst [vmem:[#allocation10_spill] sm:$0xff] %v19175_v18  ;;  %v14841_v25 = vadd.f32 %v14840_v32, %v14839_v37  ;;  %v7747_v18 = vor.u32 %v7745_v23, %v7735_v38  ;;  %8551 = vmatprep.mubr.bf16.mxu1 %v8306_v17  ;;  %v7723_v8 = vor.u32 %v7721_v31, %v7707_v12  ;;  %v7751_v32 = vrot.slane %v7749_v47, 1  ;;  %v14990_v23 = vpop.f32.mrf.mxu1 }
 0x3ef   : > { %v14842_v0 = vpop.f32.mrf.mxu0  ;;  %v19205_v38 = vadd.f32 %v14988_v28, %v14987_v9  ;;  %v7765_v31 = vshll.u32 %v18999_v42, 16  ;;  %v7741_v9 = vshll.u32 %v19001_v41, 16  ;;  %v8309_v17 = vrot.slane %v19200_v59, 1 }
 0x3f0   : > { %v19195_v44 = vadd.f32 %v18982_v4, %v14841_v25  ;;  %15402 = vmatpush3.bf16.msra.mxu0 %v16566_v35  ;;  %v8303_v4 = vrot.slane %v19188_v63, 1  ;;  %v7728_v35 = vsel %vm5882_vm9, %v7723_v8, %v7727_v46  ;;  %v7752_v25 = vsel %vm5882_vm9, %v7747_v18, %v7751_v32  ;;  %v14991_v56 = vpop.f32.mrf.mxu1 }
 0x3f1   : > { %v14843_v37 = vpop.f32.mrf.mxu0  ;;  %15403 = vmatprep.subr.bf16.mxu0 %v16571_v33  ;;  %v7737_v33 = vshrl.u32 %v18969_v39, 16  ;;  %v19223_v18 = vadd.f32 %v14991_v56, %v14990_v23 }
 0x3f2   : > { %21644 = vst [vmem:[#allocation11_spill] sm:$0xff] %v19195_v44  ;;  %v14844_v12 = vadd.f32 %v14843_v37, %v14842_v0  ;;  %v16579_v0 = vld [vmem:[%s21562_s5 + $0x320] sm:$0xff]   ;;  %v8304_v39 = vsel %vm6692_vm10, %v8299_v55, %v8303_v4  ;;  %v7767_v44 = vrot.slane %v7765_v31, 1  ;;  %v7743_v55 = vrot.slane %v7741_v9, 1 }
 0x3f3   : > { %v14845_v29 = vpop.f32.mrf.mxu0  ;;  %8094 = vmatmul.mubr.bf16.gmra.mxu0 %v7728_v35  ;;  %v7739_v37 = vor.u32 %v7737_v33, %v7727_v46  ;;  %v16587_v46 = vld [vmem:[%s21562_s5 + $0x318] sm:$0xff]   ;;  %v7757_v9 = vshll.u32 %v19025_v21, 16 }
 0x3f4   : > { %v19212_v47 = vadd.f32 %v18994_v57, %v14844_v12  ;;  %8101 = vmatprep.mubr.bf16.mxu0 %v7752_v25  ;;  %15404 = vmatpush3.bf16.msra.mxu0 %v16574_v30  ;;  %v16586_v57 = vld [vmem:[%s21562_s5 + $0x358] sm:$0xff]   ;;  %v14993_v30 = vpop.f32.mrf.mxu1  ;;  %v21646_v12 = vrot.slane %v19153_v27, 1 }
 0x3f5   : > { %v14846_v8 = vpop.f32.mrf.mxu0  ;;  %15405 = vmatprep.subr.bf16.mxu0 %v16578_v26  ;;  %8552 = vmatmul.mubr.bf16.gmra.mxu1 %v8304_v39  ;;  %v19229_v25 = vld [vmem:[#allocation2 + $0xd4] ss:$8 sps:$4 sm:$0xff]   ;;  %v7761_v26 = vshrl.u32 %v18974_v24, 16 }
 0x3f6   : > { %21645 = vst [vmem:[#allocation12_spill] sm:$0xff] %v19212_v47  ;;  %v14847_v28 = vadd.f32 %v14846_v8, %v14845_v29  ;;  %v8310_v35 = vsel %vm6692_vm10, %v21646_v12, %v8309_v17  ;;  %v14994_v29 = vpop.f32.mrf.mxu1  ;;  %v16596_v24 = vld [vmem:[%s21562_s5 + $0x350] sm:$0xff]   ;;  %v8313_v39 = vrot.slane %v19229_v25, 1 }
 0x3f7   : > { %v14848_v47 = vpop.f32.mrf.mxu0  ;;  %8559 = vmatprep.mubr.bf16.mxu1 %v8310_v35  ;;  %v7763_v56 = vor.u32 %v7761_v26, %v7751_v32  ;;  %v19240_v8 = vadd.f32 %v14994_v29, %v14993_v30  ;;  %v8307_v32 = vrot.slane %v19232_v62, 1  ;;  %v7777_v35 = vshrl.u32 %v18999_v42, 16 }
 0x3f8   : > { %v19235_v23 = vadd.f32 %v19010_v5, %v14847_v28  ;;  %15406 = vmatpush3.bf16.msra.mxu0 %v16579_v0  ;;  %v7744_v5 = vsel %vm5882_vm9, %v7739_v37, %v7743_v55  ;;  %v14996_v0 = vpop.f32.mrf.mxu1  ;;  %v7781_v26 = vshll.u32 %v19030_v52, 16  ;;  %v8314_v42 = vsel %vm6692_vm10, %v8309_v17, %v8313_v39 }
 0x3f9   : > { %v14849_v33 = vpop.f32.mrf.mxu0  ;;  %15407 = vmatprep.subr.bf16.mxu0 %v16586_v57  ;;  %v7768_v12 = vsel %vm5882_vm9, %v7763_v56, %v7767_v44  ;;  %v19261_v56 = vld [vmem:[#allocation2 + $0xd0] ss:$8 sps:$4 sm:$0xff]  }
 0x3fa   : > { %21647 = vst [vmem:[#allocation13_spill] sm:$0xff] %v19235_v23  ;;  %v14850_v31 = vadd.f32 %v14849_v33, %v14848_v47  ;;  %v14997_v30 = vpop.f32.mrf.mxu1  ;;  %v16597_v47 = vld [vmem:[%s21562_s5 + $0x310] sm:$0xff]   ;;  %v8308_v33 = vsel %vm6692_vm10, %v8303_v4, %v8307_v32  ;;  %v19273_v23 = vld [vmem:[#allocation2 + $0xe4] ss:$8 sps:$4 sm:$0xff]   ;;  %v21569_v17 = vrot.slane %v19261_v56, 1 }
 0x3fb   : > { %v14851_v28 = vpop.f32.mrf.mxu0  ;;  %8102 = vmatmul.mubr.bf16.gmra.mxu0 %v7744_v5  ;;  %v19258_v29 = vadd.f32 %v14997_v30, %v14996_v0  ;;  %v7759_v5 = vrot.slane %v7757_v9, 1  ;;  %v7779_v30 = vor.u32 %v7777_v35, %v7767_v44 }
 0x3fc   : > { %v19251_v57 = vadd.f32 %v19022_v14, %v14850_v31  ;;  %8109 = vmatprep.mubr.bf16.mxu0 %v7768_v12  ;;  %15408 = vmatpush3.bf16.msra.mxu0 %v16587_v46  ;;  %v16608_v14 = vld [vmem:[%s21562_s5 + $0x348] sm:$0xff]   ;;  %v7753_v31 = vshrl.u32 %v19001_v41, 16  ;;  %v15115_v12 = vpop.f32.mrf.mxu1 }
 0x3fd   : > { %v14852_v37 = vpop.f32.mrf.mxu0  ;;  %15409 = vmatprep.subr.bf16.mxu0 %v16596_v24  ;;  %8560 = vmatmul.mubr.bf16.gmra.mxu1 %v8308_v33  ;;  %v16611_v41 = vld [vmem:[%s21562_s5 + $0x308] sm:$0xff]  }
 0x3fe   : > { %21648 = vst [vmem:[#allocation14_spill] sm:$0xff] %v19251_v57  ;;  %v14853_v46 = vadd.f32 %v14852_v37, %v14851_v28  ;;  %8567 = vmatprep.mubr.bf16.mxu1 %v8314_v42  ;;  %v7755_v24 = vor.u32 %v7753_v31, %v7743_v55  ;;  %v15116_v57 = vpop.f32.mrf.mxu1  ;;  %v7783_v28 = vrot.slane %v7781_v26, 1  ;;  %v7546_v26 = vld [vmem:[#allocation2 + $0xf0] sm:$0x11]  ;;  %v7773_v31 = vshll.u32 %v19057_v11, 16 }
 0x3ff   : > { %v14854_v0 = vpop.f32.mrf.mxu0  ;;  %v19278_v37 = vadd.f32 %v15116_v57, %v15115_v12  ;;  %v8317_v42 = vrot.slane %v19273_v23, 1 }
 0x400   : > { %v19271_v4 = vadd.f32 %v19035_v60, %v14853_v46  ;;  %15410 = vmatpush3.bf16.msra.mxu0 %v16597_v47  ;;  %v16625_v60 = vld [vmem:[%s21562_s5 + $0x340] sm:$0xff]   ;;  %v7760_v55 = vsel %vm5882_vm9, %v7755_v24, %v7759_v5  ;;  %v15118_v47 = vpop.f32.mrf.mxu1  ;;  %v7784_v33 = vsel %vm5882_vm9, %v7779_v30, %v7783_v28  ;;  %v7797_v46 = vshll.u32 %v19055_v49, 16 }
 0x401   : > { %v14855_v9 = vpop.f32.mrf.mxu0  ;;  %15411 = vmatprep.subr.bf16.mxu0 %v16608_v14  ;;  %v7769_v14 = vshrl.u32 %v19025_v21, 16  ;;  %v16632_v21 = vld [vmem:[%s21562_s5 + $0x478] sm:$0xff]  }
 0x402   : > { %21649 = vst [vmem:[#allocation15_spill] sm:$0xff] %v19271_v4  ;;  %v14856_v44 = vadd.f32 %v14855_v9, %v14854_v0  ;;  %v15119_v12 = vpop.f32.mrf.mxu1  ;;  %v16626_v0 = vld [vmem:[%s21562_s5 + $0x300] sm:$0xff]   ;;  %v9091_v9 = vld [vmem:[#allocation2 + $0x28] sm:$0xff] }
 0x403   : > { %v14857_v35 = vpop.f32.mrf.mxu0  ;;  %8110 = vmatmul.mubr.bf16.gmra.mxu0 %v7760_v55  ;;  %v19296_v24 = vadd.f32 %v15119_v12, %v15118_v47  ;;  %v7771_v55 = vor.u32 %v7769_v14, %v7759_v5  ;;  %v19307_v47 = vcombine.high %v7546_v26, %v7546_v26  ;;  %v7775_v5 = vrot.slane %v7773_v31, 1 }
 0x404   : > { %v19288_v57 = vadd.f32 %v19050_v22, %v14856_v44  ;;  %8117 = vmatprep.mubr.bf16.mxu0 %v7784_v33  ;;  %15412 = vmatpush3.bf16.msra.mxu0 %v16611_v41  ;;  %v8312_v22 = vsel %vm6692_vm10, %v8307_v32, %v21569_v17  ;;  %v15121_v41 = vpop.f32.mrf.mxu1  ;;  %v8318_v33 = vsel %vm6692_vm10, %v8313_v39, %v8317_v42  ;;  %v7799_v32 = vrot.slane %v7797_v46, 1  ;;  %v9090_v17 = vld [vmem:[#allocation2 + $0x20] sm:$0xff] }
 0x405   : > { %v14858_v30 = vpop.f32.mrf.mxu0  ;;  %15413 = vmatprep.subr.bf16.mxu0 %v16625_v60  ;;  %8568 = vmatmul.mubr.bf16.gmra.mxu1 %v8312_v22  ;;  %v19310_v60 = vld [vmem:[#allocation2 + $0xe0] ss:$8 sps:$4 sm:$0xff]   ;;  %v19315_v14 = vcombine.high %v9090_v17, %v9091_v9  ;;  %v7789_v46 = vshll.u32 %v19081_v36, 16  ;;  %v8321_v13 = vrot.slane %v19307_v47, 1 }
 0x406   : > { %21650 = vst [vmem:[#allocation16_spill] sm:$0xff] %v19288_v57  ;;  %v14859_v44 = vadd.f32 %v14858_v30, %v14857_v35  ;;  %v7793_v57 = vshrl.u32 %v19030_v52, 16  ;;  %8575 = vmatprep.mubr.bf16.mxu1 %v8318_v33  ;;  %v15122_v35 = vpop.f32.mrf.mxu1  ;;  %v7776_v52 = vsel %vm5882_vm9, %v7771_v55, %v7775_v5 }
 0x407   : > { %v14860_v12 = vpop.f32.mrf.mxu0  ;;  %v19317_v22 = vadd.f32 %v15122_v35, %v15121_v41  ;;  %v9284_v41 = vshll.u32 %v19315_v14, 16  ;;  %v7813_v35 = vshll.u32 %v19089_v2, 16 }
 0x408   : > { %v19313_v4 = vadd.f32 %v19066_v53, %v14859_v44  ;;  %15414 = vmatpush3.bf16.msra.mxu0 %v16626_v0  ;;  %v7795_v39 = vor.u32 %v7793_v57, %v7783_v28  ;;  %v15124_v33 = vpop.f32.mrf.mxu1  ;;  %v19322_v53 = vld [vmem:[#allocation2 + $0x34] ss:$8 sps:$4 sm:$0xff]   ;;  %v8315_v0 = vrot.slane %v19310_v60, 1  ;;  %v7785_v57 = vshrl.u32 %v19057_v11, 16 }
 0x409   : > { %v14861_v30 = vpop.f32.mrf.mxu0  ;;  %21652 = vst [vmem:[#allocation18_spill] sm:$0xff] %v19317_v22  ;;  %15599 = vmatprep.subr.bf16.mxu0 %v16632_v21  ;;  %v7809_v21 = vshrl.u32 %v19055_v49, 16  ;;  %v8322_v49 = vsel %vm6692_vm10, %v8317_v42, %v8321_v13  ;;  %v9289_v11 = vshll.u32 %v19322_v53, 16  ;;  %v19342_v22 = vcombine.low %v9090_v17, %v9091_v9  ;;  %v19350_v13 = vld [vmem:[#allocation2 + $0x30] ss:$8 sps:$4 sm:$0xff]  }
 0x40a   : > { %21651 = vst [vmem:[#allocation17_spill] sm:$0xff] %v19313_v4  ;;  %v14862_v50 = vadd.f32 %v14861_v30, %v14860_v12  ;;  %v7800_v44 = vsel %vm5882_vm9, %v7795_v39, %v7799_v32  ;;  %v15125_v55 = vpop.f32.mrf.mxu1  ;;  %v21655_v39 = vrot.slane %v19261_v56, 1  ;;  %v19338_v4 = vcombine.low %v7546_v26, %v7546_v26 }
 0x40b   : > { %v14863_v31 = vpop.f32.mrf.mxu0  ;;  %8118 = vmatmul.mubr.bf16.gmra.mxu0 %v7776_v52  ;;  %v19333_v30 = vadd.f32 %v15125_v55, %v15124_v33  ;;  %v7811_v61 = vor.u32 %v7809_v21, %v7799_v32  ;;  %v7787_v55 = vor.u32 %v7785_v57, %v7775_v5  ;;  %v9286_v26 = vrot.slane %v9284_v41, 1 }
 0x40c   : > { %v19327_v28 = vadd.f32 %v19078_v19, %v14862_v50  ;;  %8125 = vmatprep.mubr.bf16.mxu0 %v7800_v44  ;;  %v8316_v52 = vsel %vm6692_vm10, %v21655_v39, %v8315_v0  ;;  %v7791_v50 = vrot.slane %v7789_v46, 1  ;;  %v15127_v44 = vpop.f32.mrf.mxu1  ;;  %v9282_v17 = vshrl.u32 %v19315_v14, 16 }
 0x40d   : > { %v14864_v12 = vpop.f32.mrf.mxu0  ;;  %21654 = vst [vmem:[#allocation20_spill] sm:$0xff] %v19333_v30  ;;  %8576 = vmatmul.mubr.bf16.gmra.mxu1 %v8316_v52  ;;  %v9291_v9 = vrot.slane %v9289_v11, 1  ;;  %v7829_v57 = vshll.u32 %v19107_v6, 16  ;;  %v9272_v41 = vshll.u32 %v19342_v22, 16 }
 0x40e   : > { %21653 = vst [vmem:[#allocation19_spill] sm:$0xff] %v19327_v28  ;;  %v14865_v19 = vadd.f32 %v14864_v12, %v14863_v31  ;;  %8583 = vmatprep.mubr.bf16.mxu1 %v8322_v49  ;;  %v15128_v39 = vpop.f32.mrf.mxu1  ;;  %v7815_v31 = vrot.slane %v7813_v35, 1  ;;  %v8319_v12 = vrot.slane %v19338_v4, 1  ;;  %v7792_v32 = vsel %vm5882_vm9, %v7787_v55, %v7791_v50 }
 0x40f   : > { %v14866_v28 = vpop.f32.mrf.mxu0  ;;  %v19347_v46 = vadd.f32 %v15128_v39, %v15127_v44  ;;  %v19362_v44 = vld [vmem:[#allocation2 + $0x44] ss:$8 sps:$4 sm:$0xff]   ;;  %v9277_v55 = vshll.u32 %v19350_v13, 16 }
 0x410   : > { %v19345_v33 = vadd.f32 %v19091_v7, %v14865_v19  ;;  %v15130_v21 = vpop.f32.mrf.mxu1  ;;  %v7816_v5 = vsel %vm5882_vm9, %v7811_v61, %v7815_v31  ;;  %v9287_v19 = vor.u32 %v9286_v26, %v9282_v17  ;;  %v8320_v61 = vsel %vm6692_vm10, %v8315_v0, %v8319_v12 }
 0x411   : > { %v14867_v30 = vpop.f32.mrf.mxu0  ;;  %v9274_v26 = vrot.slane %v9272_v41, 1  ;;  %v9301_v0 = vshrl.u32 %v19322_v53, 16  ;;  %v9305_v12 = vshll.u32 %v19362_v44, 16  ;;  %v7821_v41 = vshll.u32 %v19129_v54, 16 }
 0x412   : > { %21656 = vst [vmem:[#allocation21_spill] sm:$0xff] %v19345_v33  ;;  %v14868_v42 = vadd.f32 %v14867_v30, %v14866_v28  ;;  %v7801_v28 = vshrl.u32 %v19081_v36, 16  ;;  %v7805_v30 = vshll.u32 %v19109_v15, 16  ;;  %v15131_v52 = vpop.f32.mrf.mxu1 }
 0x413   : > { %v14869_v7 = vpop.f32.mrf.mxu0  ;;  %8126 = vmatmul.mubr.bf16.gmra.mxu0 %v7792_v32  ;;  %v19364_v11 = vadd.f32 %v15131_v52, %v15130_v21 }
 0x414   : > { %v19358_v35 = vadd.f32 %v19102_v34, %v14868_v42  ;;  %8133 = vmatprep.mubr.bf16.mxu0 %v7816_v5  ;;  %v7803_v32 = vor.u32 %v7801_v28, %v7791_v50  ;;  %v15133_v34 = vpop.f32.mrf.mxu1  ;;  %v9292_v42 = vsel %vm5882_vm9, %v9287_v19, %v9291_v9  ;;  %v7825_v5 = vshrl.u32 %v19089_v2, 16 }
 0x415   : > { %v14870_v49 = vpop.f32.mrf.mxu0  ;;  %8584 = vmatmul.mubr.bf16.gmra.mxu1 %v8320_v61  ;;  %v7807_v21 = vrot.slane %v7805_v30, 1  ;;  %v9270_v28 = vshrl.u32 %v19342_v22, 16  ;;  %v9303_v61 = vor.u32 %v9301_v0, %v9291_v9  ;;  %v19380_v30 = vld [vmem:[#allocation2 + $0x54] ss:$8 sps:$4 sm:$0xff]   ;;  %v7841_v9 = vshrl.u32 %v19107_v6, 16 }
 0x416   : > { %21657 = vst [vmem:[#allocation22_spill] sm:$0xff] %v19358_v35  ;;  %v14871_v39 = vadd.f32 %v14870_v49, %v14869_v7  ;;  %v7831_v35 = vrot.slane %v7829_v57, 1  ;;  %9657 = vmatprep.mubr.bf16.mxu1 %v9292_v42  ;;  %v15134_v52 = vpop.f32.mrf.mxu1  ;;  %v7827_v7 = vor.u32 %v7825_v5, %v7815_v31  ;;  %v9279_v49 = vrot.slane %v9277_v55, 1  ;;  %v19383_v31 = vld [vmem:[#allocation2 + $0x40] ss:$8 sps:$4 sm:$0xff]  }
 0x417   : > { %v14872_v36 = vpop.f32.mrf.mxu0  ;;  %v19376_v19 = vadd.f32 %v15134_v52, %v15133_v34  ;;  %v7808_v57 = vsel %vm5882_vm9, %v7803_v32, %v7807_v21  ;;  %v7817_v55 = vshrl.u32 %v19109_v15, 16  ;;  %v7845_v52 = vshll.u32 %v19136_v3, 16 }
 0x418   : > { %v19371_v17 = vadd.f32 %v19115_v1, %v14871_v39  ;;  %v15136_v1 = vpop.f32.mrf.mxu1  ;;  %v7832_v42 = vsel %vm5882_vm9, %v7827_v7, %v7831_v35  ;;  %v7823_v7 = vrot.slane %v7821_v41, 1  ;;  %v9297_v6 = vshll.u32 %v19383_v31, 16 }
 0x419   : > { %v14873_v50 = vpop.f32.mrf.mxu0  ;;  %v7847_v41 = vrot.slane %v7845_v52, 1 }
 0x41a   : > { %21658 = vst [vmem:[#allocation23_spill] sm:$0xff] %v19371_v17  ;;  %v14874_v2 = vadd.f32 %v14873_v50, %v14872_v36  ;;  %v9275_v17 = vor.u32 %v9274_v26, %v9270_v28  ;;  %v15137_v32 = vpop.f32.mrf.mxu1  ;;  %v9307_v36 = vrot.slane %v9305_v12, 1  ;;  %v9293_v12 = vshrl.u32 %v19350_v13, 16 }
 0x41b   : > { %v14875_v39 = vpop.f32.mrf.mxu0  ;;  %8134 = vmatmul.mubr.bf16.gmra.mxu0 %v7808_v57  ;;  %v19391_v0 = vadd.f32 %v15137_v32, %v15136_v1  ;;  %v7843_v57 = vor.u32 %v7841_v9, %v7831_v35 }
 0x41c   : > { %v19386_v34 = vadd.f32 %v19126_v48, %v14874_v2  ;;  %8141 = vmatprep.mubr.bf16.mxu0 %v7832_v42  ;;  %v9280_v50 = vsel %vm5882_vm9, %v9275_v17, %v9279_v49  ;;  %v15139_v28 = vpop.f32.mrf.mxu1  ;;  %v9308_v48 = vsel %vm5882_vm9, %v9303_v61, %v9307_v36  ;;  %v9321_v2 = vshll.u32 %v19380_v30, 16  ;;  %v19403_v61 = vld [vmem:[#allocation2 + $0x50] ss:$8 sps:$4 sm:$0xff]  }
 0x41d   : > { %v14876_v5 = vpop.f32.mrf.mxu0  ;;  %9658 = vmatmul.mubr.bf16.vlgmr.msra.gmra.mxu1 %v9280_v50  ;;  %v7819_v42 = vor.u32 %v7817_v55, %v7807_v21  ;;  %v7861_v21 = vshll.u32 %v19153_v27, 16  ;;  %v9299_v55 = vrot.slane %v9297_v6, 1 }
 0x41e   : > { %21659 = vst [vmem:[#allocation24_spill] sm:$0xff] %v19386_v34  ;;  %v14877_v26 = vadd.f32 %v14876_v5, %v14875_v39  ;;  %9665 = vmatprep.mubr.bf16.mxu1 %v9308_v48  ;;  %v15140_v17 = vpop.f32.mrf.mxu1  ;;  %v9295_v5 = vor.u32 %v9293_v12, %v9279_v49  ;;  %v9317_v48 = vshrl.u32 %v19362_v44, 16  ;;  %v9323_v34 = vrot.slane %v9321_v2, 1  ;;  %v19414_v12 = vld [vmem:[#allocation2 + $0x64] ss:$8 sps:$4 sm:$0xff]  }
 0x41f   : > { %v14878_v15 = vpop.f32.mrf.mxu0  ;;  %v19401_v32 = vadd.f32 %v15140_v17, %v15139_v28  ;;  %v7824_v35 = vsel %vm5882_vm9, %v7819_v42, %v7823_v7  ;;  %v7833_v49 = vshrl.u32 %v19129_v54, 16  ;;  %v9313_v17 = vshll.u32 %v19403_v61, 16 }
 0x420   : > { %v19399_v1 = vadd.f32 %v19138_v43, %v14877_v26  ;;  %v15142_v9 = vpop.f32.mrf.mxu1  ;;  %v7848_v43 = vsel %vm5882_vm9, %v7843_v57, %v7847_v41  ;;  %v7837_v26 = vshll.u32 %v19156_v20, 16  ;;  %v9300_v57 = vsel %vm5882_vm9, %v9295_v5, %v9299_v55 }
 0x421   : > { %v14879_v39 = vpop.f32.mrf.mxu0  ;;  %v9333_v5 = vshrl.u32 %v19380_v30, 16 }
 0x422   : > { %21660 = vst [vmem:[#allocation25_spill] sm:$0xff] %v19399_v1  ;;  %v14880_v50 = vadd.f32 %v14879_v39, %v14878_v15  ;;  %v15143_v28 = vpop.f32.mrf.mxu1  ;;  %v9319_v15 = vor.u32 %v9317_v48, %v9307_v36  ;;  %v7835_v39 = vor.u32 %v7833_v49, %v7823_v7 }
 0x423   : > { %v14881_v33 = vpop.f32.mrf.mxu0  ;;  %8142 = vmatmul.mubr.bf16.gmra.mxu0 %v7824_v35  ;;  %v19416_v42 = vadd.f32 %v15143_v28, %v15142_v9  ;;  %v7857_v35 = vshrl.u32 %v19136_v3, 16  ;;  %v7839_v9 = vrot.slane %v7837_v26, 1  ;;  %v9337_v28 = vshll.u32 %v19414_v12, 16  ;;  %v19432_v26 = vld [vmem:[#allocation2 + $0x74] ss:$8 sps:$4 sm:$0xff]  }
 0x424   : > { %v19410_v52 = vadd.f32 %v19149_v58, %v14880_v50  ;;  %8149 = vmatprep.mubr.bf16.mxu0 %v7848_v43  ;;  %v15145_v58 = vpop.f32.mrf.mxu1  ;;  %v9324_v50 = vsel %vm5882_vm9, %v9319_v15, %v9323_v34  ;;  %v7863_v43 = vrot.slane %v7861_v21, 1  ;;  %v9309_v15 = vshrl.u32 %v19383_v31, 16 }
 0x425   : > { %v14882_v2 = vpop.f32.mrf.mxu0  ;;  %9666 = vmatmul.mubr.bf16.gmra.mxu1 %v9300_v57  ;;  %v7859_v7 = vor.u32 %v7857_v35, %v7847_v41  ;;  %v7840_v3 = vsel %vm5882_vm9, %v7835_v39, %v7839_v9  ;;  %v7853_v21 = vshll.u32 %v19188_v63, 16  ;;  %v19435_v41 = vld [vmem:[#allocation2 + $0x60] ss:$8 sps:$4 sm:$0xff]  }
 0x426   : > { %21661 = vst [vmem:[#allocation26_spill] sm:$0xff] %v19410_v52  ;;  %v14883_v6 = vadd.f32 %v14882_v2, %v14881_v33  ;;  %9673 = vmatprep.mubr.bf16.mxu1 %v9324_v50  ;;  %v15146_v48 = vpop.f32.mrf.mxu1  ;;  %v9315_v2 = vrot.slane %v9313_v17, 1  ;;  %v9311_v52 = vor.u32 %v9309_v15, %v9299_v55  ;;  %v7849_v17 = vshrl.u32 %v19156_v20, 16 }
 0x427   : > { %v14884_v54 = vpop.f32.mrf.mxu0  ;;  %v19427_v49 = vadd.f32 %v15146_v48, %v15145_v58  ;;  %v7877_v48 = vshll.u32 %v19200_v59, 16 }
 0x428   : > { %v19423_v36 = vadd.f32 %v19167_v10, %v14883_v6  ;;  %v15148_v10 = vpop.f32.mrf.mxu1  ;;  %v9335_v6 = vor.u32 %v9333_v5, %v9323_v34  ;;  %v7873_v34 = vshrl.u32 %v19153_v27, 16  ;;  %v9329_v27 = vshll.u32 %v19435_v41, 16 }
 0x429   : > { %v14885_v33 = vpop.f32.mrf.mxu0 }
 0x42a   : > { %21662 = vst [vmem:[#allocation27_spill] sm:$0xff] %v19423_v36  ;;  %v14886_v57 = vadd.f32 %v14885_v33, %v14884_v54  ;;  %v7864_v36 = vsel %vm5882_vm9, %v7859_v7, %v7863_v43  ;;  %v15149_v39 = vpop.f32.mrf.mxu1  ;;  %v9339_v54 = vrot.slane %v9337_v28, 1  ;;  %v9316_v33 = vsel %vm5882_vm9, %v9311_v52, %v9315_v2 }
 0x42b   : > { %v14887_v50 = vpop.f32.mrf.mxu0  ;;  %8150 = vmatmul.mubr.bf16.gmra.mxu0 %v7840_v3  ;;  %v19443_v5 = vadd.f32 %v15149_v39, %v15148_v10  ;;  %v7855_v7 = vrot.slane %v7853_v21, 1  ;;  %v9325_v28 = vshrl.u32 %v19403_v61, 16  ;;  %v7851_v10 = vor.u32 %v7849_v17, %v7839_v9 }
 0x42c   : > { %v19438_v58 = vadd.f32 %v19185_v40, %v14886_v57  ;;  %8157 = vmatprep.mubr.bf16.mxu0 %v7864_v36  ;;  %v15151_v15 = vpop.f32.mrf.mxu1  ;;  %v9340_v40 = vsel %vm5882_vm9, %v9335_v6, %v9339_v54  ;;  %v9353_v36 = vshll.u32 %v19432_v26, 16  ;;  %v7875_v57 = vor.u32 %v7873_v34, %v7863_v43  ;;  %v19455_v6 = vld [vmem:[#allocation2 + $0x70] ss:$8 sps:$4 sm:$0xff]  }
 0x42d   : > { %v14888_v35 = vpop.f32.mrf.mxu0  ;;  %9674 = vmatmul.mubr.bf16.gmra.mxu1 %v9316_v33  ;;  %v7879_v21 = vrot.slane %v7877_v48, 1  ;;  %v7856_v43 = vsel %vm5882_vm9, %v7851_v10, %v7855_v7  ;;  %v7869_v9 = vshll.u32 %v19232_v62, 16  ;;  %v7893_v17 = vshll.u32 %v19229_v25, 16 }
 0x42e   : > { %21663 = vst [vmem:[#allocation28_spill] sm:$0xff] %v19438_v58  ;;  %v14889_v55 = vadd.f32 %v14888_v35, %v14887_v50  ;;  %9681 = vmatprep.mubr.bf16.mxu1 %v9340_v40  ;;  %v15152_v52 = vpop.f32.mrf.mxu1  ;;  %v9327_v35 = vor.u32 %v9325_v28, %v9315_v2  ;;  %v9349_v40 = vshrl.u32 %v19414_v12, 16  ;;  %v9355_v58 = vrot.slane %v9353_v36, 1  ;;  %v19466_v28 = vld [vmem:[#allocation2 + $0x84] ss:$8 sps:$4 sm:$0xff]  }
 0x42f   : > { %v14890_v20 = vpop.f32.mrf.mxu0  ;;  %v19453_v39 = vadd.f32 %v15152_v52, %v15151_v15  ;;  %v9331_v48 = vrot.slane %v9329_v27, 1  ;;  %v9345_v52 = vshll.u32 %v19455_v6, 16  ;;  %v7889_v27 = vshrl.u32 %v19200_v59, 16 }
 0x430   : > { %v19451_v3 = vadd.f32 %v19205_v38, %v14889_v55  ;;  %v15154_v34 = vpop.f32.mrf.mxu1  ;;  %v7880_v38 = vsel %vm5882_vm9, %v7875_v57, %v7879_v21  ;;  %v7865_v55 = vshrl.u32 %v19188_v63, 16  ;;  %v7885_v59 = vshll.u32 %v19261_v56, 16 }
 0x431   : > { %v14891_v50 = vpop.f32.mrf.mxu0  ;;  %v9332_v57 = vsel %vm5882_vm9, %v9327_v35, %v9331_v48  ;;  %v9365_v35 = vshrl.u32 %v19432_v26, 16 }
 0x432   : > { %v14892_v33 = vadd.f32 %v14891_v50, %v14890_v20  ;;  %v15155_v15 = vpop.f32.mrf.mxu1  ;;  %v9351_v20 = vor.u32 %v9349_v40, %v9339_v54  ;;  %v7895_v54 = vrot.slane %v7893_v17, 1 }
 0x433   : > { %v14893_v1 = vpop.f32.mrf.mxu0  ;;  %8158 = vmatmul.mubr.bf16.gmra.mxu0 %v7856_v43  ;;  %v19468_v10 = vadd.f32 %v15155_v15, %v15154_v34  ;;  %v7867_v43 = vor.u32 %v7865_v55, %v7855_v7  ;;  %v7891_v34 = vor.u32 %v7889_v27, %v7879_v21 }
 0x434   : > { %v19463_v2 = vadd.f32 %v19223_v18, %v14892_v33  ;;  %8165 = vmatprep.mubr.bf16.mxu0 %v7880_v38  ;;  %v15157_v18 = vpop.f32.mrf.mxu1  ;;  %v9356_v33 = vsel %vm5882_vm9, %v9351_v20, %v9355_v58  ;;  %v7871_v38 = vrot.slane %v7869_v9, 1  ;;  %v9341_v20 = vshrl.u32 %v19435_v41, 16 }
 0x435   : > { %v14894_v36 = vpop.f32.mrf.mxu0  ;;  %9682 = vmatmul.mubr.bf16.gmra.mxu1 %v9332_v57  ;;  %v7896_v27 = vsel %vm5882_vm9, %v7891_v34, %v7895_v54 }
 0x436   : > { %21664 = vst [vmem:[#allocation29_spill] sm:$0xff] %v19463_v2  ;;  %v14895_v50 = vadd.f32 %v14894_v36, %v14893_v1  ;;  %9689 = vmatprep.mubr.bf16.mxu1 %v9356_v33  ;;  %v15158_v15 = vpop.f32.mrf.mxu1  ;;  %v9369_v1 = vshll.u32 %v19466_v28, 16  ;;  %v9347_v36 = vrot.slane %v9345_v52, 1  ;;  %v7872_v17 = vsel %vm5882_vm9, %v7867_v43, %v7871_v38  ;;  %v19507_v2 = vld [vmem:[#allocation2 + $0x90] ss:$8 sps:$4 sm:$0xff]  }
 0x437   : > { %v14896_v63 = vpop.f32.mrf.mxu0  ;;  %v19480_v55 = vadd.f32 %v15158_v15, %v15157_v18  ;;  %v9343_v33 = vor.u32 %v9341_v20, %v9331_v48  ;;  %v7881_v52 = vshrl.u32 %v19232_v62, 16 }
 0x438   : > { %v19475_v40 = vadd.f32 %v19240_v8, %v14895_v50  ;;  %v15160_v57 = vpop.f32.mrf.mxu1  ;;  %v9367_v8 = vor.u32 %v9365_v35, %v9355_v58  ;;  %v19484_v50 = vld [vmem:[#allocation2 + $0x94] ss:$8 sps:$4 sm:$0xff]   ;;  %v9371_v15 = vrot.slane %v9369_v1, 1  ;;  %v7887_v35 = vrot.slane %v7885_v59, 1 }
 0x439   : > { %v14897_v7 = vpop.f32.mrf.mxu0  ;;  %v9348_v48 = vsel %vm5882_vm9, %v9343_v33, %v9347_v36  ;;  %v9357_v1 = vshrl.u32 %v19455_v6, 16 }
 0x43a   : > { %21665 = vst [vmem:[#allocation30_spill] sm:$0xff] %v19475_v40  ;;  %v14898_v9 = vadd.f32 %v14897_v7, %v14896_v63  ;;  %v19487_v40 = vld [vmem:[#allocation2 + $0x80] ss:$8 sps:$4 sm:$0xff]   ;;  %v7909_v63 = vshll.u32 %v19273_v23, 16  ;;  %v15161_v43 = vpop.f32.mrf.mxu1  ;;  %v7905_v7 = vshrl.u32 %v19229_v25, 16 }
 0x43b   : > { %v15015_v21 = vpop.f32.mrf.mxu0  ;;  %8166 = vmatmul.mubr.bf16.gmra.mxu0 %v7872_v17  ;;  %v19495_v17 = vadd.f32 %v15161_v43, %v15160_v57  ;;  %v9361_v59 = vshll.u32 %v19487_v40, 16 }
 0x43c   : > { %v19490_v18 = vadd.f32 %v19258_v29, %v14898_v9  ;;  %8173 = vmatprep.mubr.bf16.mxu0 %v7896_v27  ;;  %v15163_v20 = vpop.f32.mrf.mxu1  ;;  %v9372_v29 = vsel %vm5882_vm9, %v9367_v8, %v9371_v15  ;;  %v9385_v9 = vshll.u32 %v19484_v50, 16  ;;  %v7883_v27 = vor.u32 %v7881_v52, %v7871_v38 }
 0x43d   : > { %v15016_v58 = vpop.f32.mrf.mxu0  ;;  %9690 = vmatmul.mubr.bf16.gmra.mxu1 %v9348_v48  ;;  %v7911_v57 = vrot.slane %v7909_v63, 1  ;;  %v9359_v48 = vor.u32 %v9357_v1, %v9347_v36  ;;  %v9381_v52 = vshrl.u32 %v19466_v28, 16  ;;  %v19517_v1 = vld [vmem:[#allocation2 + $0xa4] ss:$8 sps:$4 sm:$0xff]  }
 0x43e   : > { %21666 = vst [vmem:[#allocation31_spill] sm:$0xff] %v19490_v18  ;;  %v15017_v34 = vadd.f32 %v15016_v58, %v15015_v21  ;;  %v7907_v18 = vor.u32 %v7905_v7, %v7895_v54  ;;  %9697 = vmatprep.mubr.bf16.mxu1 %v9372_v29  ;;  %v15164_v43 = vpop.f32.mrf.mxu1  ;;  %v7888_v21 = vsel %vm5882_vm9, %v7883_v27, %v7887_v35  ;;  %v7897_v58 = vshrl.u32 %v19261_v56, 16 }
 0x43f   : > { %v15018_v62 = vpop.f32.mrf.mxu0  ;;  %v19505_v8 = vadd.f32 %v15164_v43, %v15163_v20  ;;  %v9387_v7 = vrot.slane %v9385_v9, 1  ;;  %v7925_v56 = vshll.u32 %v19307_v47, 16  ;;  %v9363_v20 = vrot.slane %v9361_v59, 1 }
 0x440   : > { %v7020_v25 = vadd.f32 %v15017_v34, %v19086_v16  ;;  %v15166_v54 = vpop.f32.mrf.mxu1  ;;  %v7912_v63 = vsel %vm5882_vm9, %v7907_v18, %v7911_v57  ;;  %v7901_v34 = vshll.u32 %v19310_v60, 16  ;;  %v9383_v27 = vor.u32 %v9381_v52, %v9371_v15 }
 0x441   : > { %v15019_v33 = vpop.f32.mrf.mxu0  ;;  %v7899_v43 = vor.u32 %v7897_v58, %v7887_v35  ;;  %v9377_v18 = vshll.u32 %v19507_v2, 16  ;;  %v7927_v52 = vrot.slane %v7925_v56, 1 }
 0x442   : > { %v15020_v38 = vadd.f32 %v15019_v33, %v15018_v62  ;;  %v19511_v29 = vadd.f32 %v19278_v37, %v7020_v25  ;;  %v15167_v62 = vpop.f32.mrf.mxu1  ;;  %v9364_v25 = vsel %vm5882_vm9, %v9359_v48, %v9363_v20 }
 0x443   : > { %v15021_v16 = vpop.f32.mrf.mxu0  ;;  %8174 = vmatmul.mubr.bf16.gmra.mxu0 %v7888_v21  ;;  %v19519_v37 = vadd.f32 %v15167_v62, %v15166_v54  ;;  %v7921_v21 = vshrl.u32 %v19273_v23, 16  ;;  %v9397_v54 = vshrl.u32 %v19484_v50, 16 }
 0x444   : > { %v7021_v36 = vadd.f32 %v15020_v38, %v19099_v45  ;;  %8181 = vmatprep.mubr.bf16.mxu0 %v7912_v63  ;;  %v15169_v47 = vpop.f32.mrf.mxu1  ;;  %v9388_v45 = vsel %vm5882_vm9, %v9383_v27, %v9387_v7  ;;  %v7903_v38 = vrot.slane %v7901_v34, 1  ;;  %v7917_v63 = vshll.u32 %v19338_v4, 16 }
 0x445   : > { %v15022_v9 = vpop.f32.mrf.mxu0  ;;  %9698 = vmatmul.mubr.bf16.gmra.mxu1 %v9364_v25  ;;  %v7923_v58 = vor.u32 %v7921_v21, %v7911_v57  ;;  %v21667_v57 = vld [vmem:[#allocation18_spill] sm:$0xff] }
 0x446   : > { %v15023_v33 = vadd.f32 %v15022_v9, %v15021_v16  ;;  %v19526_v59 = vadd.f32 %v19296_v24, %v7021_v36  ;;  %9705 = vmatprep.mubr.bf16.mxu1 %v9388_v45  ;;  %v15170_v48 = vpop.f32.mrf.mxu1  ;;  %v9401_v16 = vshll.u32 %v19517_v1, 16  ;;  %v9373_v24 = vshrl.u32 %v19487_v40, 16  ;;  %v21668_v45 = vld [vmem:[#allocation6_spill] sm:$0xff] }
 0x447   : > { %v15024_v15 = vpop.f32.mrf.mxu0  ;;  %v19532_v62 = vadd.f32 %v15170_v48, %v15169_v47  ;;  %v9379_v36 = vrot.slane %v9377_v18, 1  ;;  %v7904_v34 = vsel %vm5882_vm9, %v7899_v43, %v7903_v38  ;;  %v9399_v9 = vor.u32 %v9397_v54, %v9387_v7  ;;  %v19542_v47 = vld [vmem:[#allocation2 + $0xa0] ss:$8 sps:$4 sm:$0xff]  }
 0x448   : > { %v7022_v35 = vadd.f32 %v15023_v33, %v19112_v51  ;;  %v15172_v56 = vpop.f32.mrf.mxu1  ;;  %v19536_v51 = vld [vmem:[#allocation2 + $0xb4] ss:$8 sps:$4 sm:$0xff]   ;;  %v7928_v21 = vsel %vm5882_vm9, %v7923_v58, %v7927_v52  ;;  %v9375_v4 = vor.u32 %v9373_v24, %v9363_v20  ;;  %v7913_v7 = vshrl.u32 %v19310_v60, 16 }
 0x449   : > { %v15025_v23 = vpop.f32.mrf.mxu0  ;;  %v7919_v54 = vrot.slane %v7917_v63, 1  ;;  %v9417_v52 = vshll.u32 %v19536_v51, 16  ;;  %v21669_v58 = vld [vmem:[#allocation20_spill] sm:$0xff]  ;;  %v9389_v60 = vshrl.u32 %v19507_v2, 16  ;;  %v9393_v63 = vshll.u32 %v19542_v47, 16 }
 0x44a   : > { %v15026_v27 = vadd.f32 %v15025_v23, %v15024_v15  ;;  %v19539_v25 = vadd.f32 %v21667_v57, %v7022_v35  ;;  %v15173_v18 = vpop.f32.mrf.mxu1  ;;  %v9403_v15 = vrot.slane %v9401_v16, 1  ;;  %v9380_v35 = vsel %vm5882_vm9, %v9375_v4, %v9379_v36 }
 0x44b   : > { %v15027_v33 = vpop.f32.mrf.mxu0  ;;  %8182 = vmatmul.mubr.bf16.gmra.mxu0 %v7904_v34  ;;  %v19546_v23 = vadd.f32 %v15173_v18, %v15172_v56  ;;  %v7915_v16 = vor.u32 %v7913_v7, %v7903_v38  ;;  %v21671_v56 = vld [vmem:[#allocation7_spill] sm:$0xff]  ;;  %v9413_v38 = vshrl.u32 %v19517_v1, 16  ;;  %v9419_v7 = vrot.slane %v9417_v52, 1 }
 0x44c   : > { %v7023_v48 = vadd.f32 %v15026_v27, %v21668_v45  ;;  %8189 = vmatprep.mubr.bf16.mxu0 %v7928_v21  ;;  %v15175_v34 = vpop.f32.mrf.mxu1  ;;  %v9404_v20 = vsel %vm5882_vm9, %v9399_v9, %v9403_v15  ;;  %v9391_v9 = vor.u32 %v9389_v60, %v9379_v36  ;;  %v19568_v36 = vld [vmem:[#allocation2 + $0xc4] ss:$8 sps:$4 sm:$0xff]  }
 0x44d   : > { %v15028_v43 = vpop.f32.mrf.mxu0  ;;  %9706 = vmatmul.mubr.bf16.gmra.mxu1 %v9380_v35  ;;  %v7920_v45 = vsel %vm5882_vm9, %v7915_v16, %v7919_v54 }
 0x44e   : > { %v15029_v57 = vadd.f32 %v15028_v43, %v15027_v33  ;;  %v19552_v24 = vadd.f32 %v21669_v58, %v7023_v48  ;;  %9713 = vmatprep.mubr.bf16.mxu1 %v9404_v20  ;;  %v15176_v4 = vpop.f32.mrf.mxu1  ;;  %v19560_v43 = vld [vmem:[#allocation2 + $0xb0] ss:$8 sps:$4 sm:$0xff]  }
 0x44f   : > { %v15030_v27 = vpop.f32.mrf.mxu0  ;;  %v19558_v18 = vadd.f32 %v15176_v4, %v15175_v34  ;;  %v9415_v34 = vor.u32 %v9413_v38, %v9403_v15  ;;  %v9409_v52 = vshll.u32 %v19560_v43, 16  ;;  %v21675_v15 = vld [vmem:[#allocation9_spill] sm:$0xff] }
 0x450   : > { %21670 = vst [vmem:[#allocation18_spill] sm:$0xff] %v19552_v24  ;;  %v7024_v21 = vadd.f32 %v15029_v57, %v21671_v56  ;;  %v15178_v35 = vpop.f32.mrf.mxu1  ;;  %v9395_v57 = vrot.slane %v9393_v63, 1  ;;  %v21673_v56 = vld [vmem:[#allocation8_spill] sm:$0xff] }
 0x451   : > { %v15031_v33 = vpop.f32.mrf.mxu0  ;;  %v9420_v63 = vsel %vm5882_vm9, %v9415_v34, %v9419_v7 }
 0x452   : > { %v15032_v48 = vadd.f32 %v15031_v33, %v15030_v27  ;;  %v19564_v20 = vadd.f32 %v19347_v46, %v7024_v21  ;;  %v15179_v54 = vpop.f32.mrf.mxu1  ;;  %v9396_v60 = vsel %vm5882_vm9, %v9391_v9, %v9395_v57  ;;  %v9429_v9 = vshrl.u32 %v19536_v51, 16 }
 0x453   : > { %v15033_v58 = vpop.f32.mrf.mxu0  ;;  %8190 = vmatmul.mubr.bf16.gmra.mxu0 %v7920_v45  ;;  %v19570_v27 = vadd.f32 %v15179_v54, %v15178_v35  ;;  %v16633_v45 = vld [vmem:[%s21562_s5 + $0x438] sm:$0xff]   ;;  %v9433_v35 = vshll.u32 %v19568_v36, 16 }
 0x454   : > { %21672 = vst [vmem:[#allocation6_spill] sm:$0xff] %v19564_v20  ;;  %v7025_v24 = vadd.f32 %v15032_v48, %v21673_v56  ;;  %8949 = vmatprep.mubr.bf16.mxu0 %v19315_v14  ;;  %v15181_v21 = vpop.f32.mrf.mxu1  ;;  %v9411_v56 = vrot.slane %v9409_v52, 1  ;;  %v21677_v20 = vld [vmem:[#allocation10_spill] sm:$0xff] }
 0x455   : > { %v15034_v16 = vpop.f32.mrf.mxu0  ;;  %9714 = vmatmul.mubr.bf16.gmra.mxu1 %v9396_v60  ;;  %v19590_v60 = vld [vmem:[#allocation2 + $0xd4] ss:$8 sps:$4 sm:$0xff]  }
 0x456   : > { %v15035_v46 = vadd.f32 %v15034_v16, %v15033_v58  ;;  %v19576_v4 = vadd.f32 %v19364_v11, %v7025_v24  ;;  %9721 = vmatprep.mubr.bf16.mxu1 %v9420_v63  ;;  %v15182_v48 = vpop.f32.mrf.mxu1  ;;  %v16640_v58 = vld [vmem:[%s21562_s5 + $0x470] sm:$0xff]   ;;  %v9405_v24 = vshrl.u32 %v19542_v47, 16  ;;  %v9431_v16 = vor.u32 %v9429_v9, %v9419_v7 }
 0x457   : > { %v15036_v14 = vpop.f32.mrf.mxu0  ;;  %v19587_v11 = vadd.f32 %v15182_v48, %v15181_v21  ;;  %v16641_v7 = vld [vmem:[%s21562_s5 + $0x430] sm:$0xff]  }
 0x458   : > { %21674 = vst [vmem:[#allocation20_spill] sm:$0xff] %v19576_v4  ;;  %v7026_v33 = vadd.f32 %v15035_v46, %v21675_v15  ;;  %v15184_v34 = vpop.f32.mrf.mxu1  ;;  %v9407_v15 = vor.u32 %v9405_v24, %v9395_v57  ;;  %v19596_v4 = vld [vmem:[#allocation2 + $0xc0] ss:$8 sps:$4 sm:$0xff]   ;;  %v21679_v24 = vld [vmem:[#allocation11_spill] sm:$0xff] }
 0x459   : > { %v15037_v38 = vpop.f32.mrf.mxu0 }
 0x45a   : > { %v15038_v54 = vadd.f32 %v15037_v38, %v15036_v14  ;;  %v19593_v46 = vadd.f32 %v19376_v19, %v7026_v33  ;;  %v15185_v52 = vpop.f32.mrf.mxu1  ;;  %v9435_v14 = vrot.slane %v9433_v35, 1  ;;  %v9412_v57 = vsel %vm5882_vm9, %v9407_v15, %v9411_v56 }
 0x45b   : > { %v15039_v63 = vpop.f32.mrf.mxu0  ;;  %8950 = vmatmul.mubr.bf16.vlgmr.msra.gmra.mxu0 %v19342_v22  ;;  %v16646_v22 = vld [vmem:[%s21562_s5 + $0x468] sm:$0xff]   ;;  %v19606_v19 = vadd.f32 %v15185_v52, %v15184_v34  ;;  %v9421_v38 = vshrl.u32 %v19560_v43, 16  ;;  %v19625_v52 = vld [vmem:[#allocation2 + $0xd0] ss:$8 sps:$4 sm:$0xff]  }
 0x45c   : > { %21676 = vst [vmem:[#allocation7_spill] sm:$0xff] %v19593_v46  ;;  %v7027_v21 = vadd.f32 %v15038_v54, %v21677_v20  ;;  %15600 = vmatpush3.bf16.msra.mxu0 %v16633_v45  ;;  %8957 = vmatprep.mubr.bf16.mxu0 %v19322_v53  ;;  %v15187_v33 = vpop.f32.mrf.mxu1  ;;  %v9436_v53 = vsel %vm5882_vm9, %v9431_v16, %v9435_v14  ;;  %v9449_v45 = vshll.u32 %v19590_v60, 16  ;;  %v16649_v34 = vld [vmem:[%s21562_s5 + $0x428] sm:$0xff]  }
 0x45d   : > { %v15040_v48 = vpop.f32.mrf.mxu0  ;;  %15601 = vmatprep.subr.bf16.mxu0 %v16640_v58  ;;  %9722 = vmatmul.mubr.bf16.gmra.mxu1 %v9412_v57  ;;  %v9425_v58 = vshll.u32 %v19596_v4, 16 }
 0x45e   : > { %v15041_v20 = vadd.f32 %v15040_v48, %v15039_v63  ;;  %v19612_v9 = vadd.f32 %v19391_v0, %v7027_v21  ;;  %9729 = vmatprep.mubr.bf16.mxu1 %v9436_v53  ;;  %v15188_v63 = vpop.f32.mrf.mxu1  ;;  %v16653_v0 = vld [vmem:[%s21562_s5 + $0x460] sm:$0xff]   ;;  %v9423_v21 = vor.u32 %v9421_v38, %v9411_v56 }
 0x45f   : > { %v15042_v35 = vpop.f32.mrf.mxu0  ;;  %v19623_v15 = vadd.f32 %v15188_v63, %v15187_v33  ;;  %v16654_v56 = vld [vmem:[%s21562_s5 + $0x420] sm:$0xff]  }
 0x460   : > { %21678 = vst [vmem:[#allocation8_spill] sm:$0xff] %v19612_v9  ;;  %v7028_v54 = vadd.f32 %v15041_v20, %v21679_v24  ;;  %15602 = vmatpush3.bf16.msra.mxu0 %v16641_v7  ;;  %v15190_v57 = vpop.f32.mrf.mxu1  ;;  %v9445_v7 = vshrl.u32 %v19568_v36, 16  ;;  %v9451_v20 = vrot.slane %v9449_v45, 1  ;;  %v21681_v9 = vld [vmem:[#allocation12_spill] sm:$0xff]  ;;  %v19637_v38 = vld [vmem:[#allocation2 + $0xe4] ss:$8 sps:$4 sm:$0xff]  }
 0x461   : > { %v15043_v16 = vpop.f32.mrf.mxu0  ;;  %15603 = vmatprep.subr.bf16.mxu0 %v16646_v22  ;;  %v9427_v22 = vrot.slane %v9425_v58, 1 }
 0x462   : > { %v15044_v48 = vadd.f32 %v15043_v16, %v15042_v35  ;;  %v19629_v53 = vadd.f32 %v19401_v32, %v7028_v54  ;;  %v15191_v33 = vpop.f32.mrf.mxu1  ;;  %v9447_v35 = vor.u32 %v9445_v7, %v9435_v14  ;;  %v21683_v16 = vld [vmem:[#allocation13_spill] sm:$0xff]  ;;  %v9465_v7 = vshll.u32 %v19637_v38, 16 }
 0x463   : > { %v15045_v24 = vpop.f32.mrf.mxu0  ;;  %8958 = vmatmul.mubr.bf16.gmra.mxu0 %v19350_v13  ;;  %v16661_v13 = vld [vmem:[%s21562_s5 + $0x458] sm:$0xff]   ;;  %v19642_v32 = vadd.f32 %v15191_v33, %v15190_v57  ;;  %v9461_v57 = vshrl.u32 %v19590_v60, 16 }
 0x464   : > { %21680 = vst [vmem:[#allocation9_spill] sm:$0xff] %v19629_v53  ;;  %v7029_v46 = vadd.f32 %v15044_v48, %v21681_v9  ;;  %8965 = vmatprep.mubr.bf16.mxu0 %v19362_v44  ;;  %15604 = vmatpush3.bf16.msra.mxu0 %v16649_v34  ;;  %v9428_v9 = vsel %vm5882_vm9, %v9423_v21, %v9427_v22  ;;  %v9441_v44 = vshll.u32 %v19625_v52, 16  ;;  %v15193_v54 = vpop.f32.mrf.mxu1  ;;  %v16662_v48 = vld [vmem:[%s21562_s5 + $0x418] sm:$0xff]  }
 0x465   : > { %v15046_v45 = vpop.f32.mrf.mxu0  ;;  %15605 = vmatprep.subr.bf16.mxu0 %v16653_v0  ;;  %9730 = vmatmul.mubr.bf16.gmra.mxu1 %v9428_v9  ;;  %v9452_v34 = vsel %vm5882_vm9, %v9447_v35, %v9451_v20  ;;  %v9463_v9 = vor.u32 %v9461_v57, %v9451_v20  ;;  %v16670_v20 = vld [vmem:[%s21562_s5 + $0x410] sm:$0xff]  }
 0x466   : > { %v15047_v58 = vadd.f32 %v15046_v45, %v15045_v24  ;;  %v19648_v14 = vadd.f32 %v19416_v42, %v7029_v46  ;;  %9737 = vmatprep.mubr.bf16.mxu1 %v9452_v34  ;;  %v15194_v21 = vpop.f32.mrf.mxu1  ;;  %v9437_v42 = vshrl.u32 %v19596_v4, 16  ;;  %v9443_v46 = vrot.slane %v9441_v44, 1 }
 0x467   : > { %v15048_v63 = vpop.f32.mrf.mxu0  ;;  %v19656_v33 = vadd.f32 %v15194_v21, %v15193_v54  ;;  %v19668_v54 = vld [vmem:[#allocation2 + $0xe0] ss:$8 sps:$4 sm:$0xff]   ;;  %v21687_v21 = vld [vmem:[#allocation14_spill] sm:$0xff] }
 0x468   : > { %21682 = vst [vmem:[#allocation10_spill] sm:$0xff] %v19648_v14  ;;  %v7030_v0 = vadd.f32 %v15047_v58, %v21683_v16  ;;  %15606 = vmatpush3.bf16.msra.mxu0 %v16654_v56  ;;  %v16669_v56 = vld [vmem:[%s21562_s5 + $0x450] sm:$0xff]   ;;  %v15196_v45 = vpop.f32.mrf.mxu1  ;;  %21686 = vst [vmem:[#allocation13_spill] sm:$0xff] %v19668_v54 }
 0x469   : > { %v15049_v24 = vpop.f32.mrf.mxu0  ;;  %15607 = vmatprep.subr.bf16.mxu0 %v16661_v13  ;;  %v19662_v58 = vld [vmem:[#allocation2 + $0xf4] ss:$8 sps:$4 sm:$0xff]   ;;  %v9439_v13 = vor.u32 %v9437_v42, %v9427_v22 }
 0x46a   : > { %v15050_v35 = vadd.f32 %v15049_v24, %v15048_v63  ;;  %21684 = vst [vmem:[#allocation11_spill] sm:$0xff] %v19662_v58  ;;  %v19665_v34 = vadd.f32 %v19427_v49, %v7030_v0  ;;  %v15197_v14 = vpop.f32.mrf.mxu1  ;;  %v9467_v63 = vrot.slane %v9465_v7, 1 }
 0x46b   : > { %v15051_v16 = vpop.f32.mrf.mxu0  ;;  %8966 = vmatmul.mubr.bf16.gmra.mxu0 %v19383_v31  ;;  %v19675_v49 = vadd.f32 %v15197_v14, %v15196_v45  ;;  %v9444_v0 = vsel %vm5882_vm9, %v9439_v13, %v9443_v46  ;;  %v16675_v31 = vld [vmem:[%s21562_s5 + $0x448] sm:$0xff]   ;;  %v9453_v14 = vshrl.u32 %v19625_v52, 16 }
 0x46c   : > { %21685 = vst [vmem:[#allocation12_spill] sm:$0xff] %v19665_v34  ;;  %v7031_v44 = vadd.f32 %v15050_v35, %v21687_v21  ;;  %8973 = vmatprep.mubr.bf16.mxu0 %v19380_v30  ;;  %15608 = vmatpush3.bf16.msra.mxu0 %v16662_v48  ;;  %v15315_v24 = vpop.f32.mrf.mxu1  ;;  %v9468_v30 = vsel %vm5882_vm9, %v9463_v9, %v9467_v63  ;;  %v9481_v48 = vshll.u32 %v19662_v58, 16  ;;  %v21689_v35 = vld [vmem:[#allocation15_spill] sm:$0xff] }
 0x46d   : > { %v15052_v57 = vpop.f32.mrf.mxu0  ;;  %15609 = vmatprep.subr.bf16.mxu0 %v16669_v56  ;;  %9738 = vmatmul.mubr.bf16.gmra.mxu1 %v9444_v0  ;;  %v9457_v56 = vshll.u32 %v19668_v54, 16  ;;  %v16679_v0 = vld [vmem:[%s21562_s5 + $0x440] sm:$0xff]  }
 0x46e   : > { %v15053_v22 = vadd.f32 %v15052_v57, %v15051_v16  ;;  %v19684_v7 = vadd.f32 %v19443_v5, %v7031_v44  ;;  %9745 = vmatprep.mubr.bf16.mxu1 %v9468_v30  ;;  %v15316_v13 = vpop.f32.mrf.mxu1  ;;  %v16677_v16 = vld [vmem:[%s21562_s5 + $0x408] sm:$0xff]   ;;  %v9455_v57 = vor.u32 %v9453_v14, %v9443_v46  ;;  %v19694_v5 = vld [vmem:[#allocation2 + $0xf0] ss:$8 sps:$4 sm:$0xff]   ;;  %v9118_v44 = vld [vmem:[#allocation2 + $0x100] sm:$0x11] }
 0x46f   : > { %v15054_v42 = vpop.f32.mrf.mxu0  ;;  %v19692_v21 = vadd.f32 %v15316_v13, %v15315_v24  ;;  %21690 = vst [vmem:[#allocation15_spill] sm:$0xff] %v19694_v5  ;;  %v9459_v46 = vrot.slane %v9457_v56, 1  ;;  %v21692_v14 = vld [vmem:[#allocation16_spill] sm:$0xff] }
 0x470   : > { %21688 = vst [vmem:[#allocation14_spill] sm:$0xff] %v19684_v7  ;;  %v7032_v45 = vadd.f32 %v15053_v22, %v21689_v35  ;;  %15610 = vmatpush3.bf16.msra.mxu0 %v16670_v20  ;;  %v19699_v22 = vpop.f32.mrf.mxu1  ;;  %v9477_v20 = vshrl.u32 %v19637_v38, 16  ;;  %v9483_v35 = vrot.slane %v9481_v48, 1  ;;  %v16680_v48 = vld [vmem:[%s21562_s5 + $0x400] sm:$0xff]  }
 0x471   : > { %v15055_v9 = vpop.f32.mrf.mxu0  ;;  %15611 = vmatprep.subr.bf16.mxu0 %v16675_v31 }
 0x472   : > { %v15056_v30 = vadd.f32 %v15055_v9, %v15054_v42  ;;  %v19703_v7 = vadd.f32 %v19453_v39, %v7032_v45  ;;  %v19708_v13 = vpop.f32.mrf.mxu1  ;;  %v9479_v34 = vor.u32 %v9477_v20, %v9467_v63  ;;  %v19710_v42 = vcombine.high %v9118_v44, %v9118_v44  ;;  %v21694_v20 = vld [vmem:[#allocation17_spill] sm:$0xff] }
 0x473   : > { %v15057_v24 = vpop.f32.mrf.mxu0  ;;  %8974 = vmatmul.mubr.bf16.gmra.mxu0 %v19403_v61  ;;  %v9460_v45 = vsel %vm5882_vm9, %v9455_v57, %v9459_v46  ;;  %v9473_v61 = vshll.u32 %v19694_v5, 16  ;;  %v9493_v57 = vshrl.u32 %v19662_v58, 16 }
 0x474   : > { %21691 = vst [vmem:[#allocation32_spill] sm:$0xff] %v19703_v7  ;;  %v7033_v31 = vadd.f32 %v15056_v30, %v21692_v14  ;;  %8981 = vmatprep.mubr.bf16.mxu0 %v19414_v12  ;;  %21693 = vst [vmem:[#allocation16_spill] sm:$0xff] %v19710_v42  ;;  %15612 = vmatpush3.bf16.msra.mxu0 %v16677_v16  ;;  %v15321_v9 = vpop.f32.mrf.mxu1  ;;  %v9484_v12 = vsel %vm5882_vm9, %v9479_v34, %v9483_v35  ;;  %v9497_v63 = vshll.u32 %v19710_v42, 16 }
 0x475   : > { %v15058_v39 = vpop.f32.mrf.mxu0  ;;  %15613 = vmatprep.subr.bf16.mxu0 %v16679_v0  ;;  %9746 = vmatmul.mubr.bf16.gmra.mxu1 %v9460_v45  ;;  %v9495_v42 = vor.u32 %v9493_v57, %v9483_v35 }
 0x476   : > { %v15059_v56 = vadd.f32 %v15058_v39, %v15057_v24  ;;  %v19720_v30 = vadd.f32 %v19468_v10, %v7033_v31  ;;  %9753 = vmatprep.mubr.bf16.mxu1 %v9484_v12  ;;  %v15322_v7 = vpop.f32.mrf.mxu1  ;;  %v9469_v24 = vshrl.u32 %v19668_v54, 16  ;;  %v9475_v39 = vrot.slane %v9473_v61, 1 }
 0x477   : > { %v15060_v16 = vpop.f32.mrf.mxu0  ;;  %v19724_v0 = vadd.f32 %v15322_v7, %v15321_v9  ;;  %v9499_v10 = vrot.slane %v9497_v63, 1 }
 0x478   : > { %v7034_v14 = vadd.f32 %v15059_v56, %v21694_v20  ;;  %15614 = vmatpush3.bf16.msra.mxu0 %v16680_v48  ;;  %v19727_v45 = vpop.f32.mrf.mxu1  ;;  %v9471_v56 = vor.u32 %v9469_v24, %v9459_v46  ;;  %v19733_v20 = vcombine.low %v9118_v44, %v9118_v44  ;;  %v21696_v48 = vld [vmem:[#allocation19_spill] sm:$0xff]  ;;  %v9485_v46 = vshrl.u32 %v19694_v5, 16 }
 0x479   : > { %v15061_v53 = vpop.f32.mrf.mxu0 }
 0x47a   : > { %v15062_v34 = vadd.f32 %v15061_v53, %v15060_v16  ;;  %v19730_v31 = vadd.f32 %v19480_v55, %v7034_v14  ;;  %21695 = vst [vmem:[#allocation17_spill] sm:$0xff] %v19733_v20  ;;  %v19737_v9 = vpop.f32.mrf.mxu1  ;;  %v9476_v61 = vsel %vm5882_vm9, %v9471_v56, %v9475_v39  ;;  %v9489_v35 = vshll.u32 %v19733_v20, 16 }
 0x47b   : > { %v15063_v12 = vpop.f32.mrf.mxu0  ;;  %8982 = vmatmul.mubr.bf16.gmra.mxu0 %v19435_v41  ;;  %v9500_v16 = vsel %vm5882_vm9, %v9495_v42, %v9499_v10  ;;  %v9487_v56 = vor.u32 %v9485_v46, %v9475_v39  ;;  %v21698_v10 = vld [vmem:[#allocation22_spill] sm:$0xff] }
 0x47c   : > { %v7035_v7 = vadd.f32 %v15062_v34, %v21696_v48  ;;  %8989 = vmatprep.mubr.bf16.mxu0 %v19432_v26  ;;  %v15327_v55 = vpop.f32.mrf.mxu1  ;;  %v21697_v26 = vld [vmem:[#allocation21_spill] sm:$0xff]  ;;  %v9491_v48 = vrot.slane %v9489_v35, 1 }
 0x47d   : > { %v15064_v53 = vpop.f32.mrf.mxu0  ;;  %9754 = vmatmul.mubr.bf16.gmra.mxu1 %v9476_v61 }
 0x47e   : > { %v15065_v63 = vadd.f32 %v15064_v53, %v15063_v12  ;;  %v19743_v41 = vadd.f32 %v19495_v17, %v7035_v7  ;;  %9761 = vmatprep.mubr.bf16.mxu1 %v9500_v16  ;;  %v15328_v57 = vpop.f32.mrf.mxu1 }
 0x47f   : > { %v15066_v44 = vpop.f32.mrf.mxu0  ;;  %v19747_v34 = vadd.f32 %v15328_v57, %v15327_v55  ;;  %v9492_v55 = vsel %vm5882_vm9, %v9487_v56, %v9491_v48  ;;  %v21700_v48 = vld [vmem:[#allocation24_spill] sm:$0xff] }
 0x480   : > { %v7036_v14 = vadd.f32 %v15065_v63, %v21697_v26  ;;  %v19749_v53 = vpop.f32.mrf.mxu1 }
 0x481   : > { %v15067_v24 = vpop.f32.mrf.mxu0 }
 0x482   : > { %v15068_v12 = vadd.f32 %v15067_v24, %v15066_v44  ;;  %v19752_v42 = vadd.f32 %v19505_v8, %v7036_v14  ;;  %v19757_v61 = vpop.f32.mrf.mxu1  ;;  %v21699_v44 = vld [vmem:[#allocation23_spill] sm:$0xff] }
 0x483   : > { %v15069_v17 = vpop.f32.mrf.mxu0  ;;  %8990 = vmatmul.mubr.bf16.gmra.mxu0 %v19455_v6 }
 0x484   : > { %v7037_v7 = vadd.f32 %v15068_v12, %v21698_v10  ;;  %8997 = vmatprep.mubr.bf16.mxu0 %v19466_v28  ;;  %v15333_v35 = vpop.f32.mrf.mxu1 }
 0x485   : > { %v15070_v63 = vpop.f32.mrf.mxu0  ;;  %9762 = vmatmul.mubr.bf16.gmra.mxu1 %v9492_v55 }
 0x486   : > { %v15071_v39 = vadd.f32 %v15070_v63, %v15069_v17  ;;  %v19761_v16 = vadd.f32 %v19519_v37, %v7037_v7  ;;  %v15334_v26 = vpop.f32.mrf.mxu1 }
 0x487   : > { %v15072_v8 = vpop.f32.mrf.mxu0  ;;  %v19764_v14 = vadd.f32 %v15334_v26, %v15333_v35 }
 0x488   : > { %v7038_v46 = vadd.f32 %v15071_v39, %v21699_v44  ;;  %v19766_v28 = vpop.f32.mrf.mxu1  ;;  %v21701_v39 = vld [vmem:[#allocation25_spill] sm:$0xff] }
 0x489   : > { %v15073_v6 = vpop.f32.mrf.mxu0 }
 0x48a   : > { %v15074_v57 = vadd.f32 %v15073_v6, %v15072_v8  ;;  %v19769_v24 = vadd.f32 %v19532_v62, %v7038_v46  ;;  %v19774_v37 = vpop.f32.mrf.mxu1  ;;  %v21702_v6 = vld [vmem:[#allocation26_spill] sm:$0xff] }
 0x48b   : > { %v15075_v56 = vpop.f32.mrf.mxu0  ;;  %8998 = vmatmul.mubr.bf16.gmra.mxu0 %v19487_v40 }
 0x48c   : > { %v7039_v12 = vadd.f32 %v15074_v57, %v21700_v48  ;;  %9005 = vmatprep.mubr.bf16.mxu0 %v19484_v50  ;;  %v15339_v7 = vpop.f32.mrf.mxu1 }
 0x48d   : > { %v15076_v17 = vpop.f32.mrf.mxu0 }
 0x48e   : > { %v15077_v10 = vadd.f32 %v15076_v17, %v15075_v56  ;;  %v19777_v63 = vadd.f32 %v19546_v23, %v7039_v12  ;;  %v15340_v62 = vpop.f32.mrf.mxu1 }
 0x48f   : > { %v15078_v55 = vpop.f32.mrf.mxu0  ;;  %v19780_v44 = vadd.f32 %v15340_v62, %v15339_v7  ;;  %v21703_v7 = vld [vmem:[#allocation27_spill] sm:$0xff] }
 0x490   : > { %v7040_v35 = vadd.f32 %v15077_v10, %v21701_v39  ;;  %v19782_v46 = vpop.f32.mrf.mxu1 }
 0x491   : > { %v15079_v8 = vpop.f32.mrf.mxu0 }
 0x492   : > { %v15080_v40 = vadd.f32 %v15079_v8, %v15078_v55  ;;  %v19785_v50 = vadd.f32 %v19558_v18, %v7040_v35  ;;  %v19790_v23 = vpop.f32.mrf.mxu1 }
 0x493   : > { %v15081_v26 = vpop.f32.mrf.mxu0  ;;  %9006 = vmatmul.mubr.bf16.gmra.mxu0 %v19507_v2 }
 0x494   : > { %v7041_v57 = vadd.f32 %v15080_v40, %v21702_v6  ;;  %9013 = vmatprep.mubr.bf16.mxu0 %v19517_v1  ;;  %v15345_v12 = vpop.f32.mrf.mxu1  ;;  %v21704_v40 = vld [vmem:[#allocation28_spill] sm:$0xff] }
 0x495   : > { %v15082_v56 = vpop.f32.mrf.mxu0 }
 0x496   : > { %v15083_v48 = vadd.f32 %v15082_v56, %v15081_v26  ;;  %v19793_v17 = vadd.f32 %v19570_v27, %v7041_v57  ;;  %v15346_v18 = vpop.f32.mrf.mxu1 }
 0x497   : > { %v15084_v10 = vpop.f32.mrf.mxu0  ;;  %v19796_v35 = vadd.f32 %v15346_v18, %v15345_v12 }
 0x498   : > { %v7042_v55 = vadd.f32 %v15083_v48, %v21703_v7  ;;  %v19798_v62 = vpop.f32.mrf.mxu1 }
 0x499   : > { %v15085_v39 = vpop.f32.mrf.mxu0 }
 0x49a   : > { %v15086_v2 = vadd.f32 %v15085_v39, %v15084_v10  ;;  %v19801_v1 = vadd.f32 %v19587_v11, %v7042_v55  ;;  %v19806_v27 = vpop.f32.mrf.mxu1 }
 0x49b   : > { %v15087_v8 = vpop.f32.mrf.mxu0  ;;  %9014 = vmatmul.mubr.bf16.gmra.mxu0 %v19542_v47 }
 0x49c   : > { %v7043_v26 = vadd.f32 %v15086_v2, %v21704_v40  ;;  %9021 = vmatprep.mubr.bf16.mxu0 %v19536_v51  ;;  %v15351_v56 = vpop.f32.mrf.mxu1  ;;  %v21705_v2 = vld [vmem:[#allocation29_spill] sm:$0xff] }
 0x49d   : > { %v15088_v6 = vpop.f32.mrf.mxu0 }
 0x49e   : > { %v15089_v57 = vadd.f32 %v15088_v6, %v15087_v8  ;;  %v19809_v48 = vadd.f32 %v19606_v19, %v7043_v26  ;;  %v15352_v11 = vpop.f32.mrf.mxu1 }
 0x49f   : > { %v15090_v12 = vpop.f32.mrf.mxu0  ;;  %v19812_v55 = vadd.f32 %v15352_v11, %v15351_v56  ;;  %v21706_v56 = vld [vmem:[#allocation30_spill] sm:$0xff] }
 0x4a0   : > { %v7044_v10 = vadd.f32 %v15089_v57, %v19451_v3  ;;  %v19814_v18 = vpop.f32.mrf.mxu1 }
 0x4a1   : > { %v15091_v7 = vpop.f32.mrf.mxu0 }
 0x4a2   : > { %v15092_v47 = vadd.f32 %v15091_v7, %v15090_v12  ;;  %v19817_v51 = vadd.f32 %v19623_v15, %v7044_v10  ;;  %v19822_v19 = vpop.f32.mrf.mxu1 }
 0x4a3   : > { %v15093_v39 = vpop.f32.mrf.mxu0  ;;  %9022 = vmatmul.mubr.bf16.gmra.mxu0 %v19560_v43 }
 0x4a4   : > { %v7045_v8 = vadd.f32 %v15092_v47, %v21705_v2  ;;  %9029 = vmatprep.mubr.bf16.mxu0 %v19568_v36  ;;  %v15357_v26 = vpop.f32.mrf.mxu1 }
 0x4a5   : > { %v15094_v3 = vpop.f32.mrf.mxu0 }
 0x4a6   : > { %v15095_v40 = vadd.f32 %v15094_v3, %v15093_v39  ;;  %v19825_v6 = vadd.f32 %v19642_v32, %v7045_v8  ;;  %v15358_v15 = vpop.f32.mrf.mxu1  ;;  %v21707_v39 = vld [vmem:[#allocation31_spill] sm:$0xff] }
 0x4a7   : > { %v15096_v57 = vpop.f32.mrf.mxu0  ;;  %v19828_v11 = vadd.f32 %v15358_v15, %v15357_v26 }
 0x4a8   : > { %v7046_v12 = vadd.f32 %v15095_v40, %v21706_v56  ;;  %v19830_v7 = vpop.f32.mrf.mxu1 }
 0x4a9   : > { %v15097_v10 = vpop.f32.mrf.mxu0 }
 0x4aa   : > { %v15098_v43 = vadd.f32 %v15097_v10, %v15096_v57  ;;  %v19833_v36 = vadd.f32 %v19656_v33, %v7046_v12  ;;  %v19838_v32 = vpop.f32.mrf.mxu1 }
 0x4ab   : > { %v15215_v47 = vpop.f32.mrf.mxu0  ;;  %9030 = vmatmul.mubr.bf16.gmra.mxu0 %v19596_v4 }
 0x4ac   : > { %v7047_v2 = vadd.f32 %v15098_v43, %v21707_v39  ;;  %9037 = vmatprep.mubr.bf16.mxu0 %v19590_v60 }
 0x4ad   : > { %v15216_v8 = vpop.f32.mrf.mxu0  ;;  %v15363_v40 = vpop.f32.mrf.mxu1 }
 0x4ae   : > { %v15217_v3 = vadd.f32 %v15216_v8, %v15215_v47  ;;  %v19841_v26 = vadd.f32 %v19675_v49, %v7047_v2  ;;  %v15320_v49 = vadd.f32 %v19708_v13, %v19699_v22 }
 0x4af   : > { %v15218_v57 = vpop.f32.mrf.mxu0  ;;  %v15364_v33 = vpop.f32.mrf.mxu1 }
 0x4b0   : > { %21708 = vst [vmem:[#allocation19_spill] sm:$0xff] %v19841_v26  ;;  %v8198_v56 = vadd.f32 %v15217_v3, %v19511_v29  ;;  %v19844_v15 = vadd.f32 %v15364_v33, %v15363_v40 }
 0x4b1   : > { %v15219_v12 = vpop.f32.mrf.mxu0  ;;  %v19846_v10 = vpop.f32.mrf.mxu1 }
 0x4b2   : > { %v15220_v4 = vadd.f32 %v15219_v12, %v15218_v57  ;;  %v19849_v60 = vadd.f32 %v19692_v21, %v8198_v56 }
 0x4b3   : > { %v15221_v43 = vpop.f32.mrf.mxu0  ;;  %9038 = vmatmul.mubr.bf16.gmra.mxu0 %v19625_v52  ;;  %v19856_v29 = vpop.f32.mrf.mxu1 }
 0x4b4   : > { %21709 = vst [vmem:[#allocation21_spill] sm:$0xff] %v19849_v60  ;;  %v8199_v47 = vadd.f32 %v15220_v4, %v19526_v59  ;;  %9045 = vmatprep.mubr.bf16.mxu0 %v19637_v38  ;;  %v15326_v4 = vadd.f32 %v19737_v9, %v19727_v45 }
 0x4b5   : > { %v15222_v39 = vpop.f32.mrf.mxu0  ;;  %v15369_v8 = vpop.f32.mrf.mxu1 }
 0x4b6   : > { %v15223_v2 = vadd.f32 %v15222_v39, %v15221_v43  ;;  %v19858_v3 = vadd.f32 %v15320_v49, %v8199_v47  ;;  %v21712_v43 = vld [vmem:[#allocation18_spill] sm:$0xff] }
 0x4b7   : > { %v15224_v40 = vpop.f32.mrf.mxu0  ;;  %v15370_v57 = vpop.f32.mrf.mxu1 }
 0x4b8   : > { %21710 = vst [vmem:[#allocation22_spill] sm:$0xff] %v19858_v3  ;;  %v8200_v21 = vadd.f32 %v15223_v2, %v19539_v25  ;;  %v19861_v33 = vadd.f32 %v15370_v57, %v15369_v8  ;;  %v9798_v25 = vld [vmem:[#allocation2 + $0x20] sm:$0xee]  ;;  %v16828_v2 = vld [vmem:[#allocation2 + $0x28] sm:$0xff] }
 0x4b9   : > { %v15225_v56 = vpop.f32.mrf.mxu0  ;;  %v19863_v22 = vpop.f32.mrf.mxu1  ;;  %v14258_v8 = vcombine.high %v9798_v25, %v16828_v2 }
 0x4ba   : > { %v15226_v12 = vadd.f32 %v15225_v56, %v15224_v40  ;;  %v19866_v59 = vadd.f32 %v19724_v0, %v8200_v21  ;;  %v16829_v56 = vld [vmem:[#allocation2 + $0x34] ss:$8 sps:$4 sm:$0xff]  }
 0x4bb   : > { %v15227_v13 = vpop.f32.mrf.mxu0  ;;  %9046 = vmatmul.mubr.bf16.gmra.mxu0 %v19668_v54  ;;  %v19873_v47 = vpop.f32.mrf.mxu1  ;;  %v9841_v20 = vrot.slane %v16829_v56, 1  ;;  %v16830_v56 = vld [vmem:[#allocation2 + $0x30] ss:$8 sps:$4 sm:$0xff]  }
 0x4bc   : > { %21711 = vst [vmem:[#allocation23_spill] sm:$0xff] %v19866_v59  ;;  %v8201_v49 = vadd.f32 %v15226_v12, %v21712_v43  ;;  %9053 = vmatprep.mubr.bf16.mxu0 %v19662_v58  ;;  %v21714_v59 = vld [vmem:[#allocation6_spill] sm:$0xff]  ;;  %v9840_v12 = vrot.slane %v14258_v8, 1 }
 0x4bd   : > { %v15228_v39 = vpop.f32.mrf.mxu0  ;;  %v15375_v57 = vpop.f32.mrf.mxu1 }
 0x4be   : > { %v15229_v40 = vadd.f32 %v15228_v39, %v15227_v13  ;;  %v19875_v0 = vadd.f32 %v15326_v4, %v8201_v49  ;;  %v9842_v4 = vsel %vm6692_vm10, %v9840_v12, %v9841_v20  ;;  %v15332_v49 = vadd.f32 %v19757_v61, %v19749_v53  ;;  %v16831_v53 = vld [vmem:[#allocation2 + $0x44] ss:$8 sps:$4 sm:$0xff]  }
 0x4bf   : > { %v15230_v21 = vpop.f32.mrf.mxu0  ;;  %v15376_v45 = vpop.f32.mrf.mxu1  ;;  %v9845_v61 = vrot.slane %v16831_v53, 1  ;;  %v16833_v53 = vld [vmem:[#allocation2 + $0x40] ss:$8 sps:$4 sm:$0xff]  }
 0x4c0   : > { %21713 = vst [vmem:[#allocation24_spill] sm:$0xff] %v19875_v0  ;;  %v8202_v3 = vadd.f32 %v15229_v40, %v21714_v59  ;;  %v19878_v43 = vadd.f32 %v15376_v45, %v15375_v57  ;;  %v21716_v59 = vld [vmem:[#allocation20_spill] sm:$0xff]  ;;  %v14257_v40 = vcombine.low %v9798_v25, %v16828_v2  ;;  %v9838_v45 = vrot.slane %v16830_v56, 1  ;;  %v21717_v0 = vld [vmem:[#allocation7_spill] sm:$0xff] }
 0x4c1   : > { %v15231_v9 = vpop.f32.mrf.mxu0  ;;  %v19880_v60 = vpop.f32.mrf.mxu1 }
 0x4c2   : > { %v15232_v54 = vadd.f32 %v15231_v9, %v15230_v21  ;;  %v19883_v58 = vadd.f32 %v19747_v34, %v8202_v3 }
 0x4c3   : > { %v15233_v13 = vpop.f32.mrf.mxu0  ;;  %9054 = vmatmul.mubr.bf16.gmra.mxu0 %v19694_v5  ;;  %v19890_v8 = vpop.f32.mrf.mxu1 }
 0x4c4   : > { %21715 = vst [vmem:[#allocation25_spill] sm:$0xff] %v19883_v58  ;;  %v8203_v39 = vadd.f32 %v15232_v54, %v21716_v59  ;;  %10051 = vmatprep.mubr.bf16.mxu0 %v9842_v4  ;;  %v9837_v58 = vrot.slane %v14257_v40, 1  ;;  %v9846_v59 = vsel %vm6692_vm10, %v9841_v20, %v9845_v61  ;;  %v9843_v20 = vrot.slane %v16833_v53, 1 }
 0x4c5   : > { %v15234_v57 = vpop.f32.mrf.mxu0  ;;  %v15381_v34 = vpop.f32.mrf.mxu1 }
 0x4c6   : > { %v15235_v21 = vadd.f32 %v15234_v57, %v15233_v13  ;;  %v19892_v3 = vadd.f32 %v15332_v49, %v8203_v39  ;;  %v9839_v2 = vsel %vm6692_vm10, %v9837_v58, %v9838_v45  ;;  %v21719_v39 = vld [vmem:[#allocation8_spill] sm:$0xff] }
 0x4c7   : > { %v15236_v9 = vpop.f32.mrf.mxu0  ;;  %v15382_v5 = vpop.f32.mrf.mxu1 }
 0x4c8   : > { %v8204_v12 = vadd.f32 %v15235_v21, %v21717_v0  ;;  %v19895_v54 = vadd.f32 %v15382_v5, %v15381_v34  ;;  %v15338_v0 = vadd.f32 %v19774_v37, %v19766_v28 }
 0x4c9   : > { %v15237_v26 = vpop.f32.mrf.mxu0  ;;  %v19898_v4 = vpop.f32.mrf.mxu1 }
 0x4ca   : > { %v15238_v25 = vadd.f32 %v15237_v26, %v15236_v9  ;;  %v19901_v13 = vadd.f32 %v19764_v14, %v8204_v12  ;;  %v16832_v14 = vld [vmem:[#allocation2 + $0x54] ss:$8 sps:$4 sm:$0xff]   ;;  %v21721_v9 = vld [vmem:[#allocation9_spill] sm:$0xff] }
 0x4cb   : > { %v15239_v49 = vpop.f32.mrf.mxu0  ;;  %10052 = vmatmul.mubr.bf16.vlgmr.msra.gmra.mxu0 %v9839_v2  ;;  %v19907_v5 = vpop.f32.mrf.mxu1  ;;  %v9849_v34 = vrot.slane %v16832_v14, 1 }
 0x4cc   : > { %21718 = vst [vmem:[#allocation26_spill] sm:$0xff] %v19901_v13  ;;  %v8205_v40 = vadd.f32 %v15238_v25, %v21719_v39  ;;  %10059 = vmatprep.mubr.bf16.mxu0 %v9846_v59  ;;  %v9844_v25 = vsel %vm6692_vm10, %v9838_v45, %v9843_v20  ;;  %v16834_v45 = vld [vmem:[#allocation2 + $0x50] ss:$8 sps:$4 sm:$0xff]  }
 0x4cd   : > { %v15240_v26 = vpop.f32.mrf.mxu0  ;;  %v15387_v58 = vpop.f32.mrf.mxu1  ;;  %v9850_v39 = vsel %vm6692_vm10, %v9845_v61, %v9849_v34  ;;  %v9847_v14 = vrot.slane %v16834_v45, 1 }
 0x4ce   : > { %v15241_v57 = vadd.f32 %v15240_v26, %v15239_v49  ;;  %v19909_v21 = vadd.f32 %v15338_v0, %v8205_v40  ;;  %v15344_v40 = vadd.f32 %v19790_v23, %v19782_v46  ;;  %v21723_v26 = vld [vmem:[#allocation10_spill] sm:$0xff] }
 0x4cf   : > { %v15242_v56 = vpop.f32.mrf.mxu0  ;;  %v15388_v2 = vpop.f32.mrf.mxu1 }
 0x4d0   : > { %21720 = vst [vmem:[#allocation27_spill] sm:$0xff] %v19909_v21  ;;  %v8206_v12 = vadd.f32 %v15241_v57, %v21721_v9  ;;  %v19912_v28 = vadd.f32 %v15388_v2, %v15387_v58 }
 0x4d1   : > { %v15243_v13 = vpop.f32.mrf.mxu0  ;;  %v19915_v59 = vpop.f32.mrf.mxu1 }
 0x4d2   : > { %v15244_v37 = vadd.f32 %v15243_v13, %v15242_v56  ;;  %v19918_v49 = vadd.f32 %v19780_v44, %v8206_v12  ;;  %v21724_v12 = vld [vmem:[#allocation12_spill] sm:$0xff] }
 0x4d3   : > { %v15245_v0 = vpop.f32.mrf.mxu0  ;;  %10060 = vmatmul.mubr.bf16.gmra.mxu0 %v9844_v25  ;;  %v19924_v58 = vpop.f32.mrf.mxu1 }
 0x4d4   : > { %21722 = vst [vmem:[#allocation28_spill] sm:$0xff] %v19918_v49  ;;  %v8207_v57 = vadd.f32 %v15244_v37, %v21723_v26  ;;  %10067 = vmatprep.mubr.bf16.mxu0 %v9850_v39  ;;  %v16835_v49 = vld [vmem:[#allocation2 + $0x64] ss:$8 sps:$4 sm:$0xff]   ;;  %v9848_v37 = vsel %vm6692_vm10, %v9843_v20, %v9847_v14  ;;  %v15350_v26 = vadd.f32 %v19806_v27, %v19798_v62 }
 0x4d5   : > { %v15246_v13 = vpop.f32.mrf.mxu0  ;;  %v15393_v9 = vpop.f32.mrf.mxu1  ;;  %v9853_v21 = vrot.slane %v16835_v49, 1 }
 0x4d6   : > { %v15247_v56 = vadd.f32 %v15246_v13, %v15245_v0  ;;  %v19926_v53 = vadd.f32 %v15344_v40, %v8207_v57  ;;  %v21725_v57 = vld [vmem:[#allocation14_spill] sm:$0xff] }
 0x4d7   : > { %v15248_v44 = vpop.f32.mrf.mxu0  ;;  %v15394_v25 = vpop.f32.mrf.mxu1  ;;  %v9854_v40 = vsel %vm6692_vm10, %v9849_v34, %v9853_v21 }
 0x4d8   : > { %v8208_v2 = vadd.f32 %v15247_v56, %v21724_v12  ;;  %v19929_v46 = vadd.f32 %v15394_v25, %v15393_v9  ;;  %v21726_v12 = vld [vmem:[#allocation32_spill] sm:$0xff] }
 0x4d9   : > { %v15249_v61 = vpop.f32.mrf.mxu0 }
 0x4da   : > { %v15250_v23 = vadd.f32 %v15249_v61, %v15248_v44  ;;  %v19933_v39 = vadd.f32 %v19796_v35, %v8208_v2  ;;  %v16836_v44 = vld [vmem:[#allocation2 + $0x74] ss:$8 sps:$4 sm:$0xff]   ;;  %v16837_v2 = vld [vmem:[#allocation2 + $0x60] ss:$8 sps:$4 sm:$0xff]  }
 0x4db   : > { %v15251_v0 = vpop.f32.mrf.mxu0  ;;  %10068 = vmatmul.mubr.bf16.gmra.mxu0 %v9848_v37  ;;  %v9857_v20 = vrot.slane %v16836_v44, 1  ;;  %v9851_v25 = vrot.slane %v16837_v2, 1  ;;  %v16839_v44 = vld [vmem:[#allocation2 + $0x84] ss:$8 sps:$4 sm:$0xff]   ;;  %v15362_v2 = vadd.f32 %v19838_v32, %v19830_v7 }
 0x4dc   : > { %v8209_v13 = vadd.f32 %v15250_v23, %v21725_v57  ;;  %10075 = vmatprep.mubr.bf16.mxu0 %v9854_v40 }
 0x4dd   : > { %v15252_v56 = vpop.f32.mrf.mxu0  ;;  %v9852_v34 = vsel %vm6692_vm10, %v9847_v14, %v9851_v25  ;;  %v9858_v23 = vsel %vm6692_vm10, %v9853_v21, %v9857_v20 }
 0x4de   : > { %v15253_v49 = vadd.f32 %v15252_v56, %v15251_v0  ;;  %v19939_v45 = vadd.f32 %v15350_v26, %v8209_v13  ;;  %v15356_v0 = vadd.f32 %v19822_v19, %v19814_v18  ;;  %v16838_v13 = vld [vmem:[#allocation2 + $0x70] ss:$8 sps:$4 sm:$0xff]  }
 0x4df   : > { %v15254_v9 = vpop.f32.mrf.mxu0  ;;  %v9855_v56 = vrot.slane %v16838_v13, 1 }
 0x4e0   : > { %v8210_v35 = vadd.f32 %v15253_v49, %v21726_v12  ;;  %v9861_v12 = vrot.slane %v16839_v44, 1  ;;  %v16842_v44 = vld [vmem:[#allocation2 + $0x90] ss:$8 sps:$4 sm:$0xff]  }
 0x4e1   : > { %v15255_v61 = vpop.f32.mrf.mxu0  ;;  %v9856_v21 = vsel %vm6692_vm10, %v9851_v25, %v9855_v56 }
 0x4e2   : > { %v15256_v37 = vadd.f32 %v15255_v61, %v15254_v9  ;;  %v19944_v62 = vadd.f32 %v19812_v55, %v8210_v35  ;;  %v9862_v19 = vsel %vm6692_vm10, %v9857_v20, %v9861_v12  ;;  %v16683_v20 = vld [vmem:[%s21563_s6 + $0x78] sm:$0xff]  }
 0x4e3   : > { %v15257_v27 = vpop.f32.mrf.mxu0  ;;  %10076 = vmatmul.mubr.bf16.gmra.mxu0 %v9852_v34  ;;  %16015 = vmatprep.subr.bf16.mxu1 %v16683_v20 }
 0x4e4   : > { %v8211_v40 = vadd.f32 %v15256_v37, %v19720_v30  ;;  %10083 = vmatprep.mubr.bf16.mxu0 %v9858_v23  ;;  %v16840_v23 = vld [vmem:[#allocation2 + $0x94] ss:$8 sps:$4 sm:$0xff]   ;;  %16016 = vmatpush3.bf16.msra.mxu1 %v16683_v20  ;;  %v16845_v20 = vld [vmem:[#allocation2 + $0xa0] ss:$8 sps:$4 sm:$0xff]  }
 0x4e5   : > { %v15258_v26 = vpop.f32.mrf.mxu0  ;;  %v9865_v25 = vrot.slane %v16840_v23, 1 }
 0x4e6   : > { %v15259_v57 = vadd.f32 %v15258_v26, %v15257_v27  ;;  %v19950_v49 = vadd.f32 %v15356_v0, %v8211_v40  ;;  %v16841_v0 = vld [vmem:[#allocation2 + $0x80] ss:$8 sps:$4 sm:$0xff]  }
 0x4e7   : > { %v15260_v14 = vpop.f32.mrf.mxu0  ;;  %v9859_v40 = vrot.slane %v16841_v0, 1  ;;  %v9866_v13 = vsel %vm6692_vm10, %v9861_v12, %v9865_v25  ;;  %v16844_v0 = vld [vmem:[#allocation2 + $0xb4] ss:$8 sps:$4 sm:$0xff]  }
 0x4e8   : > { %v8212_v55 = vadd.f32 %v15259_v57, %v19730_v31 }
 0x4e9   : > { %v15261_v9 = vpop.f32.mrf.mxu0 }
 0x4ea   : > { %v15262_v35 = vadd.f32 %v15261_v9, %v15260_v14  ;;  %v19955_v18 = vadd.f32 %v19828_v11, %v8212_v55 }
 0x4eb   : > { %v15263_v30 = vpop.f32.mrf.mxu0  ;;  %10084 = vmatmul.mubr.bf16.gmra.mxu0 %v9856_v21 }
 0x4ec   : > { %v8213_v61 = vadd.f32 %v15262_v35, %v19743_v41  ;;  %10091 = vmatprep.mubr.bf16.mxu0 %v9862_v19  ;;  %v9860_v41 = vsel %vm6692_vm10, %v9855_v56, %v9859_v40  ;;  %v9863_v35 = vrot.slane %v16842_v44, 1  ;;  %v16843_v19 = vld [vmem:[#allocation2 + $0xa4] ss:$8 sps:$4 sm:$0xff]  }
 0x4ed   : > { %v15264_v31 = vpop.f32.mrf.mxu0 }
 0x4ee   : > { %v15265_v37 = vadd.f32 %v15264_v31, %v15263_v30  ;;  %v19961_v34 = vadd.f32 %v15362_v2, %v8213_v61  ;;  %v9869_v2 = vrot.slane %v16843_v19, 1  ;;  %v9864_v61 = vsel %vm6692_vm10, %v9859_v40, %v9863_v35 }
 0x4ef   : > { %v15266_v27 = vpop.f32.mrf.mxu0  ;;  %v15374_v31 = vadd.f32 %v19873_v47, %v19863_v22  ;;  %v9873_v40 = vrot.slane %v16844_v0, 1 }
 0x4f0   : > { %v8214_v11 = vadd.f32 %v15265_v37, %v19752_v42  ;;  %v15368_v42 = vadd.f32 %v19856_v29, %v19846_v10  ;;  %v9870_v29 = vsel %vm6692_vm10, %v9865_v25, %v9869_v2  ;;  %v16684_v25 = vld [vmem:[%s21563_s6 + $0x70] sm:$0xff]  }
 0x4f1   : > { %v15267_v26 = vpop.f32.mrf.mxu0  ;;  %16017 = vmatprep.subr.bf16.mxu1 %v16684_v25 }
 0x4f2   : > { %v15268_v7 = vadd.f32 %v15267_v26, %v15266_v27  ;;  %v19969_v32 = vadd.f32 %v19844_v15, %v8214_v11  ;;  %v9867_v26 = vrot.slane %v16845_v20, 1  ;;  %16018 = vmatpush3.bf16.msra.mxu1 %v16684_v25  ;;  %v15392_v25 = vadd.f32 %v19924_v58, %v19915_v59  ;;  %v16687_v58 = vld [vmem:[%s21563_s6 + $0xf0] sm:$0xff]  }
 0x4f3   : > { %v15269_v57 = vpop.f32.mrf.mxu0  ;;  %10092 = vmatmul.mubr.bf16.gmra.mxu0 %v9860_v41 }
 0x4f4   : > { %v8215_v14 = vadd.f32 %v15268_v7, %v19761_v16  ;;  %10099 = vmatprep.mubr.bf16.mxu0 %v9866_v13 }
 0x4f5   : > { %v15270_v55 = vpop.f32.mrf.mxu0 }
 0x4f6   : > { %v15271_v9 = vadd.f32 %v15270_v55, %v15269_v57  ;;  %v19975_v56 = vadd.f32 %v15368_v42, %v8215_v14  ;;  %v9874_v57 = vsel %vm6692_vm10, %v9869_v2, %v9873_v40  ;;  %v16846_v55 = vld [vmem:[#allocation2 + $0xb0] ss:$8 sps:$4 sm:$0xff]  }
 0x4f7   : > { %v15272_v15 = vpop.f32.mrf.mxu0 }
 0x4f8   : > { %v8216_v21 = vadd.f32 %v15271_v9, %v19769_v24  ;;  %v9871_v9 = vrot.slane %v16846_v55, 1 }
 0x4f9   : > { %v15273_v30 = vpop.f32.mrf.mxu0 }
 0x4fa   : > { %v15274_v12 = vadd.f32 %v15273_v30, %v15272_v15  ;;  %v19980_v10 = vadd.f32 %v19861_v33, %v8216_v21  ;;  %v16847_v21 = vld [vmem:[#allocation2 + $0xc4] ss:$8 sps:$4 sm:$0xff]   ;;  %v9872_v2 = vsel %vm6692_vm10, %v9867_v26, %v9871_v9 }
 0x4fb   : > { %v15275_v16 = vpop.f32.mrf.mxu0  ;;  %10100 = vmatmul.mubr.bf16.gmra.mxu0 %v9864_v61  ;;  %v9877_v30 = vrot.slane %v16847_v21, 1 }
 0x4fc   : > { %v8217_v37 = vadd.f32 %v15274_v12, %v19777_v63  ;;  %10107 = vmatprep.mubr.bf16.mxu0 %v9870_v29  ;;  %v9868_v63 = vsel %vm6692_vm10, %v9863_v35, %v9867_v26  ;;  %v15386_v12 = vadd.f32 %v19907_v5, %v19898_v4  ;;  %v15396_v5 = vpop.f32.mrf.mxu1 }
 0x4fd   : > { %v15276_v24 = vpop.f32.mrf.mxu0 }
 0x4fe   : > { %v15277_v27 = vadd.f32 %v15276_v24, %v15275_v16  ;;  %v19986_v23 = vadd.f32 %v15374_v31, %v8217_v37  ;;  %v16848_v37 = vld [vmem:[#allocation2 + $0xd4] ss:$8 sps:$4 sm:$0xff]  }
 0x4ff   : > { %v15278_v11 = vpop.f32.mrf.mxu0  ;;  %v9881_v24 = vrot.slane %v16848_v37, 1 }
 0x500   : > { %v8218_v33 = vadd.f32 %v15277_v27, %v19785_v50  ;;  %v15380_v50 = vadd.f32 %v19890_v8, %v19880_v60  ;;  %v9878_v8 = vsel %vm6692_vm10, %v9873_v40, %v9877_v30 }
 0x501   : > { %v15279_v7 = vpop.f32.mrf.mxu0  ;;  %v9882_v26 = vsel %vm6692_vm10, %v9877_v30, %v9881_v24 }
 0x502   : > { %v15280_v22 = vadd.f32 %v15279_v7, %v15278_v11  ;;  %v19994_v47 = vadd.f32 %v19878_v43, %v8218_v33  ;;  %v16849_v11 = vld [vmem:[#allocation2 + $0xc0] ss:$8 sps:$4 sm:$0xff]  }
 0x503   : > { %v15281_v41 = vpop.f32.mrf.mxu0  ;;  %10108 = vmatmul.mubr.bf16.gmra.mxu0 %v9868_v63  ;;  %v9875_v4 = vrot.slane %v16849_v11, 1 }
 0x504   : > { %v8219_v13 = vadd.f32 %v15280_v22, %v19793_v17  ;;  %10115 = vmatprep.mubr.bf16.mxu0 %v9874_v57 }
 0x505   : > { %v15282_v42 = vpop.f32.mrf.mxu0  ;;  %v9876_v40 = vsel %vm6692_vm10, %v9871_v9, %v9875_v4 }
 0x506   : > { %v15283_v14 = vadd.f32 %v15282_v42, %v15281_v41  ;;  %v20000_v44 = vadd.f32 %v15380_v50, %v8219_v13  ;;  %v9879_v41 = vrot.slane %v19625_v52, 1  ;;  %v16686_v52 = vld [vmem:[%s21563_s6 + $0xf8] sm:$0xff]  }
 0x507   : > { %v15284_v43 = vpop.f32.mrf.mxu0  ;;  %16135 = vmatprep.subr.bf16.mxu0 %v16686_v52 }
 0x508   : > { %v8220_v35 = vadd.f32 %v15283_v14, %v19801_v1  ;;  %v16685_v1 = vld [vmem:[%s21563_s6 + $0x68] sm:$0xff]   ;;  %v9885_v14 = vrot.slane %v19637_v38, 1  ;;  %v9880_v59 = vsel %vm6692_vm10, %v9875_v4, %v9879_v41  ;;  %v21727_v38 = vld [vmem:[#allocation19_spill] sm:$0xff]  ;;  %16136 = vmatpush3.bf16.msra.mxu0 %v16686_v52 }
 0x509   : > { %v15285_v15 = vpop.f32.mrf.mxu0  ;;  %16019 = vmatprep.subr.bf16.mxu1 %v16685_v1  ;;  %16137 = vmatprep.subr.bf16.mxu0 %v16687_v58  ;;  %v16692_v52 = vld [vmem:[%s21563_s6 + $0x58] sm:$0xff]  }
 0x50a   : > { %v15286_v19 = vadd.f32 %v15285_v15, %v15284_v43  ;;  %v20005_v60 = vadd.f32 %v19895_v54, %v8220_v35  ;;  %16020 = vmatpush3.bf16.msra.mxu1 %v16685_v1  ;;  %v9886_v9 = vsel %vm6692_vm10, %v9881_v24, %v9885_v14  ;;  %v16688_v24 = vld [vmem:[%s21563_s6 + $0x60] sm:$0xff]  }
 0x50b   : > { %v15287_v17 = vpop.f32.mrf.mxu0  ;;  %10116 = vmatmul.mubr.bf16.gmra.mxu0 %v9872_v2  ;;  %v21728_v2 = vld [vmem:[#allocation11_spill] sm:$0xff]  ;;  %16021 = vmatprep.subr.bf16.mxu1 %v16688_v24 }
 0x50c   : > { %v8221_v61 = vadd.f32 %v15286_v19, %v19809_v48  ;;  %10123 = vmatprep.mubr.bf16.mxu0 %v9878_v8  ;;  %v21729_v8 = vld [vmem:[#allocation21_spill] sm:$0xff]  ;;  %16138 = vmatpush3.bf16.msra.mxu0 %v16687_v58 }
 0x50d   : > { %v15288_v16 = vpop.f32.mrf.mxu0 }
 0x50e   : > { %v15289_v29 = vadd.f32 %v15288_v16, %v15287_v17  ;;  %v20014_v31 = vadd.f32 %v15386_v12, %v8221_v61  ;;  %v9889_v17 = vrot.slane %v21728_v2, 1  ;;  %v21730_v61 = vld [vmem:[#allocation13_spill] sm:$0xff]  ;;  %16022 = vmatpush3.bf16.msra.mxu1 %v16688_v24 }
 0x50f   : > { %v15290_v54 = vpop.f32.mrf.mxu0  ;;  %v9883_v1 = vrot.slane %v21730_v61, 1  ;;  %16023 = vmatprep.subr.bf16.mxu1 %v16692_v52  ;;  %v16694_v24 = vld [vmem:[%s21563_s6 + $0xc8] sm:$0xff]  }
 0x510   : > { %v8222_v27 = vadd.f32 %v15289_v29, %v19817_v51  ;;  %v15397_v51 = vpop.f32.mrf.mxu1  ;;  %v9890_v4 = vsel %vm6692_vm10, %v9885_v14, %v9889_v17 }
 0x511   : > { %v15291_v48 = vpop.f32.mrf.mxu0  ;;  %v15398_v43 = vadd.f32 %v15397_v51, %v15396_v5  ;;  %v9884_v37 = vsel %vm6692_vm10, %v9879_v41, %v9883_v1  ;;  %v16690_v5 = vld [vmem:[%s21563_s6 + $0xe0] sm:$0xff]   ;;  %v21734_v41 = vld [vmem:[#allocation23_spill] sm:$0xff] }
 0x512   : > { %v15292_v0 = vadd.f32 %v15291_v48, %v15290_v54  ;;  %v20019_v33 = vadd.f32 %v19912_v28, %v8222_v27  ;;  %v20029_v13 = vpop.f32.mrf.mxu1  ;;  %v16689_v27 = vld [vmem:[%s21563_s6 + $0xe8] sm:$0xff]   ;;  %16024 = vmatpush3.bf16.msra.mxu1 %v16692_v52 }
 0x513   : > { %v15293_v20 = vpop.f32.mrf.mxu0  ;;  %10124 = vmatmul.mubr.bf16.gmra.mxu0 %v9876_v40  ;;  %v21731_v48 = vld [vmem:[#allocation22_spill] sm:$0xff]  ;;  %16139 = vmatprep.subr.bf16.mxu0 %v16689_v27 }
 0x514   : > { %v8223_v7 = vadd.f32 %v15292_v0, %v19825_v6  ;;  %10131 = vmatprep.mubr.bf16.mxu0 %v9882_v26  ;;  %v20044_v15 = vpop.f32.mrf.mxu1  ;;  %16140 = vmatpush3.bf16.msra.mxu0 %v16689_v27  ;;  %v16696_v27 = vld [vmem:[%s21563_s6 + $0x50] sm:$0xff]  }
 0x515   : > { %v15294_v22 = vpop.f32.mrf.mxu0  ;;  %16141 = vmatprep.subr.bf16.mxu0 %v16690_v5  ;;  %16025 = vmatprep.subr.bf16.mxu1 %v16696_v27 }
 0x516   : > { %v15295_v63 = vadd.f32 %v15294_v22, %v15293_v20  ;;  %v20026_v57 = vadd.f32 %v15392_v25, %v8223_v7  ;;  %v20053_v16 = vpop.f32.mrf.mxu1  ;;  %v21732_v25 = vld [vmem:[#allocation15_spill] sm:$0xff]  ;;  %v21733_v22 = vld [vmem:[#allocation16_spill] sm:$0xff]  ;;  %16026 = vmatpush3.bf16.msra.mxu1 %v16696_v27 }
 0x517   : > { %v15296_v50 = vpop.f32.mrf.mxu0  ;;  %v9887_v7 = vrot.slane %v21732_v25, 1 }
 0x518   : > { %v8224_v28 = vadd.f32 %v15295_v63, %v19833_v36  ;;  %v20069_v40 = vpop.f32.mrf.mxu1  ;;  %v9893_v63 = vrot.slane %v21733_v22, 1  ;;  %16142 = vmatpush3.bf16.msra.mxu0 %v16690_v5 }
 0x519   : > { %v15297_v42 = vpop.f32.mrf.mxu0 }
 0x51a   : > { %v15298_v55 = vadd.f32 %v15297_v42, %v15296_v50  ;;  %v20034_v6 = vadd.f32 %v19929_v46, %v8224_v28  ;;  %v20076_v28 = vpop.f32.mrf.mxu1 }
 0x51b   : > { %v15415_v36 = vpop.f32.mrf.mxu0  ;;  %10132 = vmatmul.mubr.bf16.gmra.mxu0 %v9880_v59  ;;  %v16691_v59 = vld [vmem:[%s21563_s6 + $0xd8] sm:$0xff]  }
 0x51c   : > { %v8225_v35 = vadd.f32 %v15298_v55, %v21727_v38  ;;  %10139 = vmatprep.mubr.bf16.mxu0 %v9886_v9  ;;  %v9888_v55 = vsel %vm6692_vm10, %v9883_v1, %v9887_v7  ;;  %v16693_v9 = vld [vmem:[%s21563_s6 + $0xd0] sm:$0xff]   ;;  %16143 = vmatprep.subr.bf16.mxu0 %v16691_v59 }
 0x51d   : > { %v15416_v46 = vpop.f32.mrf.mxu0  ;;  %16144 = vmatpush3.bf16.msra.mxu0 %v16691_v59 }
 0x51e   : > { %v15417_v21 = vadd.f32 %v15416_v46, %v15415_v36  ;;  %v20046_v30 = vadd.f32 %v15398_v43, %v8225_v35  ;;  %v9894_v36 = vsel %vm6692_vm10, %v9889_v17, %v9893_v63  ;;  %v21735_v43 = vld [vmem:[#allocation24_spill] sm:$0xff]  ;;  %v20092_v35 = vpop.f32.mrf.mxu1  ;;  %16145 = vmatprep.subr.bf16.mxu0 %v16693_v9  ;;  %v21737_v17 = vld [vmem:[#allocation25_spill] sm:$0xff] }
 0x51f   : > { %v15418_v19 = vpop.f32.mrf.mxu0 }
 0x520   : > { %v20050_v12 = vadd.f32 %v15417_v21, %v21729_v8  ;;  %v20098_v1 = vpop.f32.mrf.mxu1 }
 0x521   : > { %v15419_v29 = vpop.f32.mrf.mxu0  ;;  %16146 = vmatpush3.bf16.msra.mxu0 %v16693_v9 }
 0x522   : > { %v15420_v54 = vadd.f32 %v15419_v29, %v15418_v19  ;;  %v21736_v19 = vld [vmem:[#allocation17_spill] sm:$0xff]  ;;  %16147 = vmatprep.subr.bf16.mxu0 %v16694_v24 }
 0x523   : > { %v15421_v11 = vpop.f32.mrf.mxu0  ;;  %10140 = vmatmul.mubr.bf16.gmra.mxu0 %v9884_v37  ;;  %v9891_v2 = vrot.slane %v21736_v19, 1 }
 0x524   : > { %v20067_v0 = vadd.f32 %v15420_v54, %v21731_v48  ;;  %10147 = vmatprep.mubr.bf16.mxu0 %v9890_v4  ;;  %v16697_v4 = vld [vmem:[%s21563_s6 + $0xc0] sm:$0xff]   ;;  %v20113_v48 = vpop.f32.mrf.mxu1 }
 0x525   : > { %v15422_v20 = vpop.f32.mrf.mxu0  ;;  %v9892_v37 = vsel %vm6692_vm10, %v9887_v7, %v9891_v2  ;;  %16148 = vmatpush3.bf16.msra.mxu0 %v16694_v24  ;;  %v21738_v7 = vld [vmem:[#allocation26_spill] sm:$0xff] }
 0x526   : > { %v15423_v26 = vadd.f32 %v15422_v20, %v15421_v11  ;;  %16149 = vmatprep.subr.bf16.mxu0 %v16697_v4  ;;  %v20118_v22 = vpop.f32.mrf.mxu1 }
 0x527   : > { %v15424_v51 = vpop.f32.mrf.mxu0 }
 0x528   : > { %v20074_v50 = vadd.f32 %v15423_v26, %v21734_v41  ;;  %v20129_v52 = vpop.f32.mrf.mxu1 }
 0x529   : > { %v15425_v42 = vpop.f32.mrf.mxu0  ;;  %16150 = vmatpush3.bf16.msra.mxu0 %v16697_v4 }
 0x52a   : > { %v15426_v14 = vadd.f32 %v15425_v42, %v15424_v51  ;;  %v16702_v42 = vld [vmem:[%s21563_s6 + $0x40] sm:$0xff]  }
 0x52b   : > { %v15427_v58 = vpop.f32.mrf.mxu0  ;;  %10148 = vmatmul.mubr.bf16.gmra.mxu0 %v9888_v55  ;;  %v21739_v55 = vld [vmem:[#allocation27_spill] sm:$0xff] }
 0x52c   : > { %v20090_v38 = vadd.f32 %v15426_v14, %v21735_v43  ;;  %10155 = vmatprep.mubr.bf16.mxu0 %v9894_v36  ;;  %v21740_v43 = vld [vmem:[#allocation28_spill] sm:$0xff] }
 0x52d   : > { %v15428_v46 = vpop.f32.mrf.mxu0 }
 0x52e   : > { %v15429_v21 = vadd.f32 %v15428_v46, %v15427_v58 }
 0x52f   : > { %v15430_v8 = vpop.f32.mrf.mxu0 }
 0x530   : > { %v20096_v61 = vadd.f32 %v15429_v21, %v21737_v17  ;;  %v20134_v21 = vpop.f32.mrf.mxu1 }
 0x531   : > { %v15431_v29 = vpop.f32.mrf.mxu0 }
 0x532   : > { %v15432_v54 = vadd.f32 %v15431_v29, %v15430_v8  ;;  %v20139_v29 = vpop.f32.mrf.mxu1 }
 0x533   : > { %v15433_v11 = vpop.f32.mrf.mxu0  ;;  %10156 = vmatmul.mubr.bf16.gmra.mxu0 %v9892_v37 }
 0x534   : > { %v20111_v5 = vadd.f32 %v15432_v54, %v19892_v3  ;;  %v16698_v3 = vld [vmem:[%s21563_s6 + $0x48] sm:$0xff]  }
 0x535   : > { %v15434_v20 = vpop.f32.mrf.mxu0  ;;  %16027 = vmatprep.subr.bf16.mxu1 %v16698_v3 }
 0x536   : > { %v15435_v26 = vadd.f32 %v15434_v20, %v15433_v11  ;;  %16028 = vmatpush3.bf16.msra.mxu1 %v16698_v3  ;;  %v20144_v11 = vpop.f32.mrf.mxu1 }
 0x537   : > { %v15436_v25 = vpop.f32.mrf.mxu0  ;;  %16029 = vmatprep.subr.bf16.mxu1 %v16702_v42 }
 0x538   : > { %v20116_v51 = vadd.f32 %v15435_v26, %v21738_v7  ;;  %v20149_v7 = vpop.f32.mrf.mxu1 }
 0x539   : > { %v15437_v63 = vpop.f32.mrf.mxu0 }
 0x53a   : > { %v15438_v41 = vadd.f32 %v15437_v63, %v15436_v25  ;;  %16030 = vmatpush3.bf16.msra.mxu1 %v16702_v42  ;;  %v20154_v42 = vpop.f32.mrf.mxu1 }
 0x53b   : > { %v15439_v14 = vpop.f32.mrf.mxu0 }
 0x53c   : > { %v20127_v59 = vadd.f32 %v15438_v41, %v21739_v55 }
 0x53d   : > { %v15440_v58 = vpop.f32.mrf.mxu0 }
 0x53e   : > { %v15441_v36 = vadd.f32 %v15440_v58, %v15439_v14 }
 0x53f   : > { %v15442_v9 = vpop.f32.mrf.mxu0 }
 0x540   : > { %v20132_v46 = vadd.f32 %v15441_v36, %v21740_v43  ;;  %v20159_v36 = vpop.f32.mrf.mxu1 }
 0x541   : > { %v15443_v19 = vpop.f32.mrf.mxu0 }
 0x542   : > { %v15444_v2 = vadd.f32 %v15443_v19, %v15442_v9 }
 0x543   : > { %v15445_v8 = vpop.f32.mrf.mxu0 }
 0x544   : > { %v20137_v17 = vadd.f32 %v15444_v2, %v19926_v53  ;;  %v20164_v2 = vpop.f32.mrf.mxu1 }
 0x545   : > { %v15446_v54 = vpop.f32.mrf.mxu0 }
 0x546   : > { %v15447_v37 = vadd.f32 %v15446_v54, %v15445_v8 }
 0x547   : > { %v15448_v24 = vpop.f32.mrf.mxu0 }
 0x548   : > { %v20142_v27 = vadd.f32 %v15447_v37, %v19933_v39 }
 0x549   : > { %v15449_v4 = vpop.f32.mrf.mxu0 }
 0x54a   : > { %v15450_v20 = vadd.f32 %v15449_v4, %v15448_v24  ;;  %v20169_v24 = vpop.f32.mrf.mxu1 }
 0x54b   : > { %v15451_v26 = vpop.f32.mrf.mxu0 }
 0x54c   : > { %v20147_v25 = vadd.f32 %v15450_v20, %v19939_v45 }
 0x54d   : > { %v15452_v53 = vpop.f32.mrf.mxu0 }
 0x54e   : > { %v15453_v63 = vadd.f32 %v15452_v53, %v15451_v26  ;;  %v20174_v53 = vpop.f32.mrf.mxu1 }
 0x54f   : > { %v15454_v41 = vpop.f32.mrf.mxu0 }
 0x550   : > { %v20152_v3 = vadd.f32 %v15453_v63, %v19944_v62 }
 0x551   : > { %v15455_v39 = vpop.f32.mrf.mxu0 }
 0x552   : > { %v15456_v14 = vadd.f32 %v15455_v39, %v15454_v41  ;;  %v20179_v41 = vld [vmem:[%s21563_s6 + $0x38] sm:$0xff]  }
 0x553   : > { %v15457_v55 = vpop.f32.mrf.mxu0  ;;  %16055 = vmatprep.subr.bf16.mxu1 %v20179_v41 }
 0x554   : > { %v20157_v58 = vadd.f32 %v15456_v14, %v19950_v49  ;;  %v20185_v14 = vpop.f32.mrf.mxu1 }
 0x555   : > { %v15458_v45 = vpop.f32.mrf.mxu0 }
 0x556   : > { %v15459_v9 = vadd.f32 %v15458_v45, %v15457_v55 }
 0x557   : > { %v15460_v43 = vpop.f32.mrf.mxu0 }
 0x558   : > { %v20162_v19 = vadd.f32 %v15459_v9, %v19955_v18 }
 0x559   : > { %v15461_v62 = vpop.f32.mrf.mxu0 }
 0x55a   : > { %v15462_v8 = vadd.f32 %v15461_v62, %v15460_v43  ;;  %v20190_v43 = vpop.f32.mrf.mxu1 }
 0x55b   : > { %v15463_v54 = vpop.f32.mrf.mxu0 }
 0x55c   : > { %v20167_v37 = vadd.f32 %v15462_v8, %v19961_v34 }
 0x55d   : > { %v15464_v49 = vpop.f32.mrf.mxu0 }
 0x55e   : > { %v15465_v4 = vadd.f32 %v15464_v49, %v15463_v54 }
 0x55f   : > { %v15466_v20 = vpop.f32.mrf.mxu0 }
 0x560   : > { %v20172_v26 = vadd.f32 %v15465_v4, %v19969_v32 }
 0x561   : > { %v15467_v18 = vpop.f32.mrf.mxu0 }
 0x562   : > { %21741 = vst [vmem:[#allocation29_spill] sm:$0xff] %v20172_v26  ;;  %v15468_v63 = vadd.f32 %v15467_v18, %v15466_v20 }
 0x563   : > { %v15469_v39 = vpop.f32.mrf.mxu0 }
 0x564   : > { %v20182_v34 = vadd.f32 %v15468_v63, %v19975_v56  ;;  %v20195_v56 = vpop.f32.mrf.mxu1 }
 0x565   : > { %v15470_v55 = vpop.f32.mrf.mxu0 }
 0x566   : > { %21742 = vst [vmem:[#allocation30_spill] sm:$0xff] %v20182_v34  ;;  %v15471_v32 = vadd.f32 %v15470_v55, %v15469_v39  ;;  %v20200_v39 = vpop.f32.mrf.mxu1 }
 0x567   : > { %v15472_v45 = vpop.f32.mrf.mxu0 }
 0x568   : > { %v20188_v9 = vadd.f32 %v15471_v32, %v19980_v10  ;;  %v20205_v32 = vld [vmem:[%s21563_s6 + $0x178] sm:$0xff]  }
 0x569   : > { %v15473_v62 = vpop.f32.mrf.mxu0  ;;  %16215 = vmatprep.subr.bf16.mxu0 %v20205_v32 }
 0x56a   : > { %21743 = vst [vmem:[#allocation31_spill] sm:$0xff] %v20188_v9  ;;  %v15474_v8 = vadd.f32 %v15473_v62, %v15472_v45  ;;  %v20211_v62 = vpop.f32.mrf.mxu1 }
 0x56b   : > { %v15475_v54 = vpop.f32.mrf.mxu0 }
 0x56c   : > { %v20193_v49 = vadd.f32 %v15474_v8, %v19986_v23 }
 0x56d   : > { %v15476_v4 = vpop.f32.mrf.mxu0 }
 0x56e   : > { %21744 = vst [vmem:[#allocation18_spill] sm:$0xff] %v20193_v49  ;;  %v15477_v20 = vadd.f32 %v15476_v4, %v15475_v54 }
 0x56f   : > { %v15478_v18 = vpop.f32.mrf.mxu0 }
 0x570   : > { %v20198_v63 = vadd.f32 %v15477_v20, %v19994_v47  ;;  %v20216_v20 = vpop.f32.mrf.mxu1 }
 0x571   : > { %v15479_v10 = vpop.f32.mrf.mxu0 }
 0x572   : > { %21745 = vst [vmem:[#allocation6_spill] sm:$0xff] %v20198_v63  ;;  %v15480_v55 = vadd.f32 %v15479_v10, %v15478_v18 }
 0x573   : > { %v15481_v45 = vpop.f32.mrf.mxu0 }
 0x574   : > { %v20208_v23 = vadd.f32 %v15480_v55, %v20000_v44  ;;  %v20221_v44 = vpop.f32.mrf.mxu1 }
 0x575   : > { %v15482_v8 = vpop.f32.mrf.mxu0 }
 0x576   : > { %21746 = vst [vmem:[#allocation20_spill] sm:$0xff] %v20208_v23  ;;  %v15483_v47 = vadd.f32 %v15482_v8, %v15481_v45  ;;  %v20226_v45 = vpop.f32.mrf.mxu1 }
 0x577   : > { %v15484_v54 = vpop.f32.mrf.mxu0 }
 0x578   : > { %v20214_v4 = vadd.f32 %v15483_v47, %v20005_v60 }
 0x579   : > { %v15485_v18 = vpop.f32.mrf.mxu0 }
 0x57a   : > { %21747 = vst [vmem:[#allocation7_spill] sm:$0xff] %v20214_v4  ;;  %v15486_v10 = vadd.f32 %v15485_v18, %v15484_v54  ;;  %v20231_v54 = vpop.f32.mrf.mxu1 }
 0x57b   : > { %v15487_v63 = vpop.f32.mrf.mxu0 }
 0x57c   : > { %v20219_v49 = vadd.f32 %v15486_v10, %v20014_v31 }
 0x57d   : > { %v15488_v55 = vpop.f32.mrf.mxu0 }
 0x57e   : > { %21748 = vst [vmem:[#allocation8_spill] sm:$0xff] %v20219_v49  ;;  %v15489_v23 = vadd.f32 %v15488_v55, %v15487_v63  ;;  %v20236_v63 = vpop.f32.mrf.mxu1 }
 0x57f   : > { %v15490_v9 = vpop.f32.mrf.mxu0 }
 0x580   : > { %v20224_v34 = vadd.f32 %v15489_v23, %v20019_v33 }
 0x581   : > { %v15491_v60 = vpop.f32.mrf.mxu0 }
 0x582   : > { %21749 = vst [vmem:[#allocation9_spill] sm:$0xff] %v20224_v34  ;;  %v15492_v8 = vadd.f32 %v15491_v60, %v15490_v9  ;;  %v20241_v9 = vpop.f32.mrf.mxu1  ;;  %v15517_v60 = vadd.f32 %v20044_v15, %v20029_v13  ;;  %v15523_v13 = vadd.f32 %v20092_v35, %v20076_v28 }
 0x583   : > { %v15493_v47 = vpop.f32.mrf.mxu0 }
 0x584   : > { %v20229_v4 = vadd.f32 %v15492_v8, %v20026_v57 }
 0x585   : > { %v15494_v31 = vpop.f32.mrf.mxu0 }
 0x586   : > { %21750 = vst [vmem:[#allocation10_spill] sm:$0xff] %v20229_v4  ;;  %v15495_v18 = vadd.f32 %v15494_v31, %v15493_v47  ;;  %v9770_v31 = vadd.f32 %v15517_v60, %v20050_v12  ;;  %v15526_v12 = vadd.f32 %v20113_v48, %v20098_v1  ;;  %v9772_v60 = vadd.f32 %v15523_v13, %v20074_v50 }
 0x587   : > { %v15496_v10 = vpop.f32.mrf.mxu0 }
 0x588   : > { %v20234_v49 = vadd.f32 %v15495_v18, %v20034_v6  ;;  %v15520_v6 = vadd.f32 %v20069_v40, %v20053_v16  ;;  %v20248_v18 = vpop.f32.mrf.mxu1 }
 0x589   : > { %v15497_v33 = vpop.f32.mrf.mxu0 }
 0x58a   : > { %21751 = vst [vmem:[#allocation12_spill] sm:$0xff] %v20234_v49  ;;  %v15498_v23 = vadd.f32 %v15497_v33, %v15496_v10  ;;  %v20251_v4 = vpop.f32.mrf.mxu1 }
 0x58b   : > { %v15615_v55 = vpop.f32.mrf.mxu0 }
 0x58c   : > { %v20239_v34 = vadd.f32 %v15498_v23, %v20046_v30  ;;  %v9771_v30 = vadd.f32 %v15520_v6, %v20067_v0  ;;  %v20258_v0 = vpop.f32.mrf.mxu1  ;;  %v9773_v6 = vadd.f32 %v15526_v12, %v20090_v38 }
 0x58d   : > { %v15616_v57 = vpop.f32.mrf.mxu0 }
 0x58e   : > { %21752 = vst [vmem:[#allocation14_spill] sm:$0xff] %v20239_v34  ;;  %v15617_v8 = vadd.f32 %v15616_v57, %v15615_v55  ;;  %v20261_v35 = vpop.f32.mrf.mxu1 }
 0x58f   : > { %v15618_v47 = vpop.f32.mrf.mxu0 }
 0x590   : > { %v10164_v33 = vadd.f32 %v15617_v8, %v9770_v31  ;;  %v20268_v38 = vpop.f32.mrf.mxu1 }
 0x591   : > { %v15619_v10 = vpop.f32.mrf.mxu0 }
 0x592   : > { %v15620_v23 = vadd.f32 %v15619_v10, %v15618_v47  ;;  %v10192_v15 = vmax.f32 %v10164_v33, 0.0  ;;  %v15532_v33 = vadd.f32 %v20139_v29, %v20134_v21 }
 0x593   : > { %v15621_v34 = vpop.f32.mrf.mxu0 }
 0x594   : > { %v10165_v49 = vadd.f32 %v15620_v23, %v9771_v30 }
 0x595   : > { %v15622_v26 = vpop.f32.mrf.mxu0 }
 0x596   : > { %v10193_v55 = vmax.f32 %v10165_v49, 0.0  ;;  %v15623_v16 = vadd.f32 %v15622_v26, %v15621_v34  ;;  %v15529_v34 = vadd.f32 %v20129_v52, %v20118_v22 }
 0x597   : > { %v15624_v40 = vpop.f32.mrf.mxu0 }
 0x598   : > { %v14667_v57 = vpack.c.bf16 %v10193_v55, %v10192_v15  ;;  %v10166_v47 = vadd.f32 %v15623_v16, %v9772_v60  ;;  %v9774_v23 = vadd.f32 %v15529_v34, %v20096_v61  ;;  %v20273_v60 = vpop.f32.mrf.mxu1  ;;  %v15535_v61 = vadd.f32 %v20149_v7, %v20144_v11 }
 0x599   : > { %v15625_v8 = vpop.f32.mrf.mxu0 }
 0x59a   : > { %14668 = vst [vmem:[#allocation3] sm:$0xff] %v14667_v57   ;;  %v15626_v31 = vadd.f32 %v15625_v8, %v15624_v40  ;;  %v10194_v1 = vmax.f32 %v10166_v47, 0.0  ;;  %v9775_v40 = vadd.f32 %v15532_v33, %v20111_v5  ;;  %v15538_v5 = vadd.f32 %v20159_v36, %v20154_v42 }
 0x59b   : > { %v15627_v10 = vpop.f32.mrf.mxu0 }
 0x59c   : > { %v10167_v28 = vadd.f32 %v15626_v31, %v9773_v6 }
 0x59d   : > { %v15628_v26 = vpop.f32.mrf.mxu0 }
 0x59e   : > { %v10195_v48 = vmax.f32 %v10167_v28, 0.0  ;;  %v15629_v49 = vadd.f32 %v15628_v26, %v15627_v10  ;;  %v9776_v28 = vadd.f32 %v15535_v61, %v20116_v51  ;;  %v20281_v26 = vpop.f32.mrf.mxu1  ;;  %v15541_v51 = vadd.f32 %v20169_v24, %v20164_v2  ;;  %v16721_v2 = vld [vmem:[%s21563_s6 + $0x170] sm:$0xff]  }
 0x59f   : > { %v15630_v50 = vpop.f32.mrf.mxu0 }
 0x5a0   : > { %v14672_v30 = vpack.c.bf16 %v10195_v48, %v10194_v1  ;;  %v10168_v16 = vadd.f32 %v15629_v49, %v9774_v23  ;;  %v20287_v36 = vpop.f32.mrf.mxu1 }
 0x5a1   : > { %v15631_v13 = vpop.f32.mrf.mxu0  ;;  %v10360_v15 = vld [vmem:[#allocation3] sm:$0xf]  ;;  %v10361_v55 = vld [vmem:[#allocation3 + $0x4] sm:$0xf] }
 0x5a2   : > { %14734 = vst [vmem:[#allocation3 + $0x8] sm:$0xff] %v14672_v30   ;;  %v15632_v22 = vadd.f32 %v15631_v13, %v15630_v50  ;;  %v20271_v52 = vcombine.low %v10360_v15, %v10361_v55  ;;  %v10196_v8 = vmax.f32 %v10168_v16, 0.0  ;;  %v9777_v50 = vadd.f32 %v15538_v5, %v20127_v59  ;;  %v20296_v24 = vpop.f32.mrf.mxu1 }
 0x5a3   : > { %v15633_v12 = vpop.f32.mrf.mxu0 }
 0x5a4   : > { %v10169_v57 = vadd.f32 %v15632_v22, %v9775_v40  ;;  %v10484_v29 = vshll.u32 %v20271_v52, 16  ;;  %v10482_v30 = vshrl.u32 %v20271_v52, 16 }
 0x5a5   : > { %v15634_v21 = vpop.f32.mrf.mxu0 }
 0x5a6   : > { %v10197_v47 = vmax.f32 %v10169_v57, 0.0  ;;  %v15635_v6 = vadd.f32 %v15634_v21, %v15633_v12  ;;  %v10486_v48 = vrot.slane %v10484_v29, 1  ;;  %v15544_v12 = vadd.f32 %v20185_v14, %v20174_v53 }
 0x5a7   : > { %v15636_v31 = vpop.f32.mrf.mxu0  ;;  %v9778_v21 = vadd.f32 %v15541_v51, %v20132_v46 }
 0x5a8   : > { %v14677_v10 = vpack.c.bf16 %v10197_v47, %v10196_v8  ;;  %v10170_v49 = vadd.f32 %v15635_v6, %v9776_v28  ;;  %v10487_v15 = vor.u32 %v10486_v48, %v10482_v30  ;;  %v9779_v6 = vadd.f32 %v15544_v12, %v20137_v17  ;;  %v16725_v17 = vld [vmem:[%s21563_s6 + $0x168] sm:$0xff]  }
 0x5a9   : > { %v15637_v34 = vpop.f32.mrf.mxu0  ;;  %v16695_v1 = vld [vmem:[#allocation3 + $0x8] sm:$0xff]   ;;  %v15547_v28 = vadd.f32 %v20195_v56, %v20190_v43  ;;  %v15550_v43 = vadd.f32 %v20211_v62, %v20200_v39 }
 0x5aa   : > { %14735 = vst [vmem:[#allocation3 + $0x10] sm:$0xff] %v14677_v10   ;;  %v15638_v11 = vadd.f32 %v15637_v34, %v15636_v31  ;;  %v16700_v7 = vld [vmem:[#allocation3 + $0x8] sm:$0xff]   ;;  %16151 = vmatprep.mubr.bf16.mxu0 %v16695_v1  ;;  %v10198_v55 = vmax.f32 %v10170_v49, 0.0  ;;  %v20305_v34 = vpop.f32.mrf.mxu1 }
 0x5ab   : > { %v15639_v33 = vpop.f32.mrf.mxu0  ;;  %v10489_v42 = vshll.u32 %v16700_v7, 16  ;;  %v10493_v14 = vshrl.u32 %v16700_v7, 16  ;;  %v9780_v30 = vadd.f32 %v15547_v28, %v20142_v27  ;;  %v9781_v39 = vadd.f32 %v15550_v43, %v20147_v25 }
 0x5ac   : > { %v10171_v23 = vadd.f32 %v15638_v11, %v9777_v50  ;;  %v20320_v51 = vpop.f32.mrf.mxu1  ;;  %v15553_v25 = vadd.f32 %v20221_v44, %v20216_v20  ;;  %v16723_v20 = vld [vmem:[%s21563_s6 + $0x20] sm:$0xff]   ;;  %v15556_v44 = vadd.f32 %v20231_v54, %v20226_v45 }
 0x5ad   : > { %v15640_v13 = vpop.f32.mrf.mxu0  ;;  %v10491_v22 = vrot.slane %v10489_v42, 1  ;;  %v16727_v42 = vld [vmem:[%s21563_s6 + $0x160] sm:$0xff]  }
 0x5ae   : > { %v10199_v16 = vmax.f32 %v10171_v23, 0.0  ;;  %v15641_v40 = vadd.f32 %v15640_v13, %v15639_v33 }
 0x5af   : > { %v15642_v59 = vpop.f32.mrf.mxu0  ;;  %v10492_v29 = vsel %vm5882_vm9, %v10487_v15, %v10491_v22  ;;  %v10495_v1 = vor.u32 %v10493_v14, %v10491_v22  ;;  %v16718_v22 = vld [vmem:[%s21563_s6 + $0x28] sm:$0xff]  }
 0x5b0   : > { %v14682_v57 = vpack.c.bf16 %v10199_v16, %v10198_v55  ;;  %16031 = vmatprep.mubr.bf16.mxu1 %v10492_v29  ;;  %v10172_v47 = vadd.f32 %v15641_v40, %v9778_v21  ;;  %v16730_v29 = vld [vmem:[%s21563_s6 + $0x158] sm:$0xff]  }
 0x5b1   : > { %v15643_v61 = vpop.f32.mrf.mxu0  ;;  %v16701_v8 = vld [vmem:[#allocation3 + $0x10] sm:$0xff]  }
 0x5b2   : > { %14736 = vst [vmem:[#allocation3 + $0x18] sm:$0xff] %v14682_v57   ;;  %v15644_v31 = vadd.f32 %v15643_v61, %v15642_v59  ;;  %v20299_v53 = vld [vmem:[#allocation3 + $0x10] sm:$0xff]   ;;  %16152 = vmatmul.mubr.bf16.vlgmr.msra.gmra.mxu0 %v16701_v8  ;;  %v10200_v49 = vmax.f32 %v10172_v47, 0.0  ;;  %v20333_v57 = vpop.f32.mrf.mxu1 }
 0x5b3   : > { %v15645_v46 = vpop.f32.mrf.mxu0  ;;  %v10497_v10 = vshll.u32 %v20299_v53, 16  ;;  %16216 = vmatpush3.bf16.msra.mxu0 %v20205_v32  ;;  %v16716_v32 = vld [vmem:[%s21563_s6 + $0x30] sm:$0xff]   ;;  %v10501_v40 = vshrl.u32 %v20299_v53, 16 }
 0x5b4   : > { %v10173_v5 = vadd.f32 %v15644_v31, %v9779_v6  ;;  %16217 = vmatprep.subr.bf16.mxu0 %v16721_v2  ;;  %v9782_v6 = vadd.f32 %v15553_v25, %v20152_v3 }
 0x5b5   : > { %v15646_v48 = vpop.f32.mrf.mxu0  ;;  %v10499_v7 = vrot.slane %v10497_v10, 1  ;;  %v20348_v10 = vpop.f32.mrf.mxu1 }
 0x5b6   : > { %v10201_v50 = vmax.f32 %v10173_v5, 0.0  ;;  %v15647_v11 = vadd.f32 %v15646_v48, %v15645_v46  ;;  %v16732_v5 = vld [vmem:[%s21563_s6 + $0x150] sm:$0xff]   ;;  %v9783_v48 = vadd.f32 %v15556_v44, %v20157_v58  ;;  %v15559_v58 = vadd.f32 %v20241_v9, %v20236_v63 }
 0x5b7   : > { %v15648_v33 = vpop.f32.mrf.mxu0  ;;  %v10500_v23 = vsel %vm5882_vm9, %v10495_v1, %v10499_v7  ;;  %16218 = vmatpush3.bf16.msra.mxu0 %v16721_v2  ;;  %v16731_v63 = vld [vmem:[%s21563_s6 + $0x10] sm:$0xff]   ;;  %v15562_v9 = vadd.f32 %v20251_v4, %v20248_v18 }
 0x5b8   : > { %v14687_v56 = vpack.c.bf16 %v10201_v50, %v10200_v49  ;;  %16032 = vmatmul.mubr.bf16.vlgmr.msra.gmra.mxu1 %v10500_v23  ;;  %16219 = vmatprep.subr.bf16.mxu0 %v16725_v17  ;;  %v10174_v55 = vadd.f32 %v15647_v11, %v9780_v30  ;;  %v16726_v49 = vld [vmem:[%s21563_s6 + $0x18] sm:$0xff]  }
 0x5b9   : > { %v15649_v13 = vpop.f32.mrf.mxu0  ;;  %v16704_v15 = vld [vmem:[#allocation3 + $0x18] sm:$0xff]   ;;  %16056 = vmatpush3.bf16.msra.mxu1 %v20179_v41  ;;  %v10503_v41 = vor.u32 %v10501_v40, %v10499_v7  ;;  %v9785_v4 = vadd.f32 %v15562_v9, %v20167_v37  ;;  %v15565_v37 = vadd.f32 %v20261_v35, %v20258_v0  ;;  %v15568_v35 = vadd.f32 %v20273_v60, %v20268_v38  ;;  %v20410_v60 = vld [vmem:[%s21563_s6 + $0xb8] sm:$0xff]  }
 0x5ba   : > { %14737 = vst [vmem:[#allocation3 + $0x20] sm:$0xff] %v14687_v56   ;;  %v15650_v62 = vadd.f32 %v15649_v13, %v15648_v33  ;;  %v20323_v16 = vld [vmem:[#allocation3 + $0x18] sm:$0xff]   ;;  %16155 = vmatprep.mubr.bf16.mxu0 %v16704_v15  ;;  %16057 = vmatprep.subr.bf16.mxu1 %v16716_v32  ;;  %v10202_v2 = vmax.f32 %v10174_v55, 0.0  ;;  %v20360_v33 = vpop.f32.mrf.mxu1  ;;  %v16736_v56 = vld [vmem:[%s21563_s6 + $0x148] sm:$0xff]  }
 0x5bb   : > { %v15651_v27 = vpop.f32.mrf.mxu0  ;;  %v10505_v12 = vshll.u32 %v20323_v16, 16  ;;  %16220 = vmatpush3.bf16.msra.mxu0 %v16725_v17  ;;  %v10509_v11 = vshrl.u32 %v20323_v16, 16  ;;  %v16742_v0 = vld [vmem:[%s21563_s6] sm:$0xff]  }
 0x5bc   : > { %v10175_v59 = vadd.f32 %v15650_v62, %v9781_v39  ;;  %16221 = vmatprep.subr.bf16.mxu0 %v16727_v42  ;;  %v9784_v39 = vadd.f32 %v15559_v58, %v20162_v19  ;;  %v20375_v40 = vpop.f32.mrf.mxu1 }
 0x5bd   : > { %v15652_v21 = vpop.f32.mrf.mxu0  ;;  %v10507_v47 = vrot.slane %v10505_v12, 1  ;;  %16058 = vmatpush3.bf16.msra.mxu1 %v16716_v32 }
 0x5be   : > { %v10203_v61 = vmax.f32 %v10175_v59, 0.0  ;;  %v15653_v8 = vadd.f32 %v15652_v21, %v15651_v27  ;;  %16059 = vmatprep.subr.bf16.mxu1 %v16718_v22  ;;  %v16740_v27 = vld [vmem:[%s21563_s6 + $0x140] sm:$0xff]  }
 0x5bf   : > { %v15654_v31 = vpop.f32.mrf.mxu0  ;;  %v10508_v46 = vsel %vm5882_vm9, %v10503_v41, %v10507_v47  ;;  %16222 = vmatpush3.bf16.msra.mxu0 %v16727_v42  ;;  %v10511_v42 = vor.u32 %v10509_v11, %v10507_v47  ;;  %v16734_v41 = vld [vmem:[%s21563_s6 + $0x8] sm:$0xff]  }
 0x5c0   : > { %v14692_v14 = vpack.c.bf16 %v10203_v61, %v10202_v2  ;;  %v10176_v3 = vadd.f32 %v15653_v8, %v9782_v6  ;;  %16035 = vmatprep.mubr.bf16.mxu1 %v10508_v46  ;;  %16223 = vmatprep.subr.bf16.mxu0 %v16730_v29  ;;  %v20387_v61 = vpop.f32.mrf.mxu1  ;;  %v20392_v6 = vld [vmem:[%s21563_s6 + $0x1f8] sm:$0xff]   ;;  %v21753_v46 = vld [vmem:[#allocation29_spill] sm:$0xff] }
 0x5c1   : > { %v15655_v28 = vpop.f32.mrf.mxu0  ;;  %v16706_v1 = vld [vmem:[#allocation3 + $0x20] sm:$0xff]   ;;  %16060 = vmatpush3.bf16.msra.mxu1 %v16718_v22 }
 0x5c2   : > { %14738 = vst [vmem:[#allocation3 + $0x28] sm:$0xff] %v14692_v14   ;;  %v15656_v17 = vadd.f32 %v15655_v28, %v15654_v31  ;;  %v20351_v45 = vld [vmem:[#allocation3 + $0x20] sm:$0xff]   ;;  %16156 = vmatmul.mubr.bf16.gmra.mxu0 %v16706_v1  ;;  %16061 = vmatprep.subr.bf16.mxu1 %v16723_v20  ;;  %v10204_v32 = vmax.f32 %v10176_v3, 0.0 }
 0x5c3   : > { %v15657_v54 = vpop.f32.mrf.mxu0  ;;  %v10513_v7 = vshll.u32 %v20351_v45, 16  ;;  %16224 = vmatpush3.bf16.msra.mxu0 %v16730_v29  ;;  %v10517_v21 = vshrl.u32 %v20351_v45, 16 }
 0x5c4   : > { %v10177_v50 = vadd.f32 %v15656_v17, %v9783_v48  ;;  %16225 = vmatprep.subr.bf16.mxu0 %v16732_v5  ;;  %v20401_v48 = vpop.f32.mrf.mxu1 }
 0x5c5   : > { %v15658_v43 = vpop.f32.mrf.mxu0  ;;  %v10515_v13 = vrot.slane %v10513_v7, 1  ;;  %16062 = vmatpush3.bf16.msra.mxu1 %v16723_v20 }
 0x5c6   : > { %v10205_v30 = vmax.f32 %v10177_v50, 0.0  ;;  %v15659_v23 = vadd.f32 %v15658_v43, %v15657_v54  ;;  %16063 = vmatprep.subr.bf16.mxu1 %v16726_v49  ;;  %v21754_v50 = vld [vmem:[#allocation30_spill] sm:$0xff] }
 0x5c7   : > { %v15660_v15 = vpop.f32.mrf.mxu0  ;;  %v10516_v62 = vsel %vm5882_vm9, %v10511_v42, %v10515_v13  ;;  %16226 = vmatpush3.bf16.msra.mxu0 %v16732_v5  ;;  %v10519_v47 = vor.u32 %v10517_v21, %v10515_v13  ;;  %v9786_v5 = vadd.f32 %v15565_v37, %v21753_v46  ;;  %v9787_v11 = vadd.f32 %v15568_v35, %v21754_v50  ;;  %v21758_v50 = vld [vmem:[#allocation20_spill] sm:$0xff] }
 0x5c8   : > { %v14697_v55 = vpack.c.bf16 %v10205_v30, %v10204_v32  ;;  %16036 = vmatmul.mubr.bf16.gmra.mxu1 %v10516_v62  ;;  %16227 = vmatprep.subr.bf16.mxu0 %v16736_v56  ;;  %v10178_v12 = vadd.f32 %v15659_v23, %v9784_v39  ;;  %v15571_v30 = vadd.f32 %v20287_v36, %v20281_v26  ;;  %v20416_v23 = vpop.f32.mrf.mxu1 }
 0x5c9   : > { %v15661_v22 = vpop.f32.mrf.mxu0  ;;  %v16708_v59 = vld [vmem:[#allocation3 + $0x28] sm:$0xff]   ;;  %16064 = vmatpush3.bf16.msra.mxu1 %v16726_v49  ;;  %v15574_v62 = vadd.f32 %v20305_v34, %v20296_v24 }
 0x5ca   : > { %14739 = vst [vmem:[#allocation3 + $0x30] sm:$0xff] %v14697_v55   ;;  %v15662_v18 = vadd.f32 %v15661_v22, %v15660_v15  ;;  %v20378_v25 = vld [vmem:[#allocation3 + $0x28] sm:$0xff]   ;;  %16159 = vmatprep.mubr.bf16.mxu0 %v16708_v59  ;;  %16065 = vmatprep.subr.bf16.mxu1 %v16731_v63  ;;  %v10206_v31 = vmax.f32 %v10178_v12, 0.0  ;;  %v20423_v36 = vpop.f32.mrf.mxu1 }
 0x5cb   : > { %v15663_v19 = vpop.f32.mrf.mxu0  ;;  %v10521_v2 = vshll.u32 %v20378_v25, 16  ;;  %16228 = vmatpush3.bf16.msra.mxu0 %v16736_v56  ;;  %v10525_v43 = vshrl.u32 %v20378_v25, 16  ;;  %v21755_v22 = vld [vmem:[#allocation31_spill] sm:$0xff] }
 0x5cc   : > { %v10179_v29 = vadd.f32 %v15662_v18, %v9785_v4  ;;  %16229 = vmatprep.subr.bf16.mxu0 %v16740_v27  ;;  %v9788_v59 = vadd.f32 %v15571_v30, %v21755_v22  ;;  %v21759_v22 = vld [vmem:[#allocation7_spill] sm:$0xff] }
 0x5cd   : > { %v15664_v8 = vpop.f32.mrf.mxu0  ;;  %v10523_v14 = vrot.slane %v10521_v2, 1  ;;  %16066 = vmatpush3.bf16.msra.mxu1 %v16731_v63 }
 0x5ce   : > { %v10207_v20 = vmax.f32 %v10179_v29, 0.0  ;;  %v15665_v44 = vadd.f32 %v15664_v8, %v15663_v19  ;;  %16067 = vmatprep.subr.bf16.mxu1 %v16734_v41  ;;  %v21756_v19 = vld [vmem:[#allocation18_spill] sm:$0xff]  ;;  %v15577_v8 = vadd.f32 %v20333_v57, %v20320_v51 }
 0x5cf   : > { %v15666_v3 = vpop.f32.mrf.mxu0  ;;  %v10524_v1 = vsel %vm5882_vm9, %v10519_v47, %v10523_v14  ;;  %16230 = vmatpush3.bf16.msra.mxu0 %v16740_v27  ;;  %v10527_v9 = vor.u32 %v10525_v43, %v10523_v14  ;;  %v9789_v21 = vadd.f32 %v15574_v62, %v21756_v19  ;;  %v15588_v47 = vpop.f32.mrf.mxu1  ;;  %v15586_v62 = vadd.f32 %v20416_v23, %v20401_v48 }
 0x5d0   : > { %v14702_v28 = vpack.c.bf16 %v10207_v20, %v10206_v31  ;;  %v10180_v17 = vadd.f32 %v15665_v44, %v9786_v5  ;;  %16039 = vmatprep.mubr.bf16.mxu1 %v10524_v1  ;;  %16295 = vmatprep.subr.bf16.mxu0 %v20392_v6 }
 0x5d1   : > { %v15667_v54 = vpop.f32.mrf.mxu0  ;;  %v16710_v49 = vld [vmem:[#allocation3 + $0x30] sm:$0xff]   ;;  %16068 = vmatpush3.bf16.msra.mxu1 %v16734_v41 }
 0x5d2   : > { %14740 = vst [vmem:[#allocation3 + $0x38] sm:$0xff] %v14702_v28   ;;  %v15668_v7 = vadd.f32 %v15667_v54, %v15666_v3  ;;  %v20405_v58 = vld [vmem:[#allocation3 + $0x30] sm:$0xff]   ;;  %16160 = vmatmul.mubr.bf16.gmra.mxu0 %v16710_v49  ;;  %16069 = vmatprep.subr.bf16.mxu1 %v16742_v0  ;;  %v10208_v42 = vmax.f32 %v10180_v17, 0.0  ;;  %v21757_v28 = vld [vmem:[#allocation6_spill] sm:$0xff]  ;;  %v15590_v54 = vpop.f32.mrf.mxu1 }
 0x5d3   : > { %v15669_v38 = vpop.f32.mrf.mxu0  ;;  %v10529_v56 = vshll.u32 %v20405_v58, 16  ;;  %v10533_v24 = vshrl.u32 %v20405_v58, 16  ;;  %v9790_v1 = vadd.f32 %v15577_v8, %v21757_v28 }
 0x5d4   : > { %v10181_v32 = vadd.f32 %v15668_v7, %v9787_v11  ;;  %v15591_v30 = vpop.f32.mrf.mxu1 }
 0x5d5   : > { %v15670_v13 = vpop.f32.mrf.mxu0  ;;  %v10531_v55 = vrot.slane %v10529_v56, 1  ;;  %16070 = vmatpush3.bf16.msra.mxu1 %v16742_v0  ;;  %v15580_v0 = vadd.f32 %v20360_v33, %v20348_v10  ;;  %v15583_v56 = vadd.f32 %v20387_v61, %v20375_v40 }
 0x5d6   : > { %v10209_v15 = vmax.f32 %v10181_v32, 0.0  ;;  %v15671_v63 = vadd.f32 %v15670_v13, %v15669_v38  ;;  %16095 = vmatprep.subr.bf16.mxu1 %v20410_v60 }
 0x5d7   : > { %v15672_v39 = vpop.f32.mrf.mxu0  ;;  %v10532_v26 = vsel %vm5882_vm9, %v10527_v9, %v10531_v55  ;;  %v10535_v20 = vor.u32 %v10533_v24, %v10531_v55  ;;  %v9791_v11 = vadd.f32 %v15580_v0, %v21758_v50 }
 0x5d8   : > { %v14707_v27 = vpack.c.bf16 %v10209_v15, %v10208_v42  ;;  %16040 = vmatmul.mubr.bf16.gmra.mxu1 %v10532_v26  ;;  %v10182_v18 = vadd.f32 %v15671_v63, %v9788_v59  ;;  %v9792_v59 = vadd.f32 %v15583_v56, %v21759_v22 }
 0x5d9   : > { %v15673_v12 = vpop.f32.mrf.mxu0  ;;  %v16712_v4 = vld [vmem:[#allocation3 + $0x38] sm:$0xff]  }
 0x5da   : > { %14741 = vst [vmem:[#allocation3 + $0x40] sm:$0xff] %v14707_v27   ;;  %v15674_v41 = vadd.f32 %v15673_v12, %v15672_v39  ;;  %v20426_v29 = vld [vmem:[#allocation3 + $0x38] sm:$0xff]   ;;  %16163 = vmatprep.mubr.bf16.mxu0 %v16712_v4  ;;  %v10210_v44 = vmax.f32 %v10182_v18, 0.0  ;;  %v15593_v12 = vpop.f32.mrf.mxu1 }
 0x5db   : > { %v15675_v2 = vpop.f32.mrf.mxu0  ;;  %v10537_v37 = vshll.u32 %v20426_v29, 16  ;;  %v10541_v10 = vshrl.u32 %v20426_v29, 16  ;;  %v21760_v18 = vld [vmem:[#allocation8_spill] sm:$0xff] }
 0x5dc   : > { %v10183_v34 = vadd.f32 %v15674_v41, %v9789_v21  ;;  %v9793_v19 = vadd.f32 %v15586_v62, %v21760_v18  ;;  %v21763_v62 = vld [vmem:[#allocation12_spill] sm:$0xff] }
 0x5dd   : > { %v15676_v31 = vpop.f32.mrf.mxu0  ;;  %v10539_v5 = vrot.slane %v10537_v37, 1  ;;  %v15594_v37 = vpop.f32.mrf.mxu1 }
 0x5de   : > { %v10211_v14 = vmax.f32 %v10183_v34, 0.0  ;;  %v15677_v46 = vadd.f32 %v15676_v31, %v15675_v2  ;;  %v15589_v34 = vadd.f32 %v15588_v47, %v20423_v36  ;;  %v21762_v47 = vld [vmem:[#allocation10_spill] sm:$0xff] }
 0x5df   : > { %v15678_v3 = vpop.f32.mrf.mxu0  ;;  %v10540_v17 = vsel %vm5882_vm9, %v10535_v20, %v10539_v5  ;;  %v10543_v13 = vor.u32 %v10541_v10, %v10539_v5 }
 0x5e0   : > { %v14712_v35 = vpack.c.bf16 %v10211_v14, %v10210_v44  ;;  %16043 = vmatprep.mubr.bf16.mxu1 %v10540_v17  ;;  %v10184_v57 = vadd.f32 %v15677_v46, %v9790_v1  ;;  %v15596_v17 = vpop.f32.mrf.mxu1 }
 0x5e1   : > { %v15679_v49 = vpop.f32.mrf.mxu0  ;;  %v16715_v51 = vld [vmem:[#allocation3 + $0x40] sm:$0xff]  }
 0x5e2   : > { %14742 = vst [vmem:[#allocation3 + $0x48] sm:$0xff] %v14712_v35   ;;  %v15680_v7 = vadd.f32 %v15679_v49, %v15678_v3  ;;  %v20437_v38 = vld [vmem:[#allocation3 + $0x40] sm:$0xff]   ;;  %16164 = vmatmul.mubr.bf16.gmra.mxu0 %v16715_v51  ;;  %v10212_v15 = vmax.f32 %v10184_v57, 0.0  ;;  %v15592_v3 = vadd.f32 %v15591_v30, %v15590_v54 }
 0x5e3   : > { %v15681_v32 = vpop.f32.mrf.mxu0  ;;  %v10545_v43 = vshll.u32 %v20437_v38, 16  ;;  %v10549_v48 = vshrl.u32 %v20437_v38, 16  ;;  %v21761_v35 = vld [vmem:[#allocation9_spill] sm:$0xff] }
 0x5e4   : > { %v10185_v33 = vadd.f32 %v15680_v7, %v9791_v11  ;;  %v9794_v28 = vadd.f32 %v15589_v34, %v21761_v35  ;;  %v9795_v57 = vadd.f32 %v15592_v3, %v21762_v47  ;;  %v20481_v35 = vld [vmem:[#allocation3 + $0x18] sm:$0xff]  }
 0x5e5   : > { %v15682_v42 = vpop.f32.mrf.mxu0  ;;  %v10547_v55 = vrot.slane %v10545_v43, 1  ;;  %v15597_v43 = vpop.f32.mrf.mxu1 }
 0x5e6   : > { %v10213_v63 = vmax.f32 %v10185_v33, 0.0  ;;  %v15683_v9 = vadd.f32 %v15682_v42, %v15681_v32  ;;  %v15595_v33 = vadd.f32 %v15594_v37, %v15593_v12 }
 0x5e7   : > { %v15684_v39 = vpop.f32.mrf.mxu0  ;;  %v10548_v26 = vsel %vm5882_vm9, %v10543_v13, %v10547_v55  ;;  %v10551_v31 = vor.u32 %v10549_v48, %v10547_v55  ;;  %v15598_v55 = vadd.f32 %v15597_v43, %v15596_v17 }
 0x5e8   : > { %v14717_v27 = vpack.c.bf16 %v10213_v63, %v10212_v15  ;;  %16044 = vmatmul.mubr.bf16.gmra.mxu1 %v10548_v26  ;;  %v10186_v61 = vadd.f32 %v15683_v9, %v9792_v59  ;;  %v20462_v59 = vld [vmem:[#allocation3 + $0xc] sm:$0xf]  ;;  %v11950_v26 = vld [vmem:[#allocation3 + $0x8] sm:$0xe] }
 0x5e9   : > { %v15685_v4 = vpop.f32.mrf.mxu0  ;;  %v16719_v40 = vld [vmem:[#allocation3 + $0x48] sm:$0xff]   ;;  %v14462_v34 = vcombine.low %v11950_v26, %v20462_v59 }
 0x5ea   : > { %14743 = vst [vmem:[#allocation3 + $0x50] sm:$0xff] %v14717_v27   ;;  %v15686_v21 = vadd.f32 %v15685_v4, %v15684_v39  ;;  %v20448_v41 = vld [vmem:[#allocation3 + $0x48] sm:$0xff]   ;;  %16167 = vmatprep.mubr.bf16.mxu0 %v16719_v40  ;;  %v10214_v20 = vmax.f32 %v10186_v61, 0.0  ;;  %v9796_v27 = vadd.f32 %v15595_v33, %v21763_v62 }
 0x5eb   : > { %v15687_v2 = vpop.f32.mrf.mxu0  ;;  %v10553_v24 = vshll.u32 %v20448_v41, 16  ;;  %v10557_v54 = vshrl.u32 %v20448_v41, 16  ;;  %v21764_v61 = vld [vmem:[#allocation14_spill] sm:$0xff] }
 0x5ec   : > { %v10187_v23 = vadd.f32 %v15686_v21, %v9793_v19  ;;  %v9797_v18 = vadd.f32 %v15598_v55, %v21764_v61  ;;  %v20512_v26 = vld [vmem:[#allocation3 + $0x48] sm:$0xff]  }
 0x5ed   : > { %v15688_v8 = vpop.f32.mrf.mxu0  ;;  %v10555_v46 = vrot.slane %v10553_v24, 1 }
 0x5ee   : > { %v10215_v44 = vmax.f32 %v10187_v23, 0.0  ;;  %v15689_v14 = vadd.f32 %v15688_v8, %v15687_v2  ;;  %v20467_v2 = vld [vmem:[#allocation3 + $0x10] sm:$0xff]  }
 0x5ef   : > { %v15690_v5 = vpop.f32.mrf.mxu0  ;;  %v10556_v1 = vsel %vm5882_vm9, %v10551_v31, %v10555_v46  ;;  %v10559_v30 = vor.u32 %v10557_v54, %v10555_v46  ;;  %v11972_v46 = vrot.slane %v20467_v2, 1 }
 0x5f0   : > { %v14722_v0 = vpack.c.bf16 %v10215_v44, %v10214_v20  ;;  %16047 = vmatprep.mubr.bf16.mxu1 %v10556_v1  ;;  %v10188_v36 = vadd.f32 %v15689_v14, %v9794_v28  ;;  %v20483_v28 = vld [vmem:[#allocation3 + $0x20] sm:$0xff]   ;;  %v20485_v1 = vld [vmem:[#allocation3 + $0x28] sm:$0xff]  }
 0x5f1   : > { %v15691_v49 = vpop.f32.mrf.mxu0  ;;  %v16724_v51 = vld [vmem:[#allocation3 + $0x50] sm:$0xff]   ;;  %v11669_v33 = vshll.u32 %v20485_v1, 16  ;;  %v11673_v62 = vshrl.u32 %v20485_v1, 16 }
 0x5f2   : > { %14744 = vst [vmem:[#allocation3 + $0x58] sm:$0xff] %v14722_v0   ;;  %v15692_v50 = vadd.f32 %v15691_v49, %v15690_v5  ;;  %v20456_v11 = vld [vmem:[#allocation3 + $0x50] sm:$0xff]   ;;  %16168 = vmatmul.mubr.bf16.gmra.mxu0 %v16724_v51  ;;  %v10216_v42 = vmax.f32 %v10188_v36, 0.0  ;;  %v11971_v49 = vrot.slane %v14462_v34, 1 }
 0x5f3   : > { %v15693_v7 = vpop.f32.mrf.mxu0  ;;  %v10561_v10 = vshll.u32 %v20456_v11, 16  ;;  %v10565_v23 = vshrl.u32 %v20456_v11, 16  ;;  %v10999_v37 = vrot.slane %v20456_v11, 1  ;;  %v20487_v36 = vld [vmem:[#allocation3 + $0x30] sm:$0xff]  }
 0x5f4   : > { %v10189_v32 = vadd.f32 %v15692_v50, %v9795_v57  ;;  %v11973_v47 = vsel %vm6692_vm10, %v11971_v49, %v11972_v46  ;;  %v11980_v49 = vrot.slane %v20487_v36, 1 }
 0x5f5   : > { %v15694_v56 = vpop.f32.mrf.mxu0  ;;  %v10563_v63 = vrot.slane %v10561_v10, 1  ;;  %v11661_v10 = vshll.u32 %v20483_v28, 16 }
 0x5f6   : > { %v10217_v13 = vmax.f32 %v10189_v32, 0.0  ;;  %v15695_v15 = vadd.f32 %v15694_v56, %v15693_v7  ;;  %v20491_v7 = vld [vmem:[#allocation3 + $0x38] sm:$0xff]   ;;  %v11974_v32 = vrot.slane %v20481_v35, 1 }
 0x5f7   : > { %v15696_v9 = vpop.f32.mrf.mxu0  ;;  %v10564_v22 = vsel %vm5882_vm9, %v10559_v30, %v10563_v63  ;;  %v10567_v44 = vor.u32 %v10565_v23, %v10563_v63  ;;  %v11976_v30 = vrot.slane %v20483_v28, 1  ;;  %v11671_v63 = vrot.slane %v11669_v33, 1  ;;  %v20519_v23 = vld [vmem:[#allocation3 + $0x50] sm:$0xff]   ;;  %v16759_v33 = vld [vmem:[%s21563_s6 + $0x1e0] sm:$0xff]  }
 0x5f8   : > { %v14727_v39 = vpack.c.bf16 %v10217_v13, %v10216_v42  ;;  %16048 = vmatmul.mubr.bf16.gmra.mxu1 %v10564_v22  ;;  %v10190_v40 = vadd.f32 %v15695_v15, %v9796_v27  ;;  %v11665_v42 = vshrl.u32 %v20483_v28, 16  ;;  %v20501_v15 = vrot.slane %v11661_v10, 1  ;;  %v16753_v22 = vld [vmem:[%s21563_s6 + $0x1f0] sm:$0xff]  }
 0x5f9   : > { %v15697_v4 = vpop.f32.mrf.mxu0  ;;  %v16729_v12 = vld [vmem:[#allocation3 + $0x58] sm:$0xff]   ;;  %v11685_v27 = vshll.u32 %v20491_v7, 16  ;;  %v11675_v61 = vor.u32 %v11673_v62, %v11671_v63  ;;  %v20553_v10 = vld [vmem:[#allocation3 + $0x8] sm:$0xff]  }
 0x5fa   : > { %14745 = vst [vmem:[#allocation3 + $0x60] sm:$0xff] %v14727_v39   ;;  %v15698_v19 = vadd.f32 %v15697_v4, %v15696_v9  ;;  %v20465_v21 = vld [vmem:[#allocation3 + $0x58] sm:$0xff]   ;;  %16171 = vmatprep.mubr.bf16.mxu0 %v16729_v12  ;;  %v10218_v31 = vmax.f32 %v10190_v40, 0.0  ;;  %v11677_v9 = vshll.u32 %v20487_v36, 16  ;;  %v20505_v39 = vld [vmem:[#allocation3 + $0x40] sm:$0xff]   ;;  %v11667_v4 = vor.u32 %v11665_v42, %v20501_v15 }
 0x5fb   : > { %v10569_v24 = vshll.u32 %v20465_v21, 16  ;;  %v11001_v8 = vrot.slane %v20465_v21, 1  ;;  %v10573_v57 = vshrl.u32 %v20465_v21, 16  ;;  %v11681_v12 = vshrl.u32 %v20487_v36, 16  ;;  %v20525_v34 = vld [vmem:[#allocation3 + $0x58] sm:$0xff]  }
 0x5fc   : > { %v10191_v48 = vadd.f32 %v15698_v19, %v9797_v18  ;;  %v11975_v40 = vsel %vm6692_vm10, %v11972_v46, %v11974_v32  ;;  %v11679_v18 = vrot.slane %v11677_v9, 1  ;;  %v11687_v19 = vrot.slane %v11685_v27, 1  ;;  %v16749_v27 = vld [vmem:[%s21563_s6 + $0xa8] sm:$0xff]  }
 0x5fd   : > { %v10571_v14 = vrot.slane %v10569_v24, 1  ;;  %v20478_v5 = vsel %vm6692_vm10, %v10999_v37, %v11001_v8  ;;  %v20522_v24 = vsel %vm5882_vm9, %v11667_v4, %v11671_v63  ;;  %v11701_v46 = vshll.u32 %v20512_v26, 16 }
 0x5fe   : > { %v10219_v20 = vmax.f32 %v10191_v48, 0.0  ;;  %v11977_v48 = vsel %vm6692_vm10, %v11974_v32, %v11976_v30  ;;  %v11717_v32 = vshll.u32 %v20525_v34, 16  ;;  %v11713_v42 = vshrl.u32 %v20519_v23, 16 }
 0x5ff   : > { %v10572_v0 = vsel %vm5882_vm9, %v10567_v44, %v10571_v14  ;;  %v10575_v43 = vor.u32 %v10573_v57, %v10571_v14  ;;  %v11978_v44 = vrot.slane %v20485_v1, 1  ;;  %v16756_v14 = vld [vmem:[%s21563_s6 + $0x1e8] sm:$0xff]   ;;  %v16748_v1 = vld [vmem:[%s21563_s6 + $0xb0] sm:$0xff]   ;;  %v11709_v57 = vshll.u32 %v20519_v23, 16 }
 0x600   : > { %v14732_v3 = vpack.c.bf16 %v10219_v20, %v10218_v31  ;;  %16051 = vmatprep.mubr.bf16.mxu1 %v10572_v0  ;;  %v11689_v31 = vshrl.u32 %v20491_v7, 16  ;;  %v11693_v20 = vshll.u32 %v20505_v39, 16  ;;  %v11719_v9 = vrot.slane %v11717_v32, 1  ;;  %v16763_v32 = vld [vmem:[%s21563_s6 + $0x90] sm:$0xff]  }
 0x601   : > { %v16735_v17 = vld [vmem:[#allocation3 + $0x60] sm:$0xff]   ;;  %v11979_v36 = vsel %vm6692_vm10, %v11976_v30, %v11978_v44  ;;  %v11981_v62 = vsel %vm6692_vm10, %v11978_v44, %v11980_v49 }
 0x602   : > { %14746 = vst [vmem:[#allocation3 + $0x68] sm:$0xff] %v14732_v3   ;;  %v16741_v51 = vld [vmem:[#allocation3 + $0x60] ss:$0 sps:$4 sm:$0x11]   ;;  %16172 = vmatmul.mubr.bf16.gmra.mxu0 %v16735_v17  ;;  %v11691_v0 = vor.u32 %v11689_v31, %v11687_v19  ;;  %v11695_v28 = vrot.slane %v11693_v20, 1  ;;  %v11697_v17 = vshrl.u32 %v20505_v39, 16 }
 0x603   : > { %16231 = vmatprep.mubr.bf16.mxu0 %v11973_v47  ;;  %v10577_v50 = vshll.u32 %v16741_v51, 16  ;;  %v11003_v54 = vrot.slane %v16741_v51, 1  ;;  %v11703_v51 = vrot.slane %v11701_v46, 1  ;;  %v11705_v47 = vshrl.u32 %v20512_v26, 16  ;;  %v16754_v20 = vld [vmem:[%s21563_s6 + $0xa0] sm:$0xff]  }
 0x604   : > { %v11984_v31 = vrot.slane %v20505_v39, 1 }
 0x605   : > { %v10579_v56 = vrot.slane %v10577_v50, 1  ;;  %v20499_v13 = vsel %vm6692_vm10, %v11001_v8, %v11003_v54  ;;  %v11683_v8 = vor.u32 %v11681_v12, %v11679_v18  ;;  %v20550_v50 = vsel %vm5882_vm9, %v11691_v0, %v11695_v28 }
 0x606   : > { %v11699_v54 = vor.u32 %v11697_v17, %v11695_v28  ;;  %v16758_v17 = vld [vmem:[%s21563_s6 + $0x98] sm:$0xff]  }
 0x607   : > { %v10580_v55 = vsel %vm5882_vm9, %v10575_v43, %v10579_v56  ;;  %v20540_v3 = vsel %vm5882_vm9, %v11683_v8, %v11687_v19  ;;  %v11707_v43 = vor.u32 %v11705_v47, %v11703_v51  ;;  %v11711_v56 = vrot.slane %v11709_v57, 1 }
 0x608   : > { %16052 = vmatmul.mubr.bf16.gmra.mxu1 %v10580_v55  ;;  %v20564_v63 = vsel %vm5882_vm9, %v11699_v54, %v11703_v51  ;;  %v11721_v55 = vshrl.u32 %v20525_v34, 16  ;;  %v11986_v57 = vrot.slane %v20512_v26, 1  ;;  %v11988_v54 = vrot.slane %v20519_v23, 1  ;;  %v12523_v23 = vld [vmem:[#allocation3 + $0x10] sm:$0xf] }
 0x609   : > { %16071 = vmatprep.mubr.bf16.mxu1 %v20271_v52  ;;  %v20528_v52 = vsel %vm5882_vm9, %v11675_v61, %v11679_v18  ;;  %v11715_v4 = vor.u32 %v11713_v42, %v11711_v56  ;;  %v16761_v61 = vld [vmem:[%s21563_s6 + $0x1d8] sm:$0xff]   ;;  %v20582_v18 = vld [vmem:[#allocation3 + $0x68] ss:$0 sps:$4 sm:$0x11]  }
 0x60a   : > { %16232 = vmatmul.mubr.bf16.vlgmr.msra.gmra.mxu0 %v11975_v40  ;;  %v11723_v12 = vor.u32 %v11721_v55, %v11719_v9  ;;  %v11733_v39 = vshll.u32 %v20582_v18, 16  ;;  %v11987_v26 = vsel %vm6692_vm10, %v11984_v31, %v11986_v57  ;;  %v11989_v42 = vsel %vm6692_vm10, %v11986_v57, %v11988_v54 }
 0x60b   : > { %16235 = vmatprep.mubr.bf16.mxu0 %v11977_v48  ;;  %16296 = vmatpush3.bf16.msra.mxu0 %v20392_v6  ;;  %v20537_v6 = vld [vmem:[#allocation3 + $0x60] sm:$0xff]   ;;  %v20585_v19 = vsel %vm5882_vm9, %v11715_v4, %v11719_v9  ;;  %v11982_v48 = vrot.slane %v20491_v7, 1  ;;  %v16764_v7 = vld [vmem:[%s21563_s6 + $0x1d0] sm:$0xff]   ;;  %v16771_v4 = vld [vmem:[%s21563_s6 + $0x80] sm:$0xff]  }
 0x60c   : > { %16297 = vmatprep.subr.bf16.mxu0 %v16753_v22  ;;  %v11725_v30 = vshll.u32 %v20537_v6, 16  ;;  %v11729_v46 = vshrl.u32 %v20537_v6, 16  ;;  %v11735_v47 = vrot.slane %v11733_v39, 1  ;;  %v20643_v9 = vld [vmem:[#allocation3 + $0x48] sm:$0xff]  }
 0x60d   : > { %v11983_v28 = vsel %vm6692_vm10, %v11980_v49, %v11982_v48 }
 0x60e   : > { %v11727_v40 = vrot.slane %v11725_v30, 1  ;;  %v11990_v30 = vrot.slane %v20525_v34, 1 }
 0x60f   : > { %16298 = vmatpush3.bf16.msra.mxu0 %v16753_v22  ;;  %v20572_v22 = vld [vmem:[#allocation3 + $0x30] sm:$0xff]  }
 0x610   : > { %16072 = vmatmul.mubr.bf16.vlgmr.msra.gmra.mxu1 %v20553_v10  ;;  %16299 = vmatprep.subr.bf16.mxu0 %v16756_v14  ;;  %v20589_v8 = vsel %vm5882_vm9, %v11723_v12, %v11727_v40  ;;  %v12969_v44 = vrot.slane %v20572_v22, 1  ;;  %v11731_v51 = vor.u32 %v11729_v46, %v11727_v40  ;;  %v12975_v12 = vrot.slane %v20643_v9, 1 }
 0x611   : > { %16096 = vmatpush3.bf16.msra.mxu1 %v20410_v60  ;;  %16075 = vmatprep.mubr.bf16.mxu1 %v20299_v53  ;;  %v20574_v60 = vld [vmem:[#allocation3 + $0x38] sm:$0xff]   ;;  %v20577_v53 = vsel %vm5882_vm9, %v11707_v43, %v11711_v56  ;;  %v20637_v56 = vld [vmem:[#allocation3 + $0x14] sm:$0xf]  ;;  %v11991_v34 = vsel %vm6692_vm10, %v11988_v54, %v11990_v30  ;;  %v11994_v46 = vrot.slane %v20582_v18, 1 }
 0x612   : > { %16236 = vmatmul.mubr.bf16.gmra.mxu0 %v11979_v36  ;;  %16097 = vmatprep.subr.bf16.mxu1 %v16748_v1  ;;  %v20620_v49 = vsel %vm5882_vm9, %v11731_v51, %v11735_v47  ;;  %v14523_v55 = vcombine.low %v12523_v23, %v20637_v56  ;;  %v10959_v51 = vld [vmem:[#allocation3] sm:$0xe]  ;;  %v10981_v23 = vrot.slane %v20553_v10, 1 }
 0x613   : > { %16239 = vmatprep.mubr.bf16.mxu0 %v11981_v62  ;;  %16300 = vmatpush3.bf16.msra.mxu0 %v16756_v14  ;;  %v12971_v14 = vrot.slane %v20574_v60, 1  ;;  %v11992_v62 = vrot.slane %v20537_v6, 1 }
 0x614   : > { %16301 = vmatprep.subr.bf16.mxu0 %v16759_v33  ;;  %v12631_v40 = vshll.u32 %v14523_v55, 16  ;;  %v12629_v39 = vshrl.u32 %v14523_v55, 16 }
 0x615   : > { %16098 = vmatpush3.bf16.msra.mxu1 %v16748_v1  ;;  %v20606_v0 = vsel %vm6692_vm10, %v12969_v44, %v12971_v14  ;;  %v20614_v1 = vld [vmem:[#allocation3 + $0x40] sm:$0xff]   ;;  %v11993_v6 = vsel %vm6692_vm10, %v11990_v30, %v11992_v62  ;;  %v11995_v18 = vsel %vm6692_vm10, %v11992_v62, %v11994_v46  ;;  %v12668_v46 = vshll.u32 %v20574_v60, 16 }
 0x616   : > { %16099 = vmatprep.subr.bf16.mxu1 %v16749_v27  ;;  %v12973_v36 = vrot.slane %v20614_v1, 1 }
 0x617   : > { %16302 = vmatpush3.bf16.msra.mxu0 %v16759_v33  ;;  %v16770_v33 = vld [vmem:[%s21563_s6 + $0x1c0] sm:$0xff]  }
 0x618   : > { %16076 = vmatmul.mubr.bf16.gmra.mxu1 %v20323_v16  ;;  %16303 = vmatprep.subr.bf16.mxu0 %v16761_v61  ;;  %v11985_v16 = vsel %vm6692_vm10, %v11982_v48, %v11984_v31  ;;  %v20633_v43 = vsel %vm6692_vm10, %v12971_v14, %v12973_v36  ;;  %v20665_v31 = vld [vmem:[%s21563_s6 + $0x138] sm:$0xff]   ;;  %v12633_v14 = vrot.slane %v12631_v40, 1 }
 0x619   : > { %16079 = vmatprep.mubr.bf16.mxu1 %v20351_v45  ;;  %16100 = vmatpush3.bf16.msra.mxu1 %v16749_v27  ;;  %v16767_v45 = vld [vmem:[%s21563_s6 + $0x1c8] sm:$0xff]   ;;  %v20648_v27 = vld [vmem:[#allocation3 + $0x18] sm:$0xff]  }
 0x61a   : > { %16240 = vmatmul.mubr.bf16.gmra.mxu0 %v11983_v28  ;;  %16101 = vmatprep.subr.bf16.mxu1 %v16754_v20  ;;  %v12636_v48 = vshll.u32 %v20648_v27, 16  ;;  %v12634_v47 = vor.u32 %v12633_v14, %v12629_v39  ;;  %v20700_v39 = vld [vmem:[#allocation3 + $0x60] sm:$0xff]  }
 0x61b   : > { %16243 = vmatprep.mubr.bf16.mxu0 %v11985_v16  ;;  %16304 = vmatpush3.bf16.msra.mxu0 %v16761_v61  ;;  %v20656_v61 = vsel %vm6692_vm10, %v12973_v36, %v12975_v12  ;;  %v20672_v16 = vld [vmem:[#allocation3 + $0x28] sm:$0xff]  }
 0x61c   : > { %16305 = vmatprep.subr.bf16.mxu0 %v16764_v7  ;;  %v12638_v28 = vrot.slane %v12636_v48, 1 }
 0x61d   : > { %16102 = vmatpush3.bf16.msra.mxu1 %v16754_v20  ;;  %v20667_v20 = vld [vmem:[#allocation3 + $0x50] sm:$0xff]  }
 0x61e   : > { %16103 = vmatprep.subr.bf16.mxu1 %v16758_v17  ;;  %v12639_v54 = vsel %vm5882_vm9, %v12634_v47, %v12638_v28 }
 0x61f   : > { %16306 = vmatpush3.bf16.msra.mxu0 %v16764_v7  ;;  %v20669_v7 = vld [vmem:[#allocation3 + $0x20] sm:$0xff]  }
 0x620   : > { %16080 = vmatmul.mubr.bf16.gmra.mxu1 %v20378_v25  ;;  %16307 = vmatprep.subr.bf16.mxu0 %v16767_v45  ;;  %v16765_v25 = vld [vmem:[%s21563_s6 + $0x88] sm:$0xff]   ;;  %v12648_v30 = vshrl.u32 %v20669_v7, 16 }
 0x621   : > { %16083 = vmatprep.mubr.bf16.mxu1 %v20405_v58  ;;  %16104 = vmatpush3.bf16.msra.mxu1 %v16758_v17  ;;  %v12977_v17 = vrot.slane %v20667_v20, 1 }
 0x622   : > { %16244 = vmatmul.mubr.bf16.gmra.mxu0 %v11987_v26  ;;  %16105 = vmatprep.subr.bf16.mxu1 %v16763_v32  ;;  %v20685_v26 = vld [vmem:[#allocation3 + $0x58] sm:$0xff]  }
 0x623   : > { %16247 = vmatprep.mubr.bf16.mxu0 %v11989_v42  ;;  %16308 = vmatpush3.bf16.msra.mxu0 %v16767_v45  ;;  %v12644_v45 = vshll.u32 %v20669_v7, 16  ;;  %v20679_v57 = vsel %vm6692_vm10, %v12975_v12, %v12977_v17  ;;  %v12979_v62 = vrot.slane %v20685_v26, 1 }
 0x624   : > { %16309 = vmatprep.subr.bf16.mxu0 %v16770_v33 }
 0x625   : > { %16106 = vmatpush3.bf16.msra.mxu1 %v16763_v32  ;;  %v16851_v32 = vld [vmem:[#allocation3 + $0x4] sm:$0xf]  ;;  %v12646_v42 = vrot.slane %v12644_v45, 1  ;;  %v20695_v48 = vsel %vm6692_vm10, %v12977_v17, %v12979_v62  ;;  %v12664_v17 = vshrl.u32 %v20572_v22, 16 }
 0x626   : > { %16107 = vmatprep.subr.bf16.mxu1 %v16765_v25  ;;  %v14364_v36 = vcombine.low %v10959_v51, %v16851_v32  ;;  %v16853_v51 = vld [vmem:[#allocation3 + $0x18] sm:$0xff]   ;;  %v16778_v32 = vld [vmem:[%s21563_s6 + $0x130] sm:$0xff]  }
 0x627   : > { %16310 = vmatpush3.bf16.msra.mxu0 %v16770_v33  ;;  %v12652_v33 = vshll.u32 %v20672_v16, 16  ;;  %v10985_v47 = vrot.slane %v16853_v51, 1 }
 0x628   : > { %16084 = vmatmul.mubr.bf16.gmra.mxu1 %v20426_v29  ;;  %v10980_v55 = vrot.slane %v14364_v36, 1  ;;  %v12981_v36 = vrot.slane %v20700_v39, 1 }
 0x629   : > { %16087 = vmatprep.mubr.bf16.mxu1 %v20437_v38  ;;  %16108 = vmatpush3.bf16.msra.mxu1 %v16765_v25  ;;  %v12640_v25 = vshrl.u32 %v20648_v27, 16 }
 0x62a   : > { %16248 = vmatmul.mubr.bf16.gmra.mxu0 %v11991_v34  ;;  %16109 = vmatprep.subr.bf16.mxu1 %v16771_v4  ;;  %v10982_v40 = vsel %vm6692_vm10, %v10980_v55, %v10981_v23  ;;  %v12650_v34 = vor.u32 %v12648_v30, %v12646_v42  ;;  %v12676_v30 = vshll.u32 %v20614_v1, 16 }
 0x62b   : > { %16251 = vmatprep.mubr.bf16.mxu0 %v11993_v6  ;;  %v12642_v12 = vor.u32 %v12640_v25, %v12638_v28  ;;  %v12660_v6 = vshll.u32 %v20572_v22, 16 }
 0x62d   : > { %16110 = vmatpush3.bf16.msra.mxu1 %v16771_v4  ;;  %v12654_v4 = vrot.slane %v12652_v33, 1  ;;  %v12647_v10 = vsel %vm5882_vm9, %v12642_v12, %v12646_v42  ;;  %v12662_v45 = vrot.slane %v12660_v6, 1  ;;  %v20712_v12 = vsel %vm6692_vm10, %v12979_v62, %v12981_v36  ;;  %v20721_v6 = vld [vmem:[#allocation3 + $0x68] sm:$0xff]   ;;  %v16854_v62 = vld [vmem:[#allocation3 + $0x20] sm:$0xff]  }
 0x62e   : > { %16175 = vmatprep.subr.bf16.mxu1 %v20665_v31 }
 0x62f   : > { %v12655_v14 = vsel %vm5882_vm9, %v12650_v34, %v12654_v4  ;;  %v12666_v55 = vor.u32 %v12664_v17, %v12662_v45 }
 0x630   : > { %16088 = vmatmul.mubr.bf16.gmra.mxu1 %v20448_v41 }
 0x631   : > { %16091 = vmatprep.mubr.bf16.mxu1 %v20456_v11 }
 0x632   : > { %16252 = vmatmul.mubr.bf16.gmra.mxu0 %v11995_v18  ;;  %v12656_v18 = vshrl.u32 %v20672_v16, 16 }
 0x633   : > { %16311 = vmatprep.mubr.bf16.mxu0 %v12639_v54  ;;  %v12670_v54 = vrot.slane %v12668_v46, 1  ;;  %v12678_v46 = vrot.slane %v12676_v30, 1  ;;  %v10991_v30 = vrot.slane %v20405_v58, 1 }
 0x634   : > { %v12658_v42 = vor.u32 %v12656_v18, %v12654_v4  ;;  %v12684_v4 = vshll.u32 %v20643_v9, 16  ;;  %v21575_v18 = vrot.slane %v20721_v6, 1 }
 0x635   : > { %v12671_v34 = vsel %vm5882_vm9, %v12666_v55, %v12670_v54 }
 0x636   : > { %v12686_v51 = vrot.slane %v12684_v4, 1 }
 0x638   : > { %16092 = vmatmul.mubr.bf16.gmra.mxu1 %v20465_v21  ;;  %v16852_v21 = vld [vmem:[#allocation3 + $0x10] sm:$0xff]  }
 0x639   : > { %16111 = vmatprep.mubr.bf16.mxu1 %v10982_v40  ;;  %v10983_v28 = vrot.slane %v16852_v21, 1  ;;  %v12663_v40 = vsel %vm5882_vm9, %v12658_v42, %v12662_v45  ;;  %v12672_v21 = vshrl.u32 %v20574_v60, 16  ;;  %v16782_v45 = vld [vmem:[%s21563_s6 + $0x120] sm:$0xff]   ;;  %v20735_v60 = vsel %vm6692_vm10, %v12981_v36, %v21575_v18 }
 0x63a   : > { %16312 = vmatmul.mubr.bf16.vlgmr.msra.gmra.mxu0 %v12647_v10  ;;  %v10987_v10 = vrot.slane %v16854_v62, 1  ;;  %v10993_v36 = vrot.slane %v20426_v29, 1  ;;  %v16788_v62 = vld [vmem:[%s21563_s6 + $0x110] sm:$0xff]   ;;  %v12708_v29 = vshll.u32 %v20700_v39, 16 }
 0x63b   : > { %16315 = vmatprep.mubr.bf16.mxu0 %v12655_v14  ;;  %v10984_v33 = vsel %vm6692_vm10, %v10981_v23, %v10983_v28  ;;  %v10986_v25 = vsel %vm6692_vm10, %v10983_v28, %v10985_v47  ;;  %v16779_v23 = vld [vmem:[%s21563_s6 + $0x128] sm:$0xff]   ;;  %v16855_v14 = vld [vmem:[#allocation3 + $0x28] sm:$0xff]   ;;  %v12680_v28 = vshrl.u32 %v20614_v1, 16 }
 0x63c   : > { %v10988_v17 = vsel %vm6692_vm10, %v10985_v47, %v10987_v10  ;;  %v12700_v47 = vshll.u32 %v20685_v26, 16  ;;  %v10994_v58 = vsel %vm6692_vm10, %v10991_v30, %v10993_v36 }
 0x63e   : > { %v12702_v4 = vrot.slane %v12700_v47, 1  ;;  %v20767_v47 = vld [vmem:[#allocation3 + $0x70] ss:$0 sps:$4 sm:$0x11]  }
 0x640   : > { %16112 = vmatmul.mubr.bf16.vlgmr.msra.gmra.mxu1 %v10984_v33  ;;  %v12674_v33 = vor.u32 %v12672_v21, %v12670_v54  ;;  %v16785_v54 = vld [vmem:[%s21563_s6 + $0x118] sm:$0xff]   ;;  %v12716_v21 = vshll.u32 %v20721_v6, 16 }
 0x641   : > { %16176 = vmatpush3.bf16.msra.mxu1 %v20665_v31  ;;  %16115 = vmatprep.mubr.bf16.mxu1 %v10986_v25  ;;  %v10989_v31 = vrot.slane %v16855_v14, 1  ;;  %v12682_v25 = vor.u32 %v12680_v28, %v12678_v46  ;;  %v10995_v28 = vrot.slane %v20437_v38, 1 }
 0x642   : > { %16316 = vmatmul.mubr.bf16.gmra.mxu0 %v12663_v40  ;;  %16177 = vmatprep.subr.bf16.mxu1 %v16778_v32  ;;  %v12679_v1 = vsel %vm5882_vm9, %v12674_v33, %v12678_v46  ;;  %v12712_v33 = vshrl.u32 %v20700_v39, 16  ;;  %v12724_v39 = vshll.u32 %v20767_v47, 16 }
 0x643   : > { %16319 = vmatprep.mubr.bf16.mxu0 %v12671_v34  ;;  %v10990_v42 = vsel %vm6692_vm10, %v10987_v10, %v10989_v31  ;;  %v12687_v55 = vsel %vm5882_vm9, %v12682_v25, %v12686_v51  ;;  %v12688_v34 = vshrl.u32 %v20643_v9, 16  ;;  %v10992_v10 = vsel %vm6692_vm10, %v10989_v31, %v10991_v30  ;;  %v16789_v31 = vld [vmem:[%s21563_s6 + $0x108] sm:$0xff]   ;;  %v16791_v25 = vld [vmem:[%s21563_s6 + $0x100] sm:$0xff]  }
 0x645   : > { %16178 = vmatpush3.bf16.msra.mxu1 %v16778_v32  ;;  %v12692_v32 = vshll.u32 %v20667_v20, 16  ;;  %v12690_v14 = vor.u32 %v12688_v34, %v12686_v51  ;;  %v10997_v51 = vrot.slane %v20448_v41, 1 }
 0x646   : > { %16179 = vmatprep.subr.bf16.mxu1 %v16779_v23 }
 0x647   : > { %v12694_v40 = vrot.slane %v12692_v32, 1  ;;  %v11532_v32 = vld [vmem:[#allocation3 + $0x8] sm:$0xf]  ;;  %v10998_v38 = vsel %vm6692_vm10, %v10995_v28, %v10997_v51 }
 0x648   : > { %16116 = vmatmul.mubr.bf16.gmra.mxu1 %v10988_v17  ;;  %v12704_v17 = vshrl.u32 %v20685_v26, 16 }
 0x649   : > { %16119 = vmatprep.mubr.bf16.mxu1 %v10990_v42  ;;  %16180 = vmatpush3.bf16.msra.mxu1 %v16779_v23  ;;  %v12696_v23 = vshrl.u32 %v20667_v20, 16  ;;  %v12695_v9 = vsel %vm5882_vm9, %v12690_v14, %v12694_v40  ;;  %v12718_v42 = vrot.slane %v12716_v21, 1  ;;  %v11657_v21 = vshrl.u32 %v20481_v35, 16 }
 0x64a   : > { %16320 = vmatmul.mubr.bf16.gmra.mxu0 %v12679_v1  ;;  %16181 = vmatprep.subr.bf16.mxu1 %v16782_v45  ;;  %v10996_v1 = vsel %vm6692_vm10, %v10993_v36, %v10995_v28  ;;  %v16792_v36 = vld [vmem:[%s21563_s6 + $0x1b8] sm:$0xff]   ;;  %v16793_v28 = vld [vmem:[%s21563_s6 + $0x1b0] sm:$0xff]  }
 0x64b   : > { %16323 = vmatprep.mubr.bf16.mxu0 %v12687_v55  ;;  %v12698_v46 = vor.u32 %v12696_v23, %v12694_v40  ;;  %v12706_v55 = vor.u32 %v12704_v17, %v12702_v4  ;;  %v12720_v40 = vshrl.u32 %v20721_v6, 16  ;;  %v12726_v23 = vrot.slane %v12724_v39, 1  ;;  %v16805_v39 = vld [vmem:[#allocation3 + $0x28] sm:$0xff]  }
 0x64d   : > { %16182 = vmatpush3.bf16.msra.mxu1 %v16782_v45  ;;  %v12703_v20 = vsel %vm5882_vm9, %v12698_v46, %v12702_v4  ;;  %v12710_v45 = vrot.slane %v12708_v29, 1  ;;  %v12722_v34 = vor.u32 %v12720_v40, %v12718_v42  ;;  %v16811_v40 = vld [vmem:[%s21563_s6 + $0x218] sm:$0xff]  }
 0x64e   : > { %16183 = vmatprep.subr.bf16.mxu1 %v16785_v54 }
 0x64f   : > { %v12714_v41 = vor.u32 %v12712_v33, %v12710_v45  ;;  %v12711_v26 = vsel %vm5882_vm9, %v12706_v55, %v12710_v45  ;;  %v16797_v45 = vld [vmem:[%s21563_s6 + $0x190] sm:$0xff]   ;;  %v16799_v33 = vld [vmem:[%s21563_s6 + $0x180] sm:$0xff]  }
 0x650   : > { %16120 = vmatmul.mubr.bf16.gmra.mxu1 %v10992_v10  ;;  %v12727_v10 = vsel %vm5882_vm9, %v12722_v34, %v12726_v23  ;;  %v16808_v23 = vld [vmem:[#allocation3 + $0x38] sm:$0xff]  }
 0x651   : > { %16123 = vmatprep.mubr.bf16.mxu1 %v10994_v58  ;;  %16184 = vmatpush3.bf16.msra.mxu1 %v16785_v54  ;;  %v14425_v54 = vcombine.low %v11532_v32, %v20462_v59  ;;  %v12719_v30 = vsel %vm5882_vm9, %v12714_v41, %v12718_v42  ;;  %v11000_v59 = vsel %vm6692_vm10, %v10997_v51, %v10999_v37  ;;  %v16804_v41 = vld [vmem:[%s21563_s6 + $0x230] sm:$0xff]  }
 0x652   : > { %16324 = vmatmul.mubr.bf16.gmra.mxu0 %v12695_v9  ;;  %16185 = vmatprep.subr.bf16.mxu1 %v16788_v62  ;;  %v11653_v9 = vshll.u32 %v20481_v35, 16  ;;  %v16795_v35 = vld [vmem:[%s21563_s6 + $0x1a0] sm:$0xff]  }
 0x653   : > { %16327 = vmatprep.mubr.bf16.mxu0 %v12703_v20  ;;  %v11640_v4 = vshll.u32 %v14425_v54, 16  ;;  %v11638_v58 = vshrl.u32 %v14425_v54, 16  ;;  %v11649_v20 = vshrl.u32 %v20467_v2, 16  ;;  %v16810_v54 = vld [vmem:[%s21563_s6 + $0x220] sm:$0xff]  }
 0x654   : > { %v11655_v37 = vrot.slane %v11653_v9, 1  ;;  %v16819_v9 = vld [vmem:[%s21563_s6 + $0x200] sm:$0xff]  }
 0x655   : > { %16186 = vmatpush3.bf16.msra.mxu1 %v16788_v62  ;;  %v11645_v62 = vshll.u32 %v20467_v2, 16  ;;  %v11642_v14 = vrot.slane %v11640_v4, 1  ;;  %v16794_v2 = vld [vmem:[%s21563_s6 + $0x1a8] sm:$0xff]   ;;  %v16814_v4 = vld [vmem:[%s21563_s6 + $0x210] sm:$0xff]  }
 0x656   : > { %16187 = vmatprep.subr.bf16.mxu1 %v16789_v31 }
 0x657   : > { %v11647_v46 = vrot.slane %v11645_v62, 1  ;;  %v11643_v29 = vor.u32 %v11642_v14, %v11638_v58  ;;  %v16817_v14 = vld [vmem:[%s21563_s6 + $0x208] sm:$0xff]  }
 0x658   : > { %16124 = vmatmul.mubr.bf16.gmra.mxu1 %v10996_v1 }
 0x659   : > { %16127 = vmatprep.mubr.bf16.mxu1 %v10998_v38  ;;  %16188 = vmatpush3.bf16.msra.mxu1 %v16789_v31  ;;  %v11648_v11 = vsel %vm5882_vm9, %v11643_v29, %v11647_v46  ;;  %v11659_v31 = vor.u32 %v11657_v21, %v11655_v37  ;;  %v16802_v38 = vld [vmem:[#allocation3 + $0x18] sm:$0xff]   ;;  %v16812_v29 = vld [vmem:[#allocation3 + $0x48] sm:$0xff]  }
 0x65a   : > { %16328 = vmatmul.mubr.bf16.gmra.mxu0 %v12711_v26  ;;  %16189 = vmatprep.subr.bf16.mxu1 %v16791_v25 }
 0x65b   : > { %16331 = vmatprep.mubr.bf16.mxu0 %v12719_v30  ;;  %v16806_v30 = vld [vmem:[#allocation3 + $0x30] sm:$0xff]  }
 0x65d   : > { %16190 = vmatpush3.bf16.msra.mxu1 %v16791_v25 }
 0x65e   : > { %16255 = vmatprep.subr.bf16.mxu1 %v16792_v36 }
 0x660   : > { %16128 = vmatmul.mubr.bf16.gmra.mxu1 %v11000_v59  ;;  %v16809_v59 = vld [vmem:[#allocation3 + $0x40] sm:$0xff]  }
 0x661   : > { %16131 = vmatprep.mubr.bf16.mxu1 %v20478_v5  ;;  %v11651_v5 = vor.u32 %v11649_v20, %v11647_v46 }
 0x662   : > { %16332 = vmatmul.mubr.bf16.gmra.mxu0 %v12727_v10 }
 0x663   : > { %v11656_v51 = vsel %vm5882_vm9, %v11651_v5, %v11655_v37 }
 0x668   : > { %16132 = vmatmul.mubr.bf16.gmra.mxu1 %v20499_v13  ;;  %v11664_v13 = vsel %vm5882_vm9, %v11659_v31, %v20501_v15  ;;  %v16796_v15 = vld [vmem:[%s21563_s6 + $0x198] sm:$0xff]  }
 0x669   : > { %16191 = vmatprep.mubr.bf16.mxu1 %v11648_v11  ;;  %v16813_v11 = vld [vmem:[#allocation3 + $0x50] sm:$0xff]  }
 0x670   : > { %16192 = vmatmul.mubr.bf16.vlgmr.msra.gmra.mxu1 %v11656_v51  ;;  %v16815_v51 = vld [vmem:[#allocation3 + $0x58] sm:$0xff]  }
 0x671   : > { %16256 = vmatpush3.bf16.msra.mxu1 %v16792_v36  ;;  %16195 = vmatprep.mubr.bf16.mxu1 %v11664_v13  ;;  %v16816_v13 = vld [vmem:[#allocation3 + $0x60] sm:$0xff]  }
 0x672   : > { %16257 = vmatprep.subr.bf16.mxu1 %v16793_v28  ;;  %v20866_v62 = vpop.f32.mrf.mxu0 }
 0x674   : > { %v20873_v58 = vpop.f32.mrf.mxu0 }
 0x675   : > { %16258 = vmatpush3.bf16.msra.mxu1 %v16793_v28 }
 0x676   : > { %16259 = vmatprep.subr.bf16.mxu1 %v16794_v2  ;;  %v20880_v37 = vpop.f32.mrf.mxu0 }
 0x678   : > { %16196 = vmatmul.mubr.bf16.gmra.mxu1 %v20522_v24  ;;  %v20811_v24 = vpop.f32.mrf.mxu1  ;;  %v20886_v5 = vpop.f32.mrf.mxu0 }
 0x679   : > { %16199 = vmatprep.mubr.bf16.mxu1 %v20528_v52  ;;  %16260 = vmatpush3.bf16.msra.mxu1 %v16794_v2  ;;  %v16798_v52 = vld [vmem:[%s21563_s6 + $0x188] sm:$0xff]   ;;  %v12941_v2 = vld [vmem:[#allocation3 + $0x10] sm:$0xe] }
 0x67a   : > { %16261 = vmatprep.subr.bf16.mxu1 %v16795_v35  ;;  %v20816_v17 = vpop.f32.mrf.mxu1 }
 0x67d   : > { %16262 = vmatpush3.bf16.msra.mxu1 %v16795_v35 }
 0x67e   : > { %16263 = vmatprep.subr.bf16.mxu1 %v16796_v15 }
 0x680   : > { %16200 = vmatmul.mubr.bf16.gmra.mxu1 %v20540_v3  ;;  %v20823_v3 = vpop.f32.mrf.mxu1 }
 0x681   : > { %16203 = vmatprep.mubr.bf16.mxu1 %v20550_v50  ;;  %16264 = vmatpush3.bf16.msra.mxu1 %v16796_v15  ;;  %v16801_v50 = vld [vmem:[%s21563_s6 + $0x238] sm:$0xff]  }
 0x682   : > { %16265 = vmatprep.subr.bf16.mxu1 %v16797_v45  ;;  %v20828_v42 = vpop.f32.mrf.mxu1  ;;  %v20888_v31 = vpop.f32.mrf.mxu0 }
 0x684   : > { %v20892_v35 = vpop.f32.mrf.mxu0 }
 0x685   : > { %16266 = vmatpush3.bf16.msra.mxu1 %v16797_v45  ;;  %v14560_v45 = vcombine.low %v12941_v2, %v20637_v56  ;;  %v12965_v56 = vrot.slane %v20669_v7, 1 }
 0x686   : > { %16267 = vmatprep.subr.bf16.mxu1 %v16798_v52 }
 0x688   : > { %16204 = vmatmul.mubr.bf16.gmra.mxu1 %v20564_v63  ;;  %v20830_v25 = vpop.f32.mrf.mxu1 }
 0x689   : > { %16207 = vmatprep.mubr.bf16.mxu1 %v20577_v53  ;;  %16268 = vmatpush3.bf16.msra.mxu1 %v16798_v52  ;;  %v16800_v53 = vld [vmem:[#allocation3 + $0x10] sm:$0xff]   ;;  %v12963_v52 = vrot.slane %v20648_v27, 1 }
 0x68a   : > { %16269 = vmatprep.subr.bf16.mxu1 %v16799_v33  ;;  %v20834_v63 = vpop.f32.mrf.mxu1 }
 0x68c   : > { %v20836_v32 = vpop.f32.mrf.mxu1 }
 0x68d   : > { %16270 = vmatpush3.bf16.msra.mxu1 %v16799_v33  ;;  %v20898_v33 = vpop.f32.mrf.mxu0 }
 0x68e   : > { %16335 = vmatprep.subr.bf16.mxu1 %v16801_v50  ;;  %v20839_v1 = vpop.f32.mrf.mxu1 }
 0x690   : > { %16208 = vmatmul.mubr.bf16.gmra.mxu1 %v20585_v19  ;;  %v16803_v19 = vld [vmem:[#allocation3 + $0x20] sm:$0xff]  }
 0x691   : > { %16211 = vmatprep.mubr.bf16.mxu1 %v20589_v8 }
 0x698   : > { %16212 = vmatmul.mubr.bf16.gmra.mxu1 %v20620_v49  ;;  %v20841_v55 = vpop.f32.mrf.mxu1  ;;  %v16807_v49 = vld [vmem:[%s21563_s6 + $0x228] sm:$0xff]  }
 0x699   : > { %16271 = vmatprep.mubr.bf16.mxu1 %v16800_v53  ;;  %v16818_v53 = vld [vmem:[#allocation3 + $0x68] sm:$0xff]  }
 0x69a   : > { %v20846_v8 = vpop.f32.mrf.mxu1 }
 0x69c   : > { %v20851_v26 = vpop.f32.mrf.mxu1 }
 0x69e   : > { %v20856_v36 = vpop.f32.mrf.mxu1 }
 0x6a0   : > { %16272 = vmatmul.mubr.bf16.vlgmr.msra.gmra.mxu1 %v16802_v38  ;;  %v12962_v38 = vrot.slane %v14560_v45, 1 }
 0x6a1   : > { %16336 = vmatpush3.bf16.msra.mxu1 %v16801_v50  ;;  %16275 = vmatprep.mubr.bf16.mxu1 %v16803_v19 }
 0x6a2   : > { %16337 = vmatprep.subr.bf16.mxu1 %v16804_v41  ;;  %v12964_v19 = vsel %vm6692_vm10, %v12962_v38, %v12963_v52 }
 0x6a5   : > { %16338 = vmatpush3.bf16.msra.mxu1 %v16804_v41 }
 0x6a6   : > { %16339 = vmatprep.subr.bf16.mxu1 %v16807_v49 }
 0x6a8   : > { %16276 = vmatmul.mubr.bf16.gmra.mxu1 %v16805_v39  ;;  %v20861_v34 = vpop.f32.mrf.mxu1 }
 0x6a9   : > { %16279 = vmatprep.mubr.bf16.mxu1 %v16806_v30  ;;  %16340 = vmatpush3.bf16.msra.mxu1 %v16807_v49  ;;  %v20905_v49 = vpop.f32.mrf.mxu0  ;;  %v12967_v30 = vrot.slane %v20672_v16, 1 }
 0x6aa   : > { %16341 = vmatprep.subr.bf16.mxu1 %v16810_v54  ;;  %v20868_v10 = vpop.f32.mrf.mxu1 }
 0x6ab   : > { %v12970_v16 = vsel %vm6692_vm10, %v12967_v30, %v12969_v44 }
 0x6ac   : > { %v20875_v46 = vpop.f32.mrf.mxu1 }
 0x6ad   : > { %16342 = vmatpush3.bf16.msra.mxu1 %v16810_v54  ;;  %v20910_v54 = vpop.f32.mrf.mxu0 }
 0x6ae   : > { %16343 = vmatprep.subr.bf16.mxu1 %v16811_v40  ;;  %v20882_v20 = vpop.f32.mrf.mxu1 }
 0x6b0   : > { %16280 = vmatmul.mubr.bf16.gmra.mxu1 %v16808_v23  ;;  %v12966_v23 = vsel %vm6692_vm10, %v12963_v52, %v12965_v56 }
 0x6b1   : > { %16283 = vmatprep.mubr.bf16.mxu1 %v16809_v59  ;;  %16344 = vmatpush3.bf16.msra.mxu1 %v16811_v40 }
 0x6b2   : > { %16345 = vmatprep.subr.bf16.mxu1 %v16814_v4 }
 0x6b5   : > { %16346 = vmatpush3.bf16.msra.mxu1 %v16814_v4  ;;  %v20918_v4 = vpop.f32.mrf.mxu0 }
 0x6b6   : > { %16347 = vmatprep.subr.bf16.mxu1 %v16817_v14 }
 0x6b7   : > { %v20925_v7 = vpop.f32.mrf.mxu0 }
 0x6b8   : > { %16284 = vmatmul.mubr.bf16.gmra.mxu1 %v16812_v29  ;;  %v20884_v21 = vpop.f32.mrf.mxu1 }
 0x6b9   : > { %16287 = vmatprep.mubr.bf16.mxu1 %v16813_v11  ;;  %16348 = vmatpush3.bf16.msra.mxu1 %v16817_v14  ;;  %v12968_v14 = vsel %vm6692_vm10, %v12965_v56, %v12967_v30 }
 0x6ba   : > { %16349 = vmatprep.subr.bf16.mxu1 %v16819_v9  ;;  %v20890_v28 = vpop.f32.mrf.mxu1 }
 0x6bc   : > { %v20894_v15 = vpop.f32.mrf.mxu1 }
 0x6bd   : > { %16350 = vmatpush3.bf16.msra.mxu1 %v16819_v9 }
 0x6be   : > { %v20900_v50 = vpop.f32.mrf.mxu1 }
 0x6c0   : > { %16288 = vmatmul.mubr.bf16.gmra.mxu1 %v16815_v51  ;;  %v20934_v51 = vpop.f32.mrf.mxu0 }
 0x6c1   : > { %16291 = vmatprep.mubr.bf16.mxu1 %v16816_v13 }
 0x6c2   : > { %v20939_v2 = vpop.f32.mrf.mxu0 }
 0x6c8   : > { %v20902_v41 = vpop.f32.mrf.mxu1  ;;  %16292 = vmatmul.mubr.bf16.gmra.mxu1 %v16818_v53  ;;  %v20945_v53 = vpop.f32.mrf.mxu0 }
 0x6c9   : > { %16351 = vmatprep.mubr.bf16.mxu1 %v12964_v19 }
 0x6ca   : > { %v20907_v39 = vpop.f32.mrf.mxu1  ;;  %v20953_v44 = vpop.f32.mrf.mxu0 }
 0x6cb   : > { %21765 = vst [vmem:[#allocation32_spill] sm:$0xff] %v20953_v44 }
 0x6cc   : > { %v20912_v27 = vpop.f32.mrf.mxu1  ;;  %v20959_v56 = vpop.f32.mrf.mxu0 }
 0x6cd   : > { %21766 = vst [vmem:[#allocation19_spill] sm:$0xff] %v20959_v56 }
 0x6ce   : > { %v20915_v40 = vpop.f32.mrf.mxu1 }
 0x6d0   : > { %v20920_v59 = vpop.f32.mrf.mxu1  ;;  %16352 = vmatmul.mubr.bf16.vlgmr.msra.gmra.mxu1 %v12966_v23 }
 0x6d1   : > { %16355 = vmatprep.mubr.bf16.mxu1 %v12968_v14  ;;  %v20964_v14 = vpop.f32.mrf.mxu0 }
 0x6d2   : > { %v20923_v29 = vpop.f32.mrf.mxu1  ;;  %21767 = vst [vmem:[#allocation11_spill] sm:$0xff] %v20964_v14 }
 0x6d3   : > { %v20974_v44 = vpop.f32.mrf.mxu0 }
 0x6d4   : > { %v20927_v9 = vpop.f32.mrf.mxu1 }
 0x6d6   : > { %v20929_v11 = vpop.f32.mrf.mxu1 }
 0x6d8   : > { %v20936_v13 = vpop.f32.mrf.mxu1  ;;  %16356 = vmatmul.mubr.bf16.gmra.mxu1 %v12970_v16 }
 0x6d9   : > { %16359 = vmatprep.mubr.bf16.mxu1 %v20606_v0 }
 0x6da   : > { %v20941_v45 = vpop.f32.mrf.mxu1 }
 0x6dc   : > { %v20943_v52 = vpop.f32.mrf.mxu1 }
 0x6de   : > { %v20947_v38 = vpop.f32.mrf.mxu1 }
 0x6e0   : > { %v20949_v22 = vpop.f32.mrf.mxu1  ;;  %16360 = vmatmul.mubr.bf16.gmra.mxu1 %v20633_v43 }
 0x6e1   : > { %16363 = vmatprep.mubr.bf16.mxu1 %v20656_v61 }
 0x6e2   : > { %v20955_v19 = vpop.f32.mrf.mxu1 }
 0x6e4   : > { %v20957_v0 = vpop.f32.mrf.mxu1 }
 0x6e6   : > { %v10899_v30 = vpop.f32.mrf.mxu1 }
 0x6e7   : > { %v20962_v23 = vadd.f32 %v10899_v30, %v20856_v36 }
 0x6e8   : > { %v16085_v16 = vpop.f32.mrf.mxu1  ;;  %16364 = vmatmul.mubr.bf16.gmra.mxu1 %v20679_v57  ;;  %v20982_v57 = vpop.f32.mrf.mxu0 }
 0x6e9   : > { %v20968_v43 = vadd.f32 %v16085_v16, %v20861_v34  ;;  %16367 = vmatprep.mubr.bf16.mxu1 %v20695_v48 }
 0x6ea   : > { %v10912_v61 = vpop.f32.mrf.mxu1 }
 0x6eb   : > { %v20972_v18 = vadd.f32 %v10912_v61, %v20868_v10 }
 0x6ec   : > { %v16086_v56 = vpop.f32.mrf.mxu1 }
 0x6ed   : > { %v20977_v36 = vadd.f32 %v16086_v56, %v20875_v46  ;;  %v12985_v46 = vrot.slane %v20767_v47, 1  ;;  %v20993_v56 = vpop.f32.mrf.mxu0 }
 0x6ee   : > { %v10915_v30 = vpop.f32.mrf.mxu1  ;;  %21768 = vst [vmem:[#allocation21_spill] sm:$0xff] %v20993_v56 }
 0x6ef   : > { %v20980_v14 = vadd.f32 %v10915_v30, %v20882_v20  ;;  %v20998_v30 = vpop.f32.mrf.mxu0 }
 0x6f0   : > { %v16089_v34 = vpop.f32.mrf.mxu1  ;;  %16368 = vmatmul.mubr.bf16.gmra.mxu1 %v20712_v12  ;;  %21769 = vst [vmem:[#allocation13_spill] sm:$0xff] %v20998_v30 }
 0x6f1   : > { %v20986_v48 = vadd.f32 %v16089_v34, %v20884_v21  ;;  %16371 = vmatprep.mubr.bf16.mxu1 %v20735_v60  ;;  %v21770_v60 = vrot.slane %v20721_v6, 1 }
 0x6f2   : > { %v10928_v10 = vpop.f32.mrf.mxu1 }
 0x6f3   : > { %v20990_v16 = vadd.f32 %v10928_v10, %v20890_v28  ;;  %v12986_v34 = vsel %vm6692_vm10, %v21770_v60, %v12985_v46  ;;  %v21009_v10 = vpop.f32.mrf.mxu0  ;;  %v10873_v46 = vadd.f32 %v20920_v59, %v20811_v24  ;;  %v10865_v60 = vadd.f32 %v20923_v29, %v20816_v17 }
 0x6f4   : > { %v16090_v20 = vpop.f32.mrf.mxu1  ;;  %v10868_v24 = vadd.f32 %v20929_v11, %v20828_v42  ;;  %v10889_v17 = vadd.f32 %v20936_v13, %v20830_v25  ;;  %v10892_v42 = vadd.f32 %v20943_v52, %v20836_v32  ;;  %v10884_v25 = vadd.f32 %v20947_v38, %v20839_v1 }
 0x6f5   : > { %v20996_v61 = vadd.f32 %v16090_v20, %v20894_v15  ;;  %v10897_v32 = vadd.f32 %v20955_v19, %v20846_v8  ;;  %v10908_v1 = vadd.f32 %v20957_v0, %v20851_v26 }
 0x6f6   : > { %v10931_v12 = vpop.f32.mrf.mxu1 }
 0x6f7   : > { %v21001_v21 = vadd.f32 %v10931_v12, %v20900_v50  ;;  %v21017_v50 = vpop.f32.mrf.mxu0 }
 0x6f8   : > { %v16093_v28 = vpop.f32.mrf.mxu1  ;;  %16372 = vmatmul.mubr.bf16.gmra.mxu1 %v12986_v34 }
 0x6f9   : > { %v21007_v47 = vadd.f32 %v16093_v28, %v20902_v41 }
 0x6fa   : > { %v10944_v56 = vpop.f32.mrf.mxu1 }
 0x6fb   : > { %v21012_v15 = vadd.f32 %v10944_v56, %v20907_v39  ;;  %v21028_v39 = vpop.f32.mrf.mxu0 }
 0x6fc   : > { %v16094_v20 = vpop.f32.mrf.mxu1 }
 0x6fd   : > { %v21015_v30 = vadd.f32 %v16094_v20, %v20912_v27  ;;  %v10876_v27 = vadd.f32 %v20927_v9, %v20823_v3  ;;  %v21038_v59 = vpop.f32.mrf.mxu0  ;;  %v10881_v3 = vadd.f32 %v20941_v45, %v20834_v63  ;;  %v10905_v63 = vadd.f32 %v20949_v22, %v20841_v55 }
 0x6fe   : > { %v10947_v6 = vpop.f32.mrf.mxu1 }
 0x6ff   : > { %v21022_v12 = vadd.f32 %v10947_v6, %v20915_v40 }
 0x700   : > { %v16113_v41 = vpop.f32.mrf.mxu1 }
 0x701   : > { %v21026_v34 = vadd.f32 %v16113_v41, %v10873_v46  ;;  %v21048_v41 = vpop.f32.mrf.mxu0 }
 0x702   : > { %v11099_v56 = vpop.f32.mrf.mxu1 }
 0x703   : > { %v21032_v28 = vadd.f32 %v11099_v56, %v10865_v60 }
 0x704   : > { %v16114_v20 = vpop.f32.mrf.mxu1 }
 0x705   : > { %v21036_v40 = vadd.f32 %v16114_v20, %v10876_v27  ;;  %v21058_v27 = vpop.f32.mrf.mxu0 }
 0x706   : > { %v11102_v6 = vpop.f32.mrf.mxu1 }
 0x707   : > { %v21042_v29 = vadd.f32 %v11102_v6, %v10868_v24  ;;  %v21068_v6 = vpop.f32.mrf.mxu0 }
 0x708   : > { %v16117_v46 = vpop.f32.mrf.mxu1 }
 0x709   : > { %v21046_v9 = vadd.f32 %v16117_v46, %v10889_v17  ;;  %v21076_v55 = vpop.f32.mrf.mxu0 }
 0x70a   : > { %v11115_v60 = vpop.f32.mrf.mxu1 }
 0x70b   : > { %v21052_v11 = vadd.f32 %v11115_v60, %v10881_v3 }
 0x70c   : > { %v16118_v56 = vpop.f32.mrf.mxu1 }
 0x70d   : > { %v21056_v13 = vadd.f32 %v16118_v56, %v10892_v42  ;;  %v21084_v42 = vpop.f32.mrf.mxu0 }
 0x70e   : > { %v11118_v20 = vpop.f32.mrf.mxu1 }
 0x70f   : > { %v21062_v45 = vadd.f32 %v11118_v20, %v10884_v25  ;;  %v21092_v20 = vpop.f32.mrf.mxu0 }
 0x710   : > { %v16121_v24 = vpop.f32.mrf.mxu1 }
 0x711   : > { %v21066_v52 = vadd.f32 %v16121_v24, %v10905_v63 }
 0x712   : > { %v11131_v17 = vpop.f32.mrf.mxu1 }
 0x713   : > { %v21072_v38 = vadd.f32 %v11131_v17, %v10897_v32  ;;  %v21100_v32 = vpop.f32.mrf.mxu0 }
 0x714   : > { %v16122_v46 = vpop.f32.mrf.mxu1 }
 0x715   : > { %v21074_v3 = vadd.f32 %v16122_v46, %v10908_v1  ;;  %v21108_v46 = vpop.f32.mrf.mxu0 }
 0x716   : > { %v11134_v22 = vpop.f32.mrf.mxu1 }
 0x717   : > { %v21079_v60 = vadd.f32 %v11134_v22, %v20962_v23 }
 0x718   : > { %v16125_v8 = vpop.f32.mrf.mxu1 }
 0x719   : > { %v21082_v19 = vadd.f32 %v16125_v8, %v20968_v43 }
 0x71a   : > { %v11147_v56 = vpop.f32.mrf.mxu1 }
 0x71b   : > { %v21087_v26 = vadd.f32 %v11147_v56, %v20972_v18  ;;  %v21116_v56 = vpop.f32.mrf.mxu0 }
 0x71c   : > { %v16126_v0 = vpop.f32.mrf.mxu1  ;;  %21771 = vst [vmem:[#allocation22_spill] sm:$0xff] %v21116_v56 }
 0x71d   : > { %v21090_v25 = vadd.f32 %v16126_v0, %v20977_v36 }
 0x71e   : > { %v11150_v63 = vpop.f32.mrf.mxu1 }
 0x71f   : > { %v21095_v23 = vadd.f32 %v11150_v63, %v20980_v14 }
 0x720   : > { %v16129_v24 = vpop.f32.mrf.mxu1 }
 0x721   : > { %v21098_v43 = vadd.f32 %v16129_v24, %v20986_v48  ;;  %v21124_v24 = vpop.f32.mrf.mxu0 }
 0x722   : > { %v11163_v17 = vpop.f32.mrf.mxu1 }
 0x723   : > { %v21103_v18 = vadd.f32 %v11163_v17, %v20990_v16 }
 0x724   : > { %v16130_v1 = vpop.f32.mrf.mxu1 }
 0x725   : > { %v21106_v36 = vadd.f32 %v16130_v1, %v20996_v61 }
 0x726   : > { %v11166_v22 = vpop.f32.mrf.mxu1 }
 0x727   : > { %v21111_v14 = vadd.f32 %v11166_v22, %v21001_v21 }
 0x728   : > { %v16133_v8 = vpop.f32.mrf.mxu1 }
 0x729   : > { %v21114_v48 = vadd.f32 %v16133_v8, %v21007_v47  ;;  %v11510_v47 = vadd.f32 %v20866_v62, %v21026_v34  ;;  %v21135_v8 = vpop.f32.mrf.mxu0  ;;  %v11509_v62 = vadd.f32 %v20886_v5, %v21042_v29  ;;  %v11515_v5 = vadd.f32 %v20898_v33, %v21056_v13 }
 0x72a   : > { %v11179_v0 = vpop.f32.mrf.mxu1  ;;  %v11516_v33 = vadd.f32 %v20918_v4, %v21072_v38  ;;  %v11522_v4 = vadd.f32 %v20939_v2, %v21082_v19 }
 0x72b   : > { %v21119_v16 = vadd.f32 %v11179_v0, %v21012_v15  ;;  %v11508_v15 = vadd.f32 %v20873_v58, %v21032_v28  ;;  %v21145_v34 = vpop.f32.mrf.mxu0  ;;  %v11514_v58 = vadd.f32 %v20888_v31, %v21046_v9  ;;  %v11513_v31 = vadd.f32 %v20905_v49, %v21062_v45 }
 0x72c   : > { %v16134_v63 = vpop.f32.mrf.mxu1  ;;  %v11519_v49 = vadd.f32 %v20925_v7, %v21074_v3 }
 0x72d   : > { %v21122_v61 = vadd.f32 %v16134_v63, %v21015_v30  ;;  %v11511_v63 = vadd.f32 %v20880_v37, %v21036_v40  ;;  %v11512_v37 = vadd.f32 %v20892_v35, %v21052_v11  ;;  %v21155_v40 = vpop.f32.mrf.mxu0  ;;  %v11518_v35 = vadd.f32 %v20910_v54, %v21066_v52 }
 0x72e   : > { %v11182_v17 = vpop.f32.mrf.mxu1  ;;  %v11517_v54 = vadd.f32 %v20934_v51, %v21079_v60 }
 0x72f   : > { %v21127_v21 = vadd.f32 %v11182_v17, %v21022_v12  ;;  %v21165_v9 = vpop.f32.mrf.mxu0 }
 0x730   : > { %v16193_v1 = vpop.f32.mrf.mxu1 }
 0x731   : > { %v21131_v22 = vadd.f32 %v16193_v1, %v11510_v47  ;;  %v21175_v13 = vpop.f32.mrf.mxu0 }
 0x732   : > { %v11831_v0 = vpop.f32.mrf.mxu1 }
 0x733   : > { %v21137_v30 = vadd.f32 %v11831_v0, %v11508_v15  ;;  %v21185_v52 = vpop.f32.mrf.mxu0 }
 0x734   : > { %v16194_v56 = vpop.f32.mrf.mxu1 }
 0x735   : > { %v21141_v12 = vadd.f32 %v16194_v56, %v11511_v63  ;;  %v21193_v7 = vpop.f32.mrf.mxu0 }
 0x736   : > { %v11834_v17 = vpop.f32.mrf.mxu1 }
 0x737   : > { %v21147_v47 = vadd.f32 %v11834_v17, %v11509_v62 }
 0x738   : > { %v16197_v28 = vpop.f32.mrf.mxu1 }
 0x739   : > { %v21151_v1 = vadd.f32 %v16197_v28, %v11514_v58 }
 0x73a   : > { %v11847_v56 = vpop.f32.mrf.mxu1 }
 0x73b   : > { %v21157_v15 = vadd.f32 %v11847_v56, %v11512_v37 }
 0x73c   : > { %v16198_v29 = vpop.f32.mrf.mxu1 }
 0x73d   : > { %v21161_v0 = vadd.f32 %v16198_v29, %v11515_v5 }
 0x73e   : > { %v11850_v63 = vpop.f32.mrf.mxu1 }
 0x73f   : > { %v21167_v62 = vadd.f32 %v11850_v63, %v11513_v31  ;;  %v11520_v31 = vadd.f32 %v20945_v53, %v21087_v26 }
 0x740   : > { %v16201_v11 = vpop.f32.mrf.mxu1 }
 0x741   : > { %v21171_v17 = vadd.f32 %v16201_v11, %v11518_v35  ;;  %v21772_v35 = vld [vmem:[#allocation32_spill] sm:$0xff] }
 0x742   : > { %v11863_v58 = vpop.f32.mrf.mxu1  ;;  %v11523_v51 = vadd.f32 %v21772_v35, %v21090_v25  ;;  %v21775_v35 = vld [vmem:[#allocation21_spill] sm:$0xff] }
 0x743   : > { %v21177_v28 = vadd.f32 %v11863_v58, %v11516_v33  ;;  %v21773_v33 = vld [vmem:[#allocation19_spill] sm:$0xff] }
 0x744   : > { %v16202_v45 = vpop.f32.mrf.mxu1  ;;  %v11521_v58 = vadd.f32 %v21773_v33, %v21095_v23  ;;  %v11527_v23 = vadd.f32 %v20982_v57, %v21106_v36  ;;  %v11528_v57 = vadd.f32 %v21009_v10, %v21119_v16 }
 0x745   : > { %v21181_v37 = vadd.f32 %v16202_v45, %v11519_v49  ;;  %v21199_v49 = vpop.f32.mrf.mxu0  ;;  %v21774_v45 = vld [vmem:[#allocation11_spill] sm:$0xff] }
 0x746   : > { %v11866_v56 = vpop.f32.mrf.mxu1 }
 0x747   : > { %v21187_v5 = vadd.f32 %v11866_v56, %v11517_v54  ;;  %v11526_v54 = vadd.f32 %v21774_v45, %v21098_v43  ;;  %v11524_v56 = vadd.f32 %v20974_v44, %v21103_v18  ;;  %v11525_v43 = vadd.f32 %v21775_v35, %v21111_v14  ;;  %v21777_v44 = vld [vmem:[#allocation13_spill] sm:$0xff] }
 0x748   : > { %v16205_v38 = vpop.f32.mrf.mxu1  ;;  %v11530_v18 = vadd.f32 %v21777_v44, %v21114_v48  ;;  %v11531_v14 = vadd.f32 %v21017_v50, %v21122_v61  ;;  %v11529_v48 = vadd.f32 %v21028_v39, %v21127_v21 }
 0x749   : > { %v11940_v29 = vadd.f32 %v16205_v38, %v11522_v4  ;;  %v21207_v4 = vpop.f32.mrf.mxu0 }
 0x74a   : > { %v11879_v3 = vpop.f32.mrf.mxu1 }
 0x74b   : > { %v11938_v63 = vadd.f32 %v11879_v3, %v11520_v31 }
 0x74c   : > { %v16206_v60 = vpop.f32.mrf.mxu1 }
 0x74d   : > { %v11941_v11 = vadd.f32 %v16206_v60, %v11523_v51  ;;  %v21217_v51 = vpop.f32.mrf.mxu0 }
 0x74e   : > { %v11882_v2 = vpop.f32.mrf.mxu1  ;;  %21776 = vst [vmem:[#allocation15_spill] sm:$0xff] %v21217_v51 }
 0x74f   : > { %v11939_v19 = vadd.f32 %v11882_v2, %v11521_v58  ;;  %v21227_v36 = vpop.f32.mrf.mxu0 }
 0x750   : > { %v16209_v53 = vpop.f32.mrf.mxu1  ;;  %21779 = vst [vmem:[#allocation23_spill] sm:$0xff] %v21227_v36 }
 0x751   : > { %v21203_v26 = vadd.f32 %v16209_v53, %v11526_v54 }
 0x752   : > { %v11895_v25 = vpop.f32.mrf.mxu1 }
 0x753   : > { %v21209_v38 = vadd.f32 %v11895_v25, %v11524_v56  ;;  %v21237_v25 = vpop.f32.mrf.mxu0 }
 0x754   : > { %v16210_v31 = vpop.f32.mrf.mxu1  ;;  %21782 = vst [vmem:[#allocation25_spill] sm:$0xff] %v21237_v25 }
 0x755   : > { %v21213_v3 = vadd.f32 %v16210_v31, %v11527_v23  ;;  %v21241_v16 = vpop.f32.mrf.mxu0 }
 0x756   : > { %v11898_v60 = vpop.f32.mrf.mxu1  ;;  %21784 = vst [vmem:[#allocation27_spill] sm:$0xff] %v21241_v16  ;;  %v12199_v16 = vadd.f32 %v21145_v34, %v11940_v29 }
 0x757   : > { %v21219_v33 = vadd.f32 %v11898_v60, %v11525_v43  ;;  %v16313_v60 = vpop.f32.mrf.mxu0 }
 0x758   : > { %v16213_v58 = vpop.f32.mrf.mxu1 }
 0x759   : > { %v21223_v2 = vadd.f32 %v16213_v58, %v11530_v18  ;;  %v12822_v50 = vpop.f32.mrf.mxu0 }
 0x75a   : > { %v11911_v45 = vpop.f32.mrf.mxu1 }
 0x75b   : > { %21778 = vst [vmem:[#allocation16_spill] sm:$0xff] %v21223_v2  ;;  %v21229_v54 = vadd.f32 %v11911_v45, %v11528_v57  ;;  %v21249_v39 = vpop.f32.mrf.mxu0  ;;  %v12195_v57 = vadd.f32 %v21108_v46, %v21171_v17  ;;  %v12197_v17 = vadd.f32 %v21155_v40, %v11938_v63 }
 0x75c   : > { %v16214_v53 = vpop.f32.mrf.mxu1 }
 0x75d   : > { %21780 = vst [vmem:[#allocation24_spill] sm:$0xff] %v21229_v54  ;;  %v21233_v56 = vadd.f32 %v16214_v53, %v11531_v14  ;;  %v12825_v53 = vpop.f32.mrf.mxu0 }
 0x75e   : > { %v11914_v23 = vpop.f32.mrf.mxu1 }
 0x75f   : > { %21781 = vst [vmem:[#allocation17_spill] sm:$0xff] %v21233_v56  ;;  %v21239_v31 = vadd.f32 %v11914_v23, %v11529_v48  ;;  %v12196_v23 = vadd.f32 %v21124_v24, %v21181_v37  ;;  %v21263_v51 = vpop.f32.mrf.mxu0  ;;  %v12200_v24 = vadd.f32 %v21165_v9, %v11941_v11 }
 0x760   : > { %v16273_v10 = vpop.f32.mrf.mxu1 }
 0x761   : > { %21783 = vst [vmem:[#allocation26_spill] sm:$0xff] %v21239_v31 }
 0x762   : > { %v12404_v35 = vpop.f32.mrf.mxu1 }
 0x764   : > { %v16274_v43 = vpop.f32.mrf.mxu1 }
 0x766   : > { %v12407_v44 = vpop.f32.mrf.mxu1 }
 0x768   : > { %v21243_v18 = vpop.f32.mrf.mxu1 }
 0x76a   : > { %v21245_v61 = vpop.f32.mrf.mxu1 }
 0x76c   : > { %v21247_v58 = vpop.f32.mrf.mxu1 }
 0x76e   : > { %v21251_v21 = vpop.f32.mrf.mxu1 }
 0x770   : > { %v16281_v45 = vpop.f32.mrf.mxu1 }
 0x771   : > { %v21255_v14 = vadd.f32 %v16281_v45, %v12195_v57  ;;  %v12838_v57 = vpop.f32.mrf.mxu0 }
 0x772   : > { %v21257_v48 = vpop.f32.mrf.mxu1 }
 0x774   : > { %v16282_v25 = vpop.f32.mrf.mxu1 }
 0x775   : > { %v21261_v56 = vadd.f32 %v16282_v25, %v12196_v23  ;;  %v12198_v23 = vadd.f32 %v21175_v13, %v11939_v19  ;;  %v12185_v19 = vadd.f32 %v21048_v41, %v21137_v30 }
 0x776   : > { %v21265_v2 = vpop.f32.mrf.mxu1 }
 0x777   : > { %21785 = vst [vmem:[#allocation28_spill] sm:$0xff] %v21261_v56  ;;  %v21277_v56 = vpop.f32.mrf.mxu0 }
 0x778   : > { %v16285_v31 = vpop.f32.mrf.mxu1 }
 0x779   : > { %v21268_v46 = vadd.f32 %v16285_v31, %v12199_v16  ;;  %v12841_v31 = vpop.f32.mrf.mxu0 }
 0x77a   : > { %v12452_v45 = vpop.f32.mrf.mxu1 }
 0x77b   : > { %21786 = vst [vmem:[#allocation29_spill] sm:$0xff] %v21268_v46  ;;  %v21271_v36 = vadd.f32 %v12452_v45, %v12197_v17  ;;  %v21287_v16 = vpop.f32.mrf.mxu0  ;;  %v12499_v45 = vadd.f32 %v12404_v35, %v12185_v19  ;;  %v12187_v46 = vadd.f32 %v21038_v59, %v21131_v22  ;;  %v12188_v35 = vadd.f32 %v21058_v27, %v21141_v12 }
 0x77c   : > { %v16286_v37 = vpop.f32.mrf.mxu1  ;;  %21791 = vst [vmem:[#allocation20_spill] sm:$0xff] %v21287_v16  ;;  %v12189_v22 = vadd.f32 %v21084_v42, %v21157_v15 }
 0x77d   : > { %21787 = vst [vmem:[#allocation30_spill] sm:$0xff] %v21271_v36  ;;  %v21274_v25 = vadd.f32 %v16286_v37, %v12200_v24  ;;  %v21293_v17 = vpop.f32.mrf.mxu0  ;;  %v12501_v41 = vadd.f32 %v16273_v10, %v12187_v46 }
 0x77e   : > { %v12455_v54 = vpop.f32.mrf.mxu1  ;;  %v12503_v27 = vadd.f32 %v21245_v61, %v12189_v22  ;;  %v12191_v61 = vadd.f32 %v21076_v55, %v21151_v1  ;;  %v12194_v22 = vadd.f32 %v21135_v8, %v21187_v5 }
 0x77f   : > { %21788 = vst [vmem:[#allocation31_spill] sm:$0xff] %v21274_v25  ;;  %v21279_v34 = vadd.f32 %v12455_v54, %v12198_v23  ;;  %v21301_v24 = vpop.f32.mrf.mxu0  ;;  %v12186_v23 = vadd.f32 %v21068_v6, %v21147_v47  ;;  %v12502_v47 = vadd.f32 %v16274_v43, %v12188_v35  ;;  %v12190_v43 = vadd.f32 %v21100_v32, %v21167_v62 }
 0x780   : > { %v21281_v29 = vpop.f32.mrf.mxu1  ;;  %21795 = vst [vmem:[#allocation10_spill] sm:$0xff] %v21301_v24  ;;  %v12921_v15 = vadd.f32 %v12838_v57, %v12503_v27  ;;  %v12505_v32 = vadd.f32 %v21243_v18, %v12191_v61  ;;  %v21797_v18 = vld [vmem:[#allocation22_spill] sm:$0xff] }
 0x781   : > { %21789 = vst [vmem:[#allocation18_spill] sm:$0xff] %v21279_v34  ;;  %v12500_v34 = vadd.f32 %v12407_v44, %v12186_v23  ;;  %v21309_v36 = vpop.f32.mrf.mxu0  ;;  %v12920_v12 = vadd.f32 %v21249_v39, %v12502_v47  ;;  %v12504_v42 = vadd.f32 %v21251_v21, %v12190_v43  ;;  %v12192_v21 = vadd.f32 %v21092_v20, %v21161_v0 }
 0x782   : > { %v21283_v40 = vpop.f32.mrf.mxu1  ;;  %v12923_v1 = vadd.f32 %v21263_v51, %v12505_v32  ;;  %v12201_v0 = vadd.f32 %v21193_v7, %v21209_v38  ;;  %v12202_v7 = vadd.f32 %v21207_v4, %v21219_v33  ;;  %v12204_v4 = vadd.f32 %v21199_v49, %v21213_v3  ;;  %v21801_v32 = vld [vmem:[#allocation23_spill] sm:$0xff] }
 0x783   : > { %v21313_v24 = vpop.f32.mrf.mxu0  ;;  %v12922_v62 = vadd.f32 %v12841_v31, %v12504_v42  ;;  %v12506_v55 = vadd.f32 %v21247_v58, %v12192_v21  ;;  %v12193_v31 = vadd.f32 %v21797_v18, %v21177_v28  ;;  %v21798_v42 = vld [vmem:[#allocation20_spill] sm:$0xff] }
 0x784   : > { %v21285_v63 = vpop.f32.mrf.mxu1  ;;  %v12515_v28 = vadd.f32 %v21283_v40, %v12201_v0  ;;  %v21803_v18 = vld [vmem:[#allocation28_spill] sm:$0xff] }
 0x785   : > { %21790 = vst [vmem:[#allocation6_spill] sm:$0xff] %v21285_v63  ;;  %v12919_v63 = vadd.f32 %v16313_v60, %v12501_v41  ;;  %v12507_v20 = vadd.f32 %v21257_v48, %v12193_v31  ;;  %v12924_v58 = vadd.f32 %v21277_v56, %v12506_v55  ;;  %v12508_v48 = vadd.f32 %v21265_v2, %v12194_v22 }
 0x786   : > { %v21289_v9 = vpop.f32.mrf.mxu1  ;;  %v12203_v56 = vadd.f32 %v21185_v52, %v21203_v26 }
 0x787   : > { %v12925_v38 = vadd.f32 %v21293_v17, %v12507_v20  ;;  %v12516_v8 = vadd.f32 %v21289_v9, %v12202_v7  ;;  %v12926_v2 = vadd.f32 %v21309_v36, %v12508_v48  ;;  %v21800_v36 = vld [vmem:[#allocation24_spill] sm:$0xff]  ;;  %v21804_v31 = vld [vmem:[#allocation10_spill] sm:$0xff] }
 0x788   : > { %v21291_v11 = vpop.f32.mrf.mxu1  ;;  %v21808_v7 = vld [vmem:[#allocation30_spill] sm:$0xff] }
 0x789   : > { %21792 = vst [vmem:[#allocation7_spill] sm:$0xff] %v21291_v11  ;;  %v12917_v11 = vadd.f32 %v12822_v50, %v12499_v45  ;;  %v21317_v50 = vpop.f32.mrf.mxu0 }
 0x78a   : > { %v21295_v13 = vpop.f32.mrf.mxu1 }
 0x78b   : > { %21793 = vst [vmem:[#allocation8_spill] sm:$0xff] %v21295_v13 }
 0x78c   : > { %v21299_v54 = vpop.f32.mrf.mxu1 }
 0x78d   : > { %21794 = vst [vmem:[#allocation9_spill] sm:$0xff] %v21299_v54 }
 0x78e   : > { %v21303_v37 = vpop.f32.mrf.mxu1 }
 0x78f   : > { %21796 = vst [vmem:[#allocation12_spill] sm:$0xff] %v21303_v37  ;;  %v12918_v37 = vadd.f32 %v12825_v53, %v12500_v34 }
 0x790   : > { %v16353_v25 = vpop.f32.mrf.mxu1 }
 0x791   : > { %v13178_v44 = vadd.f32 %v16353_v25, %v12919_v63 }
 0x792   : > { %v13081_v13 = vpop.f32.mrf.mxu1 }
 0x793   : > { %v13176_v30 = vadd.f32 %v13081_v13, %v12917_v11  ;;  %v13202_v60 = vmax.f32 %v13178_v44, 0.0  ;;  %v21323_v11 = vpop.f32.mrf.mxu0 }
 0x794   : > { %v16354_v54 = vpop.f32.mrf.mxu1 }
 0x795   : > { %v13200_v19 = vmax.f32 %v13176_v30, 0.0  ;;  %v13179_v34 = vadd.f32 %v16354_v54, %v12920_v12 }
 0x796   : > { %v13084_v6 = vpop.f32.mrf.mxu1 }
 0x797   : > { %v13177_v16 = vadd.f32 %v13084_v6, %v12918_v37  ;;  %13224 = vxpose.xlu1.b32.start [1/16] (narrow) %v13200_v19, 8  ;;  %v13203_v39 = vmax.f32 %v13179_v34, 0.0 }
 0x798   : > { %v16357_v59 = vpop.f32.mrf.mxu1 }
 0x799   : > { %v13201_v10 = vmax.f32 %v13177_v16, 0.0  ;;  %v21330_v16 = vpop.f32.mrf.mxu0  ;;  %v13182_v35 = vadd.f32 %v16357_v59, %v12923_v1  ;;  %v21802_v1 = vld [vmem:[#allocation8_spill] sm:$0xff] }
 0x79a   : > { %v13097_v46 = vpop.f32.mrf.mxu1 }
 0x79b   : > { %13225 = vxpose.xlu1.b32.cont [2/16] (narrow) %v13201_v10, 8  ;;  %v13180_v63 = vadd.f32 %v13097_v46, %v12921_v15  ;;  %v16329_v23 = vpop.f32.mrf.mxu0  ;;  %v13206_v59 = vmax.f32 %v13182_v35, 0.0  ;;  %v12927_v15 = vadd.f32 %v21798_v42, %v21255_v14  ;;  %v12928_v35 = vadd.f32 %v21804_v31, %v21803_v18  ;;  %v21819_v18 = vld [vmem:[#allocation5_spill] sm:$0xff] }
 0x79c   : > { %v16358_v53 = vpop.f32.mrf.mxu1 }
 0x79d   : > { %v13204_v57 = vmax.f32 %v13180_v63, 0.0  ;;  %v12886_v6 = vpop.f32.mrf.mxu0  ;;  %v13183_v44 = vadd.f32 %v16358_v53, %v12924_v58 }
 0x79e   : > { %v13100_v13 = vpop.f32.mrf.mxu1  ;;  %v12933_v12 = vadd.f32 %v12886_v6, %v12515_v28  ;;  %v21806_v6 = vld [vmem:[#allocation27_spill] sm:$0xff] }
 0x79f   : > { %13226 = vxpose.xlu1.b32.cont [3/16] (narrow) %v13202_v60, 8  ;;  %v13181_v37 = vadd.f32 %v13100_v13, %v12922_v62  ;;  %v16330_v10 = vpop.f32.mrf.mxu0  ;;  %v13207_v5 = vmax.f32 %v13183_v44, 0.0  ;;  %v12517_v60 = vadd.f32 %v21281_v29, %v12203_v56  ;;  %v12205_v62 = vadd.f32 %v21801_v32, %v21800_v36  ;;  %v21807_v44 = vld [vmem:[#allocation12_spill] sm:$0xff] }
 0x7a0   : > { %v21326_v25 = vpop.f32.mrf.mxu1 }
 0x7a1   : > { %v13205_v19 = vmax.f32 %v13181_v37, 0.0  ;;  %v12889_v53 = vpop.f32.mrf.mxu0  ;;  %v12935_v29 = vadd.f32 %v16329_v23, %v12517_v60  ;;  %v13186_v3 = vadd.f32 %v21326_v25, %v12927_v15  ;;  %v12519_v14 = vadd.f32 %v21802_v1, %v12205_v62  ;;  %v21811_v60 = vld [vmem:[#allocation7_spill] sm:$0xff]  ;;  %v21815_v15 = vld [vmem:[#allocation9_spill] sm:$0xff] }
 0x7a2   : > { %v13113_v45 = vpop.f32.mrf.mxu1  ;;  %v12934_v13 = vadd.f32 %v12889_v53, %v12516_v8  ;;  %v21817_v62 = vld [vmem:[#allocation31_spill] sm:$0xff] }
 0x7a3   : > { %13227 = vxpose.xlu1.b32.cont [4/16] (narrow) %v13203_v39, 8  ;;  %v13184_v40 = vadd.f32 %v13113_v45, %v12925_v38  ;;  %v16333_v9 = vpop.f32.mrf.mxu0  ;;  %v21799_v39 = vld [vmem:[#allocation6_spill] sm:$0xff]  ;;  %v13210_v0 = vmax.f32 %v13186_v3, 0.0  ;;  %v12929_v38 = vadd.f32 %v21317_v50, %v21808_v7  ;;  %v21813_v50 = vld [vmem:[#allocation17_spill] sm:$0xff]  ;;  %v12932_v3 = vadd.f32 %v21323_v11, %v21817_v62 }
 0x7a4   : > { %v21333_v54 = vpop.f32.mrf.mxu1  ;;  %v12518_v63 = vadd.f32 %v21799_v39, %v12204_v4  ;;  %v21816_v39 = vld [vmem:[#allocation29_spill] sm:$0xff] }
 0x7a5   : > { %v13208_v17 = vmax.f32 %v13184_v40, 0.0  ;;  %v13187_v58 = vadd.f32 %v21333_v54, %v12928_v35 }
 0x7a6   : > { %v13116_v41 = vpop.f32.mrf.mxu1  ;;  %v12936_v23 = vadd.f32 %v16330_v10, %v12518_v63  ;;  %v21809_v10 = vld [vmem:[#allocation16_spill] sm:$0xff]  ;;  %v12931_v63 = vadd.f32 %v21313_v24, %v21816_v39 }
 0x7a7   : > { %13228 = vxpose.xlu1.b32.cont [5/16] (narrow) %v13204_v57, 8  ;;  %v13185_v52 = vadd.f32 %v13116_v41, %v12926_v2  ;;  %v12902_v41 = vpop.f32.mrf.mxu0 }
 0x7a8   : > { %v21339_v30 = vpop.f32.mrf.mxu1  ;;  %v12937_v56 = vadd.f32 %v12902_v41, %v12519_v14 }
 0x7a9   : > { %v13209_v21 = vmax.f32 %v13185_v52, 0.0  ;;  %v16334_v28 = vpop.f32.mrf.mxu0 }
 0x7aa   : > { %v21343_v47 = vpop.f32.mrf.mxu1 }
 0x7ab   : > { %13229 = vxpose.xlu1.b32.cont [6/16] (narrow) %v13205_v19, 8  ;;  %v21805_v19 = vld [vmem:[#allocation26_spill] sm:$0xff]  ;;  %v13188_v40 = vadd.f32 %v21343_v47, %v12929_v38  ;;  %v12905_v53 = vpop.f32.mrf.mxu0 }
 0x7ac   : > { %v21349_v51 = vpop.f32.mrf.mxu1  ;;  %v12206_v20 = vadd.f32 %v21806_v6, %v21805_v19 }
 0x7ae   : > { %v21354_v46 = vpop.f32.mrf.mxu1  ;;  %v12520_v48 = vadd.f32 %v21807_v44, %v12206_v20 }
 0x7af   : > { %13230 = vxpose.xlu1.b32.cont [7/16] (narrow) %v13206_v59, 8 }
 0x7b0   : > { %v16369_v27 = vpop.f32.mrf.mxu1 }
 0x7b1   : > { %v13194_v57 = vadd.f32 %v16369_v27, %v12935_v29  ;;  %v21810_v27 = vld [vmem:[#allocation15_spill] sm:$0xff] }
 0x7b2   : > { %v13145_v43 = vpop.f32.mrf.mxu1  ;;  %v12207_v8 = vadd.f32 %v21810_v27, %v21809_v10 }
 0x7b3   : > { %v13192_v34 = vadd.f32 %v13145_v43, %v12933_v12  ;;  %13231 = vxpose.xlu1.b32.cont [8/16] (narrow) %v13207_v5, 8  ;;  %v13218_v25 = vmax.f32 %v13194_v57, 0.0  ;;  %v13211_v5 = vmax.f32 %v13187_v58, 0.0  ;;  %v13191_v57 = vadd.f32 %v21349_v51, %v12932_v3 }
 0x7b4   : > { %v16370_v33 = vpop.f32.mrf.mxu1  ;;  %v12521_v2 = vadd.f32 %v21811_v60, %v12207_v8 }
 0x7b5   : > { %v13216_v26 = vmax.f32 %v13192_v34, 0.0  ;;  %v13195_v22 = vadd.f32 %v16370_v33, %v12936_v23  ;;  %v21812_v34 = vld [vmem:[#allocation18_spill] sm:$0xff]  ;;  %v12938_v33 = vadd.f32 %v12905_v53, %v12520_v48 }
 0x7b6   : > { %v13148_v61 = vpop.f32.mrf.mxu1  ;;  %v12930_v4 = vadd.f32 %v21330_v16, %v21812_v34  ;;  %v12939_v29 = vadd.f32 %v16333_v9, %v12521_v2  ;;  %v13190_v16 = vadd.f32 %v21339_v30, %v12931_v63  ;;  %v13215_v9 = vmax.f32 %v13191_v57, 0.0 }
 0x7b7   : > { %v13193_v45 = vadd.f32 %v13148_v61, %v12934_v13  ;;  %13256 = vxpose.xlu0.b32.start [1/8] (short) (narrow) %v13216_v26, 8  ;;  %13232 = vxpose.xlu1.b32.cont [9/16] (narrow) %v13208_v17, 8  ;;  %v13219_v12 = vmax.f32 %v13195_v22, 0.0  ;;  %v21814_v17 = vld [vmem:[#allocation25_spill] sm:$0xff]  ;;  %v13212_v26 = vmax.f32 %v13188_v40, 0.0 }
 0x7b8   : > { %v16373_v49 = vpop.f32.mrf.mxu1  ;;  %v12208_v52 = vadd.f32 %v21814_v17, %v21813_v50  ;;  %v13189_v13 = vadd.f32 %v21354_v46, %v12930_v4 }
 0x7b9   : > { %v13217_v37 = vmax.f32 %v13193_v45, 0.0  ;;  %v13198_v36 = vadd.f32 %v16373_v49, %v12939_v29  ;;  %v21818_v49 = vld [vmem:[#allocation4_spill] sm:$0xff] }
 0x7ba   : > { %v13161_v55 = vpop.f32.mrf.mxu1  ;;  %v12522_v61 = vadd.f32 %v21815_v15, %v12208_v52  ;;  %v13213_v45 = vmax.f32 %v13189_v13, 0.0 }
 0x7bb   : > { %13257 = vxpose.xlu0.b32.cont [2/8] (short) (narrow) %v13217_v37, 8  ;;  %13233 = vxpose.xlu1.b32.cont [10/16] (narrow) %v13209_v21, 8  ;;  %v13196_v54 = vadd.f32 %v13161_v55, %v12937_v56  ;;  %v13214_v21 = vmax.f32 %v13190_v16, 0.0  ;;  %v13222_v37 = vmax.f32 %v13198_v36, 0.0 }
 0x7bc   : > { %v16374_v59 = vpop.f32.mrf.mxu1  ;;  %v12940_v46 = vadd.f32 %v16334_v28, %v12522_v61 }
 0x7bd   : > { %v13220_v42 = vmax.f32 %v13196_v54, 0.0 }
 0x7be   : > { %v13164_v43 = vpop.f32.mrf.mxu1  ;;  %v13199_v24 = vadd.f32 %v16374_v59, %v12940_v46 }
 0x7bf   : > { %13258 = vxpose.xlu0.b32.cont [3/8] (short) (narrow) %v13218_v25, 8  ;;  %13234 = vxpose.xlu1.b32.cont [11/16] (narrow) %v13210_v0, 8  ;;  %v13197_v47 = vadd.f32 %v13164_v43, %v12938_v33 }
 0x7c0   : > { %v13223_v41 = vmax.f32 %v13199_v24, 0.0 }
 0x7c1   : > { %v13221_v32 = vmax.f32 %v13197_v47, 0.0 }
 0x7c3   : > { %13259 = vxpose.xlu0.b32.cont [4/8] (short) (narrow) %v13219_v12, 8  ;;  %13235 = vxpose.xlu1.b32.cont [12/16] (narrow) %v13211_v5, 8 }
 0x7c7   : > { %13260 = vxpose.xlu0.b32.cont [5/8] (short) (narrow) %v13220_v42, 8  ;;  %13236 = vxpose.xlu1.b32.cont [13/16] (narrow) %v13212_v26, 8 }
 0x7cb   : > { %13261 = vxpose.xlu0.b32.cont [6/8] (short) (narrow) %v13221_v32, 8  ;;  %13237 = vxpose.xlu1.b32.cont [14/16] (narrow) %v13213_v45, 8 }
 0x7cf   : > { %13262 = vxpose.xlu0.b32.cont [7/8] (short) (narrow) %v13222_v37, 8  ;;  %13238 = vxpose.xlu1.b32.cont [15/16] (narrow) %v13214_v21, 8 }
 0x7d3   : > { %13263 = vxpose.xlu0.b32.end [8/8] (short) (narrow) %v13223_v41, 8  ;;  %13239 = vxpose.xlu1.b32.end [16/16] (narrow) %v13215_v9, 8 }
 0x813   : > { %v13240_v30 = vpop.trf.xlu1 }
 0x814   : > { %v13295_v55 = vrot.slane %v13240_v30, %v21818_v49 }
 0x816   : > { %v13296_v11 = vcombine.high %v13295_v55, %v13295_v55  ;;  %v13303_v51 = vrot.slane %v13295_v55, %v21818_v49 }
 0x818   : > { %v13310_v1 = vrot.slane %v13296_v11, %v21818_v49  ;;  %v13311_v14 = vcombine.high %v13303_v51, %v13303_v51  ;;  %13318 = vst.msk [vmem:[%s21403_s18] sm:$0x1] %vm13317_vm11, %v13303_v51  ;;  %v13325_v31 = vrot.slane %v13303_v51, %v21819_v18 }
 0x81a   : > { %v13312_v35 = vcombine.high %v13310_v1, %v13310_v1  ;;  %13319 = vst.msk [vmem:[%s21403_s18 + $0x10] sm:$0x1] %vm13317_vm11, %v13310_v1  ;;  %13320 = vst.msk [vmem:[%s21403_s18 + $0x20] sm:$0x1] %vm13317_vm11, %v13311_v14  ;;  %13370 = vrot.lane.b32.xlu1 %v13325_v31, %s16870_s25  ;;  %13338 = vrot.lane.b32.xlu0 %v13325_v31, %s16871_s19  ;;  %v13333_v23 = vrot.slane %v13311_v14, %v21819_v18 }
 0x81b   : > { %v13329_v19 = vrot.slane %v13310_v1, %v21819_v18 }
 0x81c   : > { %13321 = vst.msk [vmem:[%s21403_s18 + $0x30] sm:$0x1] %vm13317_vm11, %v13312_v35  ;;  %v13337_v48 = vrot.slane %v13312_v35, %v21819_v18 }
 0x81e   : > { %13386 = vrot.lane.b32.xlu1 %v13325_v31, %s16872_s20  ;;  %13354 = vrot.lane.b32.xlu0 %v13325_v31, %s16873_s21 }
 0x822   : > { %13402 = vrot.lane.b32.xlu1 %v13325_v31, %s16874_s22  ;;  %13342 = vrot.lane.b32.xlu0 %v13333_v23, %s16871_s19 }
 0x826   : > { %13418 = vrot.lane.b32.xlu1 %v13325_v31, %s16875_s23  ;;  %13356 = vrot.lane.b32.xlu0 %v13329_v19, %s16873_s21 }
 0x82a   : > { %13434 = vrot.lane.b32.xlu1 %v13325_v31, %s16876_s26  ;;  %13358 = vrot.lane.b32.xlu0 %v13333_v23, %s16873_s21 }
 0x82e   : > { %13372 = vrot.lane.b32.xlu0 %v13329_v19, %s16870_s25 }
 0x832   : > { %13388 = vrot.lane.b32.xlu0 %v13329_v19, %s16872_s20 }
 0x833   : > { %v13272_v6 = vpop.trf.xlu0 }
 0x834   : > { %v13457_v20 = vrot.slane %v13272_v6, %v21818_v49 }
 0x836   : > { %v13458_v0 = vcombine.high %v13457_v20, %v13457_v20  ;;  %v13465_v58 = vrot.slane %v13457_v20, %v21818_v49  ;;  %13404 = vrot.lane.b32.xlu0 %v13329_v19, %s16874_s22 }
 0x838   : > { %v13472_v25 = vrot.slane %v13458_v0, %v21818_v49  ;;  %13479 = vst.msk [vmem:[%s21403_s18 + $0x8] sm:$0x1] %vm13317_vm11, %v13465_v58  ;;  %v13486_v22 = vrot.slane %v13465_v58, %v21819_v18  ;;  %v13473_v28 = vcombine.high %v13465_v58, %v13465_v58 }
 0x83a   : > { %13480 = vst.msk [vmem:[%s21403_s18 + $0x18] sm:$0x1] %vm13317_vm11, %v13472_v25  ;;  %13499 = vrot.lane.b32.xlu1 %v13486_v22, %s16871_s19  ;;  %13420 = vrot.lane.b32.xlu0 %v13329_v19, %s16875_s23  ;;  %13481 = vst.msk [vmem:[%s21403_s18 + $0x28] sm:$0x1] %vm13317_vm11, %v13473_v28  ;;  %v13474_v59 = vcombine.high %v13472_v25, %v13472_v25  ;;  %v13490_v44 = vrot.slane %v13472_v25, %v21819_v18 }
 0x83b   : > { %v13494_v7 = vrot.slane %v13473_v28, %v21819_v18 }
 0x83c   : > { %13482 = vst.msk [vmem:[%s21403_s18 + $0x38] sm:$0x1] %vm13317_vm11, %v13474_v59  ;;  %v13498_v38 = vrot.slane %v13474_v59, %v21819_v18 }
 0x83e   : > { %13515 = vrot.lane.b32.xlu1 %v13486_v22, %s16873_s21  ;;  %13436 = vrot.lane.b32.xlu0 %v13329_v19, %s16876_s26 }
 0x842   : > { %13531 = vrot.lane.b32.xlu1 %v13486_v22, %s16870_s25  ;;  %13501 = vrot.lane.b32.xlu0 %v13490_v44, %s16871_s19 }
 0x846   : > { %13517 = vrot.lane.b32.xlu0 %v13490_v44, %s16873_s21  ;;  %13340 = vrot.lane.b32.xlu1 %v13329_v19, %s16871_s19 }
 0x84a   : > { %13533 = vrot.lane.b32.xlu0 %v13490_v44, %s16870_s25  ;;  %13374 = vrot.lane.b32.xlu1 %v13333_v23, %s16870_s25 }
 0x84e   : > { %13390 = vrot.lane.b32.xlu1 %v13333_v23, %s16872_s20  ;;  %13344 = vrot.lane.b32.xlu0 %v13337_v48, %s16871_s19 }
 0x852   : > { %13406 = vrot.lane.b32.xlu1 %v13333_v23, %s16874_s22  ;;  %13360 = vrot.lane.b32.xlu0 %v13337_v48, %s16873_s21 }
 0x856   : > { %13422 = vrot.lane.b32.xlu1 %v13333_v23, %s16875_s23  ;;  %13376 = vrot.lane.b32.xlu0 %v13337_v48, %s16870_s25 }
 0x85a   : > { %13438 = vrot.lane.b32.xlu1 %v13333_v23, %s16876_s26  ;;  %13392 = vrot.lane.b32.xlu0 %v13337_v48, %s16872_s20 }
 0x85e   : > { %13503 = vrot.lane.b32.xlu1 %v13494_v7, %s16871_s19  ;;  %13408 = vrot.lane.b32.xlu0 %v13337_v48, %s16874_s22 }
 0x862   : > { %13519 = vrot.lane.b32.xlu1 %v13494_v7, %s16873_s21  ;;  %13424 = vrot.lane.b32.xlu0 %v13337_v48, %s16875_s23 }
 0x866   : > { %13535 = vrot.lane.b32.xlu1 %v13494_v7, %s16870_s25  ;;  %13440 = vrot.lane.b32.xlu0 %v13337_v48, %s16876_s26 }
 0x86a   : > { %13505 = vrot.lane.b32.xlu0 %v13498_v38, %s16871_s19 }
 0x86e   : > { %13521 = vrot.lane.b32.xlu0 %v13498_v38, %s16873_s21 }
 0x872   : > { %13537 = vrot.lane.b32.xlu0 %v13498_v38, %s16870_s25 }
 0x88c   : > { %v13371_v56 = vpop.permute.xlu1 %13370  ;;  %v13339_v10 = vpop.permute.xlu0 %13338 }
 0x88d   : > { %13382 = vst.msk [vmem:[%s21403_s18 + $0x3] sm:$0x1] %vm13317_vm11, %v13371_v56  ;;  %13350 = vst.msk [vmem:[%s21403_s18 + $0x1] sm:$0x1] %vm13317_vm11, %v13339_v10 }
 0x890   : > { %v13387_v27 = vpop.permute.xlu1 %13386  ;;  %v13355_v8 = vpop.permute.xlu0 %13354 }
 0x891   : > { %13398 = vst.msk [vmem:[%s21403_s18 + $0x4] sm:$0x1] %vm13317_vm11, %v13387_v27  ;;  %13366 = vst.msk [vmem:[%s21403_s18 + $0x2] sm:$0x1] %vm13317_vm11, %v13355_v8 }
 0x894   : > { %v13403_v5 = vpop.permute.xlu1 %13402  ;;  %v13343_v40 = vpop.permute.xlu0 %13342 }
 0x895   : > { %13414 = vst.msk [vmem:[%s21403_s18 + $0x5] sm:$0x1] %vm13317_vm11, %v13403_v5  ;;  %13352 = vst.msk [vmem:[%s21403_s18 + $0x21] sm:$0x1] %vm13317_vm11, %v13343_v40 }
 0x898   : > { %v13419_v12 = vpop.permute.xlu1 %13418  ;;  %v13357_v54 = vpop.permute.xlu0 %13356 }
 0x899   : > { %13430 = vst.msk [vmem:[%s21403_s18 + $0x6] sm:$0x1] %vm13317_vm11, %v13419_v12  ;;  %13367 = vst.msk [vmem:[%s21403_s18 + $0x12] sm:$0x1] %vm13317_vm11, %v13357_v54 }
 0x89c   : > { %v13435_v53 = vpop.permute.xlu1 %13434  ;;  %v13359_v43 = vpop.permute.xlu0 %13358 }
 0x89d   : > { %13446 = vst.msk [vmem:[%s21403_s18 + $0x7] sm:$0x1] %vm13317_vm11, %v13435_v53  ;;  %13368 = vst.msk [vmem:[%s21403_s18 + $0x22] sm:$0x1] %vm13317_vm11, %v13359_v43 }
 0x8a0   : > { %v13373_v60 = vpop.permute.xlu0 %13372 }
 0x8a1   : > { %13383 = vst.msk [vmem:[%s21403_s18 + $0x13] sm:$0x1] %vm13317_vm11, %v13373_v60 }
 0x8a4   : > { %v13389_v2 = vpop.permute.xlu0 %13388 }
 0x8a5   : > { %13399 = vst.msk [vmem:[%s21403_s18 + $0x14] sm:$0x1] %vm13317_vm11, %v13389_v2 }
 0x8a8   : > { %v13405_v34 = vpop.permute.xlu0 %13404 }
 0x8a9   : > { %13415 = vst.msk [vmem:[%s21403_s18 + $0x15] sm:$0x1] %vm13317_vm11, %v13405_v34 }
 0x8ac   : > { %v13500_v4 = vpop.permute.xlu1 %13499  ;;  %v13421_v33 = vpop.permute.xlu0 %13420 }
 0x8ad   : > { %13511 = vst.msk [vmem:[%s21403_s18 + $0x9] sm:$0x1] %vm13317_vm11, %v13500_v4  ;;  %13431 = vst.msk [vmem:[%s21403_s18 + $0x16] sm:$0x1] %vm13317_vm11, %v13421_v33 }
 0x8b0   : > { %v13516_v50 = vpop.permute.xlu1 %13515  ;;  %v13437_v17 = vpop.permute.xlu0 %13436 }
 0x8b1   : > { %13527 = vst.msk [vmem:[%s21403_s18 + $0xa] sm:$0x1] %vm13317_vm11, %v13516_v50  ;;  %13447 = vst.msk [vmem:[%s21403_s18 + $0x17] sm:$0x1] %vm13317_vm11, %v13437_v17 }
 0x8b4   : > { %v13532_v52 = vpop.permute.xlu1 %13531  ;;  %v13502_v26 = vpop.permute.xlu0 %13501 }
 0x8b5   : > { %13543 = vst.msk [vmem:[%s21403_s18 + $0xb] sm:$0x1] %vm13317_vm11, %v13532_v52  ;;  %13512 = vst.msk [vmem:[%s21403_s18 + $0x19] sm:$0x1] %vm13317_vm11, %v13502_v26 }
 0x8b8   : > { %v13518_v13 = vpop.permute.xlu0 %13517  ;;  %v13341_v42 = vpop.permute.xlu1 %13340 }
 0x8b9   : > { %13528 = vst.msk [vmem:[%s21403_s18 + $0x1a] sm:$0x1] %vm13317_vm11, %v13518_v13  ;;  %13351 = vst.msk [vmem:[%s21403_s18 + $0x11] sm:$0x1] %vm13317_vm11, %v13341_v42 }
 0x8bc   : > { %v13534_v47 = vpop.permute.xlu0 %13533  ;;  %v13375_v15 = vpop.permute.xlu1 %13374 }
 0x8bd   : > { %13544 = vst.msk [vmem:[%s21403_s18 + $0x1b] sm:$0x1] %vm13317_vm11, %v13534_v47  ;;  %13384 = vst.msk [vmem:[%s21403_s18 + $0x23] sm:$0x1] %vm13317_vm11, %v13375_v15 }
 0x8c0   : > { %v13391_v61 = vpop.permute.xlu1 %13390  ;;  %v13345_v39 = vpop.permute.xlu0 %13344 }
 0x8c1   : > { %13400 = vst.msk [vmem:[%s21403_s18 + $0x24] sm:$0x1] %vm13317_vm11, %v13391_v61  ;;  %13353 = vst.msk [vmem:[%s21403_s18 + $0x31] sm:$0x1] %vm13317_vm11, %v13345_v39 }
 0x8c4   : > { %v13407_v63 = vpop.permute.xlu1 %13406  ;;  %v13361_v29 = vpop.permute.xlu0 %13360 }
 0x8c5   : > { %13416 = vst.msk [vmem:[%s21403_s18 + $0x25] sm:$0x1] %vm13317_vm11, %v13407_v63  ;;  %13369 = vst.msk [vmem:[%s21403_s18 + $0x32] sm:$0x1] %vm13317_vm11, %v13361_v29 }
 0x8c8   : > { %v13423_v16 = vpop.permute.xlu1 %13422  ;;  %v13377_v45 = vpop.permute.xlu0 %13376 }
 0x8c9   : > { %13432 = vst.msk [vmem:[%s21403_s18 + $0x26] sm:$0x1] %vm13317_vm11, %v13423_v16  ;;  %13385 = vst.msk [vmem:[%s21403_s18 + $0x33] sm:$0x1] %vm13317_vm11, %v13377_v45 }
 0x8cc   : > { %v13439_v36 = vpop.permute.xlu1 %13438  ;;  %v13393_v32 = vpop.permute.xlu0 %13392 }
 0x8cd   : > { %13448 = vst.msk [vmem:[%s21403_s18 + $0x27] sm:$0x1] %vm13317_vm11, %v13439_v36  ;;  %13401 = vst.msk [vmem:[%s21403_s18 + $0x34] sm:$0x1] %vm13317_vm11, %v13393_v32 }
 0x8d0   : > { %v13504_v62 = vpop.permute.xlu1 %13503  ;;  %v13409_v3 = vpop.permute.xlu0 %13408 }
 0x8d1   : > { %13513 = vst.msk [vmem:[%s21403_s18 + $0x29] sm:$0x1] %vm13317_vm11, %v13504_v62  ;;  %13417 = vst.msk [vmem:[%s21403_s18 + $0x35] sm:$0x1] %vm13317_vm11, %v13409_v3 }
 0x8d4   : > { %v13520_v46 = vpop.permute.xlu1 %13519  ;;  %v13425_v21 = vpop.permute.xlu0 %13424 }
 0x8d5   : > { %13529 = vst.msk [vmem:[%s21403_s18 + $0x2a] sm:$0x1] %vm13317_vm11, %v13520_v46  ;;  %13433 = vst.msk [vmem:[%s21403_s18 + $0x36] sm:$0x1] %vm13317_vm11, %v13425_v21 }
 0x8d8   : > { %v13536_v57 = vpop.permute.xlu1 %13535  ;;  %v13441_v37 = vpop.permute.xlu0 %13440 }
 0x8d9   : > { %13545 = vst.msk [vmem:[%s21403_s18 + $0x2b] sm:$0x1] %vm13317_vm11, %v13536_v57  ;;  %13449 = vst.msk [vmem:[%s21403_s18 + $0x37] sm:$0x1] %vm13317_vm11, %v13441_v37 }
 0x8dc   : > { %v13506_v24 = vpop.permute.xlu0 %13505 }
 0x8dd   : > { %13514 = vst.msk [vmem:[%s21403_s18 + $0x39] sm:$0x1] %vm13317_vm11, %v13506_v24 }
 0x8e0   : > { %v13522_v9 = vpop.permute.xlu0 %13521 }
 0x8e1   : > { %13530 = vst.msk [vmem:[%s21403_s18 + $0x3a] sm:$0x1] %vm13317_vm11, %v13522_v9 }
 0x8e4   : > { %v13538_v41 = vpop.permute.xlu0 %13537 }
 0x8e5   : > { %13546 = vst.msk [vmem:[%s21403_s18 + $0x3b] sm:$0x1] %vm13317_vm11, %v13538_v41 }
 0x8e6 PF: > { %s17_s24 = sadd.s32 1, %s16862_s24  }
 0x8e7   : > { %p14_p4 = scmp.ge.s32.totalorder %s17_s24, 4  }
 0x8e9   :  { %16 = sbr.rel (!%p14_p4) target bundleno = 1 (0x1), region = 100 }

</bundles_post_ra>
